<compile_context>
chip_gen: v5e
topology: v5e:2x2
jax: 0.10.0
libtpu: 0.0.40
codegen_flags: <defaults>
</compile_context>

<pallas_src>
import functools

import jax
import jax.numpy as jnp
from jax.experimental import pallas as pl
from jax.experimental.pallas import tpu as pltpu

K = 4                       # conv kernel size
PLANE_H = 30                # common padded-plane height (28 + 2*padding)
PLANE_W = 30                # common padded-plane width
PLANE = PLANE_H * PLANE_W   # flattened per-image plane (lane axis)
POOL_OUT = 12               # MaxPool2d(2,2) output spatial size
BT = 2                      # images per grid step (batch tile)


# -----------------------------------------------------------------------------
# Fused kernel
# -----------------------------------------------------------------------------
def fused_cnn_kernel(x_ref, wc1_ref, sc1_ref, wc2_ref, sc2_ref, wc3_ref, sc3_ref,
                     m1_ref, m2_ref, w1_ref, s1_ref, w2_ref, s2_ref,
                     o_ref, xcol_ref, m3_ref, *, bt):
    """Forward pass for one batch tile of `bt` images, entirely in VMEM."""
    mt = bt * PLANE
    dmax = (K - 1) * PLANE_W + (K - 1)

    # Make the wrap-around tail of the im2col buffer finite.  Those columns are
    # never read for valid outputs, but uninitialized VMEM could hold NaNs that
    # would otherwise survive the masking (0 * NaN = NaN).
    xcol_ref[:, mt - dmax:] = jnp.zeros((xcol_ref.shape[0], dmax), jnp.float32)

    def conv_layer(x_plane, w_ref, s_ref):
        # x_plane: (Ci, mt)   w_ref: (Co, K*K*Ci)   s_ref: (Co, 1)
        ci = x_plane.shape[0]
        kkci = K * K * ci
        for ky in range(K):
            for kx in range(K):
                d = ky * PLANE_W + kx
                kk = ky * K + kx
                # im2col row block = input plane shifted left by d lanes.
                xcol_ref[kk * ci:(kk + 1) * ci, :mt - d] = x_plane[:, d:]
        acc = jnp.dot(w_ref[...], xcol_ref[:kkci, :],
                      preferred_element_type=jnp.float32)          # (Co, mt)
        return jnp.maximum(acc + s_ref[...], 0.0)                  # bias+BN folded

    def repad(a, mask_ref):
        # Zero everything outside the valid conv-output region, then shift the
        # plane by (+1, +1) so it becomes the next layer's zero-padded input.
        a = a * mask_ref[...]
        pad = jnp.zeros((a.shape[0], PLANE_W + 1), jnp.float32)
        return jnp.concatenate([pad, a[:, :mt - (PLANE_W + 1)]], axis=1)

    def shift_left(a, d):
        tail = jnp.zeros((a.shape[0], d), jnp.float32)
        return jnp.concatenate([a[:, d:], tail], axis=1)

    x0 = x_ref[0]                                            # (1,  mt) padded input
    a1 = conv_layer(x0, wc1_ref, sc1_ref)                    # (C1, mt) 27x27 valid
    a2 = conv_layer(repad(a1, m1_ref), wc2_ref, sc2_ref)     # (C2, mt) 26x26 valid
    a3 = conv_layer(repad(a2, m2_ref), wc3_ref, sc3_ref)     # (C3, mt) 25x25 valid

    # MaxPool2d(2,2): window max anchored at every plane position; only the
    # even (row, col) anchors of the 24x24 region are selected by w1_ref.
    m = jnp.maximum(jnp.maximum(a3, shift_left(a3, 1)),
                    jnp.maximum(shift_left(a3, PLANE_W),
                                shift_left(a3, PLANE_W + 1)))

    # Split the batch off the lane axis: m3[c, b, p] = m[c, b*PLANE + p].
    for b in range(bt):
        m3_ref[:, b, :] = m[:, b * PLANE:(b + 1) * PLANE]

    # FC1 (+BN1d): pooling selection and the NCHW flatten permutation are
    # folded into w1_ref (C3, H1, PLANE).
    part = jnp.einsum('cbp,cnp->cbn', m3_ref[...], w1_ref[...],
                      preferred_element_type=jnp.float32)          # (C3, bt, H1)
    h = jnp.sum(part, axis=0) + s1_ref[...]                        # (bt, H1)

    # FC2 (+BN1d) and softmax(dim=1).
    z = jnp.dot(h, w2_ref[...], preferred_element_type=jnp.float32) + s2_ref[...]
    z = z - jnp.max(z, axis=1, keepdims=True)
    e = jnp.exp(z)
    o_ref[0] = (e / jnp.sum(e, axis=1, keepdims=True)).astype(o_ref.dtype)


# -----------------------------------------------------------------------------
# Parameter folding (bias + BN -> scale/shift, pool/flatten -> FC1 weight)
# -----------------------------------------------------------------------------
def _fold_conv(w, b, scale, shift):
    # w: (K, K, Ci, Co) HWIO;  b/scale/shift: (1, Co).
    # NOTE: real PyTorch checkpoints (Co, Ci, kH, kW) would need a permutation.
    kk, _, ci, co = w.shape
    w2d = jnp.transpose(w.reshape(kk * kk * ci, co) * scale)       # (Co, K*K*Ci)
    sh = (b * scale + shift).reshape(co, 1)                        # (Co, 1)
    return w2d, sh


def _fold_fc1(w1, b1, s1, t1, c3):
    # Fold BN1d + maxpool stride-2 selection + NCHW flatten order into FC1.
    h1 = w1.shape[1]
    w1s = (w1 * s1).reshape(c3, POOL_OUT, POOL_OUT, h1)
    sel = jnp.zeros((c3, PLANE_H, PLANE_W, h1), w1.dtype)
    sel = sel.at[:, 0:2 * POOL_OUT:2, 0:2 * POOL_OUT:2, :].set(w1s)
    w1sel = jnp.transpose(sel.reshape(c3, PLANE, h1), (0, 2, 1))   # (C3, H1, PLANE)
    return w1sel, b1 * s1 + t1


def _valid_mask(ho, wo, bt):
    idx = jnp.arange(PLANE, dtype=jnp.int32)
    m = ((idx // PLANE_W < ho) & (idx % PLANE_W < wo)).astype(jnp.float32)
    return jnp.tile(m, (bt,)).reshape(1, bt * PLANE)


# -----------------------------------------------------------------------------
# Wrapper
# -----------------------------------------------------------------------------
@jax.jit
def cnn_forward(x_nchw, params):
    B = x_nchw.shape[0]
    assert B % BT == 0, "batch must be divisible by the batch tile"
    ntiles = B // BT
    mt = BT * PLANE

    # padding=1, then flatten each 30x30 plane; BT images per grid step share
    # one lane-dense plane.
    x = jnp.pad(x_nchw.astype(jnp.float32), ((0, 0), (0, 0), (1, 1), (1, 1)))
    x_planes = x.reshape(ntiles, 1, mt)

    p1, p2, p3, f = params["conv1"], params["conv2"], params["conv3"], params["fc"]
    wc1, sc1 = _fold_conv(p1["w"], p1["b"], p1["scale"], p1["shift"])
    wc2, sc2 = _fold_conv(p2["w"], p2["b"], p2["scale"], p2["shift"])
    wc3, sc3 = _fold_conv(p3["w"], p3["b"], p3["scale"], p3["shift"])
    c1, c2, c3 = wc1.shape[0], wc2.shape[0], wc3.shape[0]
    m1 = _valid_mask(27, 27, BT)                 # conv1 valid output 27x27
    m2 = _valid_mask(26, 26, BT)                 # conv2 valid output 26x26
    w1sel, s1sh = _fold_fc1(f["w1"], f["b1"], f["s1"], f["t1"], c3)
    w2f = f["w2"] * f["s2"]
    s2sh = f["b2"] * f["s2"] + f["t2"]
    h1, ncls = w2f.shape
    kkmax = K * K * max(1, c1, c2)

    flops = 2 * B * (27 * 27 * K * K * 1 * c1 + 26 * 26 * K * K * c1 * c2
                     + 25 * 25 * K * K * c2 * c3 + c3 * PLANE * h1 + h1 * ncls)
    bytes_accessed = 4 * (x_planes.size + wc1.size + wc2.size + wc3.size
                          + w1sel.size + w2f.size + B * ncls)

    out = pl.pallas_call(
        functools.partial(fused_cnn_kernel, bt=BT),
        out_shape=jax.ShapeDtypeStruct((ntiles, BT, ncls), jnp.float32),
        grid_spec=pltpu.PrefetchScalarGridSpec(
            num_scalar_prefetch=0,
            grid=(ntiles,),
            in_specs=[
                pl.BlockSpec((1, 1, mt), lambda t: (t, 0, 0)),
                pl.BlockSpec(wc1.shape, lambda t: (0, 0)),
                pl.BlockSpec(sc1.shape, lambda t: (0, 0)),
                pl.BlockSpec(wc2.shape, lambda t: (0, 0)),
                pl.BlockSpec(sc2.shape, lambda t: (0, 0)),
                pl.BlockSpec(wc3.shape, lambda t: (0, 0)),
                pl.BlockSpec(sc3.shape, lambda t: (0, 0)),
                pl.BlockSpec(m1.shape, lambda t: (0, 0)),
                pl.BlockSpec(m2.shape, lambda t: (0, 0)),
                pl.BlockSpec(w1sel.shape, lambda t: (0, 0, 0)),
                pl.BlockSpec(s1sh.shape, lambda t: (0, 0)),
                pl.BlockSpec(w2f.shape, lambda t: (0, 0)),
                pl.BlockSpec(s2sh.shape, lambda t: (0, 0)),
            ],
            out_specs=pl.BlockSpec((1, BT, ncls), lambda t: (t, 0, 0)),
            scratch_shapes=[
                pltpu.VMEM((kkmax, mt), jnp.float32),       # shared im2col buffer
                pltpu.VMEM((c3, BT, PLANE), jnp.float32),   # batch-split pooled plane
            ],
        ),
        compiler_params=pltpu.CompilerParams(
            dimension_semantics=("parallel",),
            vmem_limit_bytes=32 * 1024 * 1024,
        ),
        cost_estimate=pl.CostEstimate(flops=flops, transcendentals=B * ncls,
                                      bytes_accessed=bytes_accessed),
    )(x_planes, wc1, sc1, wc2, sc2, wc3, sc3, m1, m2, w1sel, s1sh, w2f, s2sh)
    return out.reshape(B, ncls)


# -----------------------------------------------------------------------------
# Plain-JAX reference (identical inference semantics) + deterministic params
# -----------------------------------------------------------------------------
def cnn_reference(x_nchw, params):
    x = x_nchw.astype(jnp.float32)
    for i in range(3):
        p = params[f"conv{i + 1}"]
        x = jax.lax.conv_general_dilated(
            x, p["w"], window_strides=(1, 1), padding=((1, 1), (1, 1)),
            dimension_numbers=("NCHW", "HWIO", "NCHW"))
        x = x + p["b"].reshape(1, -1, 1, 1)
        x = x * p["scale"].reshape(1, -1, 1, 1) + p["shift"].reshape(1, -1, 1, 1)
        x = jnp.maximum(x, 0.0)                       # Dropout: identity (inference)
    x = jax.lax.reduce_window(x, -jnp.inf, jax.lax.max,
                              (1, 1, 2, 2), (1, 1, 2, 2), "VALID")
    xf = x.reshape(x.shape[0], -1)                    # torch.flatten NCHW order
    f = params["fc"]
    h = xf @ f["w1"] + f["b1"]
    h = h * f["s1"] + f["t1"]
    z = h @ f["w2"] + f["b2"]
    z = z * f["s2"] + f["t2"]
    return jax.nn.softmax(z, axis=1)


def make_params(key, c1=8, c2=16, c3=16, k=4, num_classes=10, eps=1e-5):
    keys = iter(jax.random.split(key, 32))

    def nrm(shape, scale):
        return scale * jax.random.normal(next(keys), shape, jnp.float32)

    def bn(co):
        gamma = 1.0 + 0.1 * jax.random.normal(next(keys), (1, co), jnp.float32)
        beta = 0.1 * jax.random.normal(next(keys), (1, co), jnp.float32)
        mean = 0.1 * jax.random.normal(next(keys), (1, co), jnp.float32)
        var = jnp.abs(1.0 + 0.1 * jax.random.normal(next(keys), (1, co), jnp.float32))
        scale = gamma / jnp.sqrt(var + eps)
        shift = beta - mean * scale
        return scale, shift

    params = {}
    cin = 1
    for i, co in enumerate([c1, c2, c3]):
        w = nrm((k, k, cin, co), scale=1.0 / (k * (cin ** 0.5)))
        b = nrm((1, co), scale=0.05)
        s, t = bn(co)
        params[f"conv{i + 1}"] = dict(w=w, b=b, scale=s, shift=t)
        cin = co
    din = c3 * POOL_OUT * POOL_OUT
    w1 = nrm((din, c1), scale=1.0 / (din ** 0.5))
    b1 = nrm((1, c1), scale=0.05)
    s1, t1 = bn(c1)
    w2 = nrm((c1, num_classes), scale=1.0 / (c1 ** 0.5))
    b2 = nrm((1, num_classes), scale=0.05)
    s2, t2 = bn(num_classes)
    params["fc"] = dict(w1=w1, b1=b1, s1=s1, t1=t1, w2=w2, b2=b2, s2=s2, t2=t2)
    return params


if __name__ == "__main__":
    key = jax.random.PRNGKey(0)
    kp, kx = jax.random.split(key)
    # Small config consistent with the module: input must be 28x28 (the FC
    # in_size hardcodes the 12x12 post-pool spatial); channels shrunk to 8/16/16.
    params = make_params(kp, c1=8, c2=16, c3=16, k=K, num_classes=10)
    x = jax.random.normal(kx, (4, 1, 28, 28), jnp.float32)

    out = jax.block_until_ready(cnn_forward(x, params))
    ref = jax.block_until_ready(cnn_reference(x, params))

    assert out.shape == (4, 10), out.shape
    assert bool(jnp.all(jnp.isfinite(out)))
    row_sums = jnp.sum(out, axis=1)
    assert bool(jnp.all(jnp.abs(row_sums - 1.0) < 1e-4)), row_sums
    assert bool(jnp.max(jnp.abs(out - ref)) < 3e-2), float(jnp.max(jnp.abs(out - ref)))
    print("KERNEL_OK")
</pallas_src>

<mosaic_0001>
module attributes {stable_mosaic.version = 11 : i64} {
  func.func @fused_cnn_kernel(%arg0: i32, %arg1: memref<1x1x1800xf32, #tpu.memory_space<vmem>>, %arg2: memref<8x16xf32, #tpu.memory_space<vmem>>, %arg3: memref<8x1xf32, #tpu.memory_space<vmem>>, %arg4: memref<16x128xf32, #tpu.memory_space<vmem>>, %arg5: memref<16x1xf32, #tpu.memory_space<vmem>>, %arg6: memref<16x256xf32, #tpu.memory_space<vmem>>, %arg7: memref<16x1xf32, #tpu.memory_space<vmem>>, %arg8: memref<1x1800xf32, #tpu.memory_space<vmem>>, %arg9: memref<1x1800xf32, #tpu.memory_space<vmem>>, %arg10: memref<16x8x900xf32, #tpu.memory_space<vmem>>, %arg11: memref<1x8xf32, #tpu.memory_space<vmem>>, %arg12: memref<8x10xf32, #tpu.memory_space<vmem>>, %arg13: memref<1x10xf32, #tpu.memory_space<vmem>>, %arg14: memref<1x2x10xf32, #tpu.memory_space<vmem>>, %arg15: memref<256x1800xf32, #tpu.memory_space<vmem>>, %arg16: memref<16x2x900xf32, #tpu.memory_space<vmem>>) attributes {dimension_semantics = [#tpu.dimension_semantics<parallel>], iteration_bounds = array<i64: 2>, scalar_prefetch = 0 : i64, scratch_operands = 2 : i64, tpu.core_type = #tpu.core_type<tc>, window_params = [{transform_indices = @transform_0, window_bounds = array<i64: 1, 1, 1800>}, {pipeline_mode = #tpu.pipeline_mode<synchronous>, transform_indices = @transform_1, window_bounds = array<i64: 8, 16>}, {pipeline_mode = #tpu.pipeline_mode<synchronous>, transform_indices = @transform_2, window_bounds = array<i64: 8, 1>}, {pipeline_mode = #tpu.pipeline_mode<synchronous>, transform_indices = @transform_3, window_bounds = array<i64: 16, 128>}, {pipeline_mode = #tpu.pipeline_mode<synchronous>, transform_indices = @transform_4, window_bounds = array<i64: 16, 1>}, {pipeline_mode = #tpu.pipeline_mode<synchronous>, transform_indices = @transform_5, window_bounds = array<i64: 16, 256>}, {pipeline_mode = #tpu.pipeline_mode<synchronous>, transform_indices = @transform_6, window_bounds = array<i64: 16, 1>}, {pipeline_mode = #tpu.pipeline_mode<synchronous>, transform_indices = @transform_7, window_bounds = array<i64: 1, 1800>}, {pipeline_mode = #tpu.pipeline_mode<synchronous>, transform_indices = @transform_8, window_bounds = array<i64: 1, 1800>}, {pipeline_mode = #tpu.pipeline_mode<synchronous>, transform_indices = @transform_9, window_bounds = array<i64: 16, 8, 900>}, {pipeline_mode = #tpu.pipeline_mode<synchronous>, transform_indices = @transform_10, window_bounds = array<i64: 1, 8>}, {pipeline_mode = #tpu.pipeline_mode<synchronous>, transform_indices = @transform_11, window_bounds = array<i64: 8, 10>}, {pipeline_mode = #tpu.pipeline_mode<synchronous>, transform_indices = @transform_12, window_bounds = array<i64: 1, 10>}, {transform_indices = @transform_13, window_bounds = array<i64: 1, 2, 10>}]} {
    %cst = arith.constant 0.000000e+00 : f32
    %0 = vector.broadcast %cst : f32 to vector<256x93xf32>
    %c0 = arith.constant 0 : index
    %c1707 = arith.constant 1707 : index
    %1 = vector.load %arg15[%c0, %c1707] : memref<256x1800xf32, #tpu.memory_space<vmem>>, vector<256x93xf32>
    tpu.vector_store %arg15[%c0, %c1707], %0 {strides = array<i32>} : memref<256x1800xf32, #tpu.memory_space<vmem>>, vector<256x93xf32>,
    %c0_0 = arith.constant 0 : index
    %c0_1 = arith.constant 0 : index
    %c0_2 = arith.constant 0 : index
    %2 = vector.load %arg1[%c0_0, %c0_1, %c0_2] : memref<1x1x1800xf32, #tpu.memory_space<vmem>>, vector<1x1x1800xf32>
    %3 = vector.shape_cast %2 : vector<1x1x1800xf32> to vector<1x1800xf32>
    %c0_3 = arith.constant 0 : index
    %c0_4 = arith.constant 0 : index
    %4 = vector.load %arg15[%c0_3, %c0_4] : memref<256x1800xf32, #tpu.memory_space<vmem>>, vector<1x1800xf32>
    tpu.vector_store %arg15[%c0_3, %c0_4], %3 {strides = array<i32>} : memref<256x1800xf32, #tpu.memory_space<vmem>>, vector<1x1800xf32>,
    %5 = vector.extract_strided_slice %3 {offsets = [0, 1], sizes = [1, 1799], strides = [1, 1]} : vector<1x1800xf32> to vector<1x1799xf32>
    %c1 = arith.constant 1 : index
    %c0_5 = arith.constant 0 : index
    %6 = vector.load %arg15[%c1, %c0_5] : memref<256x1800xf32, #tpu.memory_space<vmem>>, vector<1x1799xf32>
    tpu.vector_store %arg15[%c1, %c0_5], %5 {strides = array<i32>} : memref<256x1800xf32, #tpu.memory_space<vmem>>, vector<1x1799xf32>,
    %7 = vector.extract_strided_slice %3 {offsets = [0, 2], sizes = [1, 1798], strides = [1, 1]} : vector<1x1800xf32> to vector<1x1798xf32>
    %c2 = arith.constant 2 : index
    %c0_6 = arith.constant 0 : index
    %8 = vector.load %arg15[%c2, %c0_6] : memref<256x1800xf32, #tpu.memory_space<vmem>>, vector<1x1798xf32>
    tpu.vector_store %arg15[%c2, %c0_6], %7 {strides = array<i32>} : memref<256x1800xf32, #tpu.memory_space<vmem>>, vector<1x1798xf32>,
    %9 = vector.extract_strided_slice %3 {offsets = [0, 3], sizes = [1, 1797], strides = [1, 1]} : vector<1x1800xf32> to vector<1x1797xf32>
    %c3 = arith.constant 3 : index
    %c0_7 = arith.constant 0 : index
    %10 = vector.load %arg15[%c3, %c0_7] : memref<256x1800xf32, #tpu.memory_space<vmem>>, vector<1x1797xf32>
    tpu.vector_store %arg15[%c3, %c0_7], %9 {strides = array<i32>} : memref<256x1800xf32, #tpu.memory_space<vmem>>, vector<1x1797xf32>,
    %11 = vector.extract_strided_slice %3 {offsets = [0, 30], sizes = [1, 1770], strides = [1, 1]} : vector<1x1800xf32> to vector<1x1770xf32>
    %c4 = arith.constant 4 : index
    %c0_8 = arith.constant 0 : index
    %12 = vector.load %arg15[%c4, %c0_8] : memref<256x1800xf32, #tpu.memory_space<vmem>>, vector<1x1770xf32>
    tpu.vector_store %arg15[%c4, %c0_8], %11 {strides = array<i32>} : memref<256x1800xf32, #tpu.memory_space<vmem>>, vector<1x1770xf32>,
    %13 = vector.extract_strided_slice %3 {offsets = [0, 31], sizes = [1, 1769], strides = [1, 1]} : vector<1x1800xf32> to vector<1x1769xf32>
    %c5 = arith.constant 5 : index
    %c0_9 = arith.constant 0 : index
    %14 = vector.load %arg15[%c5, %c0_9] : memref<256x1800xf32, #tpu.memory_space<vmem>>, vector<1x1769xf32>
    tpu.vector_store %arg15[%c5, %c0_9], %13 {strides = array<i32>} : memref<256x1800xf32, #tpu.memory_space<vmem>>, vector<1x1769xf32>,
    %15 = vector.extract_strided_slice %3 {offsets = [0, 32], sizes = [1, 1768], strides = [1, 1]} : vector<1x1800xf32> to vector<1x1768xf32>
    %c6 = arith.constant 6 : index
    %c0_10 = arith.constant 0 : index
    %16 = vector.load %arg15[%c6, %c0_10] : memref<256x1800xf32, #tpu.memory_space<vmem>>, vector<1x1768xf32>
    tpu.vector_store %arg15[%c6, %c0_10], %15 {strides = array<i32>} : memref<256x1800xf32, #tpu.memory_space<vmem>>, vector<1x1768xf32>,
    %17 = vector.extract_strided_slice %3 {offsets = [0, 33], sizes = [1, 1767], strides = [1, 1]} : vector<1x1800xf32> to vector<1x1767xf32>
    %c7 = arith.constant 7 : index
    %c0_11 = arith.constant 0 : index
    %18 = vector.load %arg15[%c7, %c0_11] : memref<256x1800xf32, #tpu.memory_space<vmem>>, vector<1x1767xf32>
    tpu.vector_store %arg15[%c7, %c0_11], %17 {strides = array<i32>} : memref<256x1800xf32, #tpu.memory_space<vmem>>, vector<1x1767xf32>,
    %19 = vector.extract_strided_slice %3 {offsets = [0, 60], sizes = [1, 1740], strides = [1, 1]} : vector<1x1800xf32> to vector<1x1740xf32>
    %c8 = arith.constant 8 : index
    %c0_12 = arith.constant 0 : index
    %20 = vector.load %arg15[%c8, %c0_12] : memref<256x1800xf32, #tpu.memory_space<vmem>>, vector<1x1740xf32>
    tpu.vector_store %arg15[%c8, %c0_12], %19 {strides = array<i32>} : memref<256x1800xf32, #tpu.memory_space<vmem>>, vector<1x1740xf32>,
    %21 = vector.extract_strided_slice %3 {offsets = [0, 61], sizes = [1, 1739], strides = [1, 1]} : vector<1x1800xf32> to vector<1x1739xf32>
    %c9 = arith.constant 9 : index
    %c0_13 = arith.constant 0 : index
    %22 = vector.load %arg15[%c9, %c0_13] : memref<256x1800xf32, #tpu.memory_space<vmem>>, vector<1x1739xf32>
    tpu.vector_store %arg15[%c9, %c0_13], %21 {strides = array<i32>} : memref<256x1800xf32, #tpu.memory_space<vmem>>, vector<1x1739xf32>,
    %23 = vector.extract_strided_slice %3 {offsets = [0, 62], sizes = [1, 1738], strides = [1, 1]} : vector<1x1800xf32> to vector<1x1738xf32>
    %c10 = arith.constant 10 : index
    %c0_14 = arith.constant 0 : index
    %24 = vector.load %arg15[%c10, %c0_14] : memref<256x1800xf32, #tpu.memory_space<vmem>>, vector<1x1738xf32>
    tpu.vector_store %arg15[%c10, %c0_14], %23 {strides = array<i32>} : memref<256x1800xf32, #tpu.memory_space<vmem>>, vector<1x1738xf32>,
    %25 = vector.extract_strided_slice %3 {offsets = [0, 63], sizes = [1, 1737], strides = [1, 1]} : vector<1x1800xf32> to vector<1x1737xf32>
    %c11 = arith.constant 11 : index
    %c0_15 = arith.constant 0 : index
    %26 = vector.load %arg15[%c11, %c0_15] : memref<256x1800xf32, #tpu.memory_space<vmem>>, vector<1x1737xf32>
    tpu.vector_store %arg15[%c11, %c0_15], %25 {strides = array<i32>} : memref<256x1800xf32, #tpu.memory_space<vmem>>, vector<1x1737xf32>,
    %27 = vector.extract_strided_slice %3 {offsets = [0, 90], sizes = [1, 1710], strides = [1, 1]} : vector<1x1800xf32> to vector<1x1710xf32>
    %c12 = arith.constant 12 : index
    %c0_16 = arith.constant 0 : index
    %28 = vector.load %arg15[%c12, %c0_16] : memref<256x1800xf32, #tpu.memory_space<vmem>>, vector<1x1710xf32>
    tpu.vector_store %arg15[%c12, %c0_16], %27 {strides = array<i32>} : memref<256x1800xf32, #tpu.memory_space<vmem>>, vector<1x1710xf32>,
    %29 = vector.extract_strided_slice %3 {offsets = [0, 91], sizes = [1, 1709], strides = [1, 1]} : vector<1x1800xf32> to vector<1x1709xf32>
    %c13 = arith.constant 13 : index
    %c0_17 = arith.constant 0 : index
    %30 = vector.load %arg15[%c13, %c0_17] : memref<256x1800xf32, #tpu.memory_space<vmem>>, vector<1x1709xf32>
    tpu.vector_store %arg15[%c13, %c0_17], %29 {strides = array<i32>} : memref<256x1800xf32, #tpu.memory_space<vmem>>, vector<1x1709xf32>,
    %31 = vector.extract_strided_slice %3 {offsets = [0, 92], sizes = [1, 1708], strides = [1, 1]} : vector<1x1800xf32> to vector<1x1708xf32>
    %c14 = arith.constant 14 : index
    %c0_18 = arith.constant 0 : index
    %32 = vector.load %arg15[%c14, %c0_18] : memref<256x1800xf32, #tpu.memory_space<vmem>>, vector<1x1708xf32>
    tpu.vector_store %arg15[%c14, %c0_18], %31 {strides = array<i32>} : memref<256x1800xf32, #tpu.memory_space<vmem>>, vector<1x1708xf32>,
    %33 = vector.extract_strided_slice %3 {offsets = [0, 93], sizes = [1, 1707], strides = [1, 1]} : vector<1x1800xf32> to vector<1x1707xf32>
    %c15 = arith.constant 15 : index
    %c0_19 = arith.constant 0 : index
    %34 = vector.load %arg15[%c15, %c0_19] : memref<256x1800xf32, #tpu.memory_space<vmem>>, vector<1x1707xf32>
    tpu.vector_store %arg15[%c15, %c0_19], %33 {strides = array<i32>} : memref<256x1800xf32, #tpu.memory_space<vmem>>, vector<1x1707xf32>,
    %c0_20 = arith.constant 0 : index
    %c0_21 = arith.constant 0 : index
    %35 = vector.load %arg2[%c0_20, %c0_21] : memref<8x16xf32, #tpu.memory_space<vmem>>, vector<8x16xf32>
    %c0_22 = arith.constant 0 : index
    %c0_23 = arith.constant 0 : index
    %36 = vector.load %arg15[%c0_22, %c0_23] : memref<256x1800xf32, #tpu.memory_space<vmem>>, vector<16x1800xf32>
    %cst_24 = arith.constant dense<0.000000e+00> : vector<8x1800xf32>
    %37 = tpu.matmul %35, %36, %cst_24 {dimension_numbers = #tpu.dot_dimension_numbers<[1], [0], [0], [1], [0, 0, 1, 1], [], []>} : vector<8x16xf32>, vector<16x1800xf32>, vector<8x1800xf32> -> vector<8x1800xf32>
    %c0_25 = arith.constant 0 : index
    %c0_26 = arith.constant 0 : index
    %38 = vector.load %arg3[%c0_25, %c0_26] : memref<8x1xf32, #tpu.memory_space<vmem>>, vector<8x1xf32>
    %39 = vector.broadcast %38 : vector<8x1xf32> to vector<8x1800xf32>
    %40 = arith.addf %37, %39 : vector<8x1800xf32>
    %cst_27 = arith.constant 0.000000e+00 : f32
    %41 = vector.broadcast %cst_27 : f32 to vector<8x1800xf32>
    %42 = arith.maximumf %40, %41 : vector<8x1800xf32>
    %c0_28 = arith.constant 0 : index
    %c0_29 = arith.constant 0 : index
    %43 = vector.load %arg8[%c0_28, %c0_29] : memref<1x1800xf32, #tpu.memory_space<vmem>>, vector<1x1800xf32>
    %44 = vector.broadcast %43 : vector<1x1800xf32> to vector<8x1800xf32>
    %45 = arith.mulf %42, %44 : vector<8x1800xf32>
    %cst_30 = arith.constant 0.000000e+00 : f32
    %46 = vector.broadcast %cst_30 : f32 to vector<8x31xf32>
    %47 = vector.extract_strided_slice %45 {offsets = [0, 0], sizes = [8, 1769], strides = [1, 1]} : vector<8x1800xf32> to vector<8x1769xf32>
    %48 = tpu.concatenate %46, %47 in 1 : vector<8x31xf32>, vector<8x1769xf32> -> vector<8x1800xf32>
    %c0_31 = arith.constant 0 : index
    %c0_32 = arith.constant 0 : index
    %49 = vector.load %arg15[%c0_31, %c0_32] : memref<256x1800xf32, #tpu.memory_space<vmem>>, vector<8x1800xf32>
    tpu.vector_store %arg15[%c0_31, %c0_32], %48 {strides = array<i32>} : memref<256x1800xf32, #tpu.memory_space<vmem>>, vector<8x1800xf32>,
    %50 = vector.extract_strided_slice %48 {offsets = [0, 1], sizes = [8, 1799], strides = [1, 1]} : vector<8x1800xf32> to vector<8x1799xf32>
    %c8_33 = arith.constant 8 : index
    %c0_34 = arith.constant 0 : index
    %51 = vector.load %arg15[%c8_33, %c0_34] : memref<256x1800xf32, #tpu.memory_space<vmem>>, vector<8x1799xf32>
    tpu.vector_store %arg15[%c8_33, %c0_34], %50 {strides = array<i32>} : memref<256x1800xf32, #tpu.memory_space<vmem>>, vector<8x1799xf32>,
    %52 = vector.extract_strided_slice %48 {offsets = [0, 2], sizes = [8, 1798], strides = [1, 1]} : vector<8x1800xf32> to vector<8x1798xf32>
    %c16 = arith.constant 16 : index
    %c0_35 = arith.constant 0 : index
    %53 = vector.load %arg15[%c16, %c0_35] : memref<256x1800xf32, #tpu.memory_space<vmem>>, vector<8x1798xf32>
    tpu.vector_store %arg15[%c16, %c0_35], %52 {strides = array<i32>} : memref<256x1800xf32, #tpu.memory_space<vmem>>, vector<8x1798xf32>,
    %54 = vector.extract_strided_slice %48 {offsets = [0, 3], sizes = [8, 1797], strides = [1, 1]} : vector<8x1800xf32> to vector<8x1797xf32>
    %c24 = arith.constant 24 : index
    %c0_36 = arith.constant 0 : index
    %55 = vector.load %arg15[%c24, %c0_36] : memref<256x1800xf32, #tpu.memory_space<vmem>>, vector<8x1797xf32>
    tpu.vector_store %arg15[%c24, %c0_36], %54 {strides = array<i32>} : memref<256x1800xf32, #tpu.memory_space<vmem>>, vector<8x1797xf32>,
    %56 = vector.extract_strided_slice %48 {offsets = [0, 30], sizes = [8, 1770], strides = [1, 1]} : vector<8x1800xf32> to vector<8x1770xf32>
    %c32 = arith.constant 32 : index
    %c0_37 = arith.constant 0 : index
    %57 = vector.load %arg15[%c32, %c0_37] : memref<256x1800xf32, #tpu.memory_space<vmem>>, vector<8x1770xf32>
    tpu.vector_store %arg15[%c32, %c0_37], %56 {strides = array<i32>} : memref<256x1800xf32, #tpu.memory_space<vmem>>, vector<8x1770xf32>,
    %58 = vector.extract_strided_slice %48 {offsets = [0, 31], sizes = [8, 1769], strides = [1, 1]} : vector<8x1800xf32> to vector<8x1769xf32>
    %c40 = arith.constant 40 : index
    %c0_38 = arith.constant 0 : index
    %59 = vector.load %arg15[%c40, %c0_38] : memref<256x1800xf32, #tpu.memory_space<vmem>>, vector<8x1769xf32>
    tpu.vector_store %arg15[%c40, %c0_38], %58 {strides = array<i32>} : memref<256x1800xf32, #tpu.memory_space<vmem>>, vector<8x1769xf32>,
    %60 = vector.extract_strided_slice %48 {offsets = [0, 32], sizes = [8, 1768], strides = [1, 1]} : vector<8x1800xf32> to vector<8x1768xf32>
    %c48 = arith.constant 48 : index
    %c0_39 = arith.constant 0 : index
    %61 = vector.load %arg15[%c48, %c0_39] : memref<256x1800xf32, #tpu.memory_space<vmem>>, vector<8x1768xf32>
    tpu.vector_store %arg15[%c48, %c0_39], %60 {strides = array<i32>} : memref<256x1800xf32, #tpu.memory_space<vmem>>, vector<8x1768xf32>,
    %62 = vector.extract_strided_slice %48 {offsets = [0, 33], sizes = [8, 1767], strides = [1, 1]} : vector<8x1800xf32> to vector<8x1767xf32>
    %c56 = arith.constant 56 : index
    %c0_40 = arith.constant 0 : index
    %63 = vector.load %arg15[%c56, %c0_40] : memref<256x1800xf32, #tpu.memory_space<vmem>>, vector<8x1767xf32>
    tpu.vector_store %arg15[%c56, %c0_40], %62 {strides = array<i32>} : memref<256x1800xf32, #tpu.memory_space<vmem>>, vector<8x1767xf32>,
    %64 = vector.extract_strided_slice %48 {offsets = [0, 60], sizes = [8, 1740], strides = [1, 1]} : vector<8x1800xf32> to vector<8x1740xf32>
    %c64 = arith.constant 64 : index
    %c0_41 = arith.constant 0 : index
    %65 = vector.load %arg15[%c64, %c0_41] : memref<256x1800xf32, #tpu.memory_space<vmem>>, vector<8x1740xf32>
    tpu.vector_store %arg15[%c64, %c0_41], %64 {strides = array<i32>} : memref<256x1800xf32, #tpu.memory_space<vmem>>, vector<8x1740xf32>,
    %66 = vector.extract_strided_slice %48 {offsets = [0, 61], sizes = [8, 1739], strides = [1, 1]} : vector<8x1800xf32> to vector<8x1739xf32>
    %c72 = arith.constant 72 : index
    %c0_42 = arith.constant 0 : index
    %67 = vector.load %arg15[%c72, %c0_42] : memref<256x1800xf32, #tpu.memory_space<vmem>>, vector<8x1739xf32>
    tpu.vector_store %arg15[%c72, %c0_42], %66 {strides = array<i32>} : memref<256x1800xf32, #tpu.memory_space<vmem>>, vector<8x1739xf32>,
    %68 = vector.extract_strided_slice %48 {offsets = [0, 62], sizes = [8, 1738], strides = [1, 1]} : vector<8x1800xf32> to vector<8x1738xf32>
    %c80 = arith.constant 80 : index
    %c0_43 = arith.constant 0 : index
    %69 = vector.load %arg15[%c80, %c0_43] : memref<256x1800xf32, #tpu.memory_space<vmem>>, vector<8x1738xf32>
    tpu.vector_store %arg15[%c80, %c0_43], %68 {strides = array<i32>} : memref<256x1800xf32, #tpu.memory_space<vmem>>, vector<8x1738xf32>,
    %70 = vector.extract_strided_slice %48 {offsets = [0, 63], sizes = [8, 1737], strides = [1, 1]} : vector<8x1800xf32> to vector<8x1737xf32>
    %c88 = arith.constant 88 : index
    %c0_44 = arith.constant 0 : index
    %71 = vector.load %arg15[%c88, %c0_44] : memref<256x1800xf32, #tpu.memory_space<vmem>>, vector<8x1737xf32>
    tpu.vector_store %arg15[%c88, %c0_44], %70 {strides = array<i32>} : memref<256x1800xf32, #tpu.memory_space<vmem>>, vector<8x1737xf32>,
    %72 = vector.extract_strided_slice %48 {offsets = [0, 90], sizes = [8, 1710], strides = [1, 1]} : vector<8x1800xf32> to vector<8x1710xf32>
    %c96 = arith.constant 96 : index
    %c0_45 = arith.constant 0 : index
    %73 = vector.load %arg15[%c96, %c0_45] : memref<256x1800xf32, #tpu.memory_space<vmem>>, vector<8x1710xf32>
    tpu.vector_store %arg15[%c96, %c0_45], %72 {strides = array<i32>} : memref<256x1800xf32, #tpu.memory_space<vmem>>, vector<8x1710xf32>,
    %74 = vector.extract_strided_slice %48 {offsets = [0, 91], sizes = [8, 1709], strides = [1, 1]} : vector<8x1800xf32> to vector<8x1709xf32>
    %c104 = arith.constant 104 : index
    %c0_46 = arith.constant 0 : index
    %75 = vector.load %arg15[%c104, %c0_46] : memref<256x1800xf32, #tpu.memory_space<vmem>>, vector<8x1709xf32>
    tpu.vector_store %arg15[%c104, %c0_46], %74 {strides = array<i32>} : memref<256x1800xf32, #tpu.memory_space<vmem>>, vector<8x1709xf32>,
    %76 = vector.extract_strided_slice %48 {offsets = [0, 92], sizes = [8, 1708], strides = [1, 1]} : vector<8x1800xf32> to vector<8x1708xf32>
    %c112 = arith.constant 112 : index
    %c0_47 = arith.constant 0 : index
    %77 = vector.load %arg15[%c112, %c0_47] : memref<256x1800xf32, #tpu.memory_space<vmem>>, vector<8x1708xf32>
    tpu.vector_store %arg15[%c112, %c0_47], %76 {strides = array<i32>} : memref<256x1800xf32, #tpu.memory_space<vmem>>, vector<8x1708xf32>,
    %78 = vector.extract_strided_slice %48 {offsets = [0, 93], sizes = [8, 1707], strides = [1, 1]} : vector<8x1800xf32> to vector<8x1707xf32>
    %c120 = arith.constant 120 : index
    %c0_48 = arith.constant 0 : index
    %79 = vector.load %arg15[%c120, %c0_48] : memref<256x1800xf32, #tpu.memory_space<vmem>>, vector<8x1707xf32>
    tpu.vector_store %arg15[%c120, %c0_48], %78 {strides = array<i32>} : memref<256x1800xf32, #tpu.memory_space<vmem>>, vector<8x1707xf32>,
    %c0_49 = arith.constant 0 : index
    %c0_50 = arith.constant 0 : index
    %80 = vector.load %arg4[%c0_49, %c0_50] : memref<16x128xf32, #tpu.memory_space<vmem>>, vector<16x128xf32>
    %c0_51 = arith.constant 0 : index
    %c0_52 = arith.constant 0 : index
    %81 = vector.load %arg15[%c0_51, %c0_52] : memref<256x1800xf32, #tpu.memory_space<vmem>>, vector<128x1800xf32>
    %cst_53 = arith.constant dense<0.000000e+00> : vector<16x1800xf32>
    %82 = tpu.matmul %80, %81, %cst_53 {dimension_numbers = #tpu.dot_dimension_numbers<[1], [0], [0], [1], [0, 0, 1, 1], [], []>} : vector<16x128xf32>, vector<128x1800xf32>, vector<16x1800xf32> -> vector<16x1800xf32>
    %c0_54 = arith.constant 0 : index
    %c0_55 = arith.constant 0 : index
    %83 = vector.load %arg5[%c0_54, %c0_55] : memref<16x1xf32, #tpu.memory_space<vmem>>, vector<16x1xf32>
    %84 = vector.broadcast %83 : vector<16x1xf32> to vector<16x1800xf32>
    %85 = arith.addf %82, %84 : vector<16x1800xf32>
    %cst_56 = arith.constant 0.000000e+00 : f32
    %86 = vector.broadcast %cst_56 : f32 to vector<16x1800xf32>
    %87 = arith.maximumf %85, %86 : vector<16x1800xf32>
    %c0_57 = arith.constant 0 : index
    %c0_58 = arith.constant 0 : index
    %88 = vector.load %arg9[%c0_57, %c0_58] : memref<1x1800xf32, #tpu.memory_space<vmem>>, vector<1x1800xf32>
    %89 = vector.broadcast %88 : vector<1x1800xf32> to vector<16x1800xf32>
    %90 = arith.mulf %87, %89 : vector<16x1800xf32>
    %cst_59 = arith.constant 0.000000e+00 : f32
    %91 = vector.broadcast %cst_59 : f32 to vector<16x31xf32>
    %92 = vector.extract_strided_slice %90 {offsets = [0, 0], sizes = [16, 1769], strides = [1, 1]} : vector<16x1800xf32> to vector<16x1769xf32>
    %93 = tpu.concatenate %91, %92 in 1 : vector<16x31xf32>, vector<16x1769xf32> -> vector<16x1800xf32>
    %c0_60 = arith.constant 0 : index
    %c0_61 = arith.constant 0 : index
    %94 = vector.load %arg15[%c0_60, %c0_61] : memref<256x1800xf32, #tpu.memory_space<vmem>>, vector<16x1800xf32>
    tpu.vector_store %arg15[%c0_60, %c0_61], %93 {strides = array<i32>} : memref<256x1800xf32, #tpu.memory_space<vmem>>, vector<16x1800xf32>,
    %95 = vector.extract_strided_slice %93 {offsets = [0, 1], sizes = [16, 1799], strides = [1, 1]} : vector<16x1800xf32> to vector<16x1799xf32>
    %c16_62 = arith.constant 16 : index
    %c0_63 = arith.constant 0 : index
    %96 = vector.load %arg15[%c16_62, %c0_63] : memref<256x1800xf32, #tpu.memory_space<vmem>>, vector<16x1799xf32>
    tpu.vector_store %arg15[%c16_62, %c0_63], %95 {strides = array<i32>} : memref<256x1800xf32, #tpu.memory_space<vmem>>, vector<16x1799xf32>,
    %97 = vector.extract_strided_slice %93 {offsets = [0, 2], sizes = [16, 1798], strides = [1, 1]} : vector<16x1800xf32> to vector<16x1798xf32>
    %c32_64 = arith.constant 32 : index
    %c0_65 = arith.constant 0 : index
    %98 = vector.load %arg15[%c32_64, %c0_65] : memref<256x1800xf32, #tpu.memory_space<vmem>>, vector<16x1798xf32>
    tpu.vector_store %arg15[%c32_64, %c0_65], %97 {strides = array<i32>} : memref<256x1800xf32, #tpu.memory_space<vmem>>, vector<16x1798xf32>,
    %99 = vector.extract_strided_slice %93 {offsets = [0, 3], sizes = [16, 1797], strides = [1, 1]} : vector<16x1800xf32> to vector<16x1797xf32>
    %c48_66 = arith.constant 48 : index
    %c0_67 = arith.constant 0 : index
    %100 = vector.load %arg15[%c48_66, %c0_67] : memref<256x1800xf32, #tpu.memory_space<vmem>>, vector<16x1797xf32>
    tpu.vector_store %arg15[%c48_66, %c0_67], %99 {strides = array<i32>} : memref<256x1800xf32, #tpu.memory_space<vmem>>, vector<16x1797xf32>,
    %101 = vector.extract_strided_slice %93 {offsets = [0, 30], sizes = [16, 1770], strides = [1, 1]} : vector<16x1800xf32> to vector<16x1770xf32>
    %c64_68 = arith.constant 64 : index
    %c0_69 = arith.constant 0 : index
    %102 = vector.load %arg15[%c64_68, %c0_69] : memref<256x1800xf32, #tpu.memory_space<vmem>>, vector<16x1770xf32>
    tpu.vector_store %arg15[%c64_68, %c0_69], %101 {strides = array<i32>} : memref<256x1800xf32, #tpu.memory_space<vmem>>, vector<16x1770xf32>,
    %103 = vector.extract_strided_slice %93 {offsets = [0, 31], sizes = [16, 1769], strides = [1, 1]} : vector<16x1800xf32> to vector<16x1769xf32>
    %c80_70 = arith.constant 80 : index
    %c0_71 = arith.constant 0 : index
    %104 = vector.load %arg15[%c80_70, %c0_71] : memref<256x1800xf32, #tpu.memory_space<vmem>>, vector<16x1769xf32>
    tpu.vector_store %arg15[%c80_70, %c0_71], %103 {strides = array<i32>} : memref<256x1800xf32, #tpu.memory_space<vmem>>, vector<16x1769xf32>,
    %105 = vector.extract_strided_slice %93 {offsets = [0, 32], sizes = [16, 1768], strides = [1, 1]} : vector<16x1800xf32> to vector<16x1768xf32>
    %c96_72 = arith.constant 96 : index
    %c0_73 = arith.constant 0 : index
    %106 = vector.load %arg15[%c96_72, %c0_73] : memref<256x1800xf32, #tpu.memory_space<vmem>>, vector<16x1768xf32>
    tpu.vector_store %arg15[%c96_72, %c0_73], %105 {strides = array<i32>} : memref<256x1800xf32, #tpu.memory_space<vmem>>, vector<16x1768xf32>,
    %107 = vector.extract_strided_slice %93 {offsets = [0, 33], sizes = [16, 1767], strides = [1, 1]} : vector<16x1800xf32> to vector<16x1767xf32>
    %c112_74 = arith.constant 112 : index
    %c0_75 = arith.constant 0 : index
    %108 = vector.load %arg15[%c112_74, %c0_75] : memref<256x1800xf32, #tpu.memory_space<vmem>>, vector<16x1767xf32>
    tpu.vector_store %arg15[%c112_74, %c0_75], %107 {strides = array<i32>} : memref<256x1800xf32, #tpu.memory_space<vmem>>, vector<16x1767xf32>,
    %109 = vector.extract_strided_slice %93 {offsets = [0, 60], sizes = [16, 1740], strides = [1, 1]} : vector<16x1800xf32> to vector<16x1740xf32>
    %c128 = arith.constant 128 : index
    %c0_76 = arith.constant 0 : index
    %110 = vector.load %arg15[%c128, %c0_76] : memref<256x1800xf32, #tpu.memory_space<vmem>>, vector<16x1740xf32>
    tpu.vector_store %arg15[%c128, %c0_76], %109 {strides = array<i32>} : memref<256x1800xf32, #tpu.memory_space<vmem>>, vector<16x1740xf32>,
    %111 = vector.extract_strided_slice %93 {offsets = [0, 61], sizes = [16, 1739], strides = [1, 1]} : vector<16x1800xf32> to vector<16x1739xf32>
    %c144 = arith.constant 144 : index
    %c0_77 = arith.constant 0 : index
    %112 = vector.load %arg15[%c144, %c0_77] : memref<256x1800xf32, #tpu.memory_space<vmem>>, vector<16x1739xf32>
    tpu.vector_store %arg15[%c144, %c0_77], %111 {strides = array<i32>} : memref<256x1800xf32, #tpu.memory_space<vmem>>, vector<16x1739xf32>,
    %113 = vector.extract_strided_slice %93 {offsets = [0, 62], sizes = [16, 1738], strides = [1, 1]} : vector<16x1800xf32> to vector<16x1738xf32>
    %c160 = arith.constant 160 : index
    %c0_78 = arith.constant 0 : index
    %114 = vector.load %arg15[%c160, %c0_78] : memref<256x1800xf32, #tpu.memory_space<vmem>>, vector<16x1738xf32>
    tpu.vector_store %arg15[%c160, %c0_78], %113 {strides = array<i32>} : memref<256x1800xf32, #tpu.memory_space<vmem>>, vector<16x1738xf32>,
    %115 = vector.extract_strided_slice %93 {offsets = [0, 63], sizes = [16, 1737], strides = [1, 1]} : vector<16x1800xf32> to vector<16x1737xf32>
    %c176 = arith.constant 176 : index
    %c0_79 = arith.constant 0 : index
    %116 = vector.load %arg15[%c176, %c0_79] : memref<256x1800xf32, #tpu.memory_space<vmem>>, vector<16x1737xf32>
    tpu.vector_store %arg15[%c176, %c0_79], %115 {strides = array<i32>} : memref<256x1800xf32, #tpu.memory_space<vmem>>, vector<16x1737xf32>,
    %117 = vector.extract_strided_slice %93 {offsets = [0, 90], sizes = [16, 1710], strides = [1, 1]} : vector<16x1800xf32> to vector<16x1710xf32>
    %c192 = arith.constant 192 : index
    %c0_80 = arith.constant 0 : index
    %118 = vector.load %arg15[%c192, %c0_80] : memref<256x1800xf32, #tpu.memory_space<vmem>>, vector<16x1710xf32>
    tpu.vector_store %arg15[%c192, %c0_80], %117 {strides = array<i32>} : memref<256x1800xf32, #tpu.memory_space<vmem>>, vector<16x1710xf32>,
    %119 = vector.extract_strided_slice %93 {offsets = [0, 91], sizes = [16, 1709], strides = [1, 1]} : vector<16x1800xf32> to vector<16x1709xf32>
    %c208 = arith.constant 208 : index
    %c0_81 = arith.constant 0 : index
    %120 = vector.load %arg15[%c208, %c0_81] : memref<256x1800xf32, #tpu.memory_space<vmem>>, vector<16x1709xf32>
    tpu.vector_store %arg15[%c208, %c0_81], %119 {strides = array<i32>} : memref<256x1800xf32, #tpu.memory_space<vmem>>, vector<16x1709xf32>,
    %121 = vector.extract_strided_slice %93 {offsets = [0, 92], sizes = [16, 1708], strides = [1, 1]} : vector<16x1800xf32> to vector<16x1708xf32>
    %c224 = arith.constant 224 : index
    %c0_82 = arith.constant 0 : index
    %122 = vector.load %arg15[%c224, %c0_82] : memref<256x1800xf32, #tpu.memory_space<vmem>>, vector<16x1708xf32>
    tpu.vector_store %arg15[%c224, %c0_82], %121 {strides = array<i32>} : memref<256x1800xf32, #tpu.memory_space<vmem>>, vector<16x1708xf32>,
    %123 = vector.extract_strided_slice %93 {offsets = [0, 93], sizes = [16, 1707], strides = [1, 1]} : vector<16x1800xf32> to vector<16x1707xf32>
    %c240 = arith.constant 240 : index
    %c0_83 = arith.constant 0 : index
    %124 = vector.load %arg15[%c240, %c0_83] : memref<256x1800xf32, #tpu.memory_space<vmem>>, vector<16x1707xf32>
    tpu.vector_store %arg15[%c240, %c0_83], %123 {strides = array<i32>} : memref<256x1800xf32, #tpu.memory_space<vmem>>, vector<16x1707xf32>,
    %c0_84 = arith.constant 0 : index
    %c0_85 = arith.constant 0 : index
    %125 = vector.load %arg6[%c0_84, %c0_85] : memref<16x256xf32, #tpu.memory_space<vmem>>, vector<16x256xf32>
    %c0_86 = arith.constant 0 : index
    %c0_87 = arith.constant 0 : index
    %126 = vector.load %arg15[%c0_86, %c0_87] : memref<256x1800xf32, #tpu.memory_space<vmem>>, vector<256x1800xf32>
    %cst_88 = arith.constant dense<0.000000e+00> : vector<16x1800xf32>
    %127 = tpu.matmul %125, %126, %cst_88 {dimension_numbers = #tpu.dot_dimension_numbers<[1], [0], [0], [1], [0, 0, 1, 1], [], []>} : vector<16x256xf32>, vector<256x1800xf32>, vector<16x1800xf32> -> vector<16x1800xf32>
    %c0_89 = arith.constant 0 : index
    %c0_90 = arith.constant 0 : index
    %128 = vector.load %arg7[%c0_89, %c0_90] : memref<16x1xf32, #tpu.memory_space<vmem>>, vector<16x1xf32>
    %129 = vector.broadcast %128 : vector<16x1xf32> to vector<16x1800xf32>
    %130 = arith.addf %127, %129 : vector<16x1800xf32>
    %cst_91 = arith.constant 0.000000e+00 : f32
    %131 = vector.broadcast %cst_91 : f32 to vector<16x1800xf32>
    %132 = arith.maximumf %130, %131 : vector<16x1800xf32>
    %cst_92 = arith.constant 0.000000e+00 : f32
    %133 = vector.broadcast %cst_92 : f32 to vector<16x1xf32>
    %134 = vector.extract_strided_slice %132 {offsets = [0, 1], sizes = [16, 1799], strides = [1, 1]} : vector<16x1800xf32> to vector<16x1799xf32>
    %135 = tpu.concatenate %134, %133 in 1 : vector<16x1799xf32>, vector<16x1xf32> -> vector<16x1800xf32>
    %136 = arith.maximumf %132, %135 : vector<16x1800xf32>
    %cst_93 = arith.constant 0.000000e+00 : f32
    %137 = vector.broadcast %cst_93 : f32 to vector<16x30xf32>
    %138 = vector.extract_strided_slice %132 {offsets = [0, 30], sizes = [16, 1770], strides = [1, 1]} : vector<16x1800xf32> to vector<16x1770xf32>
    %139 = tpu.concatenate %138, %137 in 1 : vector<16x1770xf32>, vector<16x30xf32> -> vector<16x1800xf32>
    %cst_94 = arith.constant 0.000000e+00 : f32
    %140 = vector.broadcast %cst_94 : f32 to vector<16x31xf32>
    %141 = vector.extract_strided_slice %132 {offsets = [0, 31], sizes = [16, 1769], strides = [1, 1]} : vector<16x1800xf32> to vector<16x1769xf32>
    %142 = tpu.concatenate %141, %140 in 1 : vector<16x1769xf32>, vector<16x31xf32> -> vector<16x1800xf32>
    %143 = arith.maximumf %139, %142 : vector<16x1800xf32>
    %144 = arith.maximumf %136, %143 : vector<16x1800xf32>
    %145 = vector.extract_strided_slice %144 {offsets = [0, 0], sizes = [16, 900], strides = [1, 1]} : vector<16x1800xf32> to vector<16x900xf32>
    %c0_95 = arith.constant 0 : index
    %c0_96 = arith.constant 0 : index
    %c0_97 = arith.constant 0 : index
    %146 = vector.load %arg16[%c0_95, %c0_96, %c0_97] : memref<16x2x900xf32, #tpu.memory_space<vmem>>, vector<16x1x900xf32>
    %147 = vector.shape_cast %146 : vector<16x1x900xf32> to vector<16x900xf32>
    %148 = vector.shape_cast %145 : vector<16x900xf32> to vector<16x1x900xf32>
    tpu.vector_store %arg16[%c0_95, %c0_96, %c0_97], %148 {strides = array<i32>} : memref<16x2x900xf32, #tpu.memory_space<vmem>>, vector<16x1x900xf32>,
    %149 = vector.extract_strided_slice %144 {offsets = [0, 900], sizes = [16, 900], strides = [1, 1]} : vector<16x1800xf32> to vector<16x900xf32>
    %c0_98 = arith.constant 0 : index
    %c1_99 = arith.constant 1 : index
    %c0_100 = arith.constant 0 : index
    %150 = vector.load %arg16[%c0_98, %c1_99, %c0_100] : memref<16x2x900xf32, #tpu.memory_space<vmem>>, vector<16x1x900xf32>
    %151 = vector.shape_cast %150 : vector<16x1x900xf32> to vector<16x900xf32>
    %152 = vector.shape_cast %149 : vector<16x900xf32> to vector<16x1x900xf32>
    tpu.vector_store %arg16[%c0_98, %c1_99, %c0_100], %152 {strides = array<i32>} : memref<16x2x900xf32, #tpu.memory_space<vmem>>, vector<16x1x900xf32>,
    %c0_101 = arith.constant 0 : index
    %c0_102 = arith.constant 0 : index
    %c0_103 = arith.constant 0 : index
    %153 = vector.load %arg16[%c0_101, %c0_102, %c0_103] : memref<16x2x900xf32, #tpu.memory_space<vmem>>, vector<16x2x900xf32>
    %c0_104 = arith.constant 0 : index
    %c0_105 = arith.constant 0 : index
    %c0_106 = arith.constant 0 : index
    %154 = vector.load %arg10[%c0_104, %c0_105, %c0_106] : memref<16x8x900xf32, #tpu.memory_space<vmem>>, vector<16x8x900xf32>
    "tpu.trace_start"() <{level = 10 : i32, message = "cbp,cnp->cbn"}> : () -> ()
    %cst_107 = arith.constant dense<0.000000e+00> : vector<16x2x8xf32>
    %155 = tpu.matmul %153, %154, %cst_107 {dimension_numbers = #tpu.dot_dimension_numbers<[2], [2], [1], [1], [0, 0, 0, 1, 1, 1], [0], [0]>} : vector<16x2x900xf32>, vector<16x8x900xf32>, vector<16x2x8xf32> -> vector<16x2x8xf32>
    "tpu.trace_stop"() : () -> ()
    %cst_108 = arith.constant dense<0.000000e+00> : vector<2x8xf32>
    %156 = vector.multi_reduction <add>, %155, %cst_108 [0] : vector<16x2x8xf32> to vector<2x8xf32>
    %c0_109 = arith.constant 0 : index
    %c0_110 = arith.constant 0 : index
    %157 = vector.load %arg11[%c0_109, %c0_110] : memref<1x8xf32, #tpu.memory_space<vmem>>, vector<1x8xf32>
    %158 = vector.broadcast %157 : vector<1x8xf32> to vector<2x8xf32>
    %159 = arith.addf %156, %158 : vector<2x8xf32>
    %c0_111 = arith.constant 0 : index
    %c0_112 = arith.constant 0 : index
    %160 = vector.load %arg12[%c0_111, %c0_112] : memref<8x10xf32, #tpu.memory_space<vmem>>, vector<8x10xf32>
    %cst_113 = arith.constant dense<0.000000e+00> : vector<2x10xf32>
    %161 = tpu.matmul %159, %160, %cst_113 {dimension_numbers = #tpu.dot_dimension_numbers<[1], [0], [0], [1], [0, 0, 1, 1], [], []>} : vector<2x8xf32>, vector<8x10xf32>, vector<2x10xf32> -> vector<2x10xf32>
    %c0_114 = arith.constant 0 : index
    %c0_115 = arith.constant 0 : index
    %162 = vector.load %arg13[%c0_114, %c0_115] : memref<1x10xf32, #tpu.memory_space<vmem>>, vector<1x10xf32>
    %163 = vector.broadcast %162 : vector<1x10xf32> to vector<2x10xf32>
    %164 = arith.addf %161, %163 : vector<2x10xf32>
    %cst_116 = arith.constant dense<0xFF800000> : vector<2xf32>
    %165 = vector.multi_reduction <maximumf>, %164, %cst_116 [1] : vector<2x10xf32> to vector<2xf32>
    %166 = vector.shape_cast %165 : vector<2xf32> to vector<2x1xf32>
    %167 = vector.broadcast %166 : vector<2x1xf32> to vector<2x10xf32>
    %168 = arith.subf %164, %167 : vector<2x10xf32>
    %169 = math.exp %168 : vector<2x10xf32>
    %cst_117 = arith.constant dense<0.000000e+00> : vector<2xf32>
    %170 = vector.multi_reduction <add>, %169, %cst_117 [1] : vector<2x10xf32> to vector<2xf32>
    %171 = vector.shape_cast %170 : vector<2xf32> to vector<2x1xf32>
    %172 = vector.broadcast %171 : vector<2x1xf32> to vector<2x10xf32>
    %173 = arith.divf %169, %172 : vector<2x10xf32>
    %c0_118 = arith.constant 0 : index
    %c0_119 = arith.constant 0 : index
    %c0_120 = arith.constant 0 : index
    %174 = vector.load %arg14[%c0_118, %c0_119, %c0_120] : memref<1x2x10xf32, #tpu.memory_space<vmem>>, vector<1x2x10xf32>
    %175 = vector.shape_cast %174 : vector<1x2x10xf32> to vector<2x10xf32>
    %176 = vector.shape_cast %173 : vector<2x10xf32> to vector<1x2x10xf32>
    tpu.vector_store %arg14[%c0_118, %c0_119, %c0_120], %176 {strides = array<i32>} : memref<1x2x10xf32, #tpu.memory_space<vmem>>, vector<1x2x10xf32>,
    return
  }
  func.func @transform_0(%arg0: i32) -> (i32, i32, i32) {
    %c0_i32 = arith.constant 0 : i32
    %c0_i32_0 = arith.constant 0 : i32
    %c0_i32_1 = arith.constant 0 : i32
    return %arg0, %c0_i32, %c0_i32_0 : i32, i32, i32
  }
  func.func @transform_1(%arg0: i32) -> (i32, i32) {
    %c0_i32 = arith.constant 0 : i32
    %c0_i32_0 = arith.constant 0 : i32
    %c0_i32_1 = arith.constant 0 : i32
    return %c0_i32, %c0_i32_0 : i32, i32
  }
  func.func @transform_2(%arg0: i32) -> (i32, i32) {
    %c0_i32 = arith.constant 0 : i32
    %c0_i32_0 = arith.constant 0 : i32
    %c0_i32_1 = arith.constant 0 : i32
    return %c0_i32, %c0_i32_0 : i32, i32
  }
  func.func @transform_3(%arg0: i32) -> (i32, i32) {
    %c0_i32 = arith.constant 0 : i32
    %c0_i32_0 = arith.constant 0 : i32
    %c0_i32_1 = arith.constant 0 : i32
    return %c0_i32, %c0_i32_0 : i32, i32
  }
  func.func @transform_4(%arg0: i32) -> (i32, i32) {
    %c0_i32 = arith.constant 0 : i32
    %c0_i32_0 = arith.constant 0 : i32
    %c0_i32_1 = arith.constant 0 : i32
    return %c0_i32, %c0_i32_0 : i32, i32
  }
  func.func @transform_5(%arg0: i32) -> (i32, i32) {
    %c0_i32 = arith.constant 0 : i32
    %c0_i32_0 = arith.constant 0 : i32
    %c0_i32_1 = arith.constant 0 : i32
    return %c0_i32, %c0_i32_0 : i32, i32
  }
  func.func @transform_6(%arg0: i32) -> (i32, i32) {
    %c0_i32 = arith.constant 0 : i32
    %c0_i32_0 = arith.constant 0 : i32
    %c0_i32_1 = arith.constant 0 : i32
    return %c0_i32, %c0_i32_0 : i32, i32
  }
  func.func @transform_7(%arg0: i32) -> (i32, i32) {
    %c0_i32 = arith.constant 0 : i32
    %c0_i32_0 = arith.constant 0 : i32
    %c0_i32_1 = arith.constant 0 : i32
    return %c0_i32, %c0_i32_0 : i32, i32
  }
  func.func @transform_8(%arg0: i32) -> (i32, i32) {
    %c0_i32 = arith.constant 0 : i32
    %c0_i32_0 = arith.constant 0 : i32
    %c0_i32_1 = arith.constant 0 : i32
    return %c0_i32, %c0_i32_0 : i32, i32
  }
  func.func @transform_9(%arg0: i32) -> (i32, i32, i32) {
    %c0_i32 = arith.constant 0 : i32
    %c0_i32_0 = arith.constant 0 : i32
    %c0_i32_1 = arith.constant 0 : i32
    %c0_i32_2 = arith.constant 0 : i32
    return %c0_i32, %c0_i32_0, %c0_i32_1 : i32, i32, i32
  }
  func.func @transform_10(%arg0: i32) -> (i32, i32) {
    %c0_i32 = arith.constant 0 : i32
    %c0_i32_0 = arith.constant 0 : i32
    %c0_i32_1 = arith.constant 0 : i32
    return %c0_i32, %c0_i32_0 : i32, i32
  }
  func.func @transform_11(%arg0: i32) -> (i32, i32) {
    %c0_i32 = arith.constant 0 : i32
    %c0_i32_0 = arith.constant 0 : i32
    %c0_i32_1 = arith.constant 0 : i32
    return %c0_i32, %c0_i32_0 : i32, i32
  }
  func.func @transform_12(%arg0: i32) -> (i32, i32) {
    %c0_i32 = arith.constant 0 : i32
    %c0_i32_0 = arith.constant 0 : i32
    %c0_i32_1 = arith.constant 0 : i32
    return %c0_i32, %c0_i32_0 : i32, i32
  }
  func.func @transform_13(%arg0: i32) -> (i32, i32, i32) {
    %c0_i32 = arith.constant 0 : i32
    %c0_i32_0 = arith.constant 0 : i32
    %c0_i32_1 = arith.constant 0 : i32
    return %arg0, %c0_i32, %c0_i32_0 : i32, i32, i32
  }
}

</mosaic_0001>

<bundles_post_ra>
// kernel: tile.13
= control target key start
LH: loop header
LB: loop body
LE: loop exit
PB: predicated region body
PF: predicated region fallthrough
CT: control target
= control target key end

     0   :  { %s106_s0 = inlined_call_operand.vmem [shape: f32[900], index: 0, kind: input, shape index: {}]   ;;  %s107_s1 = inlined_call_operand.vmem [shape: f32[2,900], index: 1, kind: output, shape index: {}]  }
   0x1   :  { %v4_v0 = vld [vmem:[%s106_s0] ss:$0 sm:$0xff]  ;;  %v34_v1 = vld [vmem:[%s106_s0 + $0x1] ss:$0 sm:$0xff]  ;;  %v36_v2 = vld [vmem:[%s106_s0 + $0x2] ss:$0 sm:$0xff] }
   0x2   :  { %5 = vst [vmem:[%s107_s1] sm:$0x3] %v4_v0  ;;  %v38_v3 = vld [vmem:[%s106_s0 + $0x3] ss:$0 sm:$0xff]  ;;  %v40_v4 = vld [vmem:[%s106_s0 + $0x4] ss:$0 sm:$0xff] }
   0x3   :  { %35 = vst [vmem:[%s107_s1 + $0x2] sm:$0x3] %v34_v1  ;;  %v42_v5 = vld [vmem:[%s106_s0 + $0x5] ss:$0 sm:$0xff]  ;;  %v44_v6 = vld [vmem:[%s106_s0 + $0x6] ss:$0 sm:$0xff] }
   0x4   :  { %37 = vst [vmem:[%s107_s1 + $0x4] sm:$0x3] %v36_v2  ;;  %v46_v7 = vld [vmem:[%s106_s0 + $0x7] ss:$0 sm:$0xff] }
   0x5   :  { %39 = vst [vmem:[%s107_s1 + $0x6] sm:$0x3] %v38_v3 }
   0x6   :  { %41 = vst [vmem:[%s107_s1 + $0x8] sm:$0x3] %v40_v4 }
   0x7   :  { %43 = vst [vmem:[%s107_s1 + $0xa] sm:$0x3] %v42_v5 }
   0x8   :  { %45 = vst [vmem:[%s107_s1 + $0xc] sm:$0x3] %v44_v6 }
   0x9   :  { %47 = vst [vmem:[%s107_s1 + $0xe] sm:$0x3] %v46_v7 }

// kernel: tile.14
= control target key start
LH: loop header
LB: loop body
LE: loop exit
PB: predicated region body
PF: predicated region fallthrough
CT: control target
= control target key end

     0   :  { %vm41_vm0 = vcmask 1046532   ;;  %vm53_vm1 = vcmask 1014784   ;;  %vm70_vm2 = vcmask 1044483   ;;  %s73_s22 = smov 96  ;;  %s198_s23 = smov 4   ;;  %vm75_vm3 = vcmask 1046533   ;;  %s278_s0 = inlined_call_operand.vmem [shape: f32[2,900], index: 0, kind: input, shape index: {}]   ;;  %s279_s1 = inlined_call_operand.vmem [shape: f32[1,1800], index: 1, kind: output, shape index: {}]  }
   0x1   :  { %v176_v0 = vld [vmem:[%s278_s0 + $0xe] sm:$0x3]  ;;  %v177_v1 = vld [vmem:[%s278_s0 + $0xc] sm:$0x3]  ;;  %v178_v2 = vld [vmem:[%s278_s0 + $0xa] sm:$0x3] }
   0x2   :  { %7 = vst [vmem:[#allocation1 + $0x38] sm:$0x3] %v176_v0  ;;  %v179_v3 = vld [vmem:[%s278_s0 + $0x8] sm:$0x3]  ;;  %v180_v4 = vld [vmem:[%s278_s0 + $0x6] sm:$0x3] }
   0x3   :  { %11 = vst [vmem:[#allocation1 + $0x30] sm:$0x3] %v177_v1  ;;  %v181_v5 = vld [vmem:[%s278_s0 + $0x4] sm:$0x3]  ;;  %v182_v6 = vld [vmem:[%s278_s0 + $0x2] sm:$0x3] }
   0x4   :  { %15 = vst [vmem:[#allocation1 + $0x28] sm:$0x3] %v178_v2  ;;  %v32_v7 = vld [vmem:[%s278_s0] sm:$0x3]  ;;  %s68_s0 = smov 24  ;;  %vm36_vm4 = vcmask 31744  }
   0x5   :  { %19 = vst [vmem:[#allocation1 + $0x20] sm:$0x3] %v179_v3  ;;  %vm62_vm5 = vcmask 64544   ;;  %vm79_vm6 = vcmask 1047584  }
   0x6   :  { %23 = vst [vmem:[#allocation1 + $0x18] sm:$0x3] %v180_v4 }
   0x7   :  { %27 = vst [vmem:[#allocation1 + $0x10] sm:$0x3] %v181_v5 }
   0x8   :  { %31 = vst [vmem:[#allocation1 + $0x8] sm:$0x3] %v182_v6 }
   0x9   :  { %33 = vst [vmem:[#allocation1] sm:$0x3] %v32_v7  ;;  %v52_v10 = vld [vmem:[#allocation1 + $0x39] sm:$0x1]   ;;  %v35_v28 = vld [vmem:[#allocation1 + $0x38] sm:$0x1]  }
   0xa   :  { %38 = vst.msk [vmem:[#allocation0 + $0x38] sm:$0x1] %vm36_vm4, %v35_v28  }
   0xc   :  { %v40_v8 = vld [vmem:[#allocation1] ss:$8 sm:$0x70]   ;;  %v48_v9 = vld [vmem:[#allocation1 + $0x1] ss:$8 sm:$0x70]  }
   0xe   :  { %v74_v19 = vld [vmem:[#allocation1 + $0x81] ss:$-16 sm:%s73_s22]  }
   0xf   :  { %v66_v15 = vld [vmem:[#allocation1 + $0x9] ss:$8 sm:$0x7]  }
  0x10   :  { %v39_v11 = vld [vmem:[#allocation1] ss:$8 sm:$0xf]   ;;  %v46_v12 = vld [vmem:[#allocation1 + $0x1] ss:$8 sm:$0xf]  }
  0x11   :  { %v42_v13 = vsel %vm41_vm0, %v40_v8, %v39_v11  ;;  %v50_v14 = vsel %vm41_vm0, %v48_v9, %v46_v12  ;;  %v69_v17 = vld [vmem:[#allocation1 - $0x77] ss:$40 sm:%s68_s0]  }
  0x12   :  { %43 = vst [vmem:[#allocation0] ss:$8 sm:$0xf] %v42_v13   ;;  %v54_v16 = vsel %vm53_vm1, %v52_v10, %v50_v14  ;;  %v71_v18 = vsel %vm70_vm2, %v69_v17, %v66_v15 }
  0x13   :  { %44 = vst [vmem:[#allocation0] ss:$8 sm:$0x70] %v42_v13   ;;  %55 = vrot.lane.b32.xlu0 %v54_v16, %s198_s23  ;;  %v76_v20 = vsel %vm75_vm3, %v74_v19, %v71_v18 }
  0x19   :  { %v88_v21 = vld [vmem:[#allocation0] sm:$0x1]  ;;  %v93_v22 = vld [vmem:[#allocation0 + $0x8] sm:$0x1]  ;;  %v99_v23 = vld [vmem:[#allocation0 + $0x10] sm:$0x1] }
  0x1a   :  { %91 = vst [vmem:[%s279_s1] sm:$0x1] %v88_v21  ;;  %v105_v24 = vld [vmem:[#allocation0 + $0x18] sm:$0x1]  ;;  %v111_v25 = vld [vmem:[#allocation0 + $0x20] sm:$0x1] }
  0x1b   :  { %183 = vst [vmem:[%s279_s1 + $0x1] sm:$0x1] %v93_v22  ;;  %77 = vrot.lane.b32.xlu0 %v76_v20, %s198_s23  ;;  %v117_v26 = vld [vmem:[#allocation0 + $0x28] sm:$0x1]  ;;  %v123_v27 = vld [vmem:[#allocation0 + $0x30] sm:$0x1] }
  0x1c   :  { %184 = vst [vmem:[%s279_s1 + $0x2] sm:$0x1] %v99_v23 }
  0x1d   :  { %185 = vst [vmem:[%s279_s1 + $0x3] sm:$0x1] %v105_v24 }
  0x1e   :  { %186 = vst [vmem:[%s279_s1 + $0x4] sm:$0x1] %v111_v25 }
  0x1f   :  { %187 = vst [vmem:[%s279_s1 + $0x5] sm:$0x1] %v117_v26 }
  0x20   :  { %188 = vst [vmem:[%s279_s1 + $0x6] sm:$0x1] %v123_v27 }
  0x85   :  { %v56_v29 = vpop.permute.xlu0 %55  }
  0x86   :  { %59 = vst.msk [vmem:[#allocation0 + $0x40] ss:$8 sm:$0xf] %vm36_vm4, %v56_v29  }
  0x87   :  { %61 = vst.msk [vmem:[#allocation0 + $0x40] ss:$8 sm:$0x70] %vm36_vm4, %v56_v29  }
  0x88   :  { %64 = vst.msk [vmem:[#allocation0 + $0x70] sm:$0x1] %vm62_vm5, %v56_v29  }
  0x8d   :  { %v78_v30 = vpop.permute.xlu0 %77  }
  0x8e   :  { %81 = vst.msk [vmem:[#allocation0 + $0x40] ss:$8 sm:$0x7] %vm79_vm6, %v78_v30  }
  0x8f   :  { %v171_v31 = vld [vmem:[#allocation0 + $0x70] sm:$0x1]  ;;  %83 = vst.msk [vmem:[#allocation0 - $0x40] ss:$40 sm:$0x18] %vm79_vm6, %v78_v30  }
  0x90   :  { %196 = vst [vmem:[%s279_s1 + $0xe] sm:$0x1] %v171_v31 }
  0x91   :  { %85 = vst.msk [vmem:[#allocation0 + $0xb8] ss:$-16 sm:$0x60] %vm79_vm6, %v78_v30  }
  0x95   :  { %v135_v32 = vld [vmem:[#allocation0 + $0x40] sm:$0x1]  ;;  %v141_v33 = vld [vmem:[#allocation0 + $0x48] sm:$0x1]  ;;  %v147_v35 = vld [vmem:[#allocation0 + $0x50] sm:$0x1] }
  0x96   :  { %v129_v34 = vld [vmem:[#allocation0 + $0x38] sm:$0x1]  ;;  %190 = vst [vmem:[%s279_s1 + $0x8] sm:$0x1] %v135_v32  ;;  %v159_v37 = vld [vmem:[#allocation0 + $0x60] sm:$0x1] }
  0x97   :  { %189 = vst [vmem:[%s279_s1 + $0x7] sm:$0x1] %v129_v34 }
  0x98   :  { %191 = vst [vmem:[%s279_s1 + $0x9] sm:$0x1] %v141_v33  ;;  %v153_v36 = vld [vmem:[#allocation0 + $0x58] sm:$0x1]  ;;  %v165_v38 = vld [vmem:[#allocation0 + $0x68] sm:$0x1] }
  0x99   :  { %192 = vst [vmem:[%s279_s1 + $0xa] sm:$0x1] %v147_v35 }
  0x9a   :  { %193 = vst [vmem:[%s279_s1 + $0xb] sm:$0x1] %v153_v36 }
  0x9b   :  { %194 = vst [vmem:[%s279_s1 + $0xc] sm:$0x1] %v159_v37 }
  0x9c   :  { %195 = vst [vmem:[%s279_s1 + $0xd] sm:$0x1] %v165_v38 }

// kernel: cnn_forward.1
= control target key start
LH: loop header
LB: loop body
LE: loop exit
PB: predicated region body
PF: predicated region fallthrough
CT: control target
= control target key end

     0   :  { %s17179_s0 = inlined_call_operand.vmem [shape: f32[2,1,1800], index: 0, kind: input, shape index: {}]   ;;  %s17180_s1 = inlined_call_operand.vmem [shape: f32[8,16], index: 1, kind: input, shape index: {}]   ;;  %s17181_s2 = inlined_call_operand.vmem [shape: f32[8,1], index: 2, kind: input, shape index: {}]   ;;  %s17182_s3 = inlined_call_operand.vmem [shape: f32[16,128], index: 3, kind: input, shape index: {}]   ;;  %s17183_s4 = inlined_call_operand.vmem [shape: f32[16,1], index: 4, kind: input, shape index: {}]   ;;  %s17184_s5 = inlined_call_operand.vmem [shape: f32[16,256], index: 5, kind: input, shape index: {}]   ;;  %s17185_s6 = inlined_call_operand.vmem [shape: f32[16,1], index: 6, kind: input, shape index: {}]   ;;  %s17186_s7 = inlined_call_operand.vmem [shape: f32[1,1800], index: 7, kind: input, shape index: {}]   ;;  %s17187_s8 = inlined_call_operand.vmem [shape: f32[1,1800], index: 8, kind: input, shape index: {}]   ;;  %s17188_s9 = inlined_call_operand.vmem [shape: f32[16,8,900], index: 9, kind: input, shape index: {}]   ;;  %s17189_s10 = inlined_call_operand.vmem [shape: f32[1,8], index: 10, kind: input, shape index: {}]   ;;  %s17190_s11 = inlined_call_operand.vmem [shape: f32[8,10], index: 11, kind: input, shape index: {}]   ;;  %s17191_s12 = inlined_call_operand.vmem [shape: f32[1,10], index: 12, kind: input, shape index: {}]   ;;  %s17192_s13 = inlined_call_operand.hbm [shape: f32[2,2,10], index: 13, kind: output, shape index: {}]  }
   0x1   :  { %17269 = sst [smem:[#allocation19_spill]] %s17179_s0 }
   0x2   :  { %17270 = sst [smem:[#allocation20_spill]] %s17180_s1 }
   0x3   :  { %17271 = sst [smem:[#allocation21_spill]] %s17181_s2 }
   0x4   :  { %17272 = sst [smem:[#allocation22_spill]] %s17182_s3 }
   0x5   :  { %17273 = sst [smem:[#allocation23_spill]] %s17186_s7 }
   0x6   :  { %18 = vsyncpa [#allocation5], 0 }
   0x7   :  { %20 = vsyncpa [#allocation5 + $0x1], 0  ;;  %s11195_s25 = smov 0   ;;  %s11197_s26 = smov 0  }
   0x8   :  { %s11199_s27 = smov 0   ;;  %s11201_s28 = smov 0  }
   0x9 LB: > { %s11216_s29 = sadd.s32 4294967295, %s11104_s28   ;;  %s10846_s30 = sadd.s32 4294967294, %s11104_s28   ;;  %s11104_s28 = sphi %s11201_s28, %s17726_s28   ;;  %s11100_s27 = sphi %s11199_s27, %s17725_s27   ;;  %s11096_s26 = sphi %s11197_s26, %s17724_s26   ;;  %s11092_s25 = sphi %s11195_s25, %s17723_s25  }
   0xa   : > { %s11220_s14 = sadd.s32 1, %s11104_s28   ;;  %s311_s15 = sadd.s32 1, %s11100_s27 }
   0xb   : > { %s308_s16 = ssub.s32 %s11104_s28, %s11220_s14  ;;  %p321_p0 = scmp.ne.s32.totalorder %s11100_s27, %s11096_s26 }
   0xc   : > { %p309_p1 = scmp.eq.s32.totalorder %s308_s16, 0  ;;  %p322_p2 = scmp.eq.s32.totalorder %s11216_s29, 1 }
   0xd   : > { %p327_p3 = scmp.ne.s32.totalorder %s11096_s26, %s11092_s25  ;;  %p328_p4 = scmp.eq.s32.totalorder %s10846_s30, 1 }
   0xe   : > { %s11231_s17 = scalar_select %p309_p1, %s11100_s27, %s311_s15  }
   0xf   : > { %p11233_p5 = por %p322_p2, %p321_p0  ;;  %p11237_p6 = por %p328_p4, %p327_p3 }
  0x10   : > { %17274 = sst [smem:[#allocation7_spill]] %s11231_s17  ;;  %p10849_p7 = scmp.ge.s32.totalorder %s11104_s28, 1 }
  0x11   : > { %p389_p8 = scmp.lt.s32.totalorder %s11104_s28, 3 }
  0x13   : > { %p390_p9 = pnand %p10849_p7, %p389_p8 }
  0x15   : > { %393 = sbr.rel (%p390_p9) target bundleno = 4254 (0x109e), region = 72 }
  0x1a   : > { %p432_p10 = scmp.lt.s32.totalorder %s11216_s29, 1  ;;  %s17277_s0 = sld [smem:[#allocation19_spill]]  ;;  %vm436_vm0 = vcmask 1047896   ;;  %vm17257_vm1 = vcmask 64512   ;;  %v17241_v2 = vlaneseq  ;;  %v11118_v3 = vmov 0.0  }
  0x1b   : > { %s17229_s30 = smov 126   ;;  %s17236_s15 = smov 127   ;;  %437 = vst.msk [vmem:[#allocation2 + $0x68] sm:$0xff] %vm436_vm0, %v11118_v3  ;;  %vm17220_vm3 = vcmask 1046528   ;;  %vm563_vm4 = vcmask 1022976   ;;  %vm543_vm6 = vcmask 1031168  }
  0x1c   : > { %s433_s20 = scalar_select %p432_p10, %s11216_s29, 1  ;;  %439 = vst.msk [vmem:[#allocation2 + $0x70] sm:$0xff] %vm17257_vm1, %v11118_v3  ;;  %vm508_vm2 = vcmp.lt.s32.totalorder %v17241_v2, 776  ;;  %vm571_vm5 = vcmp.lt.s32.totalorder %v17241_v2, 773  ;;  %vm17258_vm7 = vcmask 1039360   ;;  %vm551_vm8 = vcmp.lt.s32.totalorder %v17241_v2, 774 }
  0x1d   : > { %s17193_s16 = smov 125   ;;  %s17197_s22 = smov 96   ;;  %440 = vst.msk [vmem:[#allocation2 + $0xe0] sm:$0xff] %vm436_vm0, %v11118_v3  ;;  %vm17260_vm9 = vcmask 801792   ;;  %vm531_vm10 = vcmp.lt.s32.totalorder %v17241_v2, 775  ;;  %vm591_vm11 = vcmp.lt.s32.totalorder %v17241_v2, 746 }
  0x1e   : > { %s10902_s21 = smul.u32 15, %s433_s20  ;;  %s17195_s20 = smov 98   ;;  %441 = vst.msk [vmem:[#allocation2 + $0xe8] sm:$0xff] %vm17257_vm1, %v11118_v3  ;;  %vm17235_vm12 = vcmask 785408   ;;  %vm631_vm13 = vcmp.lt.s32.totalorder %v17241_v2, 744  ;;  %vm17259_vm14 = vcmask 793600  }
  0x1f   : > { %s17221_s23 = smov 95   ;;  %442 = vst.msk [vmem:[#allocation2 + $0x158] sm:$0xff] %vm436_vm0, %v11118_v3  ;;  %vm11444_vm15 = vcmp.lt.s32.totalorder %v17241_v2, 745  ;;  %s17286_s2 = sld [smem:[#allocation21_spill]] }
  0x20   : > { %s435_s24 = scalar_lea.vmem %s17277_s0, %s10902_s21  ;;  %s17199_s21 = smov 97   ;;  %443 = vst.msk [vmem:[#allocation2 + $0x160] sm:$0xff] %vm17257_vm1, %v11118_v3 }
  0x21   : > { %v502_v0 = vld [vmem:[%s435_s24] sm:$0xff]  ;;  %v503_v1 = vld [vmem:[%s435_s24 + $0x8] sm:$0x7f]  ;;  %s17223_s24 = smov 68   ;;  %444 = vst.msk [vmem:[#allocation2 + $0x1d0] sm:$0xff] %vm436_vm0, %v11118_v3  ;;  %s17287_s1 = sld [smem:[#allocation20_spill]] }
  0x22   : > { %536 = vrot.lane.b32.xlu1 %v502_v0, %s17229_s30  ;;  %504 = vst [vmem:[#allocation2] ss:$8 sm:$0xf] %v502_v0  ;;  %515 = vrot.lane.b32.xlu0 %v502_v0, %s17236_s15  ;;  %s17288_s7 = sld [smem:[#allocation23_spill]]  ;;  %s17313_s0 = smov 37  }
  0x23   : > { %505 = vst [vmem:[#allocation2] ss:$8 sm:$0xf0] %v502_v0  ;;  %556 = vrot.lane.b32.xlu2 %v502_v0, %s17193_s16  ;;  %s17340_s3 = sld [smem:[#allocation22_spill]] }
  0x24   : > { %511 = vst.msk [vmem:[#allocation2 + $0x40] ss:$8 sm:$0xf] %vm508_vm2, %v503_v1 }
  0x25   : > { %512 = vst.msk [vmem:[#allocation2 + $0x40] ss:$8 sm:$0x70] %vm508_vm2, %v503_v1  ;;  %vm651_vm2 = vcmp.lt.s32.totalorder %v17241_v2, 743 }
  0x26   : > { %445 = vst.msk [vmem:[#allocation2 + $0x1d8] sm:$0xff] %vm17257_vm1, %v11118_v3 }
  0x27   : > { %446 = vst.msk [vmem:[#allocation2 + $0x248] sm:$0xff] %vm436_vm0, %v11118_v3 }
  0x28   : > { %447 = vst.msk [vmem:[#allocation2 + $0x250] sm:$0xff] %vm17257_vm1, %v11118_v3 }
  0x29   : > { %448 = vst.msk [vmem:[#allocation2 + $0x2c0] sm:$0xff] %vm436_vm0, %v11118_v3 }
  0x2a   : > { %538 = vrot.lane.b32.xlu1 %v503_v1, %s17229_s30  ;;  %517 = vrot.lane.b32.xlu0 %v503_v1, %s17236_s15  ;;  %449 = vst.msk [vmem:[#allocation2 + $0x2c8] sm:$0xff] %vm17257_vm1, %v11118_v3 }
  0x2b   : > { %558 = vrot.lane.b32.xlu2 %v503_v1, %s17193_s16  ;;  %s17218_s16 = smov 67   ;;  %450 = vst.msk [vmem:[#allocation2 + $0x338] sm:$0xff] %vm436_vm0, %v11118_v3 }
  0x2c   : > { %451 = vst.msk [vmem:[#allocation2 + $0x340] sm:$0xff] %vm17257_vm1, %v11118_v3 }
  0x2d   : > { %452 = vst.msk [vmem:[#allocation2 + $0x3b0] sm:$0xff] %vm436_vm0, %v11118_v3 }
  0x2e   : > { %453 = vst.msk [vmem:[#allocation2 + $0x3b8] sm:$0xff] %vm17257_vm1, %v11118_v3 }
  0x2f   : > { %454 = vst.msk [vmem:[#allocation2 + $0x428] sm:$0xff] %vm436_vm0, %v11118_v3 }
  0x30   : > { %455 = vst.msk [vmem:[#allocation2 + $0x430] sm:$0xff] %vm17257_vm1, %v11118_v3 }
  0x31   : > { %456 = vst.msk [vmem:[#allocation2 + $0x4a0] sm:$0xff] %vm436_vm0, %v11118_v3 }
  0x32   : > { %578 = vrot.lane.b32.xlu1 %v503_v1, %s17195_s20  ;;  %576 = vrot.lane.b32.xlu0 %v502_v0, %s17195_s20  ;;  %s17201_s20 = smov 66   ;;  %457 = vst.msk [vmem:[#allocation2 + $0x4a8] sm:$0xff] %vm17257_vm1, %v11118_v3 }
  0x33   : > { %596 = vrot.lane.b32.xlu2 %v502_v0, %s17199_s21  ;;  %458 = vst.msk [vmem:[#allocation2 + $0x518] sm:$0xff] %vm436_vm0, %v11118_v3 }
  0x34   : > { %459 = vst.msk [vmem:[#allocation2 + $0x520] sm:$0xff] %vm17257_vm1, %v11118_v3 }
  0x35   : > { %460 = vst.msk [vmem:[#allocation2 + $0x590] sm:$0xff] %vm436_vm0, %v11118_v3 }
  0x36   : > { %461 = vst.msk [vmem:[#allocation2 + $0x598] sm:$0xff] %vm17257_vm1, %v11118_v3 }
  0x37   : > { %462 = vst.msk [vmem:[#allocation2 + $0x608] sm:$0xff] %vm436_vm0, %v11118_v3 }
  0x38   : > { %463 = vst.msk [vmem:[#allocation2 + $0x610] sm:$0xff] %vm17257_vm1, %v11118_v3 }
  0x39   : > { %464 = vst.msk [vmem:[#allocation2 + $0x680] sm:$0xff] %vm436_vm0, %v11118_v3 }
  0x3a   : > { %616 = vrot.lane.b32.xlu1 %v502_v0, %s17197_s22  ;;  %598 = vrot.lane.b32.xlu0 %v503_v1, %s17199_s21  ;;  %s17203_s21 = smov 38   ;;  %465 = vst.msk [vmem:[#allocation2 + $0x688] sm:$0xff] %vm17257_vm1, %v11118_v3 }
  0x3b   : > { %618 = vrot.lane.b32.xlu2 %v503_v1, %s17197_s22  ;;  %s17214_s22 = smov 65   ;;  %466 = vst.msk [vmem:[#allocation2 + $0x6f8] sm:$0xff] %vm436_vm0, %v11118_v3 }
  0x3c   : > { %467 = vst.msk [vmem:[#allocation2 + $0x700] sm:$0xff] %vm17257_vm1, %v11118_v3 }
  0x3d   : > { %468 = vst.msk [vmem:[#allocation2 + $0x770] sm:$0xff] %vm436_vm0, %v11118_v3 }
  0x3e   : > { %469 = vst.msk [vmem:[#allocation2 + $0x778] sm:$0xff] %vm17257_vm1, %v11118_v3 }
  0x3f   : > { %470 = vst.msk [vmem:[#allocation2 + $0x7e8] sm:$0xff] %vm436_vm0, %v11118_v3 }
  0x40   : > { %471 = vst.msk [vmem:[#allocation2 + $0x7f0] sm:$0xff] %vm17257_vm1, %v11118_v3 }
  0x41   : > { %472 = vst.msk [vmem:[#allocation2 + $0x860] sm:$0xff] %vm436_vm0, %v11118_v3 }
  0x42   : > { %638 = vrot.lane.b32.xlu1 %v503_v1, %s17221_s23  ;;  %636 = vrot.lane.b32.xlu0 %v502_v0, %s17221_s23  ;;  %473 = vst.msk [vmem:[#allocation2 + $0x868] sm:$0xff] %vm17257_vm1, %v11118_v3 }
  0x43   : > { %656 = vrot.lane.b32.xlu2 %v502_v0, %s17223_s24  ;;  %474 = vst.msk [vmem:[#allocation2 + $0x8d8] sm:$0xff] %vm436_vm0, %v11118_v3 }
  0x44   : > { %475 = vst.msk [vmem:[#allocation2 + $0x8e0] sm:$0xff] %vm17257_vm1, %v11118_v3 }
  0x45   : > { %476 = vst.msk [vmem:[#allocation2 + $0x950] sm:$0xff] %vm436_vm0, %v11118_v3 }
  0x46   : > { %477 = vst.msk [vmem:[#allocation2 + $0x958] sm:$0xff] %vm17257_vm1, %v11118_v3 }
  0x47   : > { %478 = vst.msk [vmem:[#allocation2 + $0x9c8] sm:$0xff] %vm436_vm0, %v11118_v3 }
  0x48   : > { %479 = vst.msk [vmem:[#allocation2 + $0x9d0] sm:$0xff] %vm17257_vm1, %v11118_v3 }
  0x49   : > { %480 = vst.msk [vmem:[#allocation2 + $0xa40] sm:$0xff] %vm436_vm0, %v11118_v3 }
  0x4a   : > { %676 = vrot.lane.b32.xlu1 %v502_v0, %s17218_s16  ;;  %658 = vrot.lane.b32.xlu0 %v503_v1, %s17223_s24  ;;  %481 = vst.msk [vmem:[#allocation2 + $0xa48] sm:$0xff] %vm17257_vm1, %v11118_v3 }
  0x4b   : > { %678 = vrot.lane.b32.xlu2 %v503_v1, %s17218_s16  ;;  %482 = vst.msk [vmem:[#allocation2 + $0xab8] sm:$0xff] %vm436_vm0, %v11118_v3  ;;  %s17292_s16 = smov 96  }
  0x4c   : > { %483 = vst.msk [vmem:[#allocation2 + $0xac0] sm:$0xff] %vm17257_vm1, %v11118_v3 }
  0x4d   : > { %484 = vst.msk [vmem:[#allocation2 + $0xb30] sm:$0xff] %vm436_vm0, %v11118_v3 }
  0x4e   : > { %485 = vst.msk [vmem:[#allocation2 + $0xb38] sm:$0xff] %vm17257_vm1, %v11118_v3 }
  0x4f   : > { %486 = vst.msk [vmem:[#allocation2 + $0xba8] sm:$0xff] %vm436_vm0, %v11118_v3 }
  0x50   : > { %487 = vst.msk [vmem:[#allocation2 + $0xbb0] sm:$0xff] %vm17257_vm1, %v11118_v3 }
  0x51   : > { %488 = vst.msk [vmem:[#allocation2 + $0xc20] sm:$0xff] %vm436_vm0, %v11118_v3 }
  0x52   : > { %698 = vrot.lane.b32.xlu1 %v503_v1, %s17201_s20  ;;  %696 = vrot.lane.b32.xlu0 %v502_v0, %s17201_s20  ;;  %s17205_s20 = smov 37   ;;  %489 = vst.msk [vmem:[#allocation2 + $0xc28] sm:$0xff] %vm17257_vm1, %v11118_v3 }
  0x53   : > { %716 = vrot.lane.b32.xlu2 %v502_v0, %s17214_s22  ;;  %490 = vst.msk [vmem:[#allocation2 + $0xc98] sm:$0xff] %vm436_vm0, %v11118_v3 }
  0x54   : > { %491 = vst.msk [vmem:[#allocation2 + $0xca0] sm:$0xff] %vm17257_vm1, %v11118_v3 }
  0x55   : > { %492 = vst.msk [vmem:[#allocation2 + $0xd10] sm:$0xff] %vm436_vm0, %v11118_v3 }
  0x56   : > { %493 = vst.msk [vmem:[#allocation2 + $0xd18] sm:$0xff] %vm17257_vm1, %v11118_v3 }
  0x57   : > { %494 = vst.msk [vmem:[#allocation2 + $0xd88] sm:$0xff] %vm436_vm0, %v11118_v3 }
  0x58   : > { %495 = vst.msk [vmem:[#allocation2 + $0xd90] sm:$0xff] %vm17257_vm1, %v11118_v3 }
  0x59   : > { %496 = vst.msk [vmem:[#allocation2 + $0xe00] sm:$0xff] %vm436_vm0, %v11118_v3 }
  0x5a   : > { %736 = vrot.lane.b32.xlu1 %v502_v0, %s17203_s21  ;;  %718 = vrot.lane.b32.xlu0 %v503_v1, %s17214_s22  ;;  %497 = vst.msk [vmem:[#allocation2 + $0xe08] sm:$0xff] %vm17257_vm1, %v11118_v3  ;;  %s17216_s22 = smov 31  }
  0x5b   : > { %738 = vrot.lane.b32.xlu2 %v503_v1, %s17203_s21  ;;  %s17212_s21 = smov 36   ;;  %498 = vst.msk [vmem:[#allocation2 + $0xe78] sm:$0xff] %vm436_vm0, %v11118_v3 }
  0x5c   : > { %499 = vst.msk [vmem:[#allocation2 + $0xe80] sm:$0xff] %vm17257_vm1, %v11118_v3 }
  0x5d   : > { %500 = vst.msk [vmem:[#allocation2 + $0xef0] sm:$0xff] %vm436_vm0, %v11118_v3  ;;  %vm17233_vm0 = vcmask 777216  }
  0x5e   : > { %501 = vst.msk [vmem:[#allocation2 + $0xef8] sm:$0xff] %vm17257_vm1, %v11118_v3 }
  0x62   : > { %758 = vrot.lane.b32.xlu1 %v503_v1, %s17205_s20  ;;  %756 = vrot.lane.b32.xlu0 %v502_v0, %s17205_s20  ;;  %s17210_s20 = smov 35  }
  0x63   : > { %776 = vrot.lane.b32.xlu2 %v502_v0, %s17212_s21 }
  0x6a   : > { %796 = vrot.lane.b32.xlu1 %v502_v0, %s17210_s20  ;;  %778 = vrot.lane.b32.xlu0 %v503_v1, %s17212_s21  ;;  %s17290_s21 = smov 98  }
  0x6b   : > { %798 = vrot.lane.b32.xlu2 %v503_v1, %s17210_s20  ;;  %s17289_s20 = smov 125  }
  0x7d   : > { %v557_v4 = vpop.permute.xlu2 %556 }
  0x7e   : > { %v560_v5 = vrot.slane %v557_v4, 1 }
  0x85   : > { %v559_v6 = vpop.permute.xlu2 %558 }
  0x86   : > { %v561_v7 = vrot.slane %v559_v6, 1 }
  0x88   : > { %v562_v8 = vsel %vm17220_vm3, %v560_v5, %v561_v7  ;;  %v565_v9 = vsel %vm563_vm4, %v559_v6, %v561_v7 }
  0x89   : > { %v564_v10 = vsel %vm563_vm4, %v557_v4, %v562_v8  ;;  %574 = vst.msk [vmem:[#allocation2 + $0x43] ss:$8 sm:$0xf] %vm571_vm5, %v565_v9 }
  0x8a   : > { %569 = vst [vmem:[#allocation2 + $0x3] ss:$8 sm:$0xf] %v564_v10 }
  0x8b   : > { %570 = vst [vmem:[#allocation2 + $0x3] ss:$8 sm:$0xf0] %v564_v10 }
  0x8c   : > { %575 = vst.msk [vmem:[#allocation2 + $0x43] ss:$8 sm:$0x70] %vm571_vm5, %v565_v9  ;;  %vm17207_vm5 = vcmask 547840  }
  0x8d   : > { %v11365_v11 = vpop.permute.xlu2 %596 }
  0x8e   : > { %v600_v39 = vrot.slane %v11365_v11, 1 }
  0x94   : > { %v537_v12 = vpop.permute.xlu1 %536  ;;  %v516_v13 = vpop.permute.xlu0 %515 }
  0x95   : > { %v11383_v14 = vpop.permute.xlu2 %618  ;;  %v540_v17 = vrot.slane %v537_v12, 1  ;;  %v519_v22 = vrot.slane %v516_v13, 1 }
  0x96   : > { %v621_v35 = vrot.slane %v11383_v14, 1 }
  0x98   : > { %v625_v43 = vsel %vm17235_vm12, %v11383_v14, %v621_v35 }
  0x99   : > { %634 = vst.msk [vmem:[#allocation2 + $0x46] ss:$8 sm:$0xf] %vm631_vm13, %v625_v43 }
  0x9a   : > { %635 = vst.msk [vmem:[#allocation2 + $0x46] ss:$8 sm:$0x30] %vm631_vm13, %v625_v43  ;;  %vm11466_vm13 = vcmp.lt.s32.totalorder %v17241_v2, 686 }
  0x9c   : > { %v539_v15 = vpop.permute.xlu1 %538  ;;  %v518_v16 = vpop.permute.xlu0 %517 }
  0x9d   : > { %v541_v18 = vrot.slane %v539_v15, 1  ;;  %v11401_v19 = vpop.permute.xlu2 %656  ;;  %v520_v21 = vrot.slane %v518_v16, 1 }
  0x9e   : > { %v660_v61 = vrot.slane %v11401_v19, 1 }
  0x9f   : > { %v542_v20 = vsel %vm17220_vm3, %v540_v17, %v541_v18  ;;  %v522_v24 = vsel %vm17220_vm3, %v519_v22, %v520_v21  ;;  %v545_v25 = vsel %vm543_vm6, %v539_v15, %v541_v18  ;;  %v525_v32 = vsel %vm17258_vm7, %v518_v16, %v520_v21 }
  0xa0   : > { %v544_v23 = vsel %vm543_vm6, %v537_v12, %v542_v20  ;;  %v524_v31 = vsel %vm17258_vm7, %v516_v13, %v522_v24  ;;  %554 = vst.msk [vmem:[#allocation2 + $0x42] ss:$8 sm:$0xf] %vm551_vm8, %v545_v25 }
  0xa1   : > { %549 = vst [vmem:[#allocation2 + $0x2] ss:$8 sm:$0xf] %v544_v23 }
  0xa2   : > { %550 = vst [vmem:[#allocation2 + $0x2] ss:$8 sm:$0xf0] %v544_v23 }
  0xa3   : > { %555 = vst.msk [vmem:[#allocation2 + $0x42] ss:$8 sm:$0x70] %vm551_vm8, %v545_v25  ;;  %vm17209_vm8 = vcmask 310272  }
  0xa4   : > { %v579_v26 = vpop.permute.xlu1 %578  ;;  %v577_v27 = vpop.permute.xlu0 %576  ;;  %529 = vst [vmem:[#allocation2 + $0x1] ss:$8 sm:$0xf] %v524_v31 }
  0xa5   : > { %v581_v28 = vrot.slane %v579_v26, 1  ;;  %v580_v29 = vrot.slane %v577_v27, 1  ;;  %v11422_v30 = vpop.permute.xlu2 %678  ;;  %530 = vst [vmem:[#allocation2 + $0x1] ss:$8 sm:$0xf0] %v524_v31 }
  0xa6   : > { %534 = vst.msk [vmem:[#allocation2 + $0x41] ss:$8 sm:$0xf] %vm531_vm10, %v525_v32  ;;  %v681_v55 = vrot.slane %v11422_v30, 1 }
  0xa7   : > { %v582_v33 = vsel %vm17220_vm3, %v580_v29, %v581_v28  ;;  %v585_v34 = vsel %vm17260_vm9, %v579_v26, %v581_v28  ;;  %535 = vst.msk [vmem:[#allocation2 + $0x41] ss:$8 sm:$0x70] %vm531_vm10, %v525_v32  ;;  %vm691_vm10 = vcmp.lt.s32.totalorder %v17241_v2, 715 }
  0xa8   : > { %v584_v36 = vsel %vm17260_vm9, %v577_v27, %v582_v33  ;;  %594 = vst.msk [vmem:[#allocation2 + $0x44] ss:$8 sm:$0xf] %vm591_vm11, %v585_v34  ;;  %v685_v60 = vsel %vm17207_vm5, %v11422_v30, %v681_v55 }
  0xa9   : > { %595 = vst.msk [vmem:[#allocation2 + $0x44] ss:$8 sm:$0x30] %vm591_vm11, %v585_v34  ;;  %vm17208_vm11 = vcmask 556032  }
  0xaa   : > { %589 = vst [vmem:[#allocation2 + $0x4] ss:$8 sm:$0xf] %v584_v36 }
  0xab   : > { %590 = vst [vmem:[#allocation2 + $0x4] ss:$8 sm:$0xf0] %v584_v36 }
  0xac   : > { %v617_v37 = vpop.permute.xlu1 %616  ;;  %v599_v38 = vpop.permute.xlu0 %598  ;;  %694 = vst.msk [vmem:[#allocation2 + $0xb9] ss:$8 sm:$0xf] %vm691_vm10, %v685_v60 }
  0xad   : > { %v620_v40 = vrot.slane %v617_v37, 1  ;;  %v601_v41 = vrot.slane %v599_v38, 1  ;;  %v11433_v42 = vpop.permute.xlu2 %716  ;;  %695 = vst.msk [vmem:[#allocation2 + $0xb9] ss:$8 sm:$0x30] %vm691_vm10, %v685_v60  ;;  %vm711_vm10 = vcmp.lt.s32.totalorder %v17241_v2, 714 }
  0xae   : > { %v720_v22 = vrot.slane %v11433_v42, 1 }
  0xaf   : > { %v622_v44 = vsel %vm17220_vm3, %v620_v40, %v621_v35  ;;  %v602_v45 = vsel %vm17220_vm3, %v600_v39, %v601_v41  ;;  %v605_v49 = vsel %vm17259_vm14, %v599_v38, %v601_v41 }
  0xb0   : > { %v624_v46 = vsel %vm17235_vm12, %v617_v37, %v622_v44  ;;  %v604_v47 = vsel %vm17259_vm14, %v11365_v11, %v602_v45  ;;  %614 = vst.msk [vmem:[#allocation2 + $0x45] ss:$8 sm:$0xf] %vm11444_vm15, %v605_v49 }
  0xb1   : > { %629 = vst [vmem:[#allocation2 + $0x6] ss:$8 sm:$0xf] %v624_v46 }
  0xb2   : > { %630 = vst [vmem:[#allocation2 + $0x6] ss:$8 sm:$0xf0] %v624_v46  ;;  %v845_v46 = vld [vmem:[%s17286_s2] sm:$0xff]  ;;  %s17317_s2 = smov 35  }
  0xb3   : > { %609 = vst [vmem:[#allocation2 + $0x5] ss:$8 sm:$0xf] %v604_v47 }
  0xb4   : > { %v639_v50 = vpop.permute.xlu1 %638  ;;  %v637_v51 = vpop.permute.xlu0 %636  ;;  %610 = vst [vmem:[#allocation2 + $0x5] ss:$8 sm:$0xf0] %v604_v47 }
  0xb5   : > { %v641_v52 = vrot.slane %v639_v50, 1  ;;  %v640_v53 = vrot.slane %v637_v51, 1  ;;  %v11449_v54 = vpop.permute.xlu2 %738  ;;  %615 = vst.msk [vmem:[#allocation2 + $0x45] ss:$8 sm:$0x30] %vm11444_vm15, %v605_v49  ;;  %vm11473_vm15 = vcmp.lt.s32.totalorder %v17241_v2, 716 }
  0xb6   : > { %v741_v59 = vrot.slane %v11449_v54, 1 }
  0xb7   : > { %v645_v56 = vsel %vm17233_vm0, %v639_v50, %v641_v52  ;;  %v642_v57 = vsel %vm17220_vm3, %v640_v53, %v641_v52 }
  0xb8   : > { %v644_v58 = vsel %vm17233_vm0, %v637_v51, %v642_v57  ;;  %654 = vst.msk [vmem:[#allocation2 + $0x47] ss:$8 sm:$0xf] %vm651_vm2, %v645_v56  ;;  %v745_v1 = vsel %vm17209_vm8, %v11449_v54, %v741_v59 }
  0xb9   : > { %655 = vst.msk [vmem:[#allocation2 + $0x47] ss:$8 sm:$0x30] %vm651_vm2, %v645_v56  ;;  %vm703_vm2 = vcmask 539648  }
  0xba   : > { %649 = vst [vmem:[#allocation2 + $0x7] ss:$8 sm:$0xf] %v644_v58 }
  0xbb   : > { %650 = vst [vmem:[#allocation2 + $0x7] ss:$8 sm:$0xf0] %v644_v58  ;;  %v816_v58 = vld [vmem:[%s17287_s1] sm:$0xff]  ;;  %s17314_s1 = smov 36  }
  0xbc   : > { %v677_v62 = vpop.permute.xlu1 %676  ;;  %v659_v63 = vpop.permute.xlu0 %658  ;;  %754 = vst.msk [vmem:[#allocation2 + $0xbc] ss:$8 sm:$0xf] %vm11466_vm13, %v745_v1 }
  0xbd   : > { %v680_v3 = vrot.slane %v677_v62, 1  ;;  %v661_v5 = vrot.slane %v659_v63, 1  ;;  %v11477_v6 = vpop.permute.xlu2 %776  ;;  %755 = vst.msk [vmem:[#allocation2 + $0xbc] ss:$8 sm:$0x30] %vm11466_vm13, %v745_v1  ;;  %vm723_vm13 = vcmask 531456  }
  0xbe   : > { %v780_v43 = vrot.slane %v11477_v6, 1 }
  0xbf   : > { %v682_v7 = vsel %vm17220_vm3, %v680_v3, %v681_v55  ;;  %v662_v8 = vsel %vm17220_vm3, %v660_v61, %v661_v5  ;;  %v665_v9 = vsel %vm17208_vm11, %v659_v63, %v661_v5 }
  0xc0   : > { %v684_v10 = vsel %vm17207_vm5, %v677_v62, %v682_v7  ;;  %v664_v11 = vsel %vm17208_vm11, %v11401_v19, %v662_v8  ;;  %674 = vst.msk [vmem:[#allocation2 + $0xb8] ss:$8 sm:$0xf] %vm11473_vm15, %v665_v9  ;;  %vm803_vm5 = vcmask 285696   ;;  %vm11501_vm11 = vcmp.lt.s32.totalorder %v17241_v2, 713 }
  0xc1   : > { %689 = vst [vmem:[#allocation2 + $0x79] ss:$8 sm:$0xf] %v684_v10  ;;  %v817_v56 = vld [vmem:[#allocation2] sm:$0xff]  ;;  %v818_v57 = vld [vmem:[#allocation2 + $0x8] sm:$0xff]  ;;  %v820_v60 = vld [vmem:[#allocation2 + $0x18] sm:$0xff] }
  0xc2   : > { %690 = vst [vmem:[#allocation2 + $0x79] ss:$8 sm:$0xf0] %v684_v10  ;;  %v821_v1 = vld [vmem:[#allocation2 + $0x20] sm:$0xff]  ;;  %v822_v3 = vld [vmem:[#allocation2 + $0x28] sm:$0xff]  ;;  %v823_v4 = vld [vmem:[#allocation2 + $0x30] sm:$0xff] }
  0xc3   : > { %669 = vst [vmem:[#allocation2 + $0x78] ss:$8 sm:$0xf] %v664_v11  ;;  %v824_v5 = vld [vmem:[#allocation2 + $0x38] sm:$0xff]  ;;  %v825_v10 = vld [vmem:[#allocation2 + $0x40] sm:$0xff] }
  0xc4   : > { %670 = vst [vmem:[#allocation2 + $0x78] ss:$8 sm:$0xf0] %v664_v11  ;;  %v699_v12 = vpop.permute.xlu1 %698  ;;  %v697_v13 = vpop.permute.xlu0 %696  ;;  %v826_v11 = vld [vmem:[#allocation2 + $0x48] sm:$0xff] }
  0xc5   : > { %675 = vst.msk [vmem:[#allocation2 + $0xb8] ss:$8 sm:$0x30] %vm11473_vm15, %v665_v9  ;;  %v701_v14 = vrot.slane %v699_v12, 1  ;;  %v700_v15 = vrot.slane %v697_v13, 1  ;;  %v799_v16 = vpop.permute.xlu2 %798  ;;  %vm811_vm15 = vcmp.lt.s32.totalorder %v17241_v2, 683 }
  0xc6   : > { %v801_v17 = vrot.slane %v799_v16, 1 }
  0xc7   : > { %v705_v18 = vsel %vm703_vm2, %v699_v12, %v701_v14  ;;  %v702_v19 = vsel %vm17220_vm3, %v700_v15, %v701_v14  ;;  %v827_v12 = vld [vmem:[#allocation2 + $0x50] sm:$0xff] }
  0xc8   : > { %714 = vst.msk [vmem:[#allocation2 + $0xba] ss:$8 sm:$0xf] %vm711_vm10, %v705_v18  ;;  %v704_v20 = vsel %vm703_vm2, %v697_v13, %v702_v19  ;;  %v805_v21 = vsel %vm803_vm5, %v799_v16, %v801_v17  ;;  %v828_v13 = vld [vmem:[#allocation2 + $0x58] sm:$0xff]  ;;  %v829_v16 = vld [vmem:[#allocation2 + $0x60] sm:$0xff] }
  0xc9   : > { %715 = vst.msk [vmem:[#allocation2 + $0xba] ss:$8 sm:$0x30] %vm711_vm10, %v705_v18  ;;  %vm763_vm10 = vcmask 302080   ;;  %v1149_v19 = vld [vmem:[%s17288_s7] sm:$0xff] }
  0xca   : > { %709 = vst [vmem:[#allocation2 + $0x7a] ss:$8 sm:$0xf] %v704_v20 }
  0xcb   : > { %710 = vst [vmem:[#allocation2 + $0x7a] ss:$8 sm:$0xf0] %v704_v20 }
  0xcc   : > { %v737_v23 = vpop.permute.xlu1 %736  ;;  %v719_v24 = vpop.permute.xlu0 %718  ;;  %814 = vst.msk [vmem:[#allocation2 + $0xbf] ss:$8 sm:$0xf] %vm811_vm15, %v805_v21 }
  0xcd   : > { %v740_v25 = vrot.slane %v737_v23, 1  ;;  %v721_v27 = vrot.slane %v719_v24, 1  ;;  %815 = vst.msk [vmem:[#allocation2 + $0xbf] ss:$8 sm:$0x30] %vm811_vm15, %v805_v21  ;;  %vm771_vm15 = vcmp.lt.s32.totalorder %v17241_v2, 685 }
  0xcf   : > { %v742_v28 = vsel %vm17220_vm3, %v740_v25, %v741_v59  ;;  %v722_v29 = vsel %vm17220_vm3, %v720_v22, %v721_v27  ;;  %v725_v30 = vsel %vm723_vm13, %v719_v24, %v721_v27  ;;  %v819_v59 = vld [vmem:[#allocation2 + $0x10] sm:$0xff]  ;;  %v1154_v24 = vperm.slane %v1149_v19, 1 }
  0xd0   : > { %v744_v31 = vsel %vm17209_vm8, %v737_v23, %v742_v28  ;;  %v724_v32 = vsel %vm723_vm13, %v11433_v42, %v722_v29  ;;  %734 = vst.msk [vmem:[#allocation2 + $0xbb] ss:$8 sm:$0xf] %vm11501_vm11, %v725_v30  ;;  %vm783_vm8 = vcmask 293888   ;;  %v11122_v42 = vmov 0  }
  0xd1   : > { %749 = vst [vmem:[#allocation2 + $0x7c] ss:$8 sm:$0xf] %v744_v31  ;;  %10961 = vset.pattern.permute.xlu0 %v11122_v42  ;;  %10962 = vset.pattern.permute.xlu1 %v11122_v42  ;;  %v1153_v25 = vperm.slane %v1149_v19, 0 }
  0xd2   : > { %750 = vst [vmem:[#allocation2 + $0x7c] ss:$8 sm:$0xf0] %v744_v31  ;;  %10963 = vset.pattern.permute.xlu2 %v11122_v42  ;;  %848 = vperm.xlu0 %10961, %v845_v46  }
  0xd3   : > { %729 = vst [vmem:[#allocation2 + $0x7b] ss:$8 sm:$0xf] %v724_v32 }
  0xd4   : > { %730 = vst [vmem:[#allocation2 + $0x7b] ss:$8 sm:$0xf0] %v724_v32  ;;  %v759_v33 = vpop.permute.xlu1 %758  ;;  %v757_v34 = vpop.permute.xlu0 %756 }
  0xd5   : > { %735 = vst.msk [vmem:[#allocation2 + $0xbb] ss:$8 sm:$0x30] %vm11501_vm11, %v725_v30  ;;  %v761_v35 = vrot.slane %v759_v33, 1  ;;  %v760_v36 = vrot.slane %v757_v34, 1  ;;  %vm791_vm11 = vcmp.lt.s32.totalorder %v17241_v2, 684 }
  0xd7   : > { %v765_v37 = vsel %vm763_vm10, %v759_v33, %v761_v35  ;;  %v762_v38 = vsel %vm17220_vm3, %v760_v36, %v761_v35  ;;  %v1155_v35 = vperm.slane %v1149_v19, 2 }
  0xd8   : > { %774 = vst.msk [vmem:[#allocation2 + $0xbd] ss:$8 sm:$0xf] %vm771_vm15, %v765_v37  ;;  %v764_v39 = vsel %vm763_vm10, %v757_v34, %v762_v38  ;;  %v1156_v34 = vperm.slane %v1149_v19, 3 }
  0xd9   : > { %775 = vst.msk [vmem:[#allocation2 + $0xbd] ss:$8 sm:$0x30] %vm771_vm15, %v765_v37  ;;  %vm851_vm15 = vcmask 130048  }
  0xda   : > { %769 = vst [vmem:[#allocation2 + $0x7d] ss:$8 sm:$0xf] %v764_v39 }
  0xdb   : > { %770 = vst [vmem:[#allocation2 + $0x7d] ss:$8 sm:$0xf0] %v764_v39 }
  0xdc   : > { %v797_v40 = vpop.permute.xlu1 %796  ;;  %v779_v41 = vpop.permute.xlu0 %778 }
  0xdd   : > { %v800_v44 = vrot.slane %v797_v40, 1  ;;  %v781_v45 = vrot.slane %v779_v41, 1 }
  0xdf   : > { %v802_v47 = vsel %vm17220_vm3, %v800_v44, %v801_v17  ;;  %v782_v48 = vsel %vm17220_vm3, %v780_v43, %v781_v45  ;;  %v785_v49 = vsel %vm783_vm8, %v779_v41, %v781_v45  ;;  %v830_v17 = vld [vmem:[#allocation2 + $0x68] sm:$0xff]  ;;  %v1157_v41 = vperm.slane %v1149_v19, 4 }
  0xe0   : > { %v804_v50 = vsel %vm803_vm5, %v797_v40, %v802_v47  ;;  %v784_v51 = vsel %vm783_vm8, %v11477_v6, %v782_v48  ;;  %794 = vst.msk [vmem:[#allocation2 + $0xbe] ss:$8 sm:$0xf] %vm791_vm11, %v785_v49 }
  0xe1   : > { %809 = vst [vmem:[#allocation2 + $0x7f] ss:$8 sm:$0xf] %v804_v50 }
  0xe2   : > { %810 = vst [vmem:[#allocation2 + $0x7f] ss:$8 sm:$0xf0] %v804_v50  ;;  %v1158_v50 = vperm.slane %v1149_v19, 5 }
  0xe3   : > { %789 = vst [vmem:[#allocation2 + $0x7e] ss:$8 sm:$0xf] %v784_v51 }
  0xe4   : > { %790 = vst [vmem:[#allocation2 + $0x7e] ss:$8 sm:$0xf0] %v784_v51 }
  0xe5   : > { %795 = vst.msk [vmem:[#allocation2 + $0xbe] ss:$8 sm:$0x30] %vm791_vm11, %v785_v49  ;;  %vm1237_vm11 = vcmask 252928  }
  0xe7   : > { %v839_v6 = vld [vmem:[#allocation2 + $0xb8] sm:$0xff]  ;;  %v840_v7 = vld [vmem:[#allocation2 + $0xc0] sm:$0xff]  ;;  %v841_v8 = vld [vmem:[#allocation2 + $0xc8] sm:$0xff] }
  0xe8   : > { %v842_v9 = vld [vmem:[#allocation2 + $0xd0] sm:$0xff] }
  0xea   : > { %v831_v52 = vld [vmem:[#allocation2 + $0x78] sm:$0xff]  ;;  %v832_v53 = vld [vmem:[#allocation2 + $0x80] sm:$0xff]  ;;  %v833_v54 = vld [vmem:[#allocation2 + $0x88] sm:$0xff] }
  0xeb   : > { %869 = vmatpush.msra.mxu0 %v831_v52  ;;  %889 = vmatpush.msra.mxu1 %v832_v53  ;;  %v834_v55 = vld [vmem:[#allocation2 + $0x90] sm:$0xff]  ;;  %v835_v61 = vld [vmem:[#allocation2 + $0x98] sm:$0xff]  ;;  %v836_v62 = vld [vmem:[#allocation2 + $0xa0] sm:$0xff] }
  0xec   : > { %909 = vmatpush.msra.mxu2 %v833_v54  ;;  %929 = vmatpush.msra.mxu3 %v834_v55  ;;  %v837_v63 = vld [vmem:[#allocation2 + $0xa8] sm:$0xff]  ;;  %v838_v0 = vld [vmem:[#allocation2 + $0xb0] sm:$0xff]  ;;  %v843_v14 = vld [vmem:[#allocation2 + $0xd8] sm:$0xff]  ;;  %v1159_v55 = vperm.slane %v1149_v19, 6 }
  0xed   : > { %870 = vmatpush.msra.mxu0 %v817_v56  ;;  %890 = vmatpush.msra.mxu1 %v818_v57  ;;  %v844_v15 = vld [vmem:[#allocation2 + $0xe0] sm:$0xff]  ;;  %v1160_v56 = vperm.slane %v1149_v19, 7 }
  0xee   : > { %910 = vmatpush.msra.mxu2 %v819_v59  ;;  %930 = vmatpush.msra.mxu3 %v820_v60 }
  0xef   : > { %10851 = vmatmul.msk.f32.vlgmr.msra.gmra.mxu0 %vm851_vm15, %v816_v58  ;;  %10852 = vmatmul.msk.f32.vlgmr.msra.gmra.mxu1 %vm851_vm15, %v816_v58 }
  0xf0   : > { %10853 = vmatmul.msk.f32.vlgmr.msra.gmra.mxu2 %vm851_vm15, %v816_v58  ;;  %10854 = vmatmul.msk.f32.vlgmr.msra.gmra.mxu3 %vm851_vm15, %v816_v58 }
  0xf1   : > { %949 = vmatpush.msrb.mxu0 %v835_v61  ;;  %969 = vmatpush.msrb.mxu1 %v836_v62 }
  0xf2   : > { %989 = vmatpush.msrb.mxu2 %v837_v63  ;;  %1009 = vmatpush.msrb.mxu3 %v838_v0  ;;  %v1150_v63 = vld [vmem:[%s17288_s7 + $0x8] sm:$0x7f]  ;;  %s17355_s7 = smov 31  }
  0xf3   : > { %950 = vmatpush.msrb.mxu0 %v821_v1  ;;  %970 = vmatpush.msrb.mxu1 %v822_v3 }
  0xf4   : > { %990 = vmatpush.msrb.mxu2 %v823_v4  ;;  %1010 = vmatpush.msrb.mxu3 %v824_v5  ;;  %v1161_v4 = vperm.slane %v1150_v63, 0 }
  0xf5   : > { %1029 = vmatpush.msra.mxu0 %v839_v6  ;;  %1049 = vmatpush.msra.mxu1 %v840_v7 }
  0xf6   : > { %1069 = vmatpush.msra.mxu2 %v841_v8  ;;  %1089 = vmatpush.msra.mxu3 %v842_v9  ;;  %v1162_v8 = vperm.slane %v1150_v63, 1 }
  0xf7   : > { %1030 = vmatpush.msra.mxu0 %v825_v10  ;;  %1050 = vmatpush.msra.mxu1 %v826_v11  ;;  %v1163_v10 = vperm.slane %v1150_v63, 2 }
  0xf8   : > { %1070 = vmatpush.msra.mxu2 %v827_v12  ;;  %1090 = vmatpush.msra.mxu3 %v828_v13 }
  0xf9   : > { %10855 = vmatmul.msk.f32.vlgmr.msrb.gmra.mxu0 %vm851_vm15, %v816_v58  ;;  %10856 = vmatmul.msk.f32.vlgmr.msrb.gmra.mxu1 %vm851_vm15, %v816_v58 }
  0xfa   : > { %10857 = vmatmul.msk.f32.vlgmr.msrb.gmra.mxu2 %vm851_vm15, %v816_v58  ;;  %10858 = vmatmul.msk.f32.vlgmr.msrb.gmra.mxu3 %vm851_vm15, %v816_v58 }
  0xfb   : > { %1109 = vmatpush.msrb.mxu0 %v843_v14  ;;  %1129 = vmatpush.msrb.mxu1 %v844_v15 }
  0xfd   : > { %1110 = vmatpush.msrb.mxu0 %v829_v16  ;;  %1130 = vmatpush.msrb.mxu1 %v830_v17 }
 0x101   : > { %10859 = vmatmul.msk.f32.vlgmr.msra.gmra.mxu0 %vm851_vm15, %v816_v58  ;;  %10860 = vmatmul.msk.f32.vlgmr.msra.gmra.mxu1 %vm851_vm15, %v816_v58 }
 0x102   : > { %10861 = vmatmul.msk.f32.vlgmr.msra.gmra.mxu2 %vm851_vm15, %v816_v58  ;;  %10862 = vmatmul.msk.f32.vlgmr.msra.gmra.mxu3 %vm851_vm15, %v816_v58 }
 0x109   : > { %10863 = vmatmul.msk.f32.vlgmr.msrb.gmra.mxu0 %vm851_vm15, %v816_v58  ;;  %10864 = vmatmul.msk.f32.vlgmr.msrb.gmra.mxu1 %vm851_vm15, %v816_v58  ;;  %vm17293_vm15 = vcmask 556032  }
 0x10a   : > { %vm17294_vm3 = vmmov %vm17293_vm15 }
 0x144   : > { %v11547_v18 = vpop.permute.xlu0 %848 }
 0x16c   : > { %v872_v20 = vpop.f32.mrf.mxu0  ;;  %v892_v21 = vpop.f32.mrf.mxu1 }
 0x16d   : > { %v873_v22 = vadd.f32 %v872_v20, %v11547_v18  ;;  %v893_v23 = vadd.f32 %v892_v21, %v11547_v18  ;;  %v1164_v21 = vperm.slane %v1150_v63, 3 }
 0x16f   : > { %v1135_v26 = vmax.f32 %v873_v22, 0.0  ;;  %v1136_v27 = vmax.f32 %v893_v23, 0.0  ;;  %v1165_v23 = vperm.slane %v1150_v63, 4 }
 0x171   : > { %v1182_v28 = vmul.f32 %v1154_v24, %v1136_v27  ;;  %v1181_v29 = vmul.f32 %v1153_v25, %v1135_v26  ;;  %v1166_v25 = vperm.slane %v1150_v63, 5 }
 0x173   : > { %v912_v30 = vpop.f32.mrf.mxu2  ;;  %v932_v31 = vpop.f32.mrf.mxu3  ;;  %1211 = vrot.lane.b32.xlu2 %v1182_v28, %s17216_s22  ;;  %1209 = vrot.lane.b32.xlu1 %v1181_v29, %s17216_s22 }
 0x174   : > { %v913_v32 = vadd.f32 %v912_v30, %v11547_v18  ;;  %v933_v33 = vadd.f32 %v932_v31, %v11547_v18 }
 0x176   : > { %v1137_v36 = vmax.f32 %v913_v32, 0.0  ;;  %v1138_v37 = vmax.f32 %v933_v33, 0.0  ;;  %v952_v38 = vpop.f32.mrf.mxu0  ;;  %v972_v39 = vpop.f32.mrf.mxu1 }
 0x177   : > { %v953_v40 = vadd.f32 %v952_v38, %v11547_v18  ;;  %v973_v43 = vadd.f32 %v972_v39, %v11547_v18 }
 0x178   : > { %v1184_v44 = vmul.f32 %v1156_v34, %v1138_v37  ;;  %v1183_v45 = vmul.f32 %v1155_v35, %v1137_v36 }
 0x179   : > { %v1139_v42 = vmax.f32 %v953_v40, 0.0  ;;  %v1140_v47 = vmax.f32 %v973_v43, 0.0 }
 0x17b   : > { %1215 = vrot.lane.b32.xlu2 %v1184_v44, %s17216_s22  ;;  %v1185_v46 = vmul.f32 %v1157_v41, %v1139_v42  ;;  %1213 = vrot.lane.b32.xlu1 %v1183_v45, %s17216_s22  ;;  %v1186_v60 = vmul.f32 %v1158_v50, %v1140_v47 }
 0x17d   : > { %v992_v48 = vpop.f32.mrf.mxu2  ;;  %v1012_v49 = vpop.f32.mrf.mxu3  ;;  %1217 = vrot.lane.b32.xlu0 %v1185_v46, %s17216_s22 }
 0x17e   : > { %v993_v51 = vadd.f32 %v992_v48, %v11547_v18  ;;  %v1013_v52 = vadd.f32 %v1012_v49, %v11547_v18  ;;  %v1032_v53 = vpop.f32.mrf.mxu0  ;;  %v1052_v54 = vpop.f32.mrf.mxu1 }
 0x17f   : > { %v1033_v59 = vadd.f32 %v1032_v53, %v11547_v18  ;;  %v1053_v61 = vadd.f32 %v1052_v54, %v11547_v18 }
 0x180   : > { %v1141_v57 = vmax.f32 %v993_v51, 0.0  ;;  %v1142_v58 = vmax.f32 %v1013_v52, 0.0 }
 0x181   : > { %v1143_v1 = vmax.f32 %v1033_v59, 0.0  ;;  %v1144_v5 = vmax.f32 %v1053_v61, 0.0 }
 0x182   : > { %v1187_v62 = vmul.f32 %v1159_v55, %v1141_v57  ;;  %v1188_v0 = vmul.f32 %v1160_v56, %v1142_v58 }
 0x183   : > { %1219 = vrot.lane.b32.xlu1 %v1186_v60, %s17216_s22  ;;  %v1189_v14 = vmul.f32 %v1161_v4, %v1143_v1  ;;  %v1190_v16 = vmul.f32 %v1162_v8, %v1144_v5 }
 0x184   : > { %1221 = vrot.lane.b32.xlu2 %v1187_v62, %s17216_s22 }
 0x185   : > { %v1072_v3 = vpop.f32.mrf.mxu2  ;;  %1223 = vrot.lane.b32.xlu0 %v1188_v0, %s17216_s22  ;;  %v1092_v7 = vpop.f32.mrf.mxu3 }
 0x186   : > { %v1073_v6 = vadd.f32 %v1072_v3, %v11547_v18  ;;  %v1112_v9 = vpop.f32.mrf.mxu0  ;;  %v1132_v12 = vpop.f32.mrf.mxu1  ;;  %v1093_v13 = vadd.f32 %v1092_v7, %v11547_v18 }
 0x187   : > { %v1113_v15 = vadd.f32 %v1112_v9, %v11547_v18  ;;  %v1133_v17 = vadd.f32 %v1132_v12, %v11547_v18 }
 0x188   : > { %v1145_v11 = vmax.f32 %v1073_v6, 0.0  ;;  %v1146_v20 = vmax.f32 %v1093_v13, 0.0 }
 0x189   : > { %v1147_v22 = vmax.f32 %v1113_v15, 0.0  ;;  %v1148_v24 = vmax.f32 %v1133_v17, 0.0 }
 0x18a   : > { %v1191_v19 = vmul.f32 %v1163_v10, %v1145_v11  ;;  %v1192_v26 = vmul.f32 %v1164_v21, %v1146_v20 }
 0x18b   : > { %1225 = vrot.lane.b32.xlu1 %v1189_v14, %s17216_s22  ;;  %v1193_v27 = vmul.f32 %v1165_v23, %v1147_v22  ;;  %v1194_v28 = vmul.f32 %v1166_v25, %v1148_v24 }
 0x18c   : > { %1227 = vrot.lane.b32.xlu2 %v1190_v16, %s17216_s22 }
 0x18d   : > { %1229 = vrot.lane.b32.xlu0 %v1191_v19, %s17216_s22 }
 0x193   : > { %1231 = vrot.lane.b32.xlu1 %v1192_v26, %s17216_s22 }
 0x194   : > { %1233 = vrot.lane.b32.xlu2 %v1193_v27, %s17216_s22 }
 0x195   : > { %1235 = vrot.lane.b32.xlu0 %v1194_v28, %s17216_s22  ;;  %s17291_s22 = smov 97  }
 0x1cd   : > { %v1212_v18 = vpop.permute.xlu2 %1211 }
 0x1d5   : > { %v1216_v32 = vpop.permute.xlu2 %1215 }
 0x1de   : > { %v1222_v38 = vpop.permute.xlu2 %1221 }
 0x1e5   : > { %v1210_v29 = vpop.permute.xlu1 %1209 }
 0x1e6   : > { %v11584_v30 = vsel %vm1237_vm11, %v1210_v29, %v1212_v18  ;;  %v11587_v31 = vsel %vm1237_vm11, 0.0, %v1210_v29  ;;  %v1228_v44 = vpop.permute.xlu2 %1227 }
 0x1e7   : > { %1267 = vst [vmem:[#allocation2] sm:$0xff] %v11587_v31  ;;  %1283 = vrot.lane.b32.xlu1 %v11587_v31, %s17236_s15  ;;  %1285 = vrot.lane.b32.xlu2 %v11584_v30, %s17236_s15 }
 0x1e8   : > { %1268 = vst [vmem:[#allocation2 + $0x8] sm:$0xff] %v11584_v30 }
 0x1ed   : > { %v1214_v33 = vpop.permute.xlu1 %1213 }
 0x1ee   : > { %v11596_v34 = vsel %vm1237_vm11, %v1212_v18, %v1214_v33  ;;  %v11599_v35 = vsel %vm1237_vm11, %v1214_v33, %v1216_v32  ;;  %v1234_v50 = vpop.permute.xlu2 %1233 }
 0x1ef   : > { %v1218_v36 = vpop.permute.xlu0 %1217  ;;  %1269 = vst [vmem:[#allocation2 + $0x10] sm:$0xff] %v11596_v34  ;;  %1358 = vrot.lane.b32.xlu1 %v11587_v31, %s17229_s30  ;;  %1360 = vrot.lane.b32.xlu2 %v11584_v30, %s17229_s30 }
 0x1f0   : > { %v11607_v37 = vsel %vm1237_vm11, %v1216_v32, %v1218_v36  ;;  %1270 = vst [vmem:[#allocation2 + $0x18] sm:$0xff] %v11599_v35  ;;  %1287 = vrot.lane.b32.xlu0 %v11596_v34, %s17236_s15 }
 0x1f1   : > { %1271 = vst [vmem:[#allocation2 + $0x20] sm:$0xff] %v11607_v37 }
 0x1f5   : > { %v1220_v39 = vpop.permute.xlu1 %1219 }
 0x1f6   : > { %v11614_v40 = vsel %vm1237_vm11, %v1218_v36, %v1220_v39  ;;  %v11617_v41 = vsel %vm1237_vm11, %v1220_v39, %v1222_v38 }
 0x1f7   : > { %v1224_v42 = vpop.permute.xlu0 %1223  ;;  %1272 = vst [vmem:[#allocation2 + $0x28] sm:$0xff] %v11614_v40  ;;  %1433 = vrot.lane.b32.xlu1 %v11587_v31, %s17289_s20  ;;  %1435 = vrot.lane.b32.xlu2 %v11584_v30, %s17289_s20 }
 0x1f8   : > { %v11625_v43 = vsel %vm1237_vm11, %v1222_v38, %v1224_v42  ;;  %1273 = vst [vmem:[#allocation2 + $0x30] sm:$0xff] %v11617_v41  ;;  %1362 = vrot.lane.b32.xlu0 %v11596_v34, %s17229_s30 }
 0x1f9   : > { %1274 = vst [vmem:[#allocation2 + $0x38] sm:$0xff] %v11625_v43 }
 0x1fd   : > { %v1226_v45 = vpop.permute.xlu1 %1225 }
 0x1fe   : > { %v11632_v46 = vsel %vm1237_vm11, %v1224_v42, %v1226_v45  ;;  %v11635_v47 = vsel %vm1237_vm11, %v1226_v45, %v1228_v44 }
 0x1ff   : > { %v1230_v48 = vpop.permute.xlu0 %1229  ;;  %1275 = vst [vmem:[#allocation2 + $0x40] sm:$0xff] %v11632_v46  ;;  %1508 = vrot.lane.b32.xlu1 %v11587_v31, %s17290_s21  ;;  %1510 = vrot.lane.b32.xlu2 %v11584_v30, %s17290_s21 }
 0x200   : > { %v11643_v49 = vsel %vm1237_vm11, %v1228_v44, %v1230_v48  ;;  %1276 = vst [vmem:[#allocation2 + $0x48] sm:$0xff] %v11635_v47  ;;  %1437 = vrot.lane.b32.xlu0 %v11596_v34, %s17289_s20 }
 0x201   : > { %1277 = vst [vmem:[#allocation2 + $0x50] sm:$0xff] %v11643_v49 }
 0x205   : > { %v1232_v51 = vpop.permute.xlu1 %1231 }
 0x206   : > { %v11650_v52 = vsel %vm1237_vm11, %v1230_v48, %v1232_v51  ;;  %v11653_v53 = vsel %vm1237_vm11, %v1232_v51, %v1234_v50 }
 0x207   : > { %v11655_v54 = vpop.permute.xlu0 %1235  ;;  %1278 = vst [vmem:[#allocation2 + $0x58] sm:$0xff] %v11650_v52  ;;  %1581 = vrot.lane.b32.xlu1 %v11587_v31, %s17291_s22  ;;  %1583 = vrot.lane.b32.xlu2 %v11584_v30, %s17291_s22 }
 0x208   : > { %1281 = vst.msk [vmem:[#allocation2 + $0x70] sm:$0xff] %vm17257_vm1, %v11655_v54  ;;  %1512 = vrot.lane.b32.xlu0 %v11596_v34, %s17290_s21  ;;  %v11668_v55 = vsel %vm1237_vm11, %v1234_v50, %v11655_v54 }
 0x209   : > { %1279 = vst [vmem:[#allocation2 + $0x60] sm:$0xff] %v11653_v53 }
 0x20a   : > { %1280 = vst [vmem:[#allocation2 + $0x68] sm:$0xff] %v11668_v55 }
 0x20f   : > { %1654 = vrot.lane.b32.xlu1 %v11587_v31, %s17292_s16  ;;  %1656 = vrot.lane.b32.xlu2 %v11584_v30, %s17292_s16 }
 0x210   : > { %1585 = vrot.lane.b32.xlu0 %v11596_v34, %s17291_s22 }
 0x217   : > { %1727 = vrot.lane.b32.xlu1 %v11587_v31, %s17221_s23  ;;  %1729 = vrot.lane.b32.xlu2 %v11584_v30, %s17221_s23 }
 0x218   : > { %1658 = vrot.lane.b32.xlu0 %v11596_v34, %s17292_s16 }
 0x21f   : > { %1800 = vrot.lane.b32.xlu1 %v11587_v31, %s17223_s24  ;;  %1802 = vrot.lane.b32.xlu2 %v11584_v30, %s17223_s24 }
 0x220   : > { %1731 = vrot.lane.b32.xlu0 %v11596_v34, %s17221_s23 }
 0x227   : > { %1291 = vrot.lane.b32.xlu2 %v11607_v37, %s17236_s15  ;;  %1289 = vrot.lane.b32.xlu1 %v11599_v35, %s17236_s15 }
 0x228   : > { %1804 = vrot.lane.b32.xlu0 %v11596_v34, %s17223_s24 }
 0x22f   : > { %1366 = vrot.lane.b32.xlu2 %v11607_v37, %s17229_s30  ;;  %1364 = vrot.lane.b32.xlu1 %v11599_v35, %s17229_s30 }
 0x230   : > { %1293 = vrot.lane.b32.xlu0 %v11614_v40, %s17236_s15 }
 0x237   : > { %1441 = vrot.lane.b32.xlu2 %v11607_v37, %s17289_s20  ;;  %1439 = vrot.lane.b32.xlu1 %v11599_v35, %s17289_s20 }
 0x238   : > { %1368 = vrot.lane.b32.xlu0 %v11614_v40, %s17229_s30 }
 0x23f   : > { %1516 = vrot.lane.b32.xlu2 %v11607_v37, %s17290_s21  ;;  %1514 = vrot.lane.b32.xlu1 %v11599_v35, %s17290_s21 }
 0x240   : > { %1443 = vrot.lane.b32.xlu0 %v11614_v40, %s17289_s20 }
 0x241   : > { %v1286_v56 = vpop.permute.xlu2 %1285 }
 0x247   : > { %1589 = vrot.lane.b32.xlu2 %v11607_v37, %s17291_s22  ;;  %1587 = vrot.lane.b32.xlu1 %v11599_v35, %s17291_s22 }
 0x248   : > { %1518 = vrot.lane.b32.xlu0 %v11614_v40, %s17290_s21 }
 0x249   : > { %v1361_v57 = vpop.permute.xlu2 %1360 }
 0x24f   : > { %1662 = vrot.lane.b32.xlu2 %v11607_v37, %s17292_s16  ;;  %1660 = vrot.lane.b32.xlu1 %v11599_v35, %s17292_s16 }
 0x250   : > { %1591 = vrot.lane.b32.xlu0 %v11614_v40, %s17291_s22 }
 0x251   : > { %v1436_v58 = vpop.permute.xlu2 %1435 }
 0x257   : > { %1735 = vrot.lane.b32.xlu2 %v11607_v37, %s17221_s23  ;;  %1733 = vrot.lane.b32.xlu1 %v11599_v35, %s17221_s23 }
 0x258   : > { %1664 = vrot.lane.b32.xlu0 %v11614_v40, %s17292_s16 }
 0x259   : > { %v1511_v59 = vpop.permute.xlu2 %1510  ;;  %v1284_v60 = vpop.permute.xlu1 %1283 }
 0x25a   : > { %v1313_v61 = vsel %vm17258_vm7, %v1284_v60, %v1286_v56 }
 0x25b   : > { %1342 = vst [vmem:[#allocation2 + $0x78] sm:$0xff] %v1313_v61 }
 0x25f   : > { %1808 = vrot.lane.b32.xlu2 %v11607_v37, %s17223_s24  ;;  %1806 = vrot.lane.b32.xlu1 %v11599_v35, %s17223_s24 }
 0x260   : > { %1737 = vrot.lane.b32.xlu0 %v11614_v40, %s17221_s23 }
 0x261   : > { %v1584_v62 = vpop.permute.xlu2 %1583  ;;  %v1359_v63 = vpop.permute.xlu1 %1358 }
 0x262   : > { %v11739_v0 = vpop.permute.xlu0 %1287  ;;  %v1388_v1 = vsel %vm543_vm6, %v1359_v63, %v1361_v57 }
 0x263   : > { %v1314_v3 = vsel %vm17258_vm7, %v1286_v56, %v11739_v0  ;;  %1417 = vst [vmem:[#allocation2 + $0xf0] sm:$0xff] %v1388_v1 }
 0x264   : > { %1343 = vst [vmem:[#allocation2 + $0x80] sm:$0xff] %v1314_v3 }
 0x267   : > { %1297 = vrot.lane.b32.xlu2 %v11625_v43, %s17236_s15  ;;  %1295 = vrot.lane.b32.xlu1 %v11617_v41, %s17236_s15 }
 0x268   : > { %1299 = vrot.lane.b32.xlu0 %v11632_v46, %s17236_s15 }
 0x269   : > { %v1657_v4 = vpop.permute.xlu2 %1656  ;;  %v1434_v5 = vpop.permute.xlu1 %1433 }
 0x26a   : > { %v11750_v6 = vpop.permute.xlu0 %1362  ;;  %v1463_v7 = vsel %vm563_vm4, %v1434_v5, %v1436_v58 }
 0x26b   : > { %v1389_v8 = vsel %vm543_vm6, %v1361_v57, %v11750_v6  ;;  %1492 = vst [vmem:[#allocation2 + $0x168] sm:$0xff] %v1463_v7 }
 0x26c   : > { %1418 = vst [vmem:[#allocation2 + $0xf8] sm:$0xff] %v1389_v8 }
 0x26f   : > { %1372 = vrot.lane.b32.xlu2 %v11625_v43, %s17229_s30  ;;  %1370 = vrot.lane.b32.xlu1 %v11617_v41, %s17229_s30 }
 0x270   : > { %1374 = vrot.lane.b32.xlu0 %v11632_v46, %s17229_s30 }
 0x271   : > { %v1730_v9 = vpop.permute.xlu2 %1729  ;;  %v1509_v10 = vpop.permute.xlu1 %1508 }
 0x272   : > { %v11761_v11 = vpop.permute.xlu0 %1437  ;;  %v1538_v12 = vsel %vm17260_vm9, %v1509_v10, %v1511_v59 }
 0x273   : > { %v1464_v13 = vsel %vm563_vm4, %v1436_v58, %v11761_v11  ;;  %1566 = vst [vmem:[#allocation2 + $0x1e0] sm:$0xff] %v1538_v12 }
 0x274   : > { %1493 = vst [vmem:[#allocation2 + $0x170] sm:$0xff] %v1464_v13 }
 0x277   : > { %1447 = vrot.lane.b32.xlu2 %v11625_v43, %s17289_s20  ;;  %1445 = vrot.lane.b32.xlu1 %v11617_v41, %s17289_s20 }
 0x278   : > { %1449 = vrot.lane.b32.xlu0 %v11632_v46, %s17289_s20 }
 0x279   : > { %v1803_v14 = vpop.permute.xlu2 %1802  ;;  %v1582_v15 = vpop.permute.xlu1 %1581 }
 0x27a   : > { %v11772_v16 = vpop.permute.xlu0 %1512  ;;  %v1611_v17 = vsel %vm17259_vm14, %v1582_v15, %v1584_v62 }
 0x27b   : > { %v1539_v19 = vsel %vm17260_vm9, %v1511_v59, %v11772_v16  ;;  %1639 = vst [vmem:[#allocation2 + $0x258] sm:$0xff] %v1611_v17 }
 0x27c   : > { %1567 = vst [vmem:[#allocation2 + $0x1e8] sm:$0xff] %v1539_v19 }
 0x27f   : > { %1522 = vrot.lane.b32.xlu2 %v11625_v43, %s17290_s21  ;;  %1520 = vrot.lane.b32.xlu1 %v11617_v41, %s17290_s21 }
 0x280   : > { %1524 = vrot.lane.b32.xlu0 %v11632_v46, %s17290_s21 }
 0x281   : > { %v1292_v20 = vpop.permute.xlu2 %1291  ;;  %v1655_v21 = vpop.permute.xlu1 %1654 }
 0x282   : > { %v11783_v22 = vpop.permute.xlu0 %1585  ;;  %v1684_v23 = vsel %vm17235_vm12, %v1655_v21, %v1657_v4 }
 0x283   : > { %v1612_v24 = vsel %vm17259_vm14, %v1584_v62, %v11783_v22  ;;  %1712 = vst [vmem:[#allocation2 + $0x2d0] sm:$0xff] %v1684_v23 }
 0x284   : > { %1640 = vst [vmem:[#allocation2 + $0x260] sm:$0xff] %v1612_v24 }
 0x287   : > { %1595 = vrot.lane.b32.xlu2 %v11625_v43, %s17291_s22  ;;  %1593 = vrot.lane.b32.xlu1 %v11617_v41, %s17291_s22 }
 0x288   : > { %1597 = vrot.lane.b32.xlu0 %v11632_v46, %s17291_s22 }
 0x289   : > { %v1367_v25 = vpop.permute.xlu2 %1366  ;;  %v1728_v26 = vpop.permute.xlu1 %1727 }
 0x28a   : > { %v11794_v27 = vpop.permute.xlu0 %1658  ;;  %v1757_v28 = vsel %vm17233_vm0, %v1728_v26, %v1730_v9 }
 0x28b   : > { %v1685_v18 = vsel %vm17235_vm12, %v1657_v4, %v11794_v27  ;;  %1785 = vst [vmem:[#allocation2 + $0x348] sm:$0xff] %v1757_v28 }
 0x28c   : > { %1713 = vst [vmem:[#allocation2 + $0x2d8] sm:$0xff] %v1685_v18 }
 0x28f   : > { %1668 = vrot.lane.b32.xlu2 %v11625_v43, %s17292_s16  ;;  %1666 = vrot.lane.b32.xlu1 %v11617_v41, %s17292_s16 }
 0x290   : > { %1670 = vrot.lane.b32.xlu0 %v11632_v46, %s17292_s16 }
 0x291   : > { %v1442_v29 = vpop.permute.xlu2 %1441  ;;  %v1801_v32 = vpop.permute.xlu1 %1800 }
 0x292   : > { %v11805_v33 = vpop.permute.xlu0 %1731  ;;  %v1830_v36 = vsel %vm17293_vm15, %v1801_v32, %v1803_v14 }
 0x293   : > { %v1758_v38 = vsel %vm17233_vm0, %v1730_v9, %v11805_v33  ;;  %1858 = vst [vmem:[#allocation2 + $0x3c0] sm:$0xff] %v1830_v36 }
 0x294   : > { %1786 = vst [vmem:[#allocation2 + $0x350] sm:$0xff] %v1758_v38 }
 0x297   : > { %1741 = vrot.lane.b32.xlu2 %v11625_v43, %s17221_s23  ;;  %1739 = vrot.lane.b32.xlu1 %v11617_v41, %s17221_s23 }
 0x298   : > { %1743 = vrot.lane.b32.xlu0 %v11632_v46, %s17221_s23 }
 0x299   : > { %v1517_v39 = vpop.permute.xlu2 %1516  ;;  %v1290_v42 = vpop.permute.xlu1 %1289 }
 0x29a   : > { %v11816_v44 = vpop.permute.xlu0 %1804  ;;  %v1315_v45 = vsel %vm17258_vm7, %v11739_v0, %v1290_v42  ;;  %v1316_v48 = vsel %vm17258_vm7, %v1290_v42, %v1292_v20 }
 0x29b   : > { %v1831_v50 = vsel %vm17293_vm15, %v1803_v14, %v11816_v44  ;;  %1344 = vst [vmem:[#allocation2 + $0x88] sm:$0xff] %v1315_v45 }
 0x29c   : > { %1859 = vst [vmem:[#allocation2 + $0x3c8] sm:$0xff] %v1831_v50 }
 0x29d   : > { %1345 = vst [vmem:[#allocation2 + $0x90] sm:$0xff] %v1316_v48 }
 0x29f   : > { %1303 = vrot.lane.b32.xlu2 %v11643_v49, %s17236_s15  ;;  %1301 = vrot.lane.b32.xlu1 %v11635_v47, %s17236_s15 }
 0x2a0   : > { %1305 = vrot.lane.b32.xlu0 %v11650_v52, %s17236_s15 }
 0x2a1   : > { %v1590_v51 = vpop.permute.xlu2 %1589  ;;  %v1365_v56 = vpop.permute.xlu1 %1364 }
 0x2a2   : > { %v11829_v57 = vpop.permute.xlu0 %1293  ;;  %v1390_v58 = vsel %vm543_vm6, %v11750_v6, %v1365_v56  ;;  %v1391_v59 = vsel %vm543_vm6, %v1365_v56, %v1367_v25 }
 0x2a3   : > { %v1317_v60 = vsel %vm17258_vm7, %v1292_v20, %v11829_v57  ;;  %1419 = vst [vmem:[#allocation2 + $0x100] sm:$0xff] %v1390_v58 }
 0x2a4   : > { %1346 = vst [vmem:[#allocation2 + $0x98] sm:$0xff] %v1317_v60 }
 0x2a5   : > { %1420 = vst [vmem:[#allocation2 + $0x108] sm:$0xff] %v1391_v59 }
 0x2a7   : > { %1378 = vrot.lane.b32.xlu2 %v11643_v49, %s17229_s30  ;;  %1376 = vrot.lane.b32.xlu1 %v11635_v47, %s17229_s30 }
 0x2a8   : > { %1380 = vrot.lane.b32.xlu0 %v11650_v52, %s17229_s30 }
 0x2a9   : > { %v1663_v61 = vpop.permute.xlu2 %1662  ;;  %v1440_v62 = vpop.permute.xlu1 %1439 }
 0x2aa   : > { %v11842_v63 = vpop.permute.xlu0 %1368  ;;  %v1465_v0 = vsel %vm563_vm4, %v11761_v11, %v1440_v62  ;;  %v1466_v1 = vsel %vm563_vm4, %v1440_v62, %v1442_v29 }
 0x2ab   : > { %v1392_v3 = vsel %vm543_vm6, %v1367_v25, %v11842_v63  ;;  %1494 = vst [vmem:[#allocation2 + $0x178] sm:$0xff] %v1465_v0 }
 0x2ac   : > { %1421 = vst [vmem:[#allocation2 + $0x110] sm:$0xff] %v1392_v3 }
 0x2ad   : > { %1495 = vst [vmem:[#allocation2 + $0x180] sm:$0xff] %v1466_v1 }
 0x2af   : > { %1453 = vrot.lane.b32.xlu2 %v11643_v49, %s17289_s20  ;;  %1451 = vrot.lane.b32.xlu1 %v11635_v47, %s17289_s20 }
 0x2b0   : > { %1455 = vrot.lane.b32.xlu0 %v11650_v52, %s17289_s20 }
 0x2b1   : > { %v1736_v4 = vpop.permute.xlu2 %1735  ;;  %v1515_v5 = vpop.permute.xlu1 %1514 }
 0x2b2   : > { %v11855_v6 = vpop.permute.xlu0 %1443  ;;  %v1540_v7 = vsel %vm17260_vm9, %v11772_v16, %v1515_v5  ;;  %v1541_v8 = vsel %vm17260_vm9, %v1515_v5, %v1517_v39 }
 0x2b3   : > { %v1467_v9 = vsel %vm563_vm4, %v1442_v29, %v11855_v6  ;;  %1568 = vst [vmem:[#allocation2 + $0x1f0] sm:$0xff] %v1540_v7 }
 0x2b4   : > { %1496 = vst [vmem:[#allocation2 + $0x188] sm:$0xff] %v1467_v9 }
 0x2b5   : > { %1569 = vst [vmem:[#allocation2 + $0x1f8] sm:$0xff] %v1541_v8 }
 0x2b7   : > { %1528 = vrot.lane.b32.xlu2 %v11643_v49, %s17290_s21  ;;  %1526 = vrot.lane.b32.xlu1 %v11635_v47, %s17290_s21 }
 0x2b8   : > { %1530 = vrot.lane.b32.xlu0 %v11650_v52, %s17290_s21 }
 0x2b9   : > { %v11868_v10 = vpop.permute.xlu2 %1808  ;;  %v1588_v11 = vpop.permute.xlu1 %1587 }
 0x2ba   : > { %v11870_v12 = vpop.permute.xlu0 %1518  ;;  %v1613_v13 = vsel %vm17259_vm14, %v11783_v22, %v1588_v11  ;;  %v1614_v14 = vsel %vm17259_vm14, %v1588_v11, %v1590_v51 }
 0x2bb   : > { %v1542_v15 = vsel %vm17260_vm9, %v1517_v39, %v11870_v12  ;;  %1641 = vst [vmem:[#allocation2 + $0x268] sm:$0xff] %v1613_v13 }
 0x2bc   : > { %1570 = vst [vmem:[#allocation2 + $0x200] sm:$0xff] %v1542_v15 }
 0x2bd   : > { %1642 = vst [vmem:[#allocation2 + $0x270] sm:$0xff] %v1614_v14 }
 0x2bf   : > { %1601 = vrot.lane.b32.xlu2 %v11643_v49, %s17291_s22  ;;  %1599 = vrot.lane.b32.xlu1 %v11635_v47, %s17291_s22 }
 0x2c0   : > { %1603 = vrot.lane.b32.xlu0 %v11650_v52, %s17291_s22 }
 0x2c1   : > { %v1298_v16 = vpop.permute.xlu2 %1297  ;;  %v1661_v17 = vpop.permute.xlu1 %1660 }
 0x2c2   : > { %v11883_v19 = vpop.permute.xlu0 %1591  ;;  %v1686_v20 = vsel %vm17235_vm12, %v11794_v27, %v1661_v17  ;;  %v1687_v21 = vsel %vm17235_vm12, %v1661_v17, %v1663_v61 }
 0x2c3   : > { %v1615_v22 = vsel %vm17259_vm14, %v1590_v51, %v11883_v19  ;;  %1714 = vst [vmem:[#allocation2 + $0x2e0] sm:$0xff] %v1686_v20 }
 0x2c4   : > { %1643 = vst [vmem:[#allocation2 + $0x278] sm:$0xff] %v1615_v22 }
 0x2c5   : > { %1715 = vst [vmem:[#allocation2 + $0x2e8] sm:$0xff] %v1687_v21 }
 0x2c7   : > { %1674 = vrot.lane.b32.xlu2 %v11643_v49, %s17292_s16  ;;  %1672 = vrot.lane.b32.xlu1 %v11635_v47, %s17292_s16 }
 0x2c8   : > { %1676 = vrot.lane.b32.xlu0 %v11650_v52, %s17292_s16 }
 0x2c9   : > { %v1373_v23 = vpop.permute.xlu2 %1372  ;;  %v1734_v24 = vpop.permute.xlu1 %1733 }
 0x2ca   : > { %v11896_v25 = vpop.permute.xlu0 %1664  ;;  %v1759_v26 = vsel %vm17233_vm0, %v11805_v33, %v1734_v24  ;;  %v1760_v27 = vsel %vm17233_vm0, %v1734_v24, %v1736_v4 }
 0x2cb   : > { %v1688_v28 = vsel %vm17235_vm12, %v1663_v61, %v11896_v25  ;;  %1787 = vst [vmem:[#allocation2 + $0x358] sm:$0xff] %v1759_v26 }
 0x2cc   : > { %1716 = vst [vmem:[#allocation2 + $0x2f0] sm:$0xff] %v1688_v28 }
 0x2cd   : > { %1788 = vst [vmem:[#allocation2 + $0x360] sm:$0xff] %v1760_v27 }
 0x2cf   : > { %1747 = vrot.lane.b32.xlu2 %v11643_v49, %s17221_s23  ;;  %1745 = vrot.lane.b32.xlu1 %v11635_v47, %s17221_s23 }
 0x2d0   : > { %1749 = vrot.lane.b32.xlu0 %v11650_v52, %s17221_s23 }
 0x2d1   : > { %v1448_v18 = vpop.permute.xlu2 %1447  ;;  %v1807_v29 = vpop.permute.xlu1 %1806 }
 0x2d2   : > { %v11909_v32 = vpop.permute.xlu0 %1737  ;;  %v1832_v33 = vsel %vm17293_vm15, %v11816_v44, %v1807_v29  ;;  %v1833_v36 = vsel %vm17294_vm3, %v1807_v29, %v11868_v10  ;;  %vm17225_vm3 = vcmask 56320   ;;  %vm17226_vm15 = vcmask 48128  }
 0x2d3   : > { %v1761_v38 = vsel %vm17233_vm0, %v1736_v4, %v11909_v32  ;;  %1860 = vst [vmem:[#allocation2 + $0x3d0] sm:$0xff] %v1832_v33 }
 0x2d4   : > { %1789 = vst [vmem:[#allocation2 + $0x368] sm:$0xff] %v1761_v38 }
 0x2d5   : > { %1861 = vst [vmem:[#allocation2 + $0x3d8] sm:$0xff] %v1833_v36 }
 0x2d7   : > { %1309 = vrot.lane.b32.xlu2 %v11668_v55, %s17236_s15  ;;  %1307 = vrot.lane.b32.xlu1 %v11653_v53, %s17236_s15 }
 0x2d8   : > { %1311 = vrot.lane.b32.xlu0 %v11655_v54, %s17236_s15  ;;  %s17306_s15 = smov 38  }
 0x2d9   : > { %v1523_v39 = vpop.permute.xlu2 %1522  ;;  %v1296_v42 = vpop.permute.xlu1 %1295 }
 0x2da   : > { %v11923_v44 = vpop.permute.xlu0 %1299  ;;  %v1318_v45 = vsel %vm17258_vm7, %v11829_v57, %v1296_v42  ;;  %v1319_v48 = vsel %vm17258_vm7, %v1296_v42, %v1298_v16 }
 0x2db   : > { %v1320_v50 = vsel %vm17258_vm7, %v1298_v16, %v11923_v44  ;;  %1347 = vst [vmem:[#allocation2 + $0xa0] sm:$0xff] %v1318_v45 }
 0x2dc   : > { %1349 = vst [vmem:[#allocation2 + $0xb0] sm:$0xff] %v1320_v50 }
 0x2dd   : > { %1348 = vst [vmem:[#allocation2 + $0xa8] sm:$0xff] %v1319_v48 }
 0x2df   : > { %1384 = vrot.lane.b32.xlu2 %v11668_v55, %s17229_s30  ;;  %1382 = vrot.lane.b32.xlu1 %v11653_v53, %s17229_s30 }
 0x2e0   : > { %1386 = vrot.lane.b32.xlu0 %v11655_v54, %s17229_s30  ;;  %s17297_s30 = smov 65  }
 0x2e1   : > { %v1596_v51 = vpop.permute.xlu2 %1595  ;;  %v1371_v56 = vpop.permute.xlu1 %1370 }
 0x2e2   : > { %v11936_v57 = vpop.permute.xlu0 %1374  ;;  %v1393_v58 = vsel %vm543_vm6, %v11842_v63, %v1371_v56  ;;  %v1394_v59 = vsel %vm543_vm6, %v1371_v56, %v1373_v23 }
 0x2e3   : > { %v1395_v60 = vsel %vm543_vm6, %v1373_v23, %v11936_v57  ;;  %1422 = vst [vmem:[#allocation2 + $0x118] sm:$0xff] %v1393_v58 }
 0x2e4   : > { %1424 = vst [vmem:[#allocation2 + $0x128] sm:$0xff] %v1395_v60 }
 0x2e5   : > { %1423 = vst [vmem:[#allocation2 + $0x120] sm:$0xff] %v1394_v59 }
 0x2e7   : > { %1459 = vrot.lane.b32.xlu2 %v11668_v55, %s17289_s20  ;;  %1457 = vrot.lane.b32.xlu1 %v11653_v53, %s17289_s20 }
 0x2e8   : > { %1461 = vrot.lane.b32.xlu0 %v11655_v54, %s17289_s20 }
 0x2e9   : > { %v1669_v61 = vpop.permute.xlu2 %1668  ;;  %v1446_v62 = vpop.permute.xlu1 %1445 }
 0x2ea   : > { %v11949_v63 = vpop.permute.xlu0 %1449  ;;  %v1468_v0 = vsel %vm563_vm4, %v11855_v6, %v1446_v62  ;;  %v1469_v1 = vsel %vm563_vm4, %v1446_v62, %v1448_v18 }
 0x2eb   : > { %v1470_v3 = vsel %vm563_vm4, %v1448_v18, %v11949_v63  ;;  %1497 = vst [vmem:[#allocation2 + $0x190] sm:$0xff] %v1468_v0 }
 0x2ec   : > { %1499 = vst [vmem:[#allocation2 + $0x1a0] sm:$0xff] %v1470_v3 }
 0x2ed   : > { %1498 = vst [vmem:[#allocation2 + $0x198] sm:$0xff] %v1469_v1 }
 0x2ef   : > { %1534 = vrot.lane.b32.xlu2 %v11668_v55, %s17290_s21  ;;  %1532 = vrot.lane.b32.xlu1 %v11653_v53, %s17290_s21 }
 0x2f0   : > { %1536 = vrot.lane.b32.xlu0 %v11655_v54, %s17290_s21 }
 0x2f1   : > { %v1742_v4 = vpop.permute.xlu2 %1741  ;;  %v1521_v5 = vpop.permute.xlu1 %1520 }
 0x2f2   : > { %v11962_v6 = vpop.permute.xlu0 %1524  ;;  %v1543_v7 = vsel %vm17260_vm9, %v11870_v12, %v1521_v5  ;;  %v1544_v8 = vsel %vm17260_vm9, %v1521_v5, %v1523_v39 }
 0x2f3   : > { %v1545_v9 = vsel %vm17260_vm9, %v1523_v39, %v11962_v6  ;;  %1571 = vst [vmem:[#allocation2 + $0x208] sm:$0xff] %v1543_v7 }
 0x2f4   : > { %1573 = vst [vmem:[#allocation2 + $0x218] sm:$0xff] %v1545_v9 }
 0x2f5   : > { %1572 = vst [vmem:[#allocation2 + $0x210] sm:$0xff] %v1544_v8 }
 0x2f7   : > { %1607 = vrot.lane.b32.xlu2 %v11668_v55, %s17291_s22  ;;  %1605 = vrot.lane.b32.xlu1 %v11653_v53, %s17291_s22 }
 0x2f8   : > { %1609 = vrot.lane.b32.xlu0 %v11655_v54, %s17291_s22 }
 0x2f9   : > { %v1304_v11 = vpop.permute.xlu2 %1303  ;;  %v1594_v13 = vpop.permute.xlu1 %1593 }
 0x2fa   : > { %v11975_v12 = vpop.permute.xlu0 %1597  ;;  %v1616_v14 = vsel %vm17259_vm14, %v11883_v19, %v1594_v13  ;;  %v1617_v15 = vsel %vm17259_vm14, %v1594_v13, %v1596_v51 }
 0x2fb   : > { %v1618_v16 = vsel %vm17259_vm14, %v1596_v51, %v11975_v12  ;;  %1644 = vst [vmem:[#allocation2 + $0x280] sm:$0xff] %v1616_v14 }
 0x2fc   : > { %1646 = vst [vmem:[#allocation2 + $0x290] sm:$0xff] %v1618_v16 }
 0x2fd   : > { %1645 = vst [vmem:[#allocation2 + $0x288] sm:$0xff] %v1617_v15 }
 0x2ff   : > { %1680 = vrot.lane.b32.xlu2 %v11668_v55, %s17292_s16  ;;  %1678 = vrot.lane.b32.xlu1 %v11653_v53, %s17292_s16 }
 0x300   : > { %1682 = vrot.lane.b32.xlu0 %v11655_v54, %s17292_s16 }
 0x301   : > { %v1379_v17 = vpop.permute.xlu2 %1378  ;;  %v1667_v20 = vpop.permute.xlu1 %1666 }
 0x302   : > { %v11988_v19 = vpop.permute.xlu0 %1670  ;;  %v1689_v21 = vsel %vm17235_vm12, %v11896_v25, %v1667_v20  ;;  %v1690_v22 = vsel %vm17235_vm12, %v1667_v20, %v1669_v61 }
 0x303   : > { %v1691_v23 = vsel %vm17235_vm12, %v1669_v61, %v11988_v19  ;;  %1717 = vst [vmem:[#allocation2 + $0x2f8] sm:$0xff] %v1689_v21 }
 0x304   : > { %1719 = vst [vmem:[#allocation2 + $0x308] sm:$0xff] %v1691_v23 }
 0x305   : > { %1718 = vst [vmem:[#allocation2 + $0x300] sm:$0xff] %v1690_v22 }
 0x307   : > { %1753 = vrot.lane.b32.xlu2 %v11668_v55, %s17221_s23  ;;  %1751 = vrot.lane.b32.xlu1 %v11653_v53, %s17221_s23 }
 0x308   : > { %1755 = vrot.lane.b32.xlu0 %v11655_v54, %s17221_s23  ;;  %s17295_s23 = smov 67  }
 0x309   : > { %v1454_v24 = vpop.permute.xlu2 %1453  ;;  %v1740_v26 = vpop.permute.xlu1 %1739 }
 0x30a   : > { %v12001_v25 = vpop.permute.xlu0 %1743  ;;  %v1762_v27 = vsel %vm17233_vm0, %v11909_v32, %v1740_v26  ;;  %v1763_v28 = vsel %vm17233_vm0, %v1740_v26, %v1742_v4 }
 0x30b   : > { %v1764_v18 = vsel %vm17233_vm0, %v1742_v4, %v12001_v25  ;;  %1790 = vst [vmem:[#allocation2 + $0x370] sm:$0xff] %v1762_v27 }
 0x30c   : > { %1792 = vst [vmem:[#allocation2 + $0x380] sm:$0xff] %v1764_v18 }
 0x30d   : > { %1791 = vst [vmem:[#allocation2 + $0x378] sm:$0xff] %v1763_v28 }
 0x30f   : > { %1814 = vrot.lane.b32.xlu2 %v11625_v43, %s17223_s24  ;;  %1812 = vrot.lane.b32.xlu1 %v11617_v41, %s17223_s24 }
 0x310   : > { %1810 = vrot.lane.b32.xlu0 %v11614_v40, %s17223_s24 }
 0x311   : > { %v1529_v29 = vpop.permute.xlu2 %1528  ;;  %v1302_v33 = vpop.permute.xlu1 %1301 }
 0x312   : > { %v12014_v32 = vpop.permute.xlu0 %1305  ;;  %v1321_v36 = vsel %vm17258_vm7, %v11923_v44, %v1302_v33  ;;  %v1322_v38 = vsel %vm17258_vm7, %v1302_v33, %v1304_v11 }
 0x313   : > { %v1323_v39 = vsel %vm17258_vm7, %v1304_v11, %v12014_v32  ;;  %1350 = vst [vmem:[#allocation2 + $0xb8] sm:$0xff] %v1321_v36 }
 0x314   : > { %1352 = vst [vmem:[#allocation2 + $0xc8] sm:$0xff] %v1323_v39 }
 0x315   : > { %1351 = vst [vmem:[#allocation2 + $0xc0] sm:$0xff] %v1322_v38 }
 0x317   : > { %1820 = vrot.lane.b32.xlu2 %v11643_v49, %s17223_s24  ;;  %1818 = vrot.lane.b32.xlu1 %v11635_v47, %s17223_s24 }
 0x318   : > { %1816 = vrot.lane.b32.xlu0 %v11632_v46, %s17223_s24 }
 0x319   : > { %v1602_v42 = vpop.permute.xlu2 %1601  ;;  %v1377_v45 = vpop.permute.xlu1 %1376 }
 0x31a   : > { %v12027_v44 = vpop.permute.xlu0 %1380  ;;  %v1396_v48 = vsel %vm543_vm6, %v11936_v57, %v1377_v45  ;;  %v1397_v50 = vsel %vm543_vm6, %v1377_v45, %v1379_v17 }
 0x31b   : > { %v1398_v51 = vsel %vm543_vm6, %v1379_v17, %v12027_v44  ;;  %1425 = vst [vmem:[#allocation2 + $0x130] sm:$0xff] %v1396_v48 }
 0x31c   : > { %1427 = vst [vmem:[#allocation2 + $0x140] sm:$0xff] %v1398_v51 }
 0x31d   : > { %1426 = vst [vmem:[#allocation2 + $0x138] sm:$0xff] %v1397_v50 }
 0x31f   : > { %1826 = vrot.lane.b32.xlu2 %v11668_v55, %s17223_s24  ;;  %1824 = vrot.lane.b32.xlu1 %v11653_v53, %s17223_s24 }
 0x320   : > { %1822 = vrot.lane.b32.xlu0 %v11650_v52, %s17223_s24 }
 0x321   : > { %v1675_v56 = vpop.permute.xlu2 %1674  ;;  %v1452_v58 = vpop.permute.xlu1 %1451 }
 0x322   : > { %v12040_v57 = vpop.permute.xlu0 %1455  ;;  %v1471_v59 = vsel %vm563_vm4, %v11949_v63, %v1452_v58  ;;  %v1472_v60 = vsel %vm563_vm4, %v1452_v58, %v1454_v24 }
 0x323   : > { %v1473_v61 = vsel %vm563_vm4, %v1454_v24, %v12040_v57  ;;  %1500 = vst [vmem:[#allocation2 + $0x1a8] sm:$0xff] %v1471_v59 }
 0x324   : > { %1502 = vst [vmem:[#allocation2 + $0x1b8] sm:$0xff] %v1473_v61 }
 0x325   : > { %1501 = vst [vmem:[#allocation2 + $0x1b0] sm:$0xff] %v1472_v60 }
 0x327   : > { %1875 = vrot.lane.b32.xlu2 %v11584_v30, %s17295_s23  ;;  %1873 = vrot.lane.b32.xlu1 %v11587_v31, %s17295_s23 }
 0x328   : > { %1828 = vrot.lane.b32.xlu0 %v11655_v54, %s17223_s24  ;;  %s17296_s24 = smov 66  }
 0x329   : > { %v1748_v62 = vpop.permute.xlu2 %1747  ;;  %v1527_v0 = vpop.permute.xlu1 %1526 }
 0x32a   : > { %v12053_v63 = vpop.permute.xlu0 %1530  ;;  %v1546_v1 = vsel %vm17260_vm9, %v11962_v6, %v1527_v0  ;;  %v1547_v3 = vsel %vm17260_vm9, %v1527_v0, %v1529_v29 }
 0x32b   : > { %v1548_v4 = vsel %vm17260_vm9, %v1529_v29, %v12053_v63  ;;  %1574 = vst [vmem:[#allocation2 + $0x220] sm:$0xff] %v1546_v1 }
 0x32c   : > { %1576 = vst [vmem:[#allocation2 + $0x230] sm:$0xff] %v1548_v4 }
 0x32d   : > { %1575 = vst [vmem:[#allocation2 + $0x228] sm:$0xff] %v1547_v3 }
 0x32f   : > { %1881 = vrot.lane.b32.xlu2 %v11607_v37, %s17295_s23  ;;  %1879 = vrot.lane.b32.xlu1 %v11599_v35, %s17295_s23 }
 0x330   : > { %1877 = vrot.lane.b32.xlu0 %v11596_v34, %s17295_s23 }
 0x331   : > { %v1310_v5 = vpop.permute.xlu2 %1309  ;;  %v1600_v7 = vpop.permute.xlu1 %1599 }
 0x332   : > { %v12066_v6 = vpop.permute.xlu0 %1603  ;;  %v1619_v8 = vsel %vm17259_vm14, %v11975_v12, %v1600_v7  ;;  %v1620_v9 = vsel %vm17259_vm14, %v1600_v7, %v1602_v42 }
 0x333   : > { %v1621_v11 = vsel %vm17259_vm14, %v1602_v42, %v12066_v6  ;;  %1647 = vst [vmem:[#allocation2 + $0x298] sm:$0xff] %v1619_v8 }
 0x334   : > { %1649 = vst [vmem:[#allocation2 + $0x2a8] sm:$0xff] %v1621_v11 }
 0x335   : > { %1648 = vst [vmem:[#allocation2 + $0x2a0] sm:$0xff] %v1620_v9 }
 0x337   : > { %1887 = vrot.lane.b32.xlu2 %v11625_v43, %s17295_s23  ;;  %1885 = vrot.lane.b32.xlu1 %v11617_v41, %s17295_s23 }
 0x338   : > { %1883 = vrot.lane.b32.xlu0 %v11614_v40, %s17295_s23 }
 0x339   : > { %v1385_v13 = vpop.permute.xlu2 %1384  ;;  %v1673_v14 = vpop.permute.xlu1 %1672 }
 0x33a   : > { %v12079_v12 = vpop.permute.xlu0 %1676  ;;  %v1692_v15 = vsel %vm17235_vm12, %v11988_v19, %v1673_v14  ;;  %v1693_v16 = vsel %vm17235_vm12, %v1673_v14, %v1675_v56 }
 0x33b   : > { %v1694_v17 = vsel %vm17235_vm12, %v1675_v56, %v12079_v12  ;;  %1720 = vst [vmem:[#allocation2 + $0x310] sm:$0xff] %v1692_v15 }
 0x33c   : > { %1722 = vst [vmem:[#allocation2 + $0x320] sm:$0xff] %v1694_v17 }
 0x33d   : > { %1721 = vst [vmem:[#allocation2 + $0x318] sm:$0xff] %v1693_v16 }
 0x33f   : > { %1893 = vrot.lane.b32.xlu2 %v11643_v49, %s17295_s23  ;;  %1891 = vrot.lane.b32.xlu1 %v11635_v47, %s17295_s23 }
 0x340   : > { %1889 = vrot.lane.b32.xlu0 %v11632_v46, %s17295_s23 }
 0x341   : > { %v1460_v20 = vpop.permute.xlu2 %1459  ;;  %v1746_v21 = vpop.permute.xlu1 %1745 }
 0x342   : > { %v12092_v19 = vpop.permute.xlu0 %1749  ;;  %v1765_v22 = vsel %vm17233_vm0, %v12001_v25, %v1746_v21  ;;  %v1766_v23 = vsel %vm17233_vm0, %v1746_v21, %v1748_v62 }
 0x343   : > { %v1767_v24 = vsel %vm17233_vm0, %v1748_v62, %v12092_v19  ;;  %1793 = vst [vmem:[#allocation2 + $0x388] sm:$0xff] %v1765_v22 }
 0x344   : > { %1795 = vst [vmem:[#allocation2 + $0x398] sm:$0xff] %v1767_v24 }
 0x345   : > { %1794 = vst [vmem:[#allocation2 + $0x390] sm:$0xff] %v1766_v23 }
 0x347   : > { %1899 = vrot.lane.b32.xlu2 %v11668_v55, %s17295_s23  ;;  %1897 = vrot.lane.b32.xlu1 %v11653_v53, %s17295_s23 }
 0x348   : > { %1895 = vrot.lane.b32.xlu0 %v11650_v52, %s17295_s23 }
 0x349   : > { %v1535_v26 = vpop.permute.xlu2 %1534  ;;  %v1308_v25 = vpop.permute.xlu1 %1307 }
 0x34a   : > { %v1312_v27 = vpop.permute.xlu0 %1311  ;;  %v1324_v28 = vsel %vm17258_vm7, %v12014_v32, %v1308_v25  ;;  %v1325_v29 = vsel %vm17258_vm7, %v1308_v25, %v1310_v5 }
 0x34b   : > { %v1326_v18 = vsel %vm17258_vm7, %v1310_v5, %v1312_v27  ;;  %1357 = vst.msk [vmem:[#allocation2 + $0xe8] sm:$0xff] %vm17225_vm3, %v1312_v27  ;;  %vm17227_vm3 = vcmask 39936  }
 0x34c   : > { %1355 = vst [vmem:[#allocation2 + $0xe0] sm:$0xff] %v1326_v18 }
 0x34d   : > { %1353 = vst [vmem:[#allocation2 + $0xd0] sm:$0xff] %v1324_v28 }
 0x34e   : > { %1354 = vst [vmem:[#allocation2 + $0xd8] sm:$0xff] %v1325_v29  ;;  %v12218_v29 = vld [vmem:[#allocation2 + $0x8] sm:$0xff] }
 0x34f   : > { %1948 = vrot.lane.b32.xlu2 %v11584_v30, %s17296_s24  ;;  %1946 = vrot.lane.b32.xlu1 %v11587_v31, %s17296_s24 }
 0x350   : > { %1901 = vrot.lane.b32.xlu0 %v11655_v54, %s17295_s23 }
 0x351   : > { %v1608_v33 = vpop.permute.xlu2 %1607  ;;  %v1383_v32 = vpop.permute.xlu1 %1382 }
 0x352   : > { %v1387_v36 = vpop.permute.xlu0 %1386  ;;  %v1399_v38 = vsel %vm543_vm6, %v12027_v44, %v1383_v32  ;;  %v1400_v42 = vsel %vm543_vm6, %v1383_v32, %v1385_v13  ;;  %v12232_v32 = vld [vmem:[#allocation2 + $0x20] sm:$0xff] }
 0x353   : > { %v1401_v39 = vsel %vm543_vm6, %v1385_v13, %v1387_v36  ;;  %1432 = vst.msk [vmem:[#allocation2 + $0x160] sm:$0xff] %vm17226_vm15, %v1387_v36  ;;  %vm17228_vm15 = vcmask 867328   ;;  %v12236_v36 = vld [vmem:[#allocation2 + $0x18] sm:$0xff] }
 0x354   : > { %1430 = vst [vmem:[#allocation2 + $0x158] sm:$0xff] %v1401_v39 }
 0x355   : > { %1428 = vst [vmem:[#allocation2 + $0x148] sm:$0xff] %v1399_v38  ;;  %v12240_v38 = vld [vmem:[#allocation2 + $0x10] sm:$0xff] }
 0x356   : > { %1429 = vst [vmem:[#allocation2 + $0x150] sm:$0xff] %v1400_v42 }
 0x357   : > { %1954 = vrot.lane.b32.xlu2 %v11607_v37, %s17296_s24  ;;  %1952 = vrot.lane.b32.xlu1 %v11599_v35, %s17296_s24 }
 0x358   : > { %1950 = vrot.lane.b32.xlu0 %v11596_v34, %s17296_s24 }
 0x359   : > { %v1681_v45 = vpop.permute.xlu2 %1680  ;;  %v1458_v44 = vpop.permute.xlu1 %1457 }
 0x35a   : > { %v1462_v48 = vpop.permute.xlu0 %1461  ;;  %v1474_v50 = vsel %vm563_vm4, %v12040_v57, %v1458_v44  ;;  %v1475_v56 = vsel %vm563_vm4, %v1458_v44, %v1460_v20 }
 0x35b   : > { %v1476_v51 = vsel %vm563_vm4, %v1460_v20, %v1462_v48  ;;  %1507 = vst.msk [vmem:[#allocation2 + $0x1d8] sm:$0xff] %vm17227_vm3, %v1462_v48  ;;  %vm17231_vm3 = vcmask 859136  }
 0x35c   : > { %1505 = vst [vmem:[#allocation2 + $0x1d0] sm:$0xff] %v1476_v51  ;;  %v12255_v51 = vld [vmem:[#allocation2 + $0x30] sm:$0xff] }
 0x35d   : > { %1503 = vst [vmem:[#allocation2 + $0x1c0] sm:$0xff] %v1474_v50  ;;  %v12251_v50 = vld [vmem:[#allocation2 + $0x38] sm:$0xff] }
 0x35e   : > { %1504 = vst [vmem:[#allocation2 + $0x1c8] sm:$0xff] %v1475_v56  ;;  %v12259_v56 = vld [vmem:[#allocation2 + $0x28] sm:$0xff] }
 0x35f   : > { %1960 = vrot.lane.b32.xlu2 %v11625_v43, %s17296_s24  ;;  %1958 = vrot.lane.b32.xlu1 %v11617_v41, %s17296_s24 }
 0x360   : > { %1956 = vrot.lane.b32.xlu0 %v11614_v40, %s17296_s24 }
 0x361   : > { %v1754_v58 = vpop.permute.xlu2 %1753  ;;  %v1533_v57 = vpop.permute.xlu1 %1532 }
 0x362   : > { %v1537_v59 = vpop.permute.xlu0 %1536  ;;  %v1549_v60 = vsel %vm17260_vm9, %v12053_v63, %v1533_v57  ;;  %v1550_v61 = vsel %vm17260_vm9, %v1533_v57, %v1535_v26 }
 0x363   : > { %v1551_v62 = vsel %vm17260_vm9, %v1535_v26, %v1537_v59  ;;  %1577 = vst [vmem:[#allocation2 + $0x238] sm:$0xff] %v1549_v60 }
 0x364   : > { %1580 = vst.msk [vmem:[#allocation2 + $0x248] sm:$0xff] %vm17228_vm15, %v1551_v62  ;;  %vm17232_vm15 = vcmask 850944  }
 0x365   : > { %1578 = vst [vmem:[#allocation2 + $0x240] sm:$0xff] %v1550_v61 }
 0x367   : > { %1966 = vrot.lane.b32.xlu2 %v11643_v49, %s17296_s24  ;;  %1964 = vrot.lane.b32.xlu1 %v11635_v47, %s17296_s24 }
 0x368   : > { %1962 = vrot.lane.b32.xlu0 %v11632_v46, %s17296_s24 }
 0x369   : > { %v1815_v0 = vpop.permute.xlu2 %1814  ;;  %v1606_v63 = vpop.permute.xlu1 %1605 }
 0x36a   : > { %v1610_v1 = vpop.permute.xlu0 %1609  ;;  %v1622_v3 = vsel %vm17259_vm14, %v12066_v6, %v1606_v63  ;;  %v1623_v4 = vsel %vm17259_vm14, %v1606_v63, %v1608_v33  ;;  %v12272_v63 = vld [vmem:[#allocation2 + $0x48] sm:$0xff] }
 0x36b   : > { %v1624_v5 = vsel %vm17259_vm14, %v1608_v33, %v1610_v1  ;;  %1650 = vst [vmem:[#allocation2 + $0x2b0] sm:$0xff] %v1622_v3  ;;  %v12276_v1 = vld [vmem:[#allocation2 + $0x40] sm:$0xff] }
 0x36c   : > { %1653 = vst.msk [vmem:[#allocation2 + $0x2c0] sm:$0xff] %vm17231_vm3, %v1624_v5  ;;  %vm17234_vm3 = vcmask 842752  }
 0x36d   : > { %1651 = vst [vmem:[#allocation2 + $0x2b8] sm:$0xff] %v1623_v4 }
 0x36f   : > { %1972 = vrot.lane.b32.xlu2 %v11668_v55, %s17296_s24  ;;  %1970 = vrot.lane.b32.xlu1 %v11653_v53, %s17296_s24 }
 0x370   : > { %1968 = vrot.lane.b32.xlu0 %v11650_v52, %s17296_s24 }
 0x371   : > { %v1821_v7 = vpop.permute.xlu2 %1820  ;;  %v1679_v6 = vpop.permute.xlu1 %1678 }
 0x372   : > { %v1683_v8 = vpop.permute.xlu0 %1682  ;;  %v1695_v9 = vsel %vm17235_vm12, %v12079_v12, %v1679_v6  ;;  %v1696_v11 = vsel %vm17235_vm12, %v1679_v6, %v1681_v45 }
 0x373   : > { %v1697_v13 = vsel %vm17235_vm12, %v1681_v45, %v1683_v8  ;;  %1723 = vst [vmem:[#allocation2 + $0x328] sm:$0xff] %v1695_v9  ;;  %vm17239_vm12 = vcmask 621568   ;;  %v12285_v9 = vld [vmem:[#allocation2 + $0x68] sm:$0xff] }
 0x374   : > { %1726 = vst.msk [vmem:[#allocation2 + $0x338] sm:$0xff] %vm17232_vm15, %v1697_v13  ;;  %vm17298_vm15 = vcmask 556032   ;;  %v12293_v13 = vld [vmem:[#allocation2 + $0x58] sm:$0xff] }
 0x375   : > { %1724 = vst [vmem:[#allocation2 + $0x330] sm:$0xff] %v1696_v11  ;;  %v12289_v11 = vld [vmem:[#allocation2 + $0x60] sm:$0xff] }
 0x377   : > { %2021 = vrot.lane.b32.xlu2 %v11584_v30, %s17297_s30  ;;  %2019 = vrot.lane.b32.xlu1 %v11587_v31, %s17297_s30 }
 0x378   : > { %1974 = vrot.lane.b32.xlu0 %v11655_v54, %s17296_s24 }
 0x379   : > { %v1827_v14 = vpop.permute.xlu2 %1826  ;;  %v1752_v12 = vpop.permute.xlu1 %1751 }
 0x37a   : > { %v1756_v15 = vpop.permute.xlu0 %1755  ;;  %v1768_v16 = vsel %vm17233_vm0, %v12092_v19, %v1752_v12  ;;  %v1769_v17 = vsel %vm17233_vm0, %v1752_v12, %v1754_v58 }
 0x37b   : > { %v1770_v20 = vsel %vm17233_vm0, %v1754_v58, %v1756_v15  ;;  %1796 = vst [vmem:[#allocation2 + $0x3a0] sm:$0xff] %v1768_v16  ;;  %vm17299_vm0 = vmmov %vm17298_vm15 }
 0x37c   : > { %1799 = vst.msk [vmem:[#allocation2 + $0x3b0] sm:$0xff] %vm17234_vm3, %v1770_v20  ;;  %vm17300_vm3 = vmmov %vm17299_vm0 }
 0x37d   : > { %1797 = vst [vmem:[#allocation2 + $0x3a8] sm:$0xff] %v1769_v17 }
 0x37f   : > { %2027 = vrot.lane.b32.xlu2 %v11607_v37, %s17297_s30  ;;  %2025 = vrot.lane.b32.xlu1 %v11599_v35, %s17297_s30 }
 0x380   : > { %2023 = vrot.lane.b32.xlu0 %v11596_v34, %s17297_s30 }
 0x381   : > { %v12182_v30 = vpop.permute.xlu2 %1875  ;;  %v1813_v31 = vpop.permute.xlu1 %1812 }
 0x382   : > { %v1811_v21 = vpop.permute.xlu0 %1810  ;;  %v1836_v19 = vsel %vm17298_vm15, %v1813_v31, %v1815_v0  ;;  %vm17301_vm15 = vmmov %vm17299_vm0 }
 0x383   : > { %v1834_v22 = vsel %vm17299_vm0, %v11868_v10, %v1811_v21  ;;  %v1835_v23 = vsel %vm17300_vm3, %v1811_v21, %v1813_v31  ;;  %1864 = vst [vmem:[#allocation2 + $0x3f0] sm:$0xff] %v1836_v19  ;;  %vm17302_vm3 = vmmov %vm17299_vm0 }
 0x384   : > { %1862 = vst [vmem:[#allocation2 + $0x3e0] sm:$0xff] %v1834_v22 }
 0x385   : > { %1863 = vst [vmem:[#allocation2 + $0x3e8] sm:$0xff] %v1835_v23 }
 0x387   : > { %2033 = vrot.lane.b32.xlu2 %v11625_v43, %s17297_s30  ;;  %2031 = vrot.lane.b32.xlu1 %v11617_v41, %s17297_s30 }
 0x388   : > { %2029 = vrot.lane.b32.xlu0 %v11614_v40, %s17297_s30 }
 0x389   : > { %v12194_v34 = vpop.permute.xlu2 %1881  ;;  %v1819_v35 = vpop.permute.xlu1 %1818 }
 0x38a   : > { %v1817_v37 = vpop.permute.xlu0 %1816  ;;  %v1839_v10 = vsel %vm17301_vm15, %v1819_v35, %v1821_v7  ;;  %vm17303_vm15 = vmmov %vm17299_vm0 }
 0x38b   : > { %v1837_v24 = vsel %vm17299_vm0, %v1815_v0, %v1817_v37  ;;  %v1838_v26 = vsel %vm17302_vm3, %v1817_v37, %v1819_v35  ;;  %1867 = vst [vmem:[#allocation2 + $0x408] sm:$0xff] %v1839_v10  ;;  %vm17304_vm3 = vmmov %vm17299_vm0  ;;  %v12268_v0 = vld [vmem:[#allocation2 + $0x50] sm:$0xff] }
 0x38c   : > { %1865 = vst [vmem:[#allocation2 + $0x3f8] sm:$0xff] %v1837_v24 }
 0x38d   : > { %1866 = vst [vmem:[#allocation2 + $0x400] sm:$0xff] %v1838_v26 }
 0x38f   : > { %2039 = vrot.lane.b32.xlu2 %v11643_v49, %s17297_s30  ;;  %2037 = vrot.lane.b32.xlu1 %v11635_v47, %s17297_s30 }
 0x390   : > { %2035 = vrot.lane.b32.xlu0 %v11632_v46, %s17297_s30 }
 0x391   : > { %v1888_v40 = vpop.permute.xlu2 %1887  ;;  %v1825_v41 = vpop.permute.xlu1 %1824 }
 0x392   : > { %v1823_v43 = vpop.permute.xlu0 %1822  ;;  %v1842_v25 = vsel %vm17303_vm15, %v1825_v41, %v1827_v14  ;;  %vm17305_vm15 = vmmov %vm17299_vm0 }
 0x393   : > { %v1840_v27 = vsel %vm17299_vm0, %v1821_v7, %v1823_v43  ;;  %v1841_v28 = vsel %vm17304_vm3, %v1823_v43, %v1825_v41  ;;  %1870 = vst [vmem:[#allocation2 + $0x420] sm:$0xff] %v1842_v25  ;;  %vm17307_vm0 = vcmask 547840  }
 0x394   : > { %1868 = vst [vmem:[#allocation2 + $0x410] sm:$0xff] %v1840_v27  ;;  %vm17308_vm3 = vmmov %vm17307_vm0 }
 0x395   : > { %1869 = vst [vmem:[#allocation2 + $0x418] sm:$0xff] %v1841_v28 }
 0x397   : > { %2045 = vrot.lane.b32.xlu2 %v11668_v55, %s17297_s30  ;;  %2043 = vrot.lane.b32.xlu1 %v11653_v53, %s17297_s30  ;;  %v12222_v55 = vld [vmem:[#allocation2] sm:$0xff] }
 0x398   : > { %2041 = vrot.lane.b32.xlu0 %v11650_v52, %s17297_s30 }
 0x399   : > { %v1894_v46 = vpop.permute.xlu2 %1893  ;;  %v12214_v47 = vpop.permute.xlu1 %1873 }
 0x39a   : > { %v1829_v49 = vpop.permute.xlu0 %1828 }
 0x39b   : > { %v1843_v18 = vsel %vm17305_vm15, %v1827_v14, %v1829_v49  ;;  %vm17309_vm15 = vmmov %vm17307_vm0 }
 0x39c   : > { %1872 = vst.msk [vmem:[#allocation2 + $0x428] sm:$0xff] %vm17239_vm12, %v1843_v18  ;;  %vm17254_vm12 = vcmask 375808  }
 0x39f   : > { %2094 = vrot.lane.b32.xlu2 %v12218_v29, %s17306_s15  ;;  %2092 = vrot.lane.b32.xlu1 %v12222_v55, %s17306_s15 }
 0x3a0   : > { %2047 = vrot.lane.b32.xlu0 %v11655_v54, %s17297_s30 }
 0x3a1   : > { %v1900_v52 = vpop.permute.xlu2 %1899  ;;  %v12228_v53 = vpop.permute.xlu1 %1879 }
 0x3a2   : > { %v12230_v33 = vpop.permute.xlu0 %1877 }
 0x3a7   : > { %2100 = vrot.lane.b32.xlu2 %v12232_v32, %s17306_s15  ;;  %2098 = vrot.lane.b32.xlu1 %v12236_v36, %s17306_s15 }
 0x3a8   : > { %2096 = vrot.lane.b32.xlu0 %v12240_v38, %s17306_s15 }
 0x3a9   : > { %v12244_v39 = vpop.permute.xlu2 %1948  ;;  %v1886_v42 = vpop.permute.xlu1 %1885 }
 0x3aa   : > { %v12246_v45 = vpop.permute.xlu0 %1883  ;;  %v1909_v44 = vsel %vm17307_vm0, %v1886_v42, %v1888_v40 }
 0x3ab   : > { %v1908_v48 = vsel %vm17308_vm3, %v12246_v45, %v1886_v42  ;;  %1937 = vst [vmem:[#allocation2 + $0x468] sm:$0xff] %v1909_v44  ;;  %vm17310_vm3 = vmmov %vm17307_vm0 }
 0x3ac   : > { %1936 = vst [vmem:[#allocation2 + $0x460] sm:$0xff] %v1908_v48 }
 0x3af   : > { %2106 = vrot.lane.b32.xlu2 %v12251_v50, %s17306_s15  ;;  %2104 = vrot.lane.b32.xlu1 %v12255_v51, %s17306_s15 }
 0x3b0   : > { %2102 = vrot.lane.b32.xlu0 %v12259_v56, %s17306_s15 }
 0x3b1   : > { %v12263_v58 = vpop.permute.xlu2 %1954  ;;  %v1892_v57 = vpop.permute.xlu1 %1891 }
 0x3b2   : > { %v1890_v59 = vpop.permute.xlu0 %1889  ;;  %v1912_v60 = vsel %vm17309_vm15, %v1892_v57, %v1894_v46  ;;  %vm17311_vm15 = vmmov %vm17307_vm0 }
 0x3b3   : > { %v1910_v61 = vsel %vm17307_vm0, %v1888_v40, %v1890_v59  ;;  %v1911_v62 = vsel %vm17310_vm3, %v1890_v59, %v1892_v57  ;;  %1940 = vst [vmem:[#allocation2 + $0x480] sm:$0xff] %v1912_v60  ;;  %vm17312_vm3 = vmmov %vm17307_vm0 }
 0x3b4   : > { %1938 = vst [vmem:[#allocation2 + $0x470] sm:$0xff] %v1910_v61 }
 0x3b5   : > { %1939 = vst [vmem:[#allocation2 + $0x478] sm:$0xff] %v1911_v62 }
 0x3b7   : > { %2112 = vrot.lane.b32.xlu2 %v12268_v0, %s17306_s15  ;;  %2110 = vrot.lane.b32.xlu1 %v12272_v63, %s17306_s15 }
 0x3b8   : > { %2108 = vrot.lane.b32.xlu0 %v12276_v1, %s17306_s15 }
 0x3b9   : > { %v12280_v3 = vpop.permute.xlu2 %1960  ;;  %v1898_v4 = vpop.permute.xlu1 %1897 }
 0x3ba   : > { %v1896_v5 = vpop.permute.xlu0 %1895  ;;  %v1915_v7 = vsel %vm17311_vm15, %v1898_v4, %v1900_v52  ;;  %vm17238_vm15 = vcmask 613376  }
 0x3bb   : > { %v1913_v6 = vsel %vm17307_vm0, %v1894_v46, %v1896_v5  ;;  %v1914_v8 = vsel %vm17312_vm3, %v1896_v5, %v1898_v4  ;;  %1943 = vst [vmem:[#allocation2 + $0x498] sm:$0xff] %v1915_v7  ;;  %vm17240_vm3 = vcmask 605184  }
 0x3bc   : > { %1941 = vst [vmem:[#allocation2 + $0x488] sm:$0xff] %v1913_v6 }
 0x3bd   : > { %1942 = vst [vmem:[#allocation2 + $0x490] sm:$0xff] %v1914_v8 }
 0x3bf   : > { %2118 = vrot.lane.b32.xlu2 %v12285_v9, %s17306_s15  ;;  %2116 = vrot.lane.b32.xlu1 %v12289_v11, %s17306_s15 }
 0x3c0   : > { %2114 = vrot.lane.b32.xlu0 %v12293_v13, %s17306_s15 }
 0x3c1   : > { %v1967_v14 = vpop.permute.xlu2 %1966  ;;  %v12297_v12 = vpop.permute.xlu1 %1946 }
 0x3c2   : > { %v1902_v15 = vpop.permute.xlu0 %1901 }
 0x3c3   : > { %v1916_v16 = vsel %vm17307_vm0, %v1900_v52, %v1902_v15  ;;  %vm17251_vm0 = vcmask 596992  }
 0x3c4   : > { %1945 = vst.msk [vmem:[#allocation2 + $0x4a0] sm:$0xff] %vm17238_vm15, %v1916_v16  ;;  %vm17320_vm15 = vcmask 310272  }
 0x3c7   : > { %2167 = vrot.lane.b32.xlu2 %v12218_v29, %s17313_s0  ;;  %2165 = vrot.lane.b32.xlu1 %v12222_v55, %s17313_s0 }
 0x3c8   : > { %2120 = vrot.lane.b32.xlu0 %v11655_v54, %s17306_s15 }
 0x3c9   : > { %v1973_v17 = vpop.permute.xlu2 %1972  ;;  %v12307_v20 = vpop.permute.xlu1 %1952 }
 0x3ca   : > { %v12309_v31 = vpop.permute.xlu0 %1950 }
 0x3cf   : > { %2173 = vrot.lane.b32.xlu2 %v12232_v32, %s17313_s0  ;;  %2171 = vrot.lane.b32.xlu1 %v12236_v36, %s17313_s0 }
 0x3d0   : > { %2169 = vrot.lane.b32.xlu0 %v12240_v38, %s17313_s0 }
 0x3d1   : > { %v12317_v21 = vpop.permute.xlu2 %2021  ;;  %v12319_v19 = vpop.permute.xlu1 %1958 }
 0x3d2   : > { %v12321_v22 = vpop.permute.xlu0 %1956 }
 0x3d7   : > { %2179 = vrot.lane.b32.xlu2 %v12251_v50, %s17313_s0  ;;  %2177 = vrot.lane.b32.xlu1 %v12255_v51, %s17313_s0 }
 0x3d8   : > { %2175 = vrot.lane.b32.xlu0 %v12259_v56, %s17313_s0 }
 0x3d9   : > { %v12329_v23 = vpop.permute.xlu2 %2027  ;;  %v1965_v35 = vpop.permute.xlu1 %1964 }
 0x3da   : > { %v12331_v37 = vpop.permute.xlu0 %1962  ;;  %v1985_v10 = vsel %vm703_vm2, %v1965_v35, %v1967_v14 }
 0x3db   : > { %v1984_v24 = vsel %vm703_vm2, %v12331_v37, %v1965_v35  ;;  %2013 = vst [vmem:[#allocation2 + $0x4f8] sm:$0xff] %v1985_v10 }
 0x3dc   : > { %2012 = vst [vmem:[#allocation2 + $0x4f0] sm:$0xff] %v1984_v24 }
 0x3df   : > { %2185 = vrot.lane.b32.xlu2 %v12268_v0, %s17313_s0  ;;  %2183 = vrot.lane.b32.xlu1 %v12272_v63, %s17313_s0 }
 0x3e0   : > { %2181 = vrot.lane.b32.xlu0 %v12276_v1, %s17313_s0 }
 0x3e1   : > { %v12342_v26 = vpop.permute.xlu2 %2033  ;;  %v1971_v40 = vpop.permute.xlu1 %1970 }
 0x3e2   : > { %v1969_v41 = vpop.permute.xlu0 %1968  ;;  %v1988_v43 = vsel %vm703_vm2, %v1971_v40, %v1973_v17 }
 0x3e3   : > { %v1986_v25 = vsel %vm703_vm2, %v1967_v14, %v1969_v41  ;;  %v1987_v27 = vsel %vm703_vm2, %v1969_v41, %v1971_v40  ;;  %2016 = vst [vmem:[#allocation2 + $0x510] sm:$0xff] %v1988_v43 }
 0x3e4   : > { %2014 = vst [vmem:[#allocation2 + $0x500] sm:$0xff] %v1986_v25 }
 0x3e5   : > { %2015 = vst [vmem:[#allocation2 + $0x508] sm:$0xff] %v1987_v27 }
 0x3e7   : > { %2191 = vrot.lane.b32.xlu2 %v12285_v9, %s17313_s0  ;;  %2189 = vrot.lane.b32.xlu1 %v12289_v11, %s17313_s0 }
 0x3e8   : > { %2187 = vrot.lane.b32.xlu0 %v12293_v13, %s17313_s0 }
 0x3e9   : > { %v2040_v28 = vpop.permute.xlu2 %2039  ;;  %v12353_v46 = vpop.permute.xlu1 %2019 }
 0x3ea   : > { %v1975_v49 = vpop.permute.xlu0 %1974 }
 0x3eb   : > { %v1989_v18 = vsel %vm703_vm2, %v1973_v17, %v1975_v49 }
 0x3ec   : > { %2018 = vst.msk [vmem:[#allocation2 + $0x518] sm:$0xff] %vm17240_vm3, %v1989_v18  ;;  %vm17321_vm3 = vmmov %vm17320_vm15 }
 0x3ef   : > { %2240 = vrot.lane.b32.xlu2 %v12218_v29, %s17314_s1  ;;  %2238 = vrot.lane.b32.xlu1 %v12222_v55, %s17314_s1 }
 0x3f0   : > { %2193 = vrot.lane.b32.xlu0 %v11655_v54, %s17313_s0 }
 0x3f1   : > { %v2046_v52 = vpop.permute.xlu2 %2045  ;;  %v12363_v42 = vpop.permute.xlu1 %2025 }
 0x3f2   : > { %v12365_v44 = vpop.permute.xlu0 %2023 }
 0x3f7   : > { %2246 = vrot.lane.b32.xlu2 %v12232_v32, %s17314_s1  ;;  %2244 = vrot.lane.b32.xlu1 %v12236_v36, %s17314_s1 }
 0x3f8   : > { %2242 = vrot.lane.b32.xlu0 %v12240_v38, %s17314_s1 }
 0x3f9   : > { %v12373_v48 = vpop.permute.xlu2 %2094  ;;  %v12375_v57 = vpop.permute.xlu1 %2031 }
 0x3fa   : > { %v12377_v59 = vpop.permute.xlu0 %2029 }
 0x3ff   : > { %2252 = vrot.lane.b32.xlu2 %v12251_v50, %s17314_s1  ;;  %2250 = vrot.lane.b32.xlu1 %v12255_v51, %s17314_s1 }
 0x400   : > { %2248 = vrot.lane.b32.xlu0 %v12259_v56, %s17314_s1 }
 0x401   : > { %v12385_v60 = vpop.permute.xlu2 %2100  ;;  %v12387_v61 = vpop.permute.xlu1 %2037 }
 0x402   : > { %17315 = vst [vmem:[#allocation8_spill] sm:$0xff] %v12387_v61  ;;  %v12389_v62 = vpop.permute.xlu0 %2035  ;;  %v2058_v4 = vsel %vm723_vm13, %v12387_v61, %v2040_v28 }
 0x403   : > { %2086 = vst [vmem:[#allocation2 + $0x570] sm:$0xff] %v2058_v4 }
 0x407   : > { %2258 = vrot.lane.b32.xlu2 %v12268_v0, %s17314_s1  ;;  %2256 = vrot.lane.b32.xlu1 %v12272_v63, %s17314_s1 }
 0x408   : > { %2254 = vrot.lane.b32.xlu0 %v12276_v1, %s17314_s1 }
 0x409   : > { %v12399_v5 = vpop.permute.xlu2 %2106  ;;  %v2044_v7 = vpop.permute.xlu1 %2043 }
 0x40a   : > { %v2042_v6 = vpop.permute.xlu0 %2041  ;;  %v2061_v8 = vsel %vm723_vm13, %v2044_v7, %v2046_v52 }
 0x40b   : > { %v2059_v14 = vsel %vm723_vm13, %v2040_v28, %v2042_v6  ;;  %v2060_v15 = vsel %vm723_vm13, %v2042_v6, %v2044_v7  ;;  %2089 = vst [vmem:[#allocation2 + $0x588] sm:$0xff] %v2061_v8 }
 0x40c   : > { %2087 = vst [vmem:[#allocation2 + $0x578] sm:$0xff] %v2059_v14 }
 0x40d   : > { %2088 = vst [vmem:[#allocation2 + $0x580] sm:$0xff] %v2060_v15 }
 0x40f   : > { %2264 = vrot.lane.b32.xlu2 %v12285_v9, %s17314_s1  ;;  %2262 = vrot.lane.b32.xlu1 %v12289_v11, %s17314_s1 }
 0x410   : > { %2260 = vrot.lane.b32.xlu0 %v12293_v13, %s17314_s1 }
 0x411   : > { %v12410_v16 = vpop.permute.xlu2 %2112  ;;  %v12412_v17 = vpop.permute.xlu1 %2092 }
 0x412   : > { %17316 = vst [vmem:[#allocation9_spill] sm:$0xff] %v12410_v16  ;;  %v2048_v35 = vpop.permute.xlu0 %2047 }
 0x413   : > { %v2062_v10 = vsel %vm723_vm13, %v2046_v52, %v2048_v35 }
 0x414   : > { %2091 = vst.msk [vmem:[#allocation2 + $0x590] sm:$0xff] %vm17251_vm0, %v2062_v10  ;;  %vm17329_vm0 = vcmask 310272  }
 0x417   : > { %2313 = vrot.lane.b32.xlu2 %v12218_v29, %s17317_s2  ;;  %2311 = vrot.lane.b32.xlu1 %v12222_v55, %s17317_s2 }
 0x418   : > { %2266 = vrot.lane.b32.xlu0 %v11655_v54, %s17314_s1 }
 0x419   : > { %v2119_v24 = vpop.permute.xlu2 %2118  ;;  %v12422_v40 = vpop.permute.xlu1 %2098 }
 0x41a   : > { %v12424_v41 = vpop.permute.xlu0 %2096 }
 0x41f   : > { %2319 = vrot.lane.b32.xlu2 %v12232_v32, %s17317_s2  ;;  %2317 = vrot.lane.b32.xlu1 %v12236_v36, %s17317_s2 }
 0x420   : > { %2315 = vrot.lane.b32.xlu0 %v12240_v38, %s17317_s2 }
 0x421   : > { %v12432_v29 = vpop.permute.xlu1 %2104  ;;  %v12436_v43 = vpop.permute.xlu2 %2167 }
 0x422   : > { %v12434_v55 = vpop.permute.xlu0 %2102 }
 0x427   : > { %2325 = vrot.lane.b32.xlu2 %v12251_v50, %s17317_s2  ;;  %2323 = vrot.lane.b32.xlu1 %v12255_v51, %s17317_s2 }
 0x428   : > { %2321 = vrot.lane.b32.xlu0 %v12259_v56, %s17317_s2 }
 0x429   : > { %v12444_v32 = vpop.permute.xlu1 %2110  ;;  %v12448_v38 = vpop.permute.xlu2 %2173 }
 0x42a   : > { %v12446_v36 = vpop.permute.xlu0 %2108 }
 0x42f   : > { %2331 = vrot.lane.b32.xlu2 %v12268_v0, %s17317_s2  ;;  %2329 = vrot.lane.b32.xlu1 %v12272_v63, %s17317_s2 }
 0x430   : > { %2327 = vrot.lane.b32.xlu0 %v12276_v1, %s17317_s2 }
 0x431   : > { %v12456_v50 = vpop.permute.xlu1 %2116  ;;  %v12462_v25 = vpop.permute.xlu2 %2179 }
 0x432   : > { %17318 = vst [vmem:[#allocation10_spill] sm:$0xff] %v12456_v50  ;;  %v12458_v51 = vpop.permute.xlu0 %2114  ;;  %v2134_v56 = vsel %vm17320_vm15, %v12456_v50, %v2119_v24  ;;  %vm17255_vm15 = vcmask 367616  }
 0x433   : > { %17319 = vst [vmem:[#allocation11_spill] sm:$0xff] %v12458_v51 }
 0x434   : > { %2162 = vst [vmem:[#allocation2 + $0x600] sm:$0xff] %v2134_v56 }
 0x437   : > { %2337 = vrot.lane.b32.xlu2 %v12285_v9, %s17317_s2  ;;  %2335 = vrot.lane.b32.xlu1 %v12289_v11, %s17317_s2 }
 0x438   : > { %2333 = vrot.lane.b32.xlu0 %v12293_v13, %s17317_s2 }
 0x439   : > { %v2166_v0 = vpop.permute.xlu1 %2165  ;;  %v12474_v27 = vpop.permute.xlu2 %2185 }
 0x43a   : > { %v2121_v63 = vpop.permute.xlu0 %2120  ;;  %17322 = vst [vmem:[#allocation12_spill] sm:$0xff] %v12474_v27 }
 0x43b   : > { %v2135_v1 = vsel %vm17321_vm3, %v2119_v24, %v2121_v63  ;;  %vm17256_vm3 = vcmask 359424  }
 0x43c   : > { %2164 = vst.msk [vmem:[#allocation2 + $0x608] sm:$0xff] %vm17254_vm12, %v2135_v1  ;;  %vm17331_vm12 = vcmask 310272  }
 0x440   : > { %2339 = vrot.lane.b32.xlu0 %v11655_v54, %s17317_s2 }
 0x441   : > { %v12476_v28 = vpop.permute.xlu1 %2171  ;;  %v12484_v13 = vpop.permute.xlu2 %2191 }
 0x442   : > { %v12478_v9 = vpop.permute.xlu0 %2169  ;;  %17323 = vst [vmem:[#allocation13_spill] sm:$0xff] %v12484_v13 }
 0x449   : > { %v12480_v11 = vpop.permute.xlu1 %2177  ;;  %v2241_v4 = vpop.permute.xlu2 %2240 }
 0x44a   : > { %v12482_v49 = vpop.permute.xlu0 %2175 }
 0x451   : > { %v12486_v18 = vpop.permute.xlu1 %2183  ;;  %v12494_v6 = vpop.permute.xlu2 %2246 }
 0x452   : > { %v12488_v52 = vpop.permute.xlu0 %2181 }
 0x459   : > { %v12490_v7 = vpop.permute.xlu1 %2189  ;;  %v12499_v35 = vpop.permute.xlu2 %2252 }
 0x45a   : > { %17324 = vst [vmem:[#allocation14_spill] sm:$0xff] %v12490_v7  ;;  %v12492_v54 = vpop.permute.xlu0 %2187 }
 0x45b   : > { %17325 = vst [vmem:[#allocation15_spill] sm:$0xff] %v12492_v54 }
 0x461   : > { %v2239_v8 = vpop.permute.xlu1 %2238  ;;  %v12505_v1 = vpop.permute.xlu2 %2258 }
 0x462   : > { %v2194_v14 = vpop.permute.xlu0 %2193  ;;  %17326 = vst [vmem:[#allocation16_spill] sm:$0xff] %v12505_v1  ;;  %v2268_v1 = vsel %vm783_vm8, %v2239_v8, %v2241_v4 }
 0x463   : > { %v2208_v15 = vsel %vm763_vm10, %v12484_v13, %v2194_v14 }
 0x464   : > { %2237 = vst.msk [vmem:[#allocation2 + $0x680] sm:$0xff] %vm17255_vm15, %v2208_v15 }
 0x469   : > { %v2245_v10 = vpop.permute.xlu1 %2244  ;;  %v12511_v51 = vpop.permute.xlu2 %2264 }
 0x46a   : > { %v2243_v24 = vpop.permute.xlu0 %2242 }
 0x471   : > { %v12501_v56 = vpop.permute.xlu1 %2250  ;;  %v2314_v15 = vpop.permute.xlu2 %2313 }
 0x472   : > { %v12503_v63 = vpop.permute.xlu0 %2248 }
 0x479   : > { %v12507_v2 = vpop.permute.xlu1 %2256  ;;  %v12527_v61 = vpop.permute.xlu2 %2319 }
 0x47a   : > { %v12509_v50 = vpop.permute.xlu0 %2254 }
 0x481   : > { %v12513_v16 = vpop.permute.xlu1 %2262 }
 0x482   : > { %17327 = vst [vmem:[#allocation17_spill] sm:$0xff] %v12513_v16  ;;  %v12515_v14 = vpop.permute.xlu0 %2260  ;;  %v2195_v16 = vsel %vm763_vm10, %v2166_v0, %v12436_v43  ;;  %v2271_v0 = vsel %vm783_vm8, %v2245_v10, %v12494_v6 }
 0x483   : > { %17328 = vst [vmem:[#allocation18_spill] sm:$0xff] %v12515_v14  ;;  %v2122_v14 = vsel %vm17329_vm0, %v12412_v17, %v12373_v48  ;;  %v1976_v17 = vsel %vm703_vm2, %v12297_v12, %v12244_v39  ;;  %vm17330_vm0 = vcmask 547840   ;;  %v2196_v12 = vsel %vm763_vm10, %v12436_v43, %v12478_v9 }
 0x489   : > { %v2312_v13 = vpop.permute.xlu1 %2311 }
 0x48a   : > { %v2267_v7 = vpop.permute.xlu0 %2266  ;;  %v2341_v54 = vsel %vm803_vm5, %v2312_v13, %v2314_v15 }
 0x48b   : > { %v2281_v27 = vsel %vm783_vm8, %v12511_v51, %v2267_v7  ;;  %2622 = vmatpush.msrb.mxu2 %v2341_v54  ;;  %v2049_v7 = vsel %vm723_vm13, %v12353_v46, %v12317_v21  ;;  %v2269_v46 = vsel %vm783_vm8, %v2241_v4, %v2243_v24  ;;  %v2197_v4 = vsel %vm763_vm10, %v12478_v9, %v12476_v28 }
 0x48c   : > { %2310 = vst.msk [vmem:[#allocation2 + $0x6f8] sm:$0xff] %vm17256_vm3, %v2281_v27 }
 0x48d   : > { %2623 = vmatpush.msrb.mxu2 %v2268_v1  ;;  %v2270_v1 = vsel %vm783_vm8, %v2243_v24, %v2245_v10  ;;  %v2498_v10 = vld [vmem:[#allocation2 + $0x3c0] sm:$0xff] }
 0x48f   : > { %2624 = vmatpush.msrb.mxu2 %v2195_v16 }
 0x491   : > { %v2318_v13 = vpop.permute.xlu1 %2317  ;;  %2625 = vmatpush.msrb.mxu2 %v2122_v14  ;;  %v1903_v14 = vsel %vm17330_vm0, %v12214_v47, %v12182_v30  ;;  %v2125_v47 = vsel %vm17331_vm12, %v12422_v40, %v12385_v60  ;;  %vm17332_vm0 = vmmov %vm17331_vm12  ;;  %vm17334_vm12 = vcmask 547840  }
 0x492   : > { %v2316_v54 = vpop.permute.xlu0 %2315  ;;  %v2344_v27 = vsel %vm803_vm5, %v2318_v13, %v12527_v61  ;;  %v2123_v24 = vsel %vm17332_vm0, %v12373_v48, %v12424_v41  ;;  %vm17333_vm15 = vmmov %vm17332_vm0  ;;  %v2051_v48 = vsel %vm723_vm13, %v12365_v44, %v12363_v42 }
 0x493   : > { %v2342_v8 = vsel %vm803_vm5, %v2314_v15, %v2316_v54  ;;  %v2343_v16 = vsel %vm803_vm5, %v2316_v54, %v2318_v13  ;;  %2626 = vmatpush.msrb.mxu2 %v2049_v7  ;;  %2691 = vmatpush.msra.mxu1 %v2344_v27  ;;  %v2198_v15 = vsel %vm763_vm10, %v12476_v28, %v12448_v38  ;;  %v2484_v13 = vld [vmem:[#allocation2 + $0x348] sm:$0xff]  ;;  %v2456_v27 = vld [vmem:[#allocation2 + $0x258] sm:$0xff]  ;;  %vm17336_vm0 = vmmov %vm17334_vm12 }
 0x494   : > { %2645 = vmatpush.msrb.mxu3 %v2342_v8  ;;  %2668 = vmatpush.msra.mxu0 %v2343_v16  ;;  %v2124_v43 = vsel %vm17333_vm15, %v12424_v41, %v12422_v40  ;;  %v2052_v28 = vsel %vm723_vm13, %v12363_v42, %v12329_v23  ;;  %v2050_v7 = vsel %vm723_vm13, %v12317_v21, %v12365_v44  ;;  %v2470_v41 = vld [vmem:[#allocation2 + $0x2d0] sm:$0xff]  ;;  %v12587_v44 = vpop.permute.xlu2 %2325  ;;  %vm17335_vm15 = vmmov %vm17334_vm12  ;;  %v2499_v16 = vld [vmem:[#allocation2 + $0x3c8] sm:$0xff] }
 0x495   : > { %2627 = vmatpush.msrb.mxu2 %v1976_v17  ;;  %2692 = vmatpush.msra.mxu1 %v2271_v0  ;;  %v1979_v40 = vsel %vm703_vm2, %v12307_v20, %v12263_v58  ;;  %v1977_v54 = vsel %vm703_vm2, %v12244_v39, %v12309_v31  ;;  %v1978_v21 = vsel %vm703_vm2, %v12309_v31, %v12307_v20  ;;  %v2442_v20 = vld [vmem:[#allocation2 + $0x1e0] sm:$0xff]  ;;  %v2501_v31 = vld [vmem:[#allocation2 + $0x3d8] sm:$0xff]  ;;  %v2500_v17 = vld [vmem:[#allocation2 + $0x3d0] sm:$0xff] }
 0x496   : > { %2646 = vmatpush.msrb.mxu3 %v2269_v46  ;;  %2669 = vmatpush.msra.mxu0 %v2270_v1  ;;  %v1906_v42 = vsel %vm17334_vm12, %v12228_v53, %v12194_v34  ;;  %v1904_v8 = vsel %vm17335_vm15, %v12182_v30, %v12230_v33  ;;  %v1905_v39 = vsel %vm17336_vm0, %v12230_v33, %v12228_v53  ;;  %v2428_v46 = vld [vmem:[#allocation2 + $0x168] sm:$0xff]  ;;  %v2487_v30 = vld [vmem:[#allocation2 + $0x360] sm:$0xff]  ;;  %v2485_v1 = vld [vmem:[#allocation2 + $0x350] sm:$0xff]  ;;  %vm17337_vm12 = vcmask 310272  }
 0x497   : > { %2628 = vmatpush.msrb.mxu2 %v1903_v14  ;;  %2693 = vmatpush.msra.mxu1 %v2198_v15  ;;  %v2486_v14 = vld [vmem:[#allocation2 + $0x358] sm:$0xff]  ;;  %v2414_v53 = vld [vmem:[#allocation2 + $0xf0] sm:$0xff]  ;;  %v2473_v33 = vld [vmem:[#allocation2 + $0x2e8] sm:$0xff]  ;;  %vm2382_vm15 = vcmask 351232  }
 0x498   : > { %2647 = vmatpush.msrb.mxu3 %v2196_v12  ;;  %2670 = vmatpush.msra.mxu0 %v2197_v4  ;;  %v2471_v15 = vld [vmem:[#allocation2 + $0x2d8] sm:$0xff]  ;;  %v2472_v12 = vld [vmem:[#allocation2 + $0x2e0] sm:$0xff] }
 0x499   : > { %2629 = vmatpush.msrb.mxu2 %v2498_v10  ;;  %2694 = vmatpush.msra.mxu1 %v2125_v47  ;;  %v2400_v4 = vld [vmem:[#allocation2 + $0x78] sm:$0xff]  ;;  %v2459_v47 = vld [vmem:[#allocation2 + $0x270] sm:$0xff]  ;;  %v2457_v10 = vld [vmem:[#allocation2 + $0x260] sm:$0xff] }
 0x49a   : > { %v12567_v9 = vpop.permute.xlu0 %2321  ;;  %2648 = vmatpush.msrb.mxu3 %v2123_v24  ;;  %2671 = vmatpush.msra.mxu0 %v2124_v43  ;;  %v2458_v24 = vld [vmem:[#allocation2 + $0x268] sm:$0xff] }
 0x49b   : > { %2630 = vmatpush.msrb.mxu2 %v2484_v13  ;;  %2695 = vmatpush.msra.mxu1 %v2052_v28  ;;  %v2386_v28 = vld [vmem:[#allocation2] sm:$0xff]  ;;  %v2445_v13 = vld [vmem:[#allocation2 + $0x1f8] sm:$0xff] }
 0x49c   : > { %2649 = vmatpush.msrb.mxu3 %v2050_v7  ;;  %2672 = vmatpush.msra.mxu0 %v2051_v48  ;;  %v12597_v43 = vpop.permute.xlu2 %2331  ;;  %v2443_v7 = vld [vmem:[#allocation2 + $0x1e8] sm:$0xff]  ;;  %v2444_v48 = vld [vmem:[#allocation2 + $0x1f0] sm:$0xff] }
 0x49d   : > { %2631 = vmatpush.msrb.mxu2 %v2470_v41  ;;  %2696 = vmatpush.msra.mxu1 %v1979_v40  ;;  %v2345_v40 = vsel %vm803_vm5, %v12527_v61, %v12567_v9  ;;  %v2199_v61 = vsel %vm763_vm10, %v12448_v38, %v12482_v49  ;;  %v2053_v38 = vsel %vm723_vm13, %v12329_v23, %v12377_v59 }
 0x49e   : > { %2650 = vmatpush.msrb.mxu3 %v1977_v54  ;;  %2673 = vmatpush.msra.mxu0 %v1978_v21  ;;  %v2431_v54 = vld [vmem:[#allocation2 + $0x180] sm:$0xff]  ;;  %v2429_v21 = vld [vmem:[#allocation2 + $0x170] sm:$0xff]  ;;  %v1980_v23 = vsel %vm703_vm2, %v12263_v58, %v12321_v22  ;;  %v1907_v58 = vsel %vm17336_vm0, %v12194_v34, %v12246_v45  ;;  %v2127_v34 = vsel %vm17337_vm12, %v12434_v55, %v12432_v29  ;;  %vm17338_vm0 = vmmov %vm17337_vm12 }
 0x49f   : > { %2632 = vmatpush.msrb.mxu2 %v2456_v27  ;;  %2697 = vmatpush.msra.mxu1 %v1906_v42  ;;  %v2430_v42 = vld [vmem:[#allocation2 + $0x178] sm:$0xff]  ;;  %v2272_v27 = vsel %vm783_vm8, %v12494_v6, %v12503_v63  ;;  %v2126_v6 = vsel %vm17337_vm12, %v12385_v60, %v12434_v55  ;;  %v2502_v45 = vld [vmem:[#allocation2 + $0x3e0] sm:$0xff]  ;;  %vm17339_vm3 = vmmov %vm17338_vm0 }
 0x4a0   : > { %2651 = vmatpush.msrb.mxu3 %v1904_v8  ;;  %2674 = vmatpush.msra.mxu0 %v1905_v39  ;;  %v2417_v8 = vld [vmem:[#allocation2 + $0x108] sm:$0xff]  ;;  %v2415_v39 = vld [vmem:[#allocation2 + $0xf8] sm:$0xff]  ;;  %vm17350_vm12 = vmmov %vm17338_vm0 }
 0x4a1   : > { %2633 = vmatpush.msrb.mxu2 %v2442_v20  ;;  %2698 = vmatpush.msra.mxu1 %v2501_v31  ;;  %v2416_v20 = vld [vmem:[#allocation2 + $0x100] sm:$0xff]  ;;  %v2403_v31 = vld [vmem:[#allocation2 + $0x90] sm:$0xff]  ;;  %v2488_v55 = vld [vmem:[#allocation2 + $0x368] sm:$0xff] }
 0x4a2   : > { %v12595_v0 = vpop.permute.xlu0 %2327  ;;  %2652 = vmatpush.msrb.mxu3 %v2499_v16  ;;  %2675 = vmatpush.msra.mxu0 %v2500_v17  ;;  %v2324_v16 = vpop.permute.xlu1 %2323  ;;  %v2401_v17 = vld [vmem:[#allocation2 + $0x80] sm:$0xff] }
 0x4a3   : > { %2634 = vmatpush.msrb.mxu2 %v2428_v46  ;;  %2699 = vmatpush.msra.mxu1 %v2487_v30  ;;  %v2402_v46 = vld [vmem:[#allocation2 + $0x88] sm:$0xff]  ;;  %v2389_v30 = vld [vmem:[#allocation2 + $0x18] sm:$0xff]  ;;  %v2347_v60 = vsel %vm803_vm5, %v2324_v16, %v12587_v44 }
 0x4a4   : > { %2653 = vmatpush.msrb.mxu3 %v2485_v1  ;;  %2676 = vmatpush.msra.mxu0 %v2486_v14  ;;  %v2387_v1 = vld [vmem:[#allocation2 + $0x8] sm:$0xff]  ;;  %v2388_v14 = vld [vmem:[#allocation2 + $0x10] sm:$0xff] }
 0x4a5   : > { %2635 = vmatpush.msrb.mxu2 %v2414_v53  ;;  %2700 = vmatpush.msra.mxu1 %v2473_v33  ;;  %v12616_v53 = vpop.permute.xlu2 %2337  ;;  %v2346_v33 = vsel %vm803_vm5, %v12567_v9, %v2324_v16  ;;  %v2273_v9 = vsel %vm783_vm8, %v12503_v63, %v12501_v56  ;;  %v2200_v63 = vsel %vm763_vm10, %v12482_v49, %v12480_v11  ;;  %v12689_v16 = vld [vmem:[%s17340_s3 + $0x8] sm:$0xff] }
 0x4a6   : > { %2654 = vmatpush.msrb.mxu3 %v2471_v15  ;;  %2677 = vmatpush.msra.mxu0 %v2472_v12  ;;  %v2348_v12 = vsel %vm803_vm5, %v12587_v44, %v12595_v0  ;;  %v2274_v44 = vsel %vm783_vm8, %v12501_v56, %v12499_v35  ;;  %v2201_v56 = vsel %vm763_vm10, %v12480_v11, %v12462_v25 }
 0x4a7   : > { %2636 = vmatpush.msrb.mxu2 %v2400_v4  ;;  %2701 = vmatpush.msra.mxu1 %v2459_v47  ;;  %v2275_v47 = vsel %vm783_vm8, %v12499_v35, %v12509_v50  ;;  %v2202_v35 = vsel %vm763_vm10, %v12462_v25, %v12488_v52  ;;  %v2128_v49 = vsel %vm17338_vm0, %v12432_v29, %v12399_v5 }
 0x4a8   : > { %2655 = vmatpush.msrb.mxu3 %v2457_v10  ;;  %2678 = vmatpush.msra.mxu0 %v2458_v24  ;;  %v2129_v11 = vsel %vm17339_vm3, %v12399_v5, %v12446_v36  ;;  %v2054_v25 = vsel %vm723_vm13, %v12377_v59, %v12375_v57  ;;  %v2055_v10 = vsel %vm723_vm13, %v12375_v57, %v12342_v26  ;;  %v2474_v59 = vld [vmem:[#allocation2 + $0x2f0] sm:$0xff]  ;;  %vm17341_vm3 = vmmov %vm17338_vm0 }
 0x4a9   : > { %2637 = vmatpush.msrb.mxu2 %v2386_v28  ;;  %2702 = vmatpush.msra.mxu1 %v2445_v13  ;;  %v2056_v29 = vsel %vm723_vm13, %v12342_v26, %v12389_v62  ;;  %v1981_v5 = vsel %vm703_vm2, %v12321_v22, %v12319_v19  ;;  %v1982_v24 = vsel %vm703_vm2, %v12319_v19, %v12280_v3  ;;  %v2460_v26 = vld [vmem:[#allocation2 + $0x278] sm:$0xff]  ;;  %v2517_v28 = vld [vmem:[#allocation2 + $0x460] sm:$0xff]  ;;  %v2518_v13 = vld [vmem:[#allocation2 + $0x468] sm:$0xff] }
 0x4aa   : > { %v12602_v41 = vpop.permute.xlu0 %2333  ;;  %2656 = vmatpush.msrb.mxu3 %v2443_v7  ;;  %2679 = vmatpush.msra.mxu0 %v2444_v48  ;;  %v1983_v57 = vsel %vm703_vm2, %v12280_v3, %v12331_v37  ;;  %v12682_v22 = vld [vmem:[%s17340_s3] sm:$0xff]  ;;  %v2519_v7 = vld [vmem:[#allocation2 + $0x470] sm:$0xff]  ;;  %v2503_v19 = vld [vmem:[#allocation2 + $0x3e8] sm:$0xff]  ;;  %s17356_s3 = smov 127  }
 0x4ab   : > { %2714 = vmatpush.msra.mxu2 %v2345_v40  ;;  %2703 = vmatpush.msra.mxu1 %v2431_v54  ;;  %v2446_v3 = vld [vmem:[#allocation2 + $0x200] sm:$0xff]  ;;  %v2504_v37 = vld [vmem:[#allocation2 + $0x3f0] sm:$0xff]  ;;  %v2505_v48 = vld [vmem:[#allocation2 + $0x3f8] sm:$0xff] }
 0x4ac   : > { %2657 = vmatpush.msrb.mxu3 %v2429_v21  ;;  %2680 = vmatpush.msra.mxu0 %v2430_v42  ;;  %v2489_v40 = vld [vmem:[#allocation2 + $0x370] sm:$0xff]  ;;  %v2432_v54 = vld [vmem:[#allocation2 + $0x188] sm:$0xff]  ;;  %v2490_v21 = vld [vmem:[#allocation2 + $0x378] sm:$0xff] }
 0x4ad   : > { %2715 = vmatpush.msra.mxu2 %v2272_v27  ;;  %2704 = vmatpush.msra.mxu1 %v2417_v8  ;;  %v2491_v42 = vld [vmem:[#allocation2 + $0x380] sm:$0xff]  ;;  %v2418_v27 = vld [vmem:[#allocation2 + $0x110] sm:$0xff]  ;;  %v2475_v8 = vld [vmem:[#allocation2 + $0x2f8] sm:$0xff] }
 0x4ae   : > { %2658 = vmatpush.msrb.mxu3 %v2415_v39  ;;  %2681 = vmatpush.msra.mxu0 %v2416_v20  ;;  %v2476_v39 = vld [vmem:[#allocation2 + $0x300] sm:$0xff]  ;;  %v2477_v20 = vld [vmem:[#allocation2 + $0x308] sm:$0xff] }
 0x4af   : > { %2716 = vmatpush.msra.mxu2 %v2199_v61  ;;  %2705 = vmatpush.msra.mxu1 %v2403_v31  ;;  %v2404_v61 = vld [vmem:[#allocation2 + $0x98] sm:$0xff]  ;;  %v2461_v31 = vld [vmem:[#allocation2 + $0x280] sm:$0xff] }
 0x4b0   : > { %2659 = vmatpush.msrb.mxu3 %v2401_v17  ;;  %2682 = vmatpush.msra.mxu0 %v2402_v46  ;;  %v2330_v17 = vpop.permute.xlu1 %2329  ;;  %v2462_v46 = vld [vmem:[#allocation2 + $0x288] sm:$0xff] }
 0x4b1   : > { %2717 = vmatpush.msra.mxu2 %v2126_v6  ;;  %2706 = vmatpush.msra.mxu1 %v2389_v30  ;;  %v2463_v6 = vld [vmem:[#allocation2 + $0x290] sm:$0xff]  ;;  %v2447_v30 = vld [vmem:[#allocation2 + $0x208] sm:$0xff] }
 0x4b2   : > { %v2340_v15 = vpop.permute.xlu0 %2339  ;;  %2660 = vmatpush.msrb.mxu3 %v2387_v1  ;;  %2683 = vmatpush.msra.mxu0 %v2388_v14  ;;  %v2390_v1 = vld [vmem:[#allocation2 + $0x20] sm:$0xff]  ;;  %v2448_v14 = vld [vmem:[#allocation2 + $0x210] sm:$0xff] }
 0x4b3   : > { %v2354_v4 = vsel %vm803_vm5, %v12616_v53, %v2340_v15  ;;  %2718 = vmatpush.msra.mxu2 %v2053_v38  ;;  %2783 = vmatpush.msrb.mxu1 %v2348_v12  ;;  %v2349_v38 = vsel %vm803_vm5, %v12595_v0, %v2330_v17  ;;  %v2433_v15 = vld [vmem:[#allocation2 + $0x190] sm:$0xff]  ;;  %v2276_v12 = vsel %vm783_vm8, %v12509_v50, %v12507_v2  ;;  %v2421_v0 = vld [vmem:[#allocation2 + $0x128] sm:$0xff]  ;;  %v2405_v50 = vld [vmem:[#allocation2 + $0xa0] sm:$0xff] }
 0x4b4   : > { %2737 = vmatpush.msra.mxu3 %v2346_v33  ;;  %2383 = vst.msk [vmem:[#allocation2 + $0x770] sm:$0xff] %vm2382_vm15, %v2354_v4  ;;  %2760 = vmatpush.msrb.mxu0 %v2347_v60  ;;  %v2449_v33 = vld [vmem:[#allocation2 + $0x218] sm:$0xff]  ;;  %v2435_v4 = vld [vmem:[#allocation2 + $0x1a0] sm:$0xff] }
 0x4b5   : > { %2719 = vmatpush.msra.mxu2 %v1980_v23  ;;  %2784 = vmatpush.msrb.mxu1 %v2275_v47  ;;  %v2434_v60 = vld [vmem:[#allocation2 + $0x198] sm:$0xff]  ;;  %v2406_v47 = vld [vmem:[#allocation2 + $0xa8] sm:$0xff] }
 0x4b6   : > { %2738 = vmatpush.msra.mxu3 %v2273_v9  ;;  %2761 = vmatpush.msrb.mxu0 %v2274_v44  ;;  %v2419_v23 = vld [vmem:[#allocation2 + $0x118] sm:$0xff]  ;;  %v2420_v9 = vld [vmem:[#allocation2 + $0x120] sm:$0xff]  ;;  %v2203_v44 = vsel %vm763_vm10, %v12488_v52, %v12486_v18  ;;  %v2391_v52 = vld [vmem:[#allocation2 + $0x28] sm:$0xff] }
 0x4b7   : > { %2720 = vmatpush.msra.mxu2 %v1907_v58  ;;  %2785 = vmatpush.msrb.mxu1 %v2202_v35  ;;  %v2407_v58 = vld [vmem:[#allocation2 + $0xb0] sm:$0xff] }
 0x4b8   : > { %2739 = vmatpush.msra.mxu3 %v2200_v63  ;;  %2762 = vmatpush.msrb.mxu0 %v2201_v56  ;;  %v2130_v63 = vsel %vm17341_vm3, %v12446_v36, %v12444_v32  ;;  %v12705_v56 = vpop.permute.xlu1 %2335  ;;  %v2392_v35 = vld [vmem:[#allocation2 + $0x30] sm:$0xff]  ;;  %v2351_v36 = vsel %vm803_vm5, %v12597_v43, %v12602_v41  ;;  %vm17353_vm3 = vmmov %vm17338_vm0 }
 0x4b9   : > { %2721 = vmatpush.msra.mxu2 %v2502_v45  ;;  %2786 = vmatpush.msrb.mxu1 %v2129_v11  ;;  %v17342_v45 = vld [vmem:[#allocation8_spill] sm:$0xff]  ;;  %v2350_v11 = vsel %vm803_vm5, %v2330_v17, %v12597_v43 }
 0x4ba   : > { %2740 = vmatpush.msra.mxu3 %v2127_v34  ;;  %2763 = vmatpush.msrb.mxu0 %v2128_v49  ;;  %v2393_v34 = vld [vmem:[#allocation2 + $0x38] sm:$0xff]  ;;  %v2057_v49 = vsel %vm723_vm13, %v12389_v62, %v17342_v45  ;;  %v2534_v62 = vld [vmem:[#allocation2 + $0x4f0] sm:$0xff]  ;;  %v2521_v17 = vld [vmem:[#allocation2 + $0x480] sm:$0xff] }
 0x4bb   : > { %2722 = vmatpush.msra.mxu2 %v2488_v55  ;;  %2787 = vmatpush.msrb.mxu1 %v2056_v29  ;;  %v17343_v55 = vld [vmem:[#allocation16_spill] sm:$0xff]  ;;  %v2610_v29 = vld [vmem:[%s17183_s4] sm:$0xff]  ;;  %v2437_v45 = vld [vmem:[#allocation2 + $0x1b0] sm:$0xff] }
 0x4bc   : > { %2741 = vmatpush.msra.mxu3 %v2054_v25  ;;  %2764 = vmatpush.msrb.mxu0 %v2055_v10  ;;  %v2352_v25 = vsel %vm803_vm5, %v12602_v41, %v12705_v56  ;;  %v2277_v10 = vsel %vm783_vm8, %v12507_v2, %v17343_v55  ;;  %v2520_v2 = vld [vmem:[#allocation2 + $0x478] sm:$0xff] }
 0x4bd   : > { %2723 = vmatpush.msra.mxu2 %v2474_v59  ;;  %2788 = vmatpush.msrb.mxu1 %v1983_v57  ;;  %v17345_v59 = vld [vmem:[#allocation17_spill] sm:$0xff] }
 0x4be   : > { %2742 = vmatpush.msra.mxu3 %v1981_v5  ;;  %2765 = vmatpush.msrb.mxu0 %v1982_v24  ;;  %v17344_v5 = vld [vmem:[#allocation18_spill] sm:$0xff]  ;;  %v17346_v24 = vld [vmem:[#allocation12_spill] sm:$0xff] }
 0x4bf   : > { %2724 = vmatpush.msra.mxu2 %v2460_v26  ;;  %2789 = vmatpush.msrb.mxu1 %v2519_v7  ;;  %v2278_v43 = vsel %vm783_vm8, %v17343_v55, %v17344_v5  ;;  %v2279_v41 = vsel %vm783_vm8, %v17344_v5, %v17345_v59  ;;  %v2204_v57 = vsel %vm763_vm10, %v12486_v18, %v17346_v24  ;;  %v17347_v26 = vld [vmem:[#allocation15_spill] sm:$0xff]  ;;  %v2410_v5 = vld [vmem:[#allocation2 + $0xc8] sm:$0xff] }
 0x4c0   : > { %2743 = vmatpush.msra.mxu3 %v2517_v28  ;;  %2766 = vmatpush.msrb.mxu0 %v2518_v13  ;;  %v2205_v28 = vsel %vm763_vm10, %v17346_v24, %v17347_v26  ;;  %v17348_v13 = vld [vmem:[#allocation14_spill] sm:$0xff]  ;;  %v2280_v55 = vsel %vm783_vm8, %v17345_v59, %v12511_v51  ;;  %v2566_v51 = vld [vmem:[#allocation2 + $0x600] sm:$0xff]  ;;  %v2395_v59 = vld [vmem:[#allocation2 + $0x48] sm:$0xff] }
 0x4c1   : > { %2638 = vmatmul.f32.vlgmr.msrb.gmra.mxu2 %v12682_v22  ;;  %2790 = vmatpush.msrb.mxu1 %v2505_v48  ;;  %v2206_v7 = vsel %vm763_vm10, %v17347_v26, %v17348_v13  ;;  %v17351_v48 = vld [vmem:[#allocation11_spill] sm:$0xff]  ;;  %v2552_v24 = vld [vmem:[#allocation2 + $0x588] sm:$0xff] }
 0x4c2   : > { %2744 = vmatpush.msra.mxu3 %v2503_v19  ;;  %2725 = vmatpush.msra.mxu2 %v2446_v3  ;;  %v2506_v19 = vld [vmem:[#allocation2 + $0x400] sm:$0xff]  ;;  %v17349_v3 = vld [vmem:[#allocation9_spill] sm:$0xff] }
 0x4c3   : > { %2767 = vmatpush.msrb.mxu0 %v2504_v37  ;;  %2791 = vmatpush.msrb.mxu1 %v2491_v42  ;;  %v2131_v37 = vsel %vm17350_vm12, %v12444_v32, %v17349_v3  ;;  %v2132_v18 = vsel %vm17338_vm0, %v17349_v3, %v17351_v48  ;;  %v2549_v42 = vld [vmem:[#allocation2 + $0x570] sm:$0xff]  ;;  %v2550_v32 = vld [vmem:[#allocation2 + $0x578] sm:$0xff]  ;;  %v2611_v26 = vld [vmem:[%s17183_s4 + $0x8] sm:$0xff]  ;;  %vm17360_vm0 = vcmask 48128  }
 0x4c4   : > { %2745 = vmatpush.msra.mxu3 %v2489_v40  ;;  %2726 = vmatpush.msra.mxu2 %v2432_v54  ;;  %v17352_v40 = vld [vmem:[#allocation10_spill] sm:$0xff]  ;;  %v2510_v3 = vld [vmem:[#allocation2 + $0x420] sm:$0xff] }
 0x4c5   : > { %2768 = vmatpush.msrb.mxu0 %v2490_v21  ;;  %2661 = vmatmul.f32.vlgmr.msrb.gmra.mxu3 %v12682_v22  ;;  %v2133_v54 = vsel %vm17353_vm3, %v17351_v48, %v17352_v40  ;;  %v2492_v21 = vld [vmem:[#allocation2 + $0x388] sm:$0xff]  ;;  %v2482_v40 = vld [vmem:[#allocation2 + $0x330] sm:$0xff]  ;;  %vm17361_vm3 = vmmov %vm17360_vm0 }
 0x4c6   : > { %2727 = vmatpush.msra.mxu2 %v2418_v27  ;;  %2746 = vmatpush.msra.mxu3 %v2475_v8  ;;  %v2551_v27 = vld [vmem:[#allocation2 + $0x580] sm:$0xff]  ;;  %v2478_v8 = vld [vmem:[#allocation2 + $0x310] sm:$0xff]  ;;  %v2496_v48 = vld [vmem:[#allocation2 + $0x3a8] sm:$0xff] }
 0x4c7   : > { %2769 = vmatpush.msrb.mxu0 %v2476_v39  ;;  %2792 = vmatpush.msrb.mxu1 %v2477_v20  ;;  %v2535_v39 = vld [vmem:[#allocation2 + $0x4f8] sm:$0xff]  ;;  %v2536_v20 = vld [vmem:[#allocation2 + $0x500] sm:$0xff] }
 0x4c8   : > { %2728 = vmatpush.msra.mxu2 %v2404_v61  ;;  %2747 = vmatpush.msra.mxu3 %v2461_v31  ;;  %v2537_v61 = vld [vmem:[#allocation2 + $0x508] sm:$0xff]  ;;  %v2464_v31 = vld [vmem:[#allocation2 + $0x298] sm:$0xff] }
 0x4c9   : > { %2770 = vmatpush.msrb.mxu0 %v2462_v46  ;;  %2793 = vmatpush.msrb.mxu1 %v2463_v6  ;;  %v2522_v46 = vld [vmem:[#allocation2 + $0x488] sm:$0xff]  ;;  %v2523_v6 = vld [vmem:[#allocation2 + $0x490] sm:$0xff] }
 0x4ca   : > { %2641 = vmatmul.f32.gmra.mxu2 %v12689_v16  ;;  %2748 = vmatpush.msra.mxu3 %v2447_v30  ;;  %v2450_v30 = vld [vmem:[#allocation2 + $0x220] sm:$0xff] }
 0x4cb   : > { %2729 = vmatpush.msra.mxu2 %v2390_v1  ;;  %2771 = vmatpush.msrb.mxu0 %v2448_v14  ;;  %v2507_v1 = vld [vmem:[#allocation2 + $0x408] sm:$0xff]  ;;  %v2508_v14 = vld [vmem:[#allocation2 + $0x410] sm:$0xff] }
 0x4cc   : > { %2794 = vmatpush.msrb.mxu1 %v2449_v33  ;;  %2749 = vmatpush.msra.mxu3 %v2433_v15  ;;  %v2436_v33 = vld [vmem:[#allocation2 + $0x1a8] sm:$0xff]  ;;  %v2493_v15 = vld [vmem:[#allocation2 + $0x390] sm:$0xff] }
 0x4cd   : > { %2806 = vmatpush.msrb.mxu2 %v2349_v38  ;;  %2772 = vmatpush.msrb.mxu0 %v2434_v60  ;;  %v2509_v38 = vld [vmem:[#allocation2 + $0x418] sm:$0xff] }
 0x4ce   : > { %2795 = vmatpush.msrb.mxu1 %v2435_v4  ;;  %2750 = vmatpush.msra.mxu3 %v2419_v23  ;;  %v2494_v60 = vld [vmem:[#allocation2 + $0x398] sm:$0xff]  ;;  %v2422_v4 = vld [vmem:[#allocation2 + $0x130] sm:$0xff] }
 0x4cf   : > { %2807 = vmatpush.msrb.mxu2 %v2276_v12  ;;  %2773 = vmatpush.msrb.mxu0 %v2420_v9  ;;  %v2495_v12 = vld [vmem:[#allocation2 + $0x3a0] sm:$0xff]  ;;  %v2479_v23 = vld [vmem:[#allocation2 + $0x318] sm:$0xff] }
 0x4d0   : > { %2796 = vmatpush.msrb.mxu1 %v2421_v0  ;;  %2684 = vmatmul.f32.vlgmr.msra.gmra.mxu0 %v12682_v22  ;;  %v2480_v9 = vld [vmem:[#allocation2 + $0x320] sm:$0xff]  ;;  %v2481_v0 = vld [vmem:[#allocation2 + $0x328] sm:$0xff] }
 0x4d1   : > { %2707 = vmatmul.f32.vlgmr.msra.gmra.mxu1 %v12682_v22  ;;  %2808 = vmatpush.msrb.mxu2 %v2203_v44  ;;  %v2408_v44 = vld [vmem:[#allocation2 + $0xb8] sm:$0xff] }
 0x4d2   : > { %2751 = vmatpush.msra.mxu3 %v2405_v50  ;;  %2774 = vmatpush.msrb.mxu0 %v2406_v47  ;;  %v2465_v50 = vld [vmem:[#allocation2 + $0x2a0] sm:$0xff]  ;;  %v2466_v47 = vld [vmem:[#allocation2 + $0x2a8] sm:$0xff] }
 0x4d3   : > { %2797 = vmatpush.msrb.mxu1 %v2407_v58  ;;  %2730 = vmatmul.f32.vlgmr.msra.gmra.mxu2 %v12682_v22  ;;  %v2467_v58 = vld [vmem:[#allocation2 + $0x2b0] sm:$0xff] }
 0x4d4   : > { %2809 = vmatpush.msrb.mxu2 %v2130_v63  ;;  %2752 = vmatpush.msra.mxu3 %v2391_v52  ;;  %v2394_v63 = vld [vmem:[#allocation2 + $0x40] sm:$0xff]  ;;  %v2451_v52 = vld [vmem:[#allocation2 + $0x228] sm:$0xff] }
 0x4d5   : > { %2775 = vmatpush.msrb.mxu0 %v2392_v35  ;;  %2798 = vmatpush.msrb.mxu1 %v2393_v34  ;;  %v2452_v35 = vld [vmem:[#allocation2 + $0x230] sm:$0xff]  ;;  %v2453_v34 = vld [vmem:[#allocation2 + $0x238] sm:$0xff] }
 0x4d6   : > { %2810 = vmatpush.msrb.mxu2 %v2057_v49  ;;  %2829 = vmatpush.msrb.mxu3 %v2350_v11  ;;  %v2353_v49 = vsel %vm803_vm5, %v12705_v56, %v12616_v53  ;;  %v2438_v11 = vld [vmem:[#allocation2 + $0x1b8] sm:$0xff]  ;;  %v17354_v53 = vld [vmem:[#allocation13_spill] sm:$0xff] }
 0x4d7   : > { %2852 = vmatpush.msra.mxu0 %v2351_v36  ;;  %2875 = vmatpush.msra.mxu1 %v2352_v25  ;;  %v2439_v36 = vld [vmem:[#allocation2 + $0x1c0] sm:$0xff]  ;;  %v2423_v25 = vld [vmem:[#allocation2 + $0x138] sm:$0xff]  ;;  %v2207_v56 = vsel %vm763_vm10, %v17348_v13, %v17354_v53 }
 0x4d8   : > { %2811 = vmatpush.msrb.mxu2 %v2534_v62  ;;  %2830 = vmatpush.msrb.mxu3 %v2277_v10  ;;  %v2424_v10 = vld [vmem:[#allocation2 + $0x140] sm:$0xff]  ;;  %v2425_v62 = vld [vmem:[#allocation2 + $0x148] sm:$0xff]  ;;  %v2595_v13 = vld [vmem:[#allocation2 + $0x6f8] sm:$0xff] }
 0x4d9   : > { %2853 = vmatpush.msra.mxu0 %v2278_v43  ;;  %2876 = vmatpush.msra.mxu1 %v2279_v41  ;;  %v2411_v43 = vld [vmem:[#allocation2 + $0xd0] sm:$0xff] }
 0x4da   : > { %2614 = vperm.xlu1 %10962, %v2610_v29   ;;  %2687 = vmatmul.f32.gmra.mxu0 %v12689_v16  ;;  %v2409_v29 = vld [vmem:[#allocation2 + $0xc0] sm:$0xff]  ;;  %v2396_v41 = vld [vmem:[#allocation2 + $0x50] sm:$0xff] }
 0x4db   : > { %2710 = vmatmul.f32.gmra.mxu1 %v12689_v16  ;;  %2812 = vmatpush.msrb.mxu2 %v2520_v2  ;;  %v2397_v2 = vld [vmem:[#allocation2 + $0x58] sm:$0xff] }
 0x4dc   : > { %2831 = vmatpush.msrb.mxu3 %v2204_v57  ;;  %2854 = vmatpush.msra.mxu0 %v2205_v28  ;;  %v2609_v57 = vld [vmem:[#allocation2 + $0x770] sm:$0xff] }
 0x4dd   : > { %2877 = vmatpush.msra.mxu1 %v2206_v7  ;;  %2813 = vmatpush.msrb.mxu2 %v2506_v19  ;;  %v2538_v28 = vld [vmem:[#allocation2 + $0x510] sm:$0xff]  ;;  %v2524_v7 = vld [vmem:[#allocation2 + $0x498] sm:$0xff]  ;;  %v2581_v19 = vld [vmem:[#allocation2 + $0x680] sm:$0xff] }
 0x4de   : > { %2832 = vmatpush.msrb.mxu3 %v2131_v37  ;;  %2855 = vmatpush.msra.mxu0 %v2132_v18  ;;  %v2567_v37 = vld [vmem:[#allocation2 + $0x608] sm:$0xff]  ;;  %v2553_v18 = vld [vmem:[#allocation2 + $0x590] sm:$0xff] }
 0x4df   : > { %2878 = vmatpush.msra.mxu1 %v2133_v54  ;;  %2664 = vmatmul.f32.gmra.mxu3 %v12689_v16  ;;  %v2539_v54 = vld [vmem:[#allocation2 + $0x518] sm:$0xff] }
 0x4e0   : > { %2814 = vmatpush.msrb.mxu2 %v2492_v21  ;;  %2833 = vmatpush.msrb.mxu3 %v2549_v42  ;;  %v2468_v21 = vld [vmem:[#allocation2 + $0x2b8] sm:$0xff]  ;;  %v2525_v42 = vld [vmem:[#allocation2 + $0x4a0] sm:$0xff] }
 0x4e1   : > { %2856 = vmatpush.msra.mxu0 %v2550_v32  ;;  %2879 = vmatpush.msra.mxu1 %v2551_v27  ;;  %v2454_v32 = vld [vmem:[#allocation2 + $0x240] sm:$0xff]  ;;  %v2511_v27 = vld [vmem:[#allocation2 + $0x428] sm:$0xff] }
 0x4e2   : > { %2815 = vmatpush.msrb.mxu2 %v2478_v8  ;;  %2834 = vmatpush.msrb.mxu3 %v2535_v39  ;;  %v2440_v8 = vld [vmem:[#allocation2 + $0x1c8] sm:$0xff]  ;;  %v2497_v39 = vld [vmem:[#allocation2 + $0x3b0] sm:$0xff] }
 0x4e3   : > { %2857 = vmatpush.msra.mxu0 %v2536_v20  ;;  %2880 = vmatpush.msra.mxu1 %v2537_v61  ;;  %v2426_v20 = vld [vmem:[#allocation2 + $0x150] sm:$0xff]  ;;  %v2483_v61 = vld [vmem:[#allocation2 + $0x338] sm:$0xff] }
 0x4e4   : > { %2776 = vmatmul.f32.vlgmr.msrb.gmra.mxu0 %v12682_v22  ;;  %2799 = vmatmul.f32.vlgmr.msrb.gmra.mxu1 %v12682_v22 }
 0x4e5   : > { %2816 = vmatpush.msrb.mxu2 %v2464_v31  ;;  %2835 = vmatpush.msrb.mxu3 %v2521_v17  ;;  %v2412_v31 = vld [vmem:[#allocation2 + $0xd8] sm:$0xff]  ;;  %v2469_v17 = vld [vmem:[#allocation2 + $0x2c0] sm:$0xff] }
 0x4e6   : > { %2858 = vmatpush.msra.mxu0 %v2522_v46  ;;  %2881 = vmatpush.msra.mxu1 %v2523_v6  ;;  %v2398_v46 = vld [vmem:[#allocation2 + $0x60] sm:$0xff]  ;;  %v2455_v6 = vld [vmem:[#allocation2 + $0x248] sm:$0xff] }
 0x4e7   : > { %2817 = vmatpush.msrb.mxu2 %v2450_v30  ;;  %2836 = vmatpush.msrb.mxu3 %v2507_v1  ;;  %v2441_v30 = vld [vmem:[#allocation2 + $0x1d0] sm:$0xff]  ;;  %v2427_v1 = vld [vmem:[#allocation2 + $0x158] sm:$0xff] }
 0x4e8   : > { %2859 = vmatpush.msra.mxu0 %v2508_v14  ;;  %2882 = vmatpush.msra.mxu1 %v2509_v38  ;;  %v2413_v14 = vld [vmem:[#allocation2 + $0xe0] sm:$0xff]  ;;  %v2399_v38 = vld [vmem:[#allocation2 + $0x68] sm:$0xff] }
 0x4e9   : > { %2733 = vmatmul.f32.gmra.mxu2 %v12689_v16  ;;  %2753 = vmatmul.f32.vlgmr.msra.gmra.mxu3 %v12682_v22 }
 0x4ea   : > { %2818 = vmatpush.msrb.mxu2 %v2436_v33  ;;  %2837 = vmatpush.msrb.mxu3 %v2493_v15 }
 0x4eb   : > { %2860 = vmatpush.msra.mxu0 %v2494_v60  ;;  %2883 = vmatpush.msra.mxu1 %v2495_v12  ;;  %v12786_v60 = vld [vmem:[%s17187_s8] sm:$0xff] }
 0x4ec   : > { %2819 = vmatpush.msrb.mxu2 %v2422_v4  ;;  %2838 = vmatpush.msrb.mxu3 %v2479_v23 }
 0x4ed   : > { %2861 = vmatpush.msra.mxu0 %v2480_v9  ;;  %2884 = vmatpush.msra.mxu1 %v2481_v0 }
 0x4ee   : > { %2820 = vmatpush.msrb.mxu2 %v2408_v44  ;;  %2839 = vmatpush.msrb.mxu3 %v2465_v50  ;;  %v2978_v50 = vperm.slane %v12786_v60, 2 }
 0x4ef   : > { %2862 = vmatpush.msra.mxu0 %v2466_v47  ;;  %2885 = vmatpush.msra.mxu1 %v2467_v58 }
 0x4f0   : > { %2821 = vmatpush.msrb.mxu2 %v2394_v63  ;;  %2840 = vmatpush.msrb.mxu3 %v2451_v52 }
 0x4f1   : > { %2863 = vmatpush.msra.mxu0 %v2452_v35  ;;  %2886 = vmatpush.msra.mxu1 %v2453_v34 }
 0x4f2   : > { %2756 = vmatmul.f32.gmra.mxu3 %v12689_v16  ;;  %2779 = vmatmul.f32.gmra.mxu0 %v12689_v16 }
 0x4f3   : > { %2822 = vmatmul.f32.vlgmr.msrb.gmra.mxu2 %v12682_v22  ;;  %2841 = vmatpush.msrb.mxu3 %v2437_v45 }
 0x4f4   : > { %2898 = vmatpush.msra.mxu2 %v2353_v49  ;;  %2864 = vmatpush.msra.mxu0 %v2438_v11 }
 0x4f5   : > { %2887 = vmatpush.msra.mxu1 %v2439_v36  ;;  %2842 = vmatpush.msrb.mxu3 %v2423_v25  ;;  %v2979_v36 = vperm.slane %v12786_v60, 3 }
 0x4f6   : > { %2899 = vmatpush.msra.mxu2 %v2280_v55  ;;  %2865 = vmatpush.msra.mxu0 %v2424_v10 }
 0x4f7   : > { %2888 = vmatpush.msra.mxu1 %v2425_v62  ;;  %2843 = vmatpush.msrb.mxu3 %v2409_v29  ;;  %v2980_v29 = vperm.slane %v12786_v60, 4 }
 0x4f8   : > { %2900 = vmatpush.msra.mxu2 %v2207_v56  ;;  %2802 = vmatmul.f32.gmra.mxu1 %v12689_v16 }
 0x4f9   : > { %2866 = vmatpush.msra.mxu0 %v2410_v5  ;;  %2889 = vmatpush.msra.mxu1 %v2411_v43 }
 0x4fa   : > { %2901 = vmatpush.msra.mxu2 %v2566_v51  ;;  %2844 = vmatpush.msrb.mxu3 %v2395_v59 }
 0x4fb   : > { %2867 = vmatpush.msra.mxu0 %v2396_v41  ;;  %2890 = vmatpush.msra.mxu1 %v2397_v2  ;;  %v2982_v41 = vperm.slane %v12786_v60, 6 }
 0x4fc   : > { %2845 = vmatmul.f32.vlgmr.msrb.gmra.mxu3 %v12682_v22  ;;  %2868 = vmatmul.f32.vlgmr.msra.gmra.mxu0 %v12682_v22 }
 0x4fd   : > { %2902 = vmatpush.msra.mxu2 %v2552_v24  ;;  %2921 = vmatpush.msra.mxu3 %v2609_v57  ;;  %v2983_v24 = vperm.slane %v12786_v60, 7 }
 0x4fe   : > { %2825 = vmatmul.f32.gmra.mxu2 %v12689_v16  ;;  %2619 = vperm.xlu2 %10963, %v2611_v26  }
 0x4ff   : > { %2903 = vmatpush.msra.mxu2 %v2538_v28  ;;  %2922 = vmatpush.msra.mxu3 %v2595_v13 }
 0x500   : > { %2891 = vmatmul.f32.vlgmr.msra.gmra.mxu1 %v12682_v22 }
 0x501   : > { %2904 = vmatpush.msra.mxu2 %v2524_v7  ;;  %2923 = vmatpush.msra.mxu3 %v2581_v19 }
 0x503   : > { %2905 = vmatpush.msra.mxu2 %v2510_v3  ;;  %2924 = vmatpush.msra.mxu3 %v2567_v37 }
 0x504   : > { %2848 = vmatmul.f32.gmra.mxu3 %v12689_v16  ;;  %2871 = vmatmul.f32.gmra.mxu0 %v12689_v16 }
 0x505   : > { %2906 = vmatpush.msra.mxu2 %v2496_v48  ;;  %2925 = vmatpush.msra.mxu3 %v2553_v18  ;;  %v2981_v48 = vperm.slane %v12786_v60, 5 }
 0x507   : > { %2907 = vmatpush.msra.mxu2 %v2482_v40  ;;  %2926 = vmatpush.msra.mxu3 %v2539_v54 }
 0x508   : > { %2894 = vmatmul.f32.gmra.mxu1 %v12689_v16 }
 0x509   : > { %2908 = vmatpush.msra.mxu2 %v2468_v21  ;;  %2927 = vmatpush.msra.mxu3 %v2525_v42  ;;  %v12839_v21 = vld [vmem:[%s17187_s8 + $0x8] sm:$0x7f] }
 0x50b   : > { %2909 = vmatpush.msra.mxu2 %v2454_v32  ;;  %2928 = vmatpush.msra.mxu3 %v2511_v27 }
 0x50d   : > { %2910 = vmatpush.msra.mxu2 %v2440_v8  ;;  %2929 = vmatpush.msra.mxu3 %v2497_v39  ;;  %v2984_v39 = vperm.slane %v12839_v21, 0 }
 0x50f   : > { %2911 = vmatpush.msra.mxu2 %v2426_v20  ;;  %2930 = vmatpush.msra.mxu3 %v2483_v61 }
 0x511   : > { %2912 = vmatpush.msra.mxu2 %v2412_v31  ;;  %2931 = vmatpush.msra.mxu3 %v2469_v17  ;;  %v2986_v17 = vperm.slane %v12839_v21, 2 }
 0x513   : > { %2913 = vmatpush.msra.mxu2 %v2398_v46  ;;  %2932 = vmatpush.msra.mxu3 %v2455_v6 }
 0x514   : > { %2914 = vmatmul.f32.vlgmr.msra.gmra.mxu2 %v12682_v22 }
 0x515   : > { %2933 = vmatpush.msra.mxu3 %v2441_v30 }
 0x517   : > { %2934 = vmatpush.msra.mxu3 %v2427_v1 }
 0x519   : > { %2935 = vmatpush.msra.mxu3 %v2413_v14 }
 0x51b   : > { %2936 = vmatpush.msra.mxu3 %v2399_v38  ;;  %v2987_v38 = vperm.slane %v12839_v21, 3 }
 0x51c   : > { %2937 = vmatmul.f32.vlgmr.msra.gmra.mxu3 %v12682_v22  ;;  %2917 = vmatmul.f32.gmra.mxu2 %v12689_v16  ;;  %v2977_v22 = vperm.slane %v12786_v60, 1 }
 0x524   : > { %2940 = vmatmul.f32.gmra.mxu3 %v12689_v16  ;;  %v2976_v16 = vperm.slane %v12786_v60, 0 }
 0x544   : > { %v2639_v33 = vpop.f32.mrf.mxu2 }
 0x548   : > { %v2662_v15 = vpop.f32.mrf.mxu3 }
 0x54c   : > { %v12788_v12 = vpop.permute.xlu1 %2614 }
 0x54d   : > { %v12790_v4 = vpop.f32.mrf.mxu2  ;;  %v2685_v23 = vpop.f32.mrf.mxu0  ;;  %v2663_v9 = vadd.f32 %v2662_v15, %v12788_v12  ;;  %v2640_v0 = vadd.f32 %v2639_v33, %v12788_v12 }
 0x54e   : > { %v2686_v44 = vadd.f32 %v2685_v23, %v12788_v12  ;;  %v2708_v47 = vpop.f32.mrf.mxu1 }
 0x54f   : > { %v2709_v58 = vadd.f32 %v2708_v47, %v12788_v12  ;;  %v2945_v63 = vmax.f32 %v2663_v9, 0.0  ;;  %v2944_v52 = vmax.f32 %v2640_v0, 0.0  ;;  %v2985_v0 = vperm.slane %v12839_v21, 1 }
 0x550   : > { %v2946_v35 = vmax.f32 %v2686_v44, 0.0 }
 0x551   : > { %v3005_v34 = vmul.f32 %v2977_v22, %v2945_v63  ;;  %v3004_v45 = vmul.f32 %v2976_v16, %v2944_v52  ;;  %v2947_v11 = vmax.f32 %v2709_v58, 0.0 }
 0x552   : > { %v3006_v49 = vmul.f32 %v2978_v50, %v2946_v35 }
 0x553   : > { %3062 = vrot.lane.b32.xlu1 %v3005_v34, %s17355_s7  ;;  %3060 = vrot.lane.b32.xlu0 %v3004_v45, %s17355_s7  ;;  %v3007_v55 = vmul.f32 %v2979_v36, %v2947_v11 }
 0x554   : > { %3064 = vrot.lane.b32.xlu2 %v3006_v49, %s17355_s7 }
 0x556   : > { %v2731_v25 = vpop.f32.mrf.mxu2 }
 0x557   : > { %v12811_v10 = vpop.f32.mrf.mxu0  ;;  %v2732_v62 = vadd.f32 %v2731_v25, %v12788_v12 }
 0x558   : > { %v2711_v53 = vpop.f32.mrf.mxu1  ;;  %v12856_v15 = vpop.permute.xlu2 %2619 }
 0x559   : > { %v2948_v56 = vmax.f32 %v2732_v62, 0.0  ;;  %v2643_v58 = vadd.f32 %v12790_v4, %v12856_v15  ;;  %v2712_v34 = vadd.f32 %v2711_v53, %v12856_v15 }
 0x55b   : > { %v3008_v5 = vmul.f32 %v2980_v29, %v2948_v56  ;;  %3066 = vrot.lane.b32.xlu0 %v3007_v55, %s17355_s7  ;;  %v2958_v52 = vmax.f32 %v2643_v58, 0.0  ;;  %v2961_v49 = vmax.f32 %v2712_v34, 0.0 }
 0x55d   : > { %3068 = vrot.lane.b32.xlu1 %v3008_v5, %s17355_s7  ;;  %v3018_v35 = vmul.f32 %v2976_v16, %v2958_v52  ;;  %v3021_v11 = vmul.f32 %v2979_v36, %v2961_v49  ;;  %v2988_v16 = vperm.slane %v12839_v21, 4 }
 0x561   : > { %v2777_v43 = vpop.f32.mrf.mxu0  ;;  %v2800_v51 = vpop.f32.mrf.mxu1 }
 0x562   : > { %v2778_v59 = vadd.f32 %v2777_v43, %v12788_v12  ;;  %v2801_v2 = vadd.f32 %v2800_v51, %v12788_v12  ;;  %v2665_v57 = vpop.f32.mrf.mxu3 }
 0x563   : > { %v2666_v36 = vadd.f32 %v2665_v57, %v12856_v15 }
 0x564   : > { %v2950_v26 = vmax.f32 %v2778_v59, 0.0  ;;  %v2951_v28 = vmax.f32 %v2801_v2, 0.0 }
 0x566   : > { %v3010_v13 = vmul.f32 %v2982_v41, %v2950_v26  ;;  %v3011_v7 = vmul.f32 %v2983_v24, %v2951_v28 }
 0x568   : > { %3074 = vrot.lane.b32.xlu1 %v3011_v7, %s17355_s7  ;;  %3072 = vrot.lane.b32.xlu0 %v3010_v13, %s17355_s7  ;;  %v2989_v13 = vperm.slane %v12839_v21, 5  ;;  %v2959_v7 = vmax.f32 %v2666_v36, 0.0 }
 0x56a   : > { %v3019_v57 = vmul.f32 %v2977_v22, %v2959_v7 }
 0x56c   : > { %v12829_v19 = vpop.f32.mrf.mxu2  ;;  %v2754_v3 = vpop.f32.mrf.mxu3 }
 0x56d   : > { %v2755_v37 = vadd.f32 %v2754_v3, %v12788_v12 }
 0x56f   : > { %v2949_v18 = vmax.f32 %v2755_v37, 0.0  ;;  %v2780_v40 = vpop.f32.mrf.mxu0 }
 0x570   : > { %v2781_v4 = vadd.f32 %v2780_v40, %v12856_v15  ;;  %v2689_v40 = vadd.f32 %v12811_v10, %v12856_v15 }
 0x571   : > { %v3009_v54 = vmul.f32 %v2981_v48, %v2949_v18 }
 0x572   : > { %v2964_v62 = vmax.f32 %v2781_v4, 0.0 }
 0x573   : > { %3070 = vrot.lane.b32.xlu2 %v3009_v54, %s17355_s7  ;;  %v2735_v54 = vadd.f32 %v12829_v19, %v12856_v15 }
 0x574   : > { %v3024_v43 = vmul.f32 %v2982_v41, %v2964_v62 }
 0x575   : > { %v12841_v42 = vpop.f32.mrf.mxu1  ;;  %v12843_v32 = vpop.f32.mrf.mxu3 }
 0x576   : > { %v2823_v27 = vpop.f32.mrf.mxu2  ;;  %v2758_v22 = vadd.f32 %v12843_v32, %v12856_v15 }
 0x577   : > { %v2824_v8 = vadd.f32 %v2823_v27, %v12788_v12 }
 0x579   : > { %v2952_v20 = vmax.f32 %v2824_v8, 0.0  ;;  %v2869_v61 = vpop.f32.mrf.mxu0  ;;  %v2962_v8 = vmax.f32 %v2735_v54, 0.0 }
 0x57a   : > { %v2870_v31 = vadd.f32 %v2869_v61, %v12788_v12  ;;  %v2804_v61 = vadd.f32 %v12841_v42, %v12856_v15 }
 0x57b   : > { %v3012_v46 = vmul.f32 %v2984_v39, %v2952_v20  ;;  %v3022_v19 = vmul.f32 %v2980_v29, %v2962_v8 }
 0x57c   : > { %v2954_v6 = vmax.f32 %v2870_v31, 0.0  ;;  %v2965_v31 = vmax.f32 %v2804_v61, 0.0 }
 0x57d   : > { %v2892_v30 = vpop.f32.mrf.mxu1  ;;  %3076 = vrot.lane.b32.xlu2 %v3012_v46, %s17355_s7  ;;  %v2963_v46 = vmax.f32 %v2758_v22, 0.0 }
 0x57e   : > { %v3014_v1 = vmul.f32 %v2986_v17, %v2954_v6  ;;  %v2893_v14 = vadd.f32 %v2892_v30, %v12788_v12  ;;  %v3025_v42 = vmul.f32 %v2983_v24, %v2965_v31 }
 0x57f   : > { %v2846_v33 = vpop.f32.mrf.mxu3  ;;  %v3023_v32 = vmul.f32 %v2981_v48, %v2963_v46 }
 0x580   : > { %v2955_v23 = vmax.f32 %v2893_v14, 0.0  ;;  %v2847_v9 = vadd.f32 %v2846_v33, %v12788_v12  ;;  %3080 = vrot.lane.b32.xlu1 %v3014_v1, %s17355_s7 }
 0x581   : > { %v2826_v45 = vpop.f32.mrf.mxu2  ;;  %v2872_v6 = vpop.f32.mrf.mxu0 }
 0x582   : > { %v3015_v44 = vmul.f32 %v2987_v38, %v2955_v23  ;;  %v2953_v47 = vmax.f32 %v2847_v9, 0.0  ;;  %v2873_v30 = vadd.f32 %v2872_v6, %v12856_v15 }
 0x584   : > { %v3013_v63 = vmul.f32 %v2985_v0, %v2953_v47  ;;  %v2968_v1 = vmax.f32 %v2873_v30, 0.0 }
 0x585   : > { %3082 = vrot.lane.b32.xlu2 %v3015_v44, %s17355_s7  ;;  %v2895_v14 = vpop.f32.mrf.mxu1 }
 0x586   : > { %3078 = vrot.lane.b32.xlu0 %v3013_v63, %s17355_s7  ;;  %v3028_v24 = vmul.f32 %v2986_v17, %v2968_v1  ;;  %v2896_v60 = vadd.f32 %v2895_v14, %v12856_v15 }
 0x587   : > { %v2849_v25 = vpop.f32.mrf.mxu3 }
 0x588   : > { %v2850_v53 = vadd.f32 %v2849_v25, %v12856_v15  ;;  %v2969_v9 = vmax.f32 %v2896_v60, 0.0 }
 0x58a   : > { %v2967_v59 = vmax.f32 %v2850_v53, 0.0  ;;  %v3029_v47 = vmul.f32 %v2987_v38, %v2969_v9 }
 0x58c   : > { %v3027_v18 = vmul.f32 %v2985_v0, %v2967_v59 }
 0x58d   : > { %3088 = vrot.lane.b32.xlu2 %v3018_v35, %s17355_s7 }
 0x595   : > { %3094 = vrot.lane.b32.xlu2 %v3021_v11, %s17355_s7 }
 0x597   : > { %v2915_v55 = vpop.f32.mrf.mxu2 }
 0x598   : > { %v2916_v56 = vadd.f32 %v2915_v55, %v12788_v12 }
 0x59a   : > { %v2956_v5 = vmax.f32 %v2916_v56, 0.0 }
 0x59c   : > { %v3016_v51 = vmul.f32 %v2988_v16, %v2956_v5 }
 0x59d   : > { %3100 = vrot.lane.b32.xlu2 %v3024_v43, %s17355_s7 }
 0x59e   : > { %3084 = vrot.lane.b32.xlu0 %v3016_v51, %s17355_s7 }
 0x59f   : > { %v2938_v2 = vpop.f32.mrf.mxu3  ;;  %v2918_v26 = vpop.f32.mrf.mxu2 }
 0x5a0   : > { %v2939_v28 = vadd.f32 %v2938_v2, %v12788_v12  ;;  %v2919_v3 = vadd.f32 %v2918_v26, %v12856_v15  ;;  %v2960_v12 = vmax.f32 %v2689_v40, 0.0 }
 0x5a2   : > { %v2957_v37 = vmax.f32 %v2939_v28, 0.0  ;;  %v2970_v27 = vmax.f32 %v2919_v3, 0.0  ;;  %v3020_v10 = vmul.f32 %v2978_v50, %v2960_v12  ;;  %v2827_v50 = vadd.f32 %v2826_v45, %v12856_v15 }
 0x5a4   : > { %v3017_v41 = vmul.f32 %v2989_v13, %v2957_v37  ;;  %v3030_v20 = vmul.f32 %v2988_v16, %v2970_v27  ;;  %v2966_v29 = vmax.f32 %v2827_v50, 0.0 }
 0x5a5   : > { %3106 = vrot.lane.b32.xlu2 %v3027_v18, %s17355_s7 }
 0x5a6   : > { %3086 = vrot.lane.b32.xlu1 %v3017_v41, %s17355_s7  ;;  %3090 = vrot.lane.b32.xlu0 %v3019_v57, %s17355_s7  ;;  %v3026_v23 = vmul.f32 %v2984_v39, %v2966_v29 }
 0x5a7   : > { %v2941_v33 = vpop.f32.mrf.mxu3 }
 0x5a8   : > { %v2942_v48 = vadd.f32 %v2941_v33, %v12856_v15 }
 0x5aa   : > { %v2971_v0 = vmax.f32 %v2942_v48, 0.0 }
 0x5ac   : > { %v3031_v58 = vmul.f32 %v2989_v13, %v2971_v0 }
 0x5ad   : > { %3112 = vrot.lane.b32.xlu2 %v3030_v20, %s17355_s7 }
 0x5ae   : > { %3092 = vrot.lane.b32.xlu1 %v3020_v10, %s17355_s7  ;;  %3096 = vrot.lane.b32.xlu0 %v3022_v19, %s17355_s7  ;;  %v3065_v44 = vpop.permute.xlu2 %3064 }
 0x5b6   : > { %3098 = vrot.lane.b32.xlu1 %v3023_v32, %s17355_s7  ;;  %3102 = vrot.lane.b32.xlu0 %v3025_v42, %s17355_s7 }
 0x5be   : > { %3104 = vrot.lane.b32.xlu1 %v3026_v23, %s17355_s7  ;;  %3108 = vrot.lane.b32.xlu0 %v3028_v24, %s17355_s7 }
 0x5c5   : > { %v3063_v63 = vpop.permute.xlu1 %3062  ;;  %v3061_v39 = vpop.permute.xlu0 %3060 }
 0x5c6   : > { %3110 = vrot.lane.b32.xlu1 %v3029_v47, %s17355_s7  ;;  %3114 = vrot.lane.b32.xlu0 %v3031_v58, %s17355_s7  ;;  %v12927_v17 = vsel %vm1237_vm11, %v3063_v63, %v3065_v44  ;;  %v12930_v15 = vsel %vm1237_vm11, %v3061_v39, %v3063_v63  ;;  %v12934_v52 = vsel %vm1237_vm11, 0.0, %v3061_v39  ;;  %s17357_s7 = smov 126  }
 0x5c7   : > { %3176 = vst [vmem:[#allocation2 + $0x10] sm:$0xff] %v12927_v17  ;;  %3208 = vrot.lane.b32.xlu2 %v12930_v15, %s17356_s3 }
 0x5c8   : > { %3174 = vst [vmem:[#allocation2] sm:$0xff] %v12934_v52 }
 0x5c9   : > { %3175 = vst [vmem:[#allocation2 + $0x8] sm:$0xff] %v12930_v15 }
 0x5cd   : > { %v3071_v21 = vpop.permute.xlu2 %3070  ;;  %v3067_v38 = vpop.permute.xlu0 %3066 }
 0x5ce   : > { %3210 = vrot.lane.b32.xlu0 %v12927_v17, %s17356_s3  ;;  %3206 = vrot.lane.b32.xlu1 %v12934_v52, %s17356_s3  ;;  %v12945_v35 = vsel %vm1237_vm11, %v3065_v44, %v3067_v38 }
 0x5cf   : > { %v3069_v34 = vpop.permute.xlu1 %3068  ;;  %3177 = vst [vmem:[#allocation2 + $0x18] sm:$0xff] %v12945_v35 }
 0x5d0   : > { %v12949_v45 = vsel %vm1237_vm11, %v3069_v34, %v3071_v21  ;;  %v12952_v49 = vsel %vm1237_vm11, %v3067_v38, %v3069_v34 }
 0x5d1   : > { %3179 = vst [vmem:[#allocation2 + $0x28] sm:$0xff] %v12949_v45  ;;  %3214 = vrot.lane.b32.xlu2 %v12952_v49, %s17356_s3 }
 0x5d2   : > { %3178 = vst [vmem:[#allocation2 + $0x20] sm:$0xff] %v12952_v49 }
 0x5d6   : > { %3216 = vrot.lane.b32.xlu0 %v12949_v45, %s17356_s3  ;;  %3212 = vrot.lane.b32.xlu1 %v12945_v35, %s17356_s3 }
 0x5d7   : > { %v3077_v11 = vpop.permute.xlu2 %3076 }
 0x5da   : > { %v3075_v4 = vpop.permute.xlu1 %3074  ;;  %v3073_v25 = vpop.permute.xlu0 %3072 }
 0x5db   : > { %v12963_v55 = vsel %vm1237_vm11, %v3075_v4, %v3077_v11  ;;  %v12966_v62 = vsel %vm1237_vm11, %v3071_v21, %v3073_v25  ;;  %v12969_v56 = vsel %vm1237_vm11, %v3073_v25, %v3075_v4 }
 0x5dc   : > { %3182 = vst [vmem:[#allocation2 + $0x40] sm:$0xff] %v12963_v55  ;;  %3220 = vrot.lane.b32.xlu2 %v12969_v56, %s17356_s3 }
 0x5dd   : > { %3180 = vst [vmem:[#allocation2 + $0x30] sm:$0xff] %v12966_v62 }
 0x5de   : > { %3181 = vst [vmem:[#allocation2 + $0x38] sm:$0xff] %v12969_v56  ;;  %3222 = vrot.lane.b32.xlu0 %v12963_v55, %s17356_s3  ;;  %3218 = vrot.lane.b32.xlu1 %v12966_v62, %s17356_s3 }
 0x5df   : > { %v3083_v16 = vpop.permute.xlu2 %3082 }
 0x5e7   : > { %v3089_v5 = vpop.permute.xlu2 %3088 }
 0x5e8   : > { %v12981_v53 = vsel %vm1237_vm11, 0.0, %v3089_v5 }
 0x5e9   : > { %3189 = vst [vmem:[#allocation2 + $0x78] sm:$0xff] %v12981_v53  ;;  %3236 = vrot.lane.b32.xlu1 %v12981_v53, %s17356_s3 }
 0x5ef   : > { %v3095_v13 = vpop.permute.xlu2 %3094 }
 0x5f2   : > { %v3081_v43 = vpop.permute.xlu1 %3080 }
 0x5f3   : > { %v12987_v51 = vsel %vm1237_vm11, %v3081_v43, %v3083_v16 }
 0x5f4   : > { %3185 = vst [vmem:[#allocation2 + $0x58] sm:$0xff] %v12987_v51  ;;  %3228 = vrot.lane.b32.xlu0 %v12987_v51, %s17356_s3 }
 0x5f7   : > { %v3101_v41 = vpop.permute.xlu2 %3100 }
 0x5f8   : > { %v3079_v36 = vpop.permute.xlu0 %3078 }
 0x5f9   : > { %v12993_v59 = vsel %vm1237_vm11, %v3077_v11, %v3079_v36  ;;  %v12996_v2 = vsel %vm1237_vm11, %v3079_v36, %v3081_v43 }
 0x5fa   : > { %3183 = vst [vmem:[#allocation2 + $0x48] sm:$0xff] %v12993_v59  ;;  %3224 = vrot.lane.b32.xlu1 %v12993_v59, %s17356_s3 }
 0x5fb   : > { %3184 = vst [vmem:[#allocation2 + $0x50] sm:$0xff] %v12996_v2 }
 0x5ff   : > { %v3107_v19 = vpop.permute.xlu2 %3106 }
 0x607   : > { %v3113_v50 = vpop.permute.xlu2 %3112 }
 0x610   : > { %v3085_v26 = vpop.permute.xlu0 %3084 }
 0x611   : > { %v13003_v28 = vsel %vm1237_vm11, %v3083_v16, %v3085_v26 }
 0x612   : > { %3186 = vst [vmem:[#allocation2 + $0x60] sm:$0xff] %v13003_v28  ;;  %3230 = vrot.lane.b32.xlu1 %v13003_v28, %s17356_s3 }
 0x618   : > { %v13008_v7 = vpop.permute.xlu1 %3086  ;;  %v3091_v3 = vpop.permute.xlu0 %3090 }
 0x619   : > { %3188 = vst.msk [vmem:[#allocation2 + $0x70] sm:$0xff] %vm17257_vm1, %v13008_v7  ;;  %v13013_v37 = vsel %vm1237_vm11, %v3089_v5, %v3091_v3  ;;  %v13017_v18 = vsel %vm1237_vm11, %v3085_v26, %v13008_v7 }
 0x61a   : > { %3190 = vst [vmem:[#allocation2 + $0x80] sm:$0xff] %v13013_v37  ;;  %3238 = vrot.lane.b32.xlu2 %v13013_v37, %s17356_s3 }
 0x61b   : > { %3187 = vst [vmem:[#allocation2 + $0x68] sm:$0xff] %v13017_v18 }
 0x620   : > { %v3093_v57 = vpop.permute.xlu1 %3092  ;;  %v3097_v40 = vpop.permute.xlu0 %3096 }
 0x621   : > { %v13024_v54 = vsel %vm1237_vm11, %v3091_v3, %v3093_v57  ;;  %v13027_v27 = vsel %vm1237_vm11, %v3093_v57, %v3095_v13  ;;  %v13030_v12 = vsel %vm1237_vm11, %v3095_v13, %v3097_v40  ;;  %v3209_v23 = vpop.permute.xlu2 %3208 }
 0x622   : > { %3191 = vst [vmem:[#allocation2 + $0x88] sm:$0xff] %v13024_v54  ;;  %3242 = vrot.lane.b32.xlu1 %v13027_v27, %s17356_s3  ;;  %3240 = vrot.lane.b32.xlu0 %v13024_v54, %s17356_s3 }
 0x623   : > { %3192 = vst [vmem:[#allocation2 + $0x90] sm:$0xff] %v13027_v27  ;;  %3226 = vrot.lane.b32.xlu2 %v12996_v2, %s17356_s3 }
 0x624   : > { %3193 = vst [vmem:[#allocation2 + $0x98] sm:$0xff] %v13030_v12 }
 0x628   : > { %v3099_v8 = vpop.permute.xlu1 %3098  ;;  %v3103_v20 = vpop.permute.xlu0 %3102 }
 0x629   : > { %v13042_v61 = vsel %vm1237_vm11, %v3097_v40, %v3099_v8  ;;  %v13045_v22 = vsel %vm1237_vm11, %v3099_v8, %v3101_v41  ;;  %v13048_v10 = vsel %vm1237_vm11, %v3101_v41, %v3103_v20 }
 0x62a   : > { %3194 = vst [vmem:[#allocation2 + $0xa0] sm:$0xff] %v13042_v61  ;;  %3248 = vrot.lane.b32.xlu1 %v13045_v22, %s17356_s3  ;;  %3234 = vrot.lane.b32.xlu0 %v13008_v7, %s17356_s3 }
 0x62b   : > { %3195 = vst [vmem:[#allocation2 + $0xa8] sm:$0xff] %v13045_v22  ;;  %3244 = vrot.lane.b32.xlu2 %v13030_v12, %s17356_s3  ;;  %v3215_v0 = vpop.permute.xlu2 %3214 }
 0x62c   : > { %3196 = vst [vmem:[#allocation2 + $0xb0] sm:$0xff] %v13048_v10 }
 0x630   : > { %v3105_v31 = vpop.permute.xlu1 %3104  ;;  %v3109_v46 = vpop.permute.xlu0 %3108 }
 0x631   : > { %v13060_v6 = vsel %vm1237_vm11, %v3103_v20, %v3105_v31  ;;  %v13063_v42 = vsel %vm1237_vm11, %v3105_v31, %v3107_v19  ;;  %v13066_v32 = vsel %vm1237_vm11, %v3107_v19, %v3109_v46 }
 0x632   : > { %3197 = vst [vmem:[#allocation2 + $0xb8] sm:$0xff] %v13060_v6  ;;  %3254 = vrot.lane.b32.xlu1 %v13063_v42, %s17356_s3  ;;  %3246 = vrot.lane.b32.xlu0 %v13042_v61, %s17356_s3 }
 0x633   : > { %3198 = vst [vmem:[#allocation2 + $0xc0] sm:$0xff] %v13063_v42  ;;  %3232 = vrot.lane.b32.xlu2 %v13017_v18, %s17356_s3 }
 0x634   : > { %3199 = vst [vmem:[#allocation2 + $0xc8] sm:$0xff] %v13066_v32 }
 0x636   : > { %v3221_v21 = vpop.permute.xlu2 %3220 }
 0x638   : > { %v3111_v30 = vpop.permute.xlu1 %3110  ;;  %v13077_v29 = vpop.permute.xlu0 %3114 }
 0x639   : > { %v13080_v1 = vsel %vm1237_vm11, %v3109_v46, %v3111_v30  ;;  %v13083_v14 = vsel %vm1237_vm11, %v3111_v30, %v3113_v50  ;;  %3203 = vst.msk [vmem:[#allocation2 + $0xe8] sm:$0xff] %vm17257_vm1, %v13077_v29  ;;  %v13089_v33 = vsel %vm1237_vm11, %v3113_v50, %v13077_v29  ;;  %vm17358_vm11 = vcmask 56320  }
 0x63a   : > { %3200 = vst [vmem:[#allocation2 + $0xd0] sm:$0xff] %v13080_v1  ;;  %3260 = vrot.lane.b32.xlu1 %v13083_v14, %s17356_s3  ;;  %3252 = vrot.lane.b32.xlu0 %v13060_v6, %s17356_s3  ;;  %vm17359_vm12 = vmmov %vm17358_vm11  ;;  %vm7121_vm1 = vcmask 1046533  }
 0x63b   : > { %3201 = vst [vmem:[#allocation2 + $0xd8] sm:$0xff] %v13083_v14  ;;  %3250 = vrot.lane.b32.xlu2 %v13048_v10, %s17356_s3 }
 0x63c   : > { %3202 = vst [vmem:[#allocation2 + $0xe0] sm:$0xff] %v13089_v33 }
 0x640   : > { %v3207_v24 = vpop.permute.xlu1 %3206  ;;  %v3211_v60 = vpop.permute.xlu0 %3210 }
 0x641   : > { %v3266_v48 = vsel %vm17258_vm7, %v3207_v24, %v3209_v23  ;;  %v3267_v9 = vsel %vm17258_vm7, %v3209_v23, %v3211_v60 }
 0x642   : > { %3324 = vst [vmem:[#allocation2 + $0xf0] sm:$0xff] %v3266_v48  ;;  %3354 = vrot.lane.b32.xlu1 %v12934_v52, %s17357_s7  ;;  %3258 = vrot.lane.b32.xlu0 %v13080_v1, %s17356_s3 }
 0x643   : > { %3325 = vst [vmem:[#allocation2 + $0xf8] sm:$0xff] %v3267_v9  ;;  %3256 = vrot.lane.b32.xlu2 %v13066_v32, %s17356_s3 }
 0x648   : > { %v3213_v44 = vpop.permute.xlu1 %3212  ;;  %v3217_v47 = vpop.permute.xlu0 %3216 }
 0x649   : > { %v3268_v58 = vsel %vm17258_vm7, %v3211_v60, %v3213_v44  ;;  %v3269_v63 = vsel %vm17258_vm7, %v3213_v44, %v3215_v0  ;;  %v3270_v39 = vsel %vm17258_vm7, %v3215_v0, %v3217_v47 }
 0x64a   : > { %3360 = vrot.lane.b32.xlu1 %v12945_v35, %s17357_s7  ;;  %3264 = vrot.lane.b32.xlu0 %v13077_v29, %s17356_s3  ;;  %3326 = vst [vmem:[#allocation2 + $0x100] sm:$0xff] %v3268_v58 }
 0x64b   : > { %3262 = vrot.lane.b32.xlu2 %v13089_v33, %s17356_s3  ;;  %3327 = vst [vmem:[#allocation2 + $0x108] sm:$0xff] %v3269_v63 }
 0x64c   : > { %3328 = vst [vmem:[#allocation2 + $0x110] sm:$0xff] %v3270_v39 }
 0x650   : > { %v3219_v38 = vpop.permute.xlu1 %3218  ;;  %v3223_v34 = vpop.permute.xlu0 %3222 }
 0x651   : > { %v3271_v11 = vsel %vm17258_vm7, %v3217_v47, %v3219_v38  ;;  %v3272_v4 = vsel %vm17258_vm7, %v3219_v38, %v3221_v21  ;;  %v3273_v25 = vsel %vm17258_vm7, %v3221_v21, %v3223_v34 }
 0x652   : > { %3366 = vrot.lane.b32.xlu1 %v12966_v62, %s17357_s7  ;;  %3358 = vrot.lane.b32.xlu0 %v12927_v17, %s17357_s7  ;;  %3329 = vst [vmem:[#allocation2 + $0x118] sm:$0xff] %v3271_v11 }
 0x653   : > { %3356 = vrot.lane.b32.xlu2 %v12930_v15, %s17357_s7  ;;  %3330 = vst [vmem:[#allocation2 + $0x120] sm:$0xff] %v3272_v4 }
 0x654   : > { %3331 = vst [vmem:[#allocation2 + $0x128] sm:$0xff] %v3273_v25 }
 0x65a   : > { %3372 = vrot.lane.b32.xlu1 %v12993_v59, %s17357_s7  ;;  %3364 = vrot.lane.b32.xlu0 %v12949_v45, %s17357_s7 }
 0x65b   : > { %3362 = vrot.lane.b32.xlu2 %v12952_v49, %s17357_s7  ;;  %v3237_v16 = vpop.permute.xlu1 %3236 }
 0x662   : > { %3378 = vrot.lane.b32.xlu1 %v13003_v28, %s17357_s7  ;;  %3370 = vrot.lane.b32.xlu0 %v12963_v55, %s17357_s7 }
 0x663   : > { %3368 = vrot.lane.b32.xlu2 %v12969_v56, %s17357_s7 }
 0x666   : > { %v3229_v13 = vpop.permute.xlu0 %3228 }
 0x66a   : > { %3384 = vrot.lane.b32.xlu1 %v12981_v53, %s17357_s7  ;;  %3376 = vrot.lane.b32.xlu0 %v12987_v51, %s17357_s7 }
 0x66b   : > { %3374 = vrot.lane.b32.xlu2 %v12996_v2, %s17357_s7 }
 0x66c   : > { %v3225_v5 = vpop.permute.xlu1 %3224 }
 0x66d   : > { %v3274_v43 = vsel %vm17258_vm7, %v3223_v34, %v3225_v5 }
 0x66e   : > { %3332 = vst [vmem:[#allocation2 + $0x130] sm:$0xff] %v3274_v43 }
 0x672   : > { %3390 = vrot.lane.b32.xlu1 %v13027_v27, %s17357_s7  ;;  %3382 = vrot.lane.b32.xlu0 %v13008_v7, %s17357_s7 }
 0x673   : > { %3380 = vrot.lane.b32.xlu2 %v13017_v18, %s17357_s7 }
 0x674   : > { %v3239_v36 = vpop.permute.xlu2 %3238 }
 0x675   : > { %v3280_v26 = vsel %vm17258_vm7, %v3237_v16, %v3239_v36 }
 0x676   : > { %3339 = vst [vmem:[#allocation2 + $0x168] sm:$0xff] %v3280_v26 }
 0x67a   : > { %3396 = vrot.lane.b32.xlu1 %v13045_v22, %s17357_s7  ;;  %3388 = vrot.lane.b32.xlu0 %v13024_v54, %s17357_s7 }
 0x67b   : > { %3386 = vrot.lane.b32.xlu2 %v13013_v37, %s17357_s7 }
 0x67d   : > { %v3227_v3 = vpop.permute.xlu2 %3226 }
 0x67e   : > { %v3275_v41 = vsel %vm17258_vm7, %v3225_v5, %v3227_v3  ;;  %v3276_v57 = vsel %vm17258_vm7, %v3227_v3, %v3229_v13 }
 0x67f   : > { %3333 = vst [vmem:[#allocation2 + $0x138] sm:$0xff] %v3275_v41 }
 0x680   : > { %3334 = vst [vmem:[#allocation2 + $0x140] sm:$0xff] %v3276_v57 }
 0x682   : > { %3402 = vrot.lane.b32.xlu1 %v13063_v42, %s17357_s7  ;;  %3394 = vrot.lane.b32.xlu0 %v13042_v61, %s17357_s7 }
 0x683   : > { %3392 = vrot.lane.b32.xlu2 %v13030_v12, %s17357_s7 }
 0x684   : > { %v3231_v40 = vpop.permute.xlu1 %3230 }
 0x685   : > { %v3277_v8 = vsel %vm17258_vm7, %v3229_v13, %v3231_v40  ;;  %v3245_v20 = vpop.permute.xlu2 %3244 }
 0x686   : > { %3335 = vst [vmem:[#allocation2 + $0x148] sm:$0xff] %v3277_v8 }
 0x68a   : > { %3408 = vrot.lane.b32.xlu1 %v13083_v14, %s17357_s7  ;;  %3400 = vrot.lane.b32.xlu0 %v13060_v6, %s17357_s7 }
 0x68b   : > { %3398 = vrot.lane.b32.xlu2 %v13048_v10, %s17357_s7 }
 0x68d   : > { %v3233_v19 = vpop.permute.xlu2 %3232 }
 0x68e   : > { %v3278_v31 = vsel %vm17258_vm7, %v3231_v40, %v3233_v19 }
 0x68f   : > { %3336 = vst [vmem:[#allocation2 + $0x150] sm:$0xff] %v3278_v31 }
 0x692   : > { %3502 = vrot.lane.b32.xlu1 %v12934_v52, %s17289_s20  ;;  %3406 = vrot.lane.b32.xlu0 %v13080_v1, %s17357_s7 }
 0x693   : > { %3404 = vrot.lane.b32.xlu2 %v13066_v32, %s17357_s7 }
 0x694   : > { %v3243_v46 = vpop.permute.xlu1 %3242  ;;  %v3241_v50 = vpop.permute.xlu0 %3240 }
 0x695   : > { %v3283_v30 = vsel %vm17258_vm7, %v3243_v46, %v3245_v20  ;;  %v3251_v23 = vpop.permute.xlu2 %3250  ;;  %v3281_v24 = vsel %vm17258_vm7, %v3239_v36, %v3241_v50  ;;  %v3282_v60 = vsel %vm17258_vm7, %v3241_v50, %v3243_v46 }
 0x696   : > { %3342 = vst [vmem:[#allocation2 + $0x180] sm:$0xff] %v3283_v30 }
 0x697   : > { %3340 = vst [vmem:[#allocation2 + $0x170] sm:$0xff] %v3281_v24 }
 0x698   : > { %3341 = vst [vmem:[#allocation2 + $0x178] sm:$0xff] %v3282_v60 }
 0x69a   : > { %3508 = vrot.lane.b32.xlu1 %v12945_v35, %s17289_s20  ;;  %3412 = vrot.lane.b32.xlu0 %v13077_v29, %s17357_s7 }
 0x69b   : > { %3410 = vrot.lane.b32.xlu2 %v13089_v33, %s17357_s7  ;;  %s17422_s7 = smov 68  }
 0x69c   : > { %v3249_v48 = vpop.permute.xlu1 %3248  ;;  %v3235_v9 = vpop.permute.xlu0 %3234 }
 0x69d   : > { %v3286_v0 = vsel %vm17258_vm7, %v3249_v48, %v3251_v23  ;;  %v3257_v44 = vpop.permute.xlu2 %3256  ;;  %v3279_v47 = vsel %vm17258_vm7, %v3233_v19, %v3235_v9  ;;  %3338 = vst.msk [vmem:[#allocation2 + $0x160] sm:$0xff] %vm17358_vm11, %v3235_v9 }
 0x69e   : > { %3345 = vst [vmem:[#allocation2 + $0x198] sm:$0xff] %v3286_v0 }
 0x69f   : > { %3337 = vst [vmem:[#allocation2 + $0x158] sm:$0xff] %v3279_v47 }
 0x6a2   : > { %3514 = vrot.lane.b32.xlu1 %v12966_v62, %s17289_s20  ;;  %3506 = vrot.lane.b32.xlu0 %v12927_v17, %s17289_s20 }
 0x6a3   : > { %3504 = vrot.lane.b32.xlu2 %v12930_v15, %s17289_s20 }
 0x6a4   : > { %v3255_v58 = vpop.permute.xlu1 %3254  ;;  %v3247_v63 = vpop.permute.xlu0 %3246 }
 0x6a5   : > { %v3289_v39 = vsel %vm17258_vm7, %v3255_v58, %v3257_v44  ;;  %v3263_v21 = vpop.permute.xlu2 %3262  ;;  %v3284_v38 = vsel %vm17258_vm7, %v3245_v20, %v3247_v63  ;;  %v3285_v34 = vsel %vm17258_vm7, %v3247_v63, %v3249_v48 }
 0x6a6   : > { %3348 = vst [vmem:[#allocation2 + $0x1b0] sm:$0xff] %v3289_v39 }
 0x6a7   : > { %3343 = vst [vmem:[#allocation2 + $0x188] sm:$0xff] %v3284_v38 }
 0x6a8   : > { %3344 = vst [vmem:[#allocation2 + $0x190] sm:$0xff] %v3285_v34 }
 0x6aa   : > { %3520 = vrot.lane.b32.xlu1 %v12993_v59, %s17289_s20  ;;  %3512 = vrot.lane.b32.xlu0 %v12949_v45, %s17289_s20 }
 0x6ab   : > { %3510 = vrot.lane.b32.xlu2 %v12952_v49, %s17289_s20 }
 0x6ac   : > { %v3261_v11 = vpop.permute.xlu1 %3260  ;;  %v3253_v4 = vpop.permute.xlu0 %3252 }
 0x6ad   : > { %v3292_v25 = vsel %vm17258_vm7, %v3261_v11, %v3263_v21  ;;  %v3357_v16 = vpop.permute.xlu2 %3356  ;;  %v3287_v5 = vsel %vm17258_vm7, %v3251_v23, %v3253_v4  ;;  %v3288_v43 = vsel %vm17258_vm7, %v3253_v4, %v3255_v58 }
 0x6ae   : > { %3351 = vst [vmem:[#allocation2 + $0x1c8] sm:$0xff] %v3292_v25 }
 0x6af   : > { %3346 = vst [vmem:[#allocation2 + $0x1a0] sm:$0xff] %v3287_v5 }
 0x6b0   : > { %3347 = vst [vmem:[#allocation2 + $0x1a8] sm:$0xff] %v3288_v43 }
 0x6b2   : > { %3526 = vrot.lane.b32.xlu1 %v13003_v28, %s17289_s20  ;;  %3518 = vrot.lane.b32.xlu0 %v12963_v55, %s17289_s20 }
 0x6b3   : > { %3516 = vrot.lane.b32.xlu2 %v12969_v56, %s17289_s20 }
 0x6b4   : > { %v3355_v36 = vpop.permute.xlu1 %3354  ;;  %v3259_v26 = vpop.permute.xlu0 %3258 }
 0x6b5   : > { %v3414_v13 = vsel %vm543_vm6, %v3355_v36, %v3357_v16  ;;  %v3363_v3 = vpop.permute.xlu2 %3362  ;;  %v3290_v41 = vsel %vm17258_vm7, %v3257_v44, %v3259_v26  ;;  %v3291_v57 = vsel %vm17258_vm7, %v3259_v26, %v3261_v11 }
 0x6b6   : > { %3472 = vst [vmem:[#allocation2 + $0x1e0] sm:$0xff] %v3414_v13 }
 0x6b7   : > { %3349 = vst [vmem:[#allocation2 + $0x1b8] sm:$0xff] %v3290_v41 }
 0x6b8   : > { %3350 = vst [vmem:[#allocation2 + $0x1c0] sm:$0xff] %v3291_v57 }
 0x6ba   : > { %3532 = vrot.lane.b32.xlu1 %v12981_v53, %s17289_s20  ;;  %3524 = vrot.lane.b32.xlu0 %v12987_v51, %s17289_s20 }
 0x6bb   : > { %3522 = vrot.lane.b32.xlu2 %v12996_v2, %s17289_s20 }
 0x6bc   : > { %v3361_v40 = vpop.permute.xlu1 %3360  ;;  %v3265_v8 = vpop.permute.xlu0 %3264 }
 0x6bd   : > { %v3417_v20 = vsel %vm543_vm6, %v3361_v40, %v3363_v3  ;;  %v3369_v19 = vpop.permute.xlu2 %3368  ;;  %v3293_v31 = vsel %vm17258_vm7, %v3263_v21, %v3265_v8  ;;  %3353 = vst.msk [vmem:[#allocation2 + $0x1d8] sm:$0xff] %vm17359_vm12, %v3265_v8 }
 0x6be   : > { %3475 = vst [vmem:[#allocation2 + $0x1f8] sm:$0xff] %v3417_v20 }
 0x6bf   : > { %3352 = vst [vmem:[#allocation2 + $0x1d0] sm:$0xff] %v3293_v31 }
 0x6c2   : > { %3538 = vrot.lane.b32.xlu1 %v13027_v27, %s17289_s20  ;;  %3530 = vrot.lane.b32.xlu0 %v13008_v7, %s17289_s20 }
 0x6c3   : > { %3528 = vrot.lane.b32.xlu2 %v13017_v18, %s17289_s20 }
 0x6c4   : > { %v3367_v46 = vpop.permute.xlu1 %3366  ;;  %v3359_v50 = vpop.permute.xlu0 %3358 }
 0x6c5   : > { %v3420_v30 = vsel %vm543_vm6, %v3367_v46, %v3369_v19  ;;  %v3375_v23 = vpop.permute.xlu2 %3374  ;;  %v3415_v24 = vsel %vm543_vm6, %v3357_v16, %v3359_v50  ;;  %v3416_v60 = vsel %vm543_vm6, %v3359_v50, %v3361_v40 }
 0x6c6   : > { %3478 = vst [vmem:[#allocation2 + $0x210] sm:$0xff] %v3420_v30 }
 0x6c7   : > { %3473 = vst [vmem:[#allocation2 + $0x1e8] sm:$0xff] %v3415_v24 }
 0x6c8   : > { %3474 = vst [vmem:[#allocation2 + $0x1f0] sm:$0xff] %v3416_v60 }
 0x6ca   : > { %3544 = vrot.lane.b32.xlu1 %v13045_v22, %s17289_s20  ;;  %3536 = vrot.lane.b32.xlu0 %v13024_v54, %s17289_s20 }
 0x6cb   : > { %3534 = vrot.lane.b32.xlu2 %v13013_v37, %s17289_s20 }
 0x6cc   : > { %v3373_v48 = vpop.permute.xlu1 %3372  ;;  %v3365_v9 = vpop.permute.xlu0 %3364 }
 0x6cd   : > { %v3423_v0 = vsel %vm543_vm6, %v3373_v48, %v3375_v23  ;;  %v3381_v44 = vpop.permute.xlu2 %3380  ;;  %v3418_v47 = vsel %vm543_vm6, %v3363_v3, %v3365_v9  ;;  %v3419_v58 = vsel %vm543_vm6, %v3365_v9, %v3367_v46 }
 0x6ce   : > { %3481 = vst [vmem:[#allocation2 + $0x228] sm:$0xff] %v3423_v0 }
 0x6cf   : > { %3476 = vst [vmem:[#allocation2 + $0x200] sm:$0xff] %v3418_v47 }
 0x6d0   : > { %3477 = vst [vmem:[#allocation2 + $0x208] sm:$0xff] %v3419_v58 }
 0x6d2   : > { %3550 = vrot.lane.b32.xlu1 %v13063_v42, %s17289_s20  ;;  %3542 = vrot.lane.b32.xlu0 %v13042_v61, %s17289_s20 }
 0x6d3   : > { %3540 = vrot.lane.b32.xlu2 %v13030_v12, %s17289_s20 }
 0x6d4   : > { %v3379_v63 = vpop.permute.xlu1 %3378  ;;  %v3371_v39 = vpop.permute.xlu0 %3370 }
 0x6d5   : > { %v3426_v21 = vsel %vm543_vm6, %v3379_v63, %v3381_v44  ;;  %v3387_v38 = vpop.permute.xlu2 %3386  ;;  %v3421_v34 = vsel %vm543_vm6, %v3369_v19, %v3371_v39  ;;  %v3422_v11 = vsel %vm543_vm6, %v3371_v39, %v3373_v48 }
 0x6d6   : > { %3484 = vst [vmem:[#allocation2 + $0x240] sm:$0xff] %v3426_v21 }
 0x6d7   : > { %3479 = vst [vmem:[#allocation2 + $0x218] sm:$0xff] %v3421_v34 }
 0x6d8   : > { %3480 = vst [vmem:[#allocation2 + $0x220] sm:$0xff] %v3422_v11 }
 0x6da   : > { %3556 = vrot.lane.b32.xlu1 %v13083_v14, %s17289_s20  ;;  %3548 = vrot.lane.b32.xlu0 %v13060_v6, %s17289_s20 }
 0x6db   : > { %3546 = vrot.lane.b32.xlu2 %v13048_v10, %s17289_s20 }
 0x6dc   : > { %v3385_v4 = vpop.permute.xlu1 %3384  ;;  %v3377_v25 = vpop.permute.xlu0 %3376 }
 0x6dd   : > { %v3428_v16 = vsel %vm543_vm6, %v3385_v4, %v3387_v38  ;;  %v3393_v5 = vpop.permute.xlu2 %3392  ;;  %v3424_v43 = vsel %vm543_vm6, %v3375_v23, %v3377_v25  ;;  %v3425_v36 = vsel %vm543_vm6, %v3377_v25, %v3379_v63 }
 0x6de   : > { %3487 = vst [vmem:[#allocation2 + $0x258] sm:$0xff] %v3428_v16 }
 0x6df   : > { %3482 = vst [vmem:[#allocation2 + $0x230] sm:$0xff] %v3424_v43 }
 0x6e0   : > { %3483 = vst [vmem:[#allocation2 + $0x238] sm:$0xff] %v3425_v36 }
 0x6e2   : > { %3650 = vrot.lane.b32.xlu1 %v12934_v52, %s17290_s21  ;;  %3554 = vrot.lane.b32.xlu0 %v13080_v1, %s17289_s20 }
 0x6e3   : > { %3552 = vrot.lane.b32.xlu2 %v13066_v32, %s17289_s20 }
 0x6e4   : > { %v3391_v26 = vpop.permute.xlu1 %3390  ;;  %v3383_v13 = vpop.permute.xlu0 %3382 }
 0x6e5   : > { %v3431_v3 = vsel %vm543_vm6, %v3391_v26, %v3393_v5  ;;  %v3399_v41 = vpop.permute.xlu2 %3398  ;;  %v3427_v57 = vsel %vm543_vm6, %v3381_v44, %v3383_v13  ;;  %3486 = vst.msk [vmem:[#allocation2 + $0x250] sm:$0xff] %vm17360_vm0, %v3383_v13  ;;  %vm17367_vm0 = vcmask 859136  }
 0x6e6   : > { %3490 = vst [vmem:[#allocation2 + $0x270] sm:$0xff] %v3431_v3 }
 0x6e7   : > { %3485 = vst [vmem:[#allocation2 + $0x248] sm:$0xff] %v3427_v57 }
 0x6ea   : > { %3656 = vrot.lane.b32.xlu1 %v12945_v35, %s17290_s21  ;;  %3560 = vrot.lane.b32.xlu0 %v13077_v29, %s17289_s20 }
 0x6eb   : > { %3558 = vrot.lane.b32.xlu2 %v13089_v33, %s17289_s20  ;;  %s17366_s20 = smov 95  }
 0x6ec   : > { %v3397_v40 = vpop.permute.xlu1 %3396  ;;  %v3389_v8 = vpop.permute.xlu0 %3388 }
 0x6ed   : > { %v3434_v20 = vsel %vm543_vm6, %v3397_v40, %v3399_v41  ;;  %v3405_v19 = vpop.permute.xlu2 %3404  ;;  %v3429_v31 = vsel %vm543_vm6, %v3387_v38, %v3389_v8  ;;  %v3430_v46 = vsel %vm543_vm6, %v3389_v8, %v3391_v26 }
 0x6ee   : > { %3493 = vst [vmem:[#allocation2 + $0x288] sm:$0xff] %v3434_v20 }
 0x6ef   : > { %3488 = vst [vmem:[#allocation2 + $0x260] sm:$0xff] %v3429_v31 }
 0x6f0   : > { %3489 = vst [vmem:[#allocation2 + $0x268] sm:$0xff] %v3430_v46 }
 0x6f2   : > { %3662 = vrot.lane.b32.xlu1 %v12966_v62, %s17290_s21  ;;  %3654 = vrot.lane.b32.xlu0 %v12927_v17, %s17290_s21 }
 0x6f3   : > { %3652 = vrot.lane.b32.xlu2 %v12930_v15, %s17290_s21 }
 0x6f4   : > { %v3403_v50 = vpop.permute.xlu1 %3402  ;;  %v3395_v30 = vpop.permute.xlu0 %3394 }
 0x6f5   : > { %v3437_v23 = vsel %vm543_vm6, %v3403_v50, %v3405_v19  ;;  %v3411_v24 = vpop.permute.xlu2 %3410  ;;  %v3432_v60 = vsel %vm543_vm6, %v3393_v5, %v3395_v30  ;;  %v3433_v48 = vsel %vm543_vm6, %v3395_v30, %v3397_v40 }
 0x6f6   : > { %3496 = vst [vmem:[#allocation2 + $0x2a0] sm:$0xff] %v3437_v23 }
 0x6f7   : > { %3491 = vst [vmem:[#allocation2 + $0x278] sm:$0xff] %v3432_v60 }
 0x6f8   : > { %3492 = vst [vmem:[#allocation2 + $0x280] sm:$0xff] %v3433_v48 }
 0x6fa   : > { %3668 = vrot.lane.b32.xlu1 %v12993_v59, %s17290_s21  ;;  %3660 = vrot.lane.b32.xlu0 %v12949_v45, %s17290_s21 }
 0x6fb   : > { %3658 = vrot.lane.b32.xlu2 %v12952_v49, %s17290_s21 }
 0x6fc   : > { %v3409_v9 = vpop.permute.xlu1 %3408  ;;  %v3401_v0 = vpop.permute.xlu0 %3400 }
 0x6fd   : > { %v3440_v44 = vsel %vm543_vm6, %v3409_v9, %v3411_v24  ;;  %v3505_v47 = vpop.permute.xlu2 %3504  ;;  %v3435_v58 = vsel %vm543_vm6, %v3399_v41, %v3401_v0  ;;  %v3436_v63 = vsel %vm543_vm6, %v3401_v0, %v3403_v50 }
 0x6fe   : > { %3499 = vst [vmem:[#allocation2 + $0x2b8] sm:$0xff] %v3440_v44 }
 0x6ff   : > { %3494 = vst [vmem:[#allocation2 + $0x290] sm:$0xff] %v3435_v58 }
 0x700   : > { %3495 = vst [vmem:[#allocation2 + $0x298] sm:$0xff] %v3436_v63 }
 0x702   : > { %3674 = vrot.lane.b32.xlu1 %v13003_v28, %s17290_s21  ;;  %3666 = vrot.lane.b32.xlu0 %v12963_v55, %s17290_s21 }
 0x703   : > { %3664 = vrot.lane.b32.xlu2 %v12969_v56, %s17290_s21 }
 0x704   : > { %v3503_v39 = vpop.permute.xlu1 %3502  ;;  %v3407_v21 = vpop.permute.xlu0 %3406 }
 0x705   : > { %v3562_v38 = vsel %vm563_vm4, %v3503_v39, %v3505_v47  ;;  %v3511_v34 = vpop.permute.xlu2 %3510  ;;  %v3438_v11 = vsel %vm543_vm6, %v3405_v19, %v3407_v21  ;;  %v3439_v4 = vsel %vm543_vm6, %v3407_v21, %v3409_v9 }
 0x706   : > { %3620 = vst [vmem:[#allocation2 + $0x2d0] sm:$0xff] %v3562_v38 }
 0x707   : > { %3497 = vst [vmem:[#allocation2 + $0x2a8] sm:$0xff] %v3438_v11 }
 0x708   : > { %3498 = vst [vmem:[#allocation2 + $0x2b0] sm:$0xff] %v3439_v4 }
 0x70a   : > { %3680 = vrot.lane.b32.xlu1 %v12981_v53, %s17290_s21  ;;  %3672 = vrot.lane.b32.xlu0 %v12987_v51, %s17290_s21 }
 0x70b   : > { %3670 = vrot.lane.b32.xlu2 %v12996_v2, %s17290_s21 }
 0x70c   : > { %v3509_v25 = vpop.permute.xlu1 %3508  ;;  %v3413_v16 = vpop.permute.xlu0 %3412 }
 0x70d   : > { %v3565_v5 = vsel %vm563_vm4, %v3509_v25, %v3511_v34  ;;  %v3517_v43 = vpop.permute.xlu2 %3516  ;;  %v3441_v36 = vsel %vm543_vm6, %v3411_v24, %v3413_v16  ;;  %3501 = vst.msk [vmem:[#allocation2 + $0x2c8] sm:$0xff] %vm17361_vm3, %v3413_v16  ;;  %vm17362_vm6 = vcmask 39936   ;;  %vm17368_vm3 = vcmask 785408  }
 0x70e   : > { %3623 = vst [vmem:[#allocation2 + $0x2e8] sm:$0xff] %v3565_v5  ;;  %vm17363_vm11 = vmmov %vm17362_vm6 }
 0x70f   : > { %3500 = vst [vmem:[#allocation2 + $0x2c0] sm:$0xff] %v3441_v36 }
 0x712   : > { %3686 = vrot.lane.b32.xlu1 %v13027_v27, %s17290_s21  ;;  %3678 = vrot.lane.b32.xlu0 %v13008_v7, %s17290_s21 }
 0x713   : > { %3676 = vrot.lane.b32.xlu2 %v13017_v18, %s17290_s21 }
 0x714   : > { %v3515_v26 = vpop.permute.xlu1 %3514  ;;  %v3507_v13 = vpop.permute.xlu0 %3506 }
 0x715   : > { %v3568_v3 = vsel %vm563_vm4, %v3515_v26, %v3517_v43  ;;  %v3523_v41 = vpop.permute.xlu2 %3522  ;;  %v3563_v57 = vsel %vm563_vm4, %v3505_v47, %v3507_v13  ;;  %v3564_v40 = vsel %vm563_vm4, %v3507_v13, %v3509_v25 }
 0x716   : > { %3626 = vst [vmem:[#allocation2 + $0x300] sm:$0xff] %v3568_v3 }
 0x717   : > { %3621 = vst [vmem:[#allocation2 + $0x2d8] sm:$0xff] %v3563_v57 }
 0x718   : > { %3622 = vst [vmem:[#allocation2 + $0x2e0] sm:$0xff] %v3564_v40 }
 0x71a   : > { %3692 = vrot.lane.b32.xlu1 %v13045_v22, %s17290_s21  ;;  %3684 = vrot.lane.b32.xlu0 %v13024_v54, %s17290_s21 }
 0x71b   : > { %3682 = vrot.lane.b32.xlu2 %v13013_v37, %s17290_s21 }
 0x71c   : > { %v3521_v8 = vpop.permute.xlu1 %3520  ;;  %v3513_v20 = vpop.permute.xlu0 %3512 }
 0x71d   : > { %v3571_v19 = vsel %vm563_vm4, %v3521_v8, %v3523_v41  ;;  %v3529_v31 = vpop.permute.xlu2 %3528  ;;  %v3566_v46 = vsel %vm563_vm4, %v3511_v34, %v3513_v20  ;;  %v3567_v50 = vsel %vm563_vm4, %v3513_v20, %v3515_v26 }
 0x71e   : > { %3629 = vst [vmem:[#allocation2 + $0x318] sm:$0xff] %v3571_v19 }
 0x71f   : > { %3624 = vst [vmem:[#allocation2 + $0x2f0] sm:$0xff] %v3566_v46 }
 0x720   : > { %3625 = vst [vmem:[#allocation2 + $0x2f8] sm:$0xff] %v3567_v50 }
 0x722   : > { %3698 = vrot.lane.b32.xlu1 %v13063_v42, %s17290_s21  ;;  %3690 = vrot.lane.b32.xlu0 %v13042_v61, %s17290_s21 }
 0x723   : > { %3688 = vrot.lane.b32.xlu2 %v13030_v12, %s17290_s21 }
 0x724   : > { %v3527_v30 = vpop.permute.xlu1 %3526  ;;  %v3519_v23 = vpop.permute.xlu0 %3518 }
 0x725   : > { %v3574_v24 = vsel %vm563_vm4, %v3527_v30, %v3529_v31  ;;  %v3535_v60 = vpop.permute.xlu2 %3534  ;;  %v3569_v48 = vsel %vm563_vm4, %v3517_v43, %v3519_v23  ;;  %v3570_v9 = vsel %vm563_vm4, %v3519_v23, %v3521_v8 }
 0x726   : > { %3632 = vst [vmem:[#allocation2 + $0x330] sm:$0xff] %v3574_v24 }
 0x727   : > { %3627 = vst [vmem:[#allocation2 + $0x308] sm:$0xff] %v3569_v48 }
 0x728   : > { %3628 = vst [vmem:[#allocation2 + $0x310] sm:$0xff] %v3570_v9 }
 0x72a   : > { %3704 = vrot.lane.b32.xlu1 %v13083_v14, %s17290_s21  ;;  %3696 = vrot.lane.b32.xlu0 %v13060_v6, %s17290_s21 }
 0x72b   : > { %3694 = vrot.lane.b32.xlu2 %v13048_v10, %s17290_s21 }
 0x72c   : > { %v3533_v0 = vpop.permute.xlu1 %3532  ;;  %v3525_v44 = vpop.permute.xlu0 %3524 }
 0x72d   : > { %v3576_v47 = vsel %vm563_vm4, %v3533_v0, %v3535_v60  ;;  %v3541_v58 = vpop.permute.xlu2 %3540  ;;  %v3572_v63 = vsel %vm563_vm4, %v3523_v41, %v3525_v44  ;;  %v3573_v39 = vsel %vm563_vm4, %v3525_v44, %v3527_v30 }
 0x72e   : > { %3635 = vst [vmem:[#allocation2 + $0x348] sm:$0xff] %v3576_v47 }
 0x72f   : > { %3630 = vst [vmem:[#allocation2 + $0x320] sm:$0xff] %v3572_v63 }
 0x730   : > { %3631 = vst [vmem:[#allocation2 + $0x328] sm:$0xff] %v3573_v39 }
 0x732   : > { %3794 = vrot.lane.b32.xlu1 %v12934_v52, %s17291_s22  ;;  %3702 = vrot.lane.b32.xlu0 %v13080_v1, %s17290_s21 }
 0x733   : > { %3700 = vrot.lane.b32.xlu2 %v13066_v32, %s17290_s21 }
 0x734   : > { %v3539_v21 = vpop.permute.xlu1 %3538  ;;  %v3531_v38 = vpop.permute.xlu0 %3530 }
 0x735   : > { %v3579_v34 = vsel %vm563_vm4, %v3539_v21, %v3541_v58  ;;  %v3547_v11 = vpop.permute.xlu2 %3546  ;;  %v3575_v4 = vsel %vm563_vm4, %v3529_v31, %v3531_v38  ;;  %3634 = vst.msk [vmem:[#allocation2 + $0x340] sm:$0xff] %vm17362_vm6, %v3531_v38  ;;  %vm17369_vm6 = vmmov %vm17368_vm3 }
 0x736   : > { %3638 = vst [vmem:[#allocation2 + $0x360] sm:$0xff] %v3579_v34  ;;  %v13452_v34 = vld [vmem:[#allocation2] sm:$0xff] }
 0x737   : > { %3633 = vst [vmem:[#allocation2 + $0x338] sm:$0xff] %v3575_v4 }
 0x73a   : > { %3800 = vrot.lane.b32.xlu1 %v12945_v35, %s17291_s22  ;;  %3708 = vrot.lane.b32.xlu0 %v13077_v29, %s17290_s21 }
 0x73b   : > { %3706 = vrot.lane.b32.xlu2 %v13089_v33, %s17290_s21 }
 0x73c   : > { %v3545_v52 = vpop.permute.xlu1 %3544  ;;  %v3537_v25 = vpop.permute.xlu0 %3536 }
 0x73d   : > { %v3582_v16 = vsel %vm563_vm4, %v3545_v52, %v3547_v11  ;;  %v3553_v5 = vpop.permute.xlu2 %3552  ;;  %v3577_v43 = vsel %vm563_vm4, %v3535_v60, %v3537_v25  ;;  %v3578_v36 = vsel %vm563_vm4, %v3537_v25, %v3539_v21 }
 0x73e   : > { %3641 = vst [vmem:[#allocation2 + $0x378] sm:$0xff] %v3582_v16 }
 0x73f   : > { %3636 = vst [vmem:[#allocation2 + $0x350] sm:$0xff] %v3577_v43 }
 0x740   : > { %3637 = vst [vmem:[#allocation2 + $0x358] sm:$0xff] %v3578_v36  ;;  %v13478_v36 = vld [vmem:[#allocation2 + $0x30] sm:$0xff] }
 0x742   : > { %3806 = vrot.lane.b32.xlu1 %v12966_v62, %s17291_s22  ;;  %3798 = vrot.lane.b32.xlu0 %v12927_v17, %s17291_s22 }
 0x743   : > { %3796 = vrot.lane.b32.xlu2 %v12930_v15, %s17291_s22 }
 0x744   : > { %v3551_v35 = vpop.permute.xlu1 %3550  ;;  %v3543_v26 = vpop.permute.xlu0 %3542 }
 0x745   : > { %v3585_v13 = vsel %vm563_vm4, %v3551_v35, %v3553_v5  ;;  %v3559_v3 = vpop.permute.xlu2 %3558  ;;  %v3580_v41 = vsel %vm563_vm4, %v3541_v58, %v3543_v26  ;;  %v3581_v57 = vsel %vm563_vm4, %v3543_v26, %v3545_v52  ;;  %v13463_v52 = vld [vmem:[#allocation2 + $0x18] sm:$0xff] }
 0x746   : > { %3644 = vst [vmem:[#allocation2 + $0x390] sm:$0xff] %v3585_v13 }
 0x747   : > { %3639 = vst [vmem:[#allocation2 + $0x368] sm:$0xff] %v3580_v41 }
 0x748   : > { %3640 = vst [vmem:[#allocation2 + $0x370] sm:$0xff] %v3581_v57 }
 0x74a   : > { %3812 = vrot.lane.b32.xlu1 %v12993_v59, %s17291_s22  ;;  %3804 = vrot.lane.b32.xlu0 %v12949_v45, %s17291_s22 }
 0x74b   : > { %3802 = vrot.lane.b32.xlu2 %v12952_v49, %s17291_s22 }
 0x74c   : > { %v3557_v17 = vpop.permute.xlu1 %3556  ;;  %v3549_v15 = vpop.permute.xlu0 %3548 }
 0x74d   : > { %v3588_v62 = vsel %vm563_vm4, %v3557_v17, %v3559_v3  ;;  %v3653_v40 = vpop.permute.xlu2 %3652  ;;  %v3583_v8 = vsel %vm563_vm4, %v3547_v11, %v3549_v15  ;;  %v3584_v20 = vsel %vm563_vm4, %v3549_v15, %v3551_v35  ;;  %v13482_v35 = vld [vmem:[#allocation2 + $0x10] sm:$0xff]  ;;  %v13493_v15 = vld [vmem:[#allocation2 + $0x48] sm:$0xff] }
 0x74e   : > { %3647 = vst [vmem:[#allocation2 + $0x3a8] sm:$0xff] %v3588_v62  ;;  %v13497_v62 = vld [vmem:[#allocation2 + $0x28] sm:$0xff] }
 0x74f   : > { %3642 = vst [vmem:[#allocation2 + $0x380] sm:$0xff] %v3583_v8 }
 0x750   : > { %3643 = vst [vmem:[#allocation2 + $0x388] sm:$0xff] %v3584_v20 }
 0x752   : > { %3818 = vrot.lane.b32.xlu1 %v13003_v28, %s17291_s22  ;;  %3810 = vrot.lane.b32.xlu0 %v12963_v55, %s17291_s22 }
 0x753   : > { %3808 = vrot.lane.b32.xlu2 %v12969_v56, %s17291_s22 }
 0x754   : > { %v3651_v45 = vpop.permute.xlu1 %3650  ;;  %v3555_v49 = vpop.permute.xlu0 %3554 }
 0x755   : > { %v13397_v59 = vsel %vm17260_vm9, %v3651_v45, %v3653_v40  ;;  %v3659_v19 = vpop.permute.xlu2 %3658  ;;  %v3586_v31 = vsel %vm563_vm4, %v3553_v5, %v3555_v49  ;;  %v3587_v46 = vsel %vm563_vm4, %v3555_v49, %v3557_v17 }
 0x756   : > { %3766 = vst [vmem:[#allocation2 + $0x3c0] sm:$0xff] %v13397_v59 }
 0x757   : > { %3645 = vst [vmem:[#allocation2 + $0x398] sm:$0xff] %v3586_v31 }
 0x758   : > { %3646 = vst [vmem:[#allocation2 + $0x3a0] sm:$0xff] %v3587_v46  ;;  %v13508_v46 = vld [vmem:[#allocation2 + $0x60] sm:$0xff] }
 0x75a   : > { %3824 = vrot.lane.b32.xlu1 %v12981_v53, %s17291_s22  ;;  %3816 = vrot.lane.b32.xlu0 %v12987_v51, %s17291_s22 }
 0x75b   : > { %3814 = vrot.lane.b32.xlu2 %v12996_v2, %s17291_s22 }
 0x75c   : > { %v3657_v55 = vpop.permute.xlu1 %3656  ;;  %v3561_v56 = vpop.permute.xlu0 %3560 }
 0x75d   : > { %v3713_v28 = vsel %vm17260_vm9, %v3657_v55, %v3659_v19  ;;  %v3665_v50 = vpop.permute.xlu2 %3664  ;;  %v3589_v30 = vsel %vm563_vm4, %v3559_v3, %v3561_v56  ;;  %3649 = vst.msk [vmem:[#allocation2 + $0x3b8] sm:$0xff] %vm17363_vm11, %v3561_v56  ;;  %vm17364_vm4 = vcmask 867328   ;;  %v13516_v56 = vld [vmem:[#allocation2 + $0x38] sm:$0xff]  ;;  %vm17370_vm11 = vmmov %vm17367_vm0 }
 0x75e   : > { %3769 = vst [vmem:[#allocation2 + $0x3d8] sm:$0xff] %v3713_v28  ;;  %vm17365_vm12 = vmmov %vm17364_vm4 }
 0x75f   : > { %3648 = vst [vmem:[#allocation2 + $0x3b0] sm:$0xff] %v3589_v30 }
 0x762   : > { %3830 = vrot.lane.b32.xlu1 %v13027_v27, %s17291_s22  ;;  %3822 = vrot.lane.b32.xlu0 %v13008_v7, %s17291_s22 }
 0x763   : > { %3820 = vrot.lane.b32.xlu2 %v13017_v18, %s17291_s22 }
 0x764   : > { %v3663_v53 = vpop.permute.xlu1 %3662  ;;  %v3655_v51 = vpop.permute.xlu0 %3654 }
 0x765   : > { %v3716_v2 = vsel %vm17260_vm9, %v3663_v53, %v3665_v50  ;;  %v3671_v23 = vpop.permute.xlu2 %3670  ;;  %v13419_v24 = vsel %vm17260_vm9, %v3653_v40, %v3655_v51  ;;  %v3712_v60 = vsel %vm17260_vm9, %v3655_v51, %v3657_v55  ;;  %v13501_v40 = vld [vmem:[#allocation2 + $0x20] sm:$0xff] }
 0x766   : > { %3772 = vst [vmem:[#allocation2 + $0x3f0] sm:$0xff] %v3716_v2  ;;  %v13512_v55 = vld [vmem:[#allocation2 + $0x40] sm:$0xff] }
 0x767   : > { %3767 = vst [vmem:[#allocation2 + $0x3c8] sm:$0xff] %v13419_v24 }
 0x768   : > { %3768 = vst [vmem:[#allocation2 + $0x3d0] sm:$0xff] %v3712_v60  ;;  %v13529_v60 = vld [vmem:[#allocation2 + $0x58] sm:$0xff] }
 0x76a   : > { %3836 = vrot.lane.b32.xlu1 %v13045_v22, %s17291_s22  ;;  %3828 = vrot.lane.b32.xlu0 %v13024_v54, %s17291_s22 }
 0x76b   : > { %3826 = vrot.lane.b32.xlu2 %v13013_v37, %s17291_s22 }
 0x76c   : > { %v3669_v18 = vpop.permute.xlu1 %3668  ;;  %v3661_v27 = vpop.permute.xlu0 %3660 }
 0x76d   : > { %v3719_v48 = vsel %vm17260_vm9, %v3669_v18, %v3671_v23  ;;  %v3677_v9 = vpop.permute.xlu2 %3676  ;;  %v3714_v0 = vsel %vm17260_vm9, %v3659_v19, %v3661_v27  ;;  %v3715_v44 = vsel %vm17260_vm9, %v3661_v27, %v3663_v53 }
 0x76e   : > { %3775 = vst [vmem:[#allocation2 + $0x408] sm:$0xff] %v3719_v48 }
 0x76f   : > { %3770 = vst [vmem:[#allocation2 + $0x3e0] sm:$0xff] %v3714_v0 }
 0x770   : > { %3771 = vst [vmem:[#allocation2 + $0x3e8] sm:$0xff] %v3715_v44 }
 0x772   : > { %3842 = vrot.lane.b32.xlu1 %v13063_v42, %s17291_s22  ;;  %3834 = vrot.lane.b32.xlu0 %v13042_v61, %s17291_s22 }
 0x773   : > { %3832 = vrot.lane.b32.xlu2 %v13030_v12, %s17291_s22 }
 0x774   : > { %v3675_v37 = vpop.permute.xlu1 %3674  ;;  %v3667_v54 = vpop.permute.xlu0 %3666 }
 0x775   : > { %v3722_v22 = vsel %vm17260_vm9, %v3675_v37, %v3677_v9  ;;  %v3683_v47 = vpop.permute.xlu2 %3682  ;;  %v3717_v58 = vsel %vm17260_vm9, %v3665_v50, %v3667_v54  ;;  %v3718_v63 = vsel %vm17260_vm9, %v3667_v54, %v3669_v18  ;;  %v13533_v18 = vld [vmem:[#allocation2 + $0x50] sm:$0xff]  ;;  %v13548_v54 = vld [vmem:[#allocation2 + $0x68] sm:$0xff] }
 0x776   : > { %3778 = vst [vmem:[#allocation2 + $0x420] sm:$0xff] %v3722_v22 }
 0x777   : > { %3773 = vst [vmem:[#allocation2 + $0x3f8] sm:$0xff] %v3717_v58 }
 0x778   : > { %3774 = vst [vmem:[#allocation2 + $0x400] sm:$0xff] %v3718_v63 }
 0x77a   : > { %3848 = vrot.lane.b32.xlu1 %v13083_v14, %s17291_s22  ;;  %3840 = vrot.lane.b32.xlu0 %v13060_v6, %s17291_s22 }
 0x77b   : > { %3838 = vrot.lane.b32.xlu2 %v13048_v10, %s17291_s22 }
 0x77c   : > { %v3681_v12 = vpop.permute.xlu1 %3680  ;;  %v3673_v61 = vpop.permute.xlu0 %3672 }
 0x77d   : > { %v13448_v42 = vsel %vm17260_vm9, %v3681_v12, %v3683_v47  ;;  %v3689_v39 = vpop.permute.xlu2 %3688  ;;  %v3720_v21 = vsel %vm17260_vm9, %v3671_v23, %v3673_v61  ;;  %v3721_v38 = vsel %vm17260_vm9, %v3673_v61, %v3675_v37  ;;  %v13525_v23 = vld [vmem:[#allocation2 + $0x78] sm:$0xff]  ;;  %v13542_v37 = vld [vmem:[#allocation2 + $0x90] sm:$0xff] }
 0x77e   : > { %3776 = vst [vmem:[#allocation2 + $0x410] sm:$0xff] %v3720_v21  ;;  %v13563_v21 = vld [vmem:[#allocation2 + $0x88] sm:$0xff] }
 0x77f   : > { %3777 = vst [vmem:[#allocation2 + $0x418] sm:$0xff] %v3721_v38  ;;  %v13567_v38 = vld [vmem:[#allocation2 + $0x80] sm:$0xff] }
 0x782   : > { %3938 = vrot.lane.b32.xlu1 %v13452_v34, %s17292_s16  ;;  %3846 = vrot.lane.b32.xlu0 %v13080_v1, %s17291_s22 }
 0x783   : > { %3844 = vrot.lane.b32.xlu2 %v13066_v32, %s17291_s22 }
 0x784   : > { %v3687_v10 = vpop.permute.xlu1 %3686  ;;  %v3679_v6 = vpop.permute.xlu0 %3678 }
 0x785   : > { %v3727_v14 = vsel %vm17260_vm9, %v3687_v10, %v3689_v39  ;;  %v3695_v11 = vpop.permute.xlu2 %3694  ;;  %v3723_v4 = vsel %vm17260_vm9, %v3677_v9, %v3679_v6 }
 0x786   : > { %3783 = vst [vmem:[#allocation2 + $0x450] sm:$0xff] %v3727_v14 }
 0x787   : > { %3779 = vst.msk [vmem:[#allocation2 + $0x428] sm:$0xff] %vm17364_vm4, %v3723_v4  ;;  %vm17371_vm4 = vmmov %vm17368_vm3 }
 0x78a   : > { %3944 = vrot.lane.b32.xlu1 %v13463_v52, %s17292_s16  ;;  %3852 = vrot.lane.b32.xlu0 %v13077_v29, %s17291_s22 }
 0x78b   : > { %3850 = vrot.lane.b32.xlu2 %v13089_v33, %s17291_s22  ;;  %v13486_v33 = vld [vmem:[#allocation2 + $0x8] sm:$0xff] }
 0x78c   : > { %v3693_v32 = vpop.permute.xlu1 %3692  ;;  %v3685_v1 = vpop.permute.xlu0 %3684 }
 0x78d   : > { %v3730_v25 = vsel %vm17260_vm9, %v3693_v32, %v3695_v11  ;;  %v3701_v16 = vpop.permute.xlu2 %3700  ;;  %v13473_v5 = vsel %vm17260_vm9, %v3683_v47, %v3685_v1  ;;  %v13476_v43 = vsel %vm17260_vm9, %v3685_v1, %v3687_v10  ;;  %v13576_v1 = vld [vmem:[#allocation2 + $0xc0] sm:$0xff] }
 0x78e   : > { %3786 = vst [vmem:[#allocation2 + $0x468] sm:$0xff] %v3730_v25  ;;  %v13580_v25 = vld [vmem:[#allocation2 + $0xa0] sm:$0xff] }
 0x792   : > { %3950 = vrot.lane.b32.xlu1 %v13478_v36, %s17292_s16  ;;  %3942 = vrot.lane.b32.xlu0 %v13482_v35, %s17292_s16 }
 0x793   : > { %3940 = vrot.lane.b32.xlu2 %v13486_v33, %s17292_s16 }
 0x794   : > { %v3699_v26 = vpop.permute.xlu1 %3698  ;;  %v3691_v13 = vpop.permute.xlu0 %3690 }
 0x795   : > { %v3733_v3 = vsel %vm17260_vm9, %v3699_v26, %v3701_v16  ;;  %v3707_v41 = vpop.permute.xlu2 %3706  ;;  %v3728_v57 = vsel %vm17260_vm9, %v3689_v39, %v3691_v13  ;;  %v3729_v17 = vsel %vm17260_vm9, %v3691_v13, %v3693_v32  ;;  %v13559_v39 = vld [vmem:[#allocation2 + $0xa8] sm:$0xff] }
 0x796   : > { %3789 = vst [vmem:[#allocation2 + $0x480] sm:$0xff] %v3733_v3 }
 0x797   : > { %3784 = vst [vmem:[#allocation2 + $0x458] sm:$0xff] %v3728_v57 }
 0x798   : > { %3785 = vst [vmem:[#allocation2 + $0x460] sm:$0xff] %v3729_v17 }
 0x79a   : > { %3956 = vrot.lane.b32.xlu1 %v13493_v15, %s17292_s16  ;;  %3948 = vrot.lane.b32.xlu0 %v13497_v62, %s17292_s16 }
 0x79b   : > { %3946 = vrot.lane.b32.xlu2 %v13501_v40, %s17292_s16 }
 0x79c   : > { %v3705_v8 = vpop.permute.xlu1 %3704  ;;  %v3697_v20 = vpop.permute.xlu0 %3696 }
 0x79d   : > { %v3736_v45 = vsel %vm17260_vm9, %v3705_v8, %v3707_v41  ;;  %v3797_v49 = vpop.permute.xlu2 %3796  ;;  %v3731_v19 = vsel %vm17260_vm9, %v3695_v11, %v3697_v20  ;;  %v3732_v31 = vsel %vm17260_vm9, %v3697_v20, %v3699_v26  ;;  %v13595_v20 = vld [vmem:[#allocation2 + $0xb8] sm:$0xff] }
 0x79e   : > { %3792 = vst [vmem:[#allocation2 + $0x498] sm:$0xff] %v3736_v45  ;;  %v13599_v45 = vld [vmem:[#allocation2 + $0xb0] sm:$0xff] }
 0x79f   : > { %3787 = vst [vmem:[#allocation2 + $0x470] sm:$0xff] %v3731_v19 }
 0x7a0   : > { %3788 = vst [vmem:[#allocation2 + $0x478] sm:$0xff] %v3732_v31 }
 0x7a2   : > { %3962 = vrot.lane.b32.xlu1 %v13508_v46, %s17292_s16  ;;  %3954 = vrot.lane.b32.xlu0 %v13512_v55, %s17292_s16 }
 0x7a3   : > { %3952 = vrot.lane.b32.xlu2 %v13516_v56, %s17292_s16 }
 0x7a4   : > { %v3795_v28 = vpop.permute.xlu1 %3794  ;;  %v3703_v50 = vpop.permute.xlu0 %3702 }
 0x7a5   : > { %v13521_v30 = vsel %vm17259_vm14, %v3795_v28, %v3797_v49  ;;  %v3803_v53 = vpop.permute.xlu2 %3802  ;;  %v3734_v51 = vsel %vm17260_vm9, %v3701_v16, %v3703_v50  ;;  %v3735_v2 = vsel %vm17260_vm9, %v3703_v50, %v3705_v8  ;;  %v13584_v16 = vld [vmem:[#allocation2 + $0x98] sm:$0xff] }
 0x7a6   : > { %3790 = vst [vmem:[#allocation2 + $0x488] sm:$0xff] %v3734_v51  ;;  %v13591_v8 = vld [vmem:[#allocation2 + $0xd8] sm:$0xff]  ;;  %v13610_v51 = vld [vmem:[#allocation2 + $0xd0] sm:$0xff] }
 0x7a7   : > { %3791 = vst [vmem:[#allocation2 + $0x490] sm:$0xff] %v3735_v2  ;;  %v13614_v2 = vld [vmem:[#allocation2 + $0xc8] sm:$0xff] }
 0x7aa   : > { %3968 = vrot.lane.b32.xlu1 %v13525_v23, %s17292_s16  ;;  %3960 = vrot.lane.b32.xlu0 %v13529_v60, %s17292_s16 }
 0x7ab   : > { %3958 = vrot.lane.b32.xlu2 %v13533_v18, %s17292_s16 }
 0x7ac   : > { %v3801_v27 = vpop.permute.xlu1 %3800  ;;  %v3709_v48 = vpop.permute.xlu0 %3708 }
 0x7ad   : > { %v13538_v9 = vsel %vm17259_vm14, %v3801_v27, %v3803_v53  ;;  %v3809_v0 = vpop.permute.xlu2 %3808  ;;  %v3737_v44 = vsel %vm17260_vm9, %v3707_v41, %v3709_v48 }
 0x7ae   : > { %3793 = vst.msk [vmem:[#allocation2 + $0x4a0] sm:$0xff] %vm17365_vm12, %v3737_v44  ;;  %vm17372_vm12 = vmmov %vm17368_vm3 }
 0x7b2   : > { %3974 = vrot.lane.b32.xlu1 %v13542_v37, %s17292_s16  ;;  %3966 = vrot.lane.b32.xlu0 %v13008_v7, %s17292_s16 }
 0x7b3   : > { %3964 = vrot.lane.b32.xlu2 %v13548_v54, %s17292_s16 }
 0x7b4   : > { %v3807_v22 = vpop.permute.xlu1 %3806  ;;  %v3799_v47 = vpop.permute.xlu0 %3798 }
 0x7b5   : > { %v3860_v58 = vsel %vm17259_vm14, %v3807_v22, %v3809_v0  ;;  %v3815_v63 = vpop.permute.xlu2 %3814  ;;  %v13554_v12 = vsel %vm17259_vm14, %v3797_v49, %v3799_v47  ;;  %v13557_v61 = vsel %vm17259_vm14, %v3799_v47, %v3801_v27  ;;  %v13627_v47 = vld [vmem:[#allocation2 + $0xe0] sm:$0xff] }
 0x7b6   : > { %3916 = vst [vmem:[#allocation2 + $0x4e0] sm:$0xff] %v3860_v58 }
 0x7ba   : > { %3980 = vrot.lane.b32.xlu1 %v13559_v39, %s17292_s16  ;;  %3972 = vrot.lane.b32.xlu0 %v13563_v21, %s17292_s16 }
 0x7bb   : > { %3970 = vrot.lane.b32.xlu2 %v13567_v38, %s17292_s16 }
 0x7bc   : > { %v3813_v10 = vpop.permute.xlu1 %3812  ;;  %v3805_v6 = vpop.permute.xlu0 %3804 }
 0x7bd   : > { %v3863_v14 = vsel %vm17259_vm14, %v3813_v10, %v3815_v63  ;;  %v3821_v11 = vpop.permute.xlu2 %3820  ;;  %v13573_v4 = vsel %vm17259_vm14, %v3803_v53, %v3805_v6  ;;  %v3859_v32 = vsel %vm17259_vm14, %v3805_v6, %v3807_v22 }
 0x7be   : > { %3919 = vst [vmem:[#allocation2 + $0x4f8] sm:$0xff] %v3863_v14 }
 0x7bf   : > { %3915 = vst [vmem:[#allocation2 + $0x4d8] sm:$0xff] %v3859_v32 }
 0x7c2   : > { %3986 = vrot.lane.b32.xlu1 %v13576_v1, %s17292_s16  ;;  %3978 = vrot.lane.b32.xlu0 %v13580_v25, %s17292_s16 }
 0x7c3   : > { %3976 = vrot.lane.b32.xlu2 %v13584_v16, %s17292_s16 }
 0x7c4   : > { %v3819_v26 = vpop.permute.xlu1 %3818  ;;  %v3811_v13 = vpop.permute.xlu0 %3810 }
 0x7c5   : > { %v3866_v3 = vsel %vm17259_vm14, %v3819_v26, %v3821_v11  ;;  %v3827_v41 = vpop.permute.xlu2 %3826  ;;  %v3861_v57 = vsel %vm17259_vm14, %v3809_v0, %v3811_v13  ;;  %v3862_v17 = vsel %vm17259_vm14, %v3811_v13, %v3813_v10 }
 0x7c6   : > { %3922 = vst [vmem:[#allocation2 + $0x510] sm:$0xff] %v3866_v3 }
 0x7c7   : > { %3917 = vst [vmem:[#allocation2 + $0x4e8] sm:$0xff] %v3861_v57 }
 0x7c8   : > { %3918 = vst [vmem:[#allocation2 + $0x4f0] sm:$0xff] %v3862_v17 }
 0x7ca   : > { %3992 = vrot.lane.b32.xlu1 %v13591_v8, %s17292_s16  ;;  %3984 = vrot.lane.b32.xlu0 %v13595_v20, %s17292_s16 }
 0x7cb   : > { %3982 = vrot.lane.b32.xlu2 %v13599_v45, %s17292_s16 }
 0x7cc   : > { %v3825_v49 = vpop.permute.xlu1 %3824  ;;  %v3817_v19 = vpop.permute.xlu0 %3816 }
 0x7cd   : > { %v13604_v31 = vsel %vm17259_vm14, %v3825_v49, %v3827_v41  ;;  %v3833_v28 = vpop.permute.xlu2 %3832  ;;  %v3864_v50 = vsel %vm17259_vm14, %v3815_v63, %v3817_v19  ;;  %v3865_v53 = vsel %vm17259_vm14, %v3817_v19, %v3819_v26 }
 0x7ce   : > { %3920 = vst [vmem:[#allocation2 + $0x500] sm:$0xff] %v3864_v50 }
 0x7cf   : > { %3921 = vst [vmem:[#allocation2 + $0x508] sm:$0xff] %v3865_v53 }
 0x7d2   : > { %4082 = vrot.lane.b32.xlu1 %v13452_v34, %s17366_s20  ;;  %3990 = vrot.lane.b32.xlu0 %v13610_v51, %s17292_s16 }
 0x7d3   : > { %3988 = vrot.lane.b32.xlu2 %v13614_v2, %s17292_s16 }
 0x7d4   : > { %v3831_v27 = vpop.permute.xlu1 %3830  ;;  %v3823_v48 = vpop.permute.xlu0 %3822 }
 0x7d5   : > { %v13619_v0 = vsel %vm17259_vm14, %v3831_v27, %v3833_v28  ;;  %v3839_v44 = vpop.permute.xlu2 %3838  ;;  %v3867_v22 = vsel %vm17259_vm14, %v3821_v11, %v3823_v48 }
 0x7d6   : > { %3923 = vst.msk [vmem:[#allocation2 + $0x518] sm:$0xff] %vm17367_vm0, %v3867_v22  ;;  %vm17373_vm0 = vmmov %vm17368_vm3 }
 0x7da   : > { %4088 = vrot.lane.b32.xlu1 %v13463_v52, %s17366_s20  ;;  %3996 = vrot.lane.b32.xlu0 %v13077_v29, %s17292_s16 }
 0x7db   : > { %3994 = vrot.lane.b32.xlu2 %v13627_v47, %s17292_s16 }
 0x7dc   : > { %v3837_v58 = vpop.permute.xlu1 %3836  ;;  %v3829_v63 = vpop.permute.xlu0 %3828 }
 0x7dd   : > { %v3874_v10 = vsel %vm17259_vm14, %v3837_v58, %v3839_v44  ;;  %v3845_v6 = vpop.permute.xlu2 %3844  ;;  %v13633_v14 = vsel %vm17259_vm14, %v3827_v41, %v3829_v63  ;;  %v13636_v11 = vsel %vm17259_vm14, %v3829_v63, %v3831_v27 }
 0x7de   : > { %3930 = vst [vmem:[#allocation2 + $0x558] sm:$0xff] %v3874_v10 }
 0x7e2   : > { %4094 = vrot.lane.b32.xlu1 %v13478_v36, %s17366_s20  ;;  %4086 = vrot.lane.b32.xlu0 %v13482_v35, %s17366_s20 }
 0x7e3   : > { %4084 = vrot.lane.b32.xlu2 %v13486_v33, %s17366_s20 }
 0x7e4   : > { %v3843_v32 = vpop.permute.xlu1 %3842  ;;  %v3835_v26 = vpop.permute.xlu0 %3834 }
 0x7e5   : > { %v3877_v13 = vsel %vm17259_vm14, %v3843_v32, %v3845_v6  ;;  %v3851_v3 = vpop.permute.xlu2 %3850  ;;  %v13646_v41 = vsel %vm17259_vm14, %v3833_v28, %v3835_v26  ;;  %v13649_v57 = vsel %vm17259_vm14, %v3835_v26, %v3837_v58 }
 0x7e6   : > { %3933 = vst [vmem:[#allocation2 + $0x570] sm:$0xff] %v3877_v13 }
 0x7ea   : > { %4100 = vrot.lane.b32.xlu1 %v13493_v15, %s17366_s20  ;;  %4092 = vrot.lane.b32.xlu0 %v13497_v62, %s17366_s20 }
 0x7eb   : > { %4090 = vrot.lane.b32.xlu2 %v13501_v40, %s17366_s20 }
 0x7ec   : > { %v3849_v36 = vpop.permute.xlu1 %3848  ;;  %v3841_v17 = vpop.permute.xlu0 %3840 }
 0x7ed   : > { %v3880_v49 = vsel %vm17259_vm14, %v3849_v36, %v3851_v3  ;;  %v3941_v19 = vpop.permute.xlu2 %3940  ;;  %v3875_v28 = vsel %vm17259_vm14, %v3839_v44, %v3841_v17  ;;  %v3876_v50 = vsel %vm17259_vm14, %v3841_v17, %v3843_v32 }
 0x7ee   : > { %3936 = vst [vmem:[#allocation2 + $0x588] sm:$0xff] %v3880_v49 }
 0x7ef   : > { %3931 = vst [vmem:[#allocation2 + $0x560] sm:$0xff] %v3875_v28 }
 0x7f0   : > { %3932 = vst [vmem:[#allocation2 + $0x568] sm:$0xff] %v3876_v50 }
 0x7f2   : > { %4106 = vrot.lane.b32.xlu1 %v13508_v46, %s17366_s20  ;;  %4098 = vrot.lane.b32.xlu0 %v13512_v55, %s17366_s20 }
 0x7f3   : > { %4096 = vrot.lane.b32.xlu2 %v13516_v56, %s17366_s20 }
 0x7f4   : > { %v3939_v15 = vpop.permute.xlu1 %3938  ;;  %v3847_v62 = vpop.permute.xlu0 %3846 }
 0x7f5   : > { %v13667_v53 = vsel %vm17368_vm3, %v3939_v15, %v3941_v19  ;;  %v3947_v27 = vpop.permute.xlu2 %3946  ;;  %v3878_v48 = vsel %vm17259_vm14, %v3845_v6, %v3847_v62  ;;  %v3879_v44 = vsel %vm17259_vm14, %v3847_v62, %v3849_v36  ;;  %vm17374_vm3 = vmmov %vm17373_vm0 }
 0x7f6   : > { %3934 = vst [vmem:[#allocation2 + $0x578] sm:$0xff] %v3878_v48 }
 0x7f7   : > { %3935 = vst [vmem:[#allocation2 + $0x580] sm:$0xff] %v3879_v44 }
 0x7fa   : > { %4112 = vrot.lane.b32.xlu1 %v13525_v23, %s17366_s20  ;;  %4104 = vrot.lane.b32.xlu0 %v13529_v60, %s17366_s20 }
 0x7fb   : > { %4102 = vrot.lane.b32.xlu2 %v13533_v18, %s17366_s20 }
 0x7fc   : > { %v3945_v46 = vpop.permute.xlu1 %3944  ;;  %v3853_v55 = vpop.permute.xlu0 %3852 }
 0x7fd   : > { %v13678_v56 = vsel %vm17369_vm6, %v3945_v46, %v3947_v27  ;;  %v3953_v22 = vpop.permute.xlu2 %3952  ;;  %v3881_v58 = vsel %vm17259_vm14, %v3851_v3, %v3853_v55  ;;  %vm17375_vm6 = vmmov %vm17373_vm0 }
 0x7fe   : > { %3937 = vst.msk [vmem:[#allocation2 + $0x590] sm:$0xff] %vm17370_vm11, %v3881_v58  ;;  %vm17376_vm11 = vmmov %vm17373_vm0 }
 0x802   : > { %4118 = vrot.lane.b32.xlu1 %v13542_v37, %s17366_s20  ;;  %4110 = vrot.lane.b32.xlu0 %v13008_v7, %s17366_s20 }
 0x803   : > { %4108 = vrot.lane.b32.xlu2 %v13548_v54, %s17366_s20 }
 0x804   : > { %v3951_v60 = vpop.permute.xlu1 %3950  ;;  %v3943_v18 = vpop.permute.xlu0 %3942 }
 0x805   : > { %v4004_v63 = vsel %vm17371_vm4, %v3951_v60, %v3953_v22  ;;  %v3959_v10 = vpop.permute.xlu2 %3958  ;;  %v13690_v6 = vsel %vm17372_vm12, %v3941_v19, %v3943_v18  ;;  %v13693_v32 = vsel %vm17373_vm0, %v3943_v18, %v3945_v46  ;;  %vm17377_vm4 = vmmov %vm17373_vm0 }
 0x806   : > { %4060 = vst [vmem:[#allocation2 + $0x5d0] sm:$0xff] %v4004_v63  ;;  %vm17378_vm12 = vmmov %vm17373_vm0 }
 0x80a   : > { %4124 = vrot.lane.b32.xlu1 %v13559_v39, %s17366_s20  ;;  %4116 = vrot.lane.b32.xlu0 %v13563_v21, %s17366_s20 }
 0x80b   : > { %4114 = vrot.lane.b32.xlu2 %v13567_v38, %s17366_s20 }
 0x80c   : > { %v3957_v54 = vpop.permute.xlu1 %3956  ;;  %v3949_v26 = vpop.permute.xlu0 %3948 }
 0x80d   : > { %v4007_v13 = vsel %vm17374_vm3, %v3957_v54, %v3959_v10  ;;  %v3965_v3 = vpop.permute.xlu2 %3964  ;;  %v13703_v36 = vsel %vm17375_vm6, %v3947_v27, %v3949_v26  ;;  %v13706_v17 = vsel %vm17376_vm11, %v3949_v26, %v3951_v60  ;;  %vm17379_vm3 = vmmov %vm17373_vm0 }
 0x80e   : > { %4063 = vst [vmem:[#allocation2 + $0x5e8] sm:$0xff] %v4007_v13  ;;  %vm17380_vm6 = vmmov %vm17373_vm0 }
 0x80f   : > { %vm17381_vm11 = vmmov %vm17373_vm0 }
 0x812   : > { %4130 = vrot.lane.b32.xlu1 %v13576_v1, %s17366_s20  ;;  %4122 = vrot.lane.b32.xlu0 %v13580_v25, %s17366_s20 }
 0x813   : > { %4120 = vrot.lane.b32.xlu2 %v13584_v16, %s17366_s20 }
 0x814   : > { %v3963_v39 = vpop.permute.xlu1 %3962  ;;  %v3955_v49 = vpop.permute.xlu0 %3954 }
 0x815   : > { %v4010_v19 = vsel %vm17377_vm4, %v3963_v39, %v3965_v3  ;;  %v3971_v28 = vpop.permute.xlu2 %3970  ;;  %v4005_v50 = vsel %vm17378_vm12, %v3953_v22, %v3955_v49  ;;  %v4006_v15 = vsel %vm17373_vm0, %v3955_v49, %v3957_v54  ;;  %vm17382_vm4 = vmmov %vm17373_vm0 }
 0x816   : > { %4066 = vst [vmem:[#allocation2 + $0x600] sm:$0xff] %v4010_v19  ;;  %vm17383_vm12 = vmmov %vm17373_vm0  ;;  %vm17384_vm0 = vcmask 850944  }
 0x817   : > { %4061 = vst [vmem:[#allocation2 + $0x5d8] sm:$0xff] %v4005_v50 }
 0x818   : > { %4062 = vst [vmem:[#allocation2 + $0x5e0] sm:$0xff] %v4006_v15 }
 0x81a   : > { %4136 = vrot.lane.b32.xlu1 %v13591_v8, %s17366_s20  ;;  %4128 = vrot.lane.b32.xlu0 %v13595_v20, %s17366_s20 }
 0x81b   : > { %4126 = vrot.lane.b32.xlu2 %v13599_v45, %s17366_s20 }
 0x81c   : > { %v3969_v1 = vpop.permute.xlu1 %3968  ;;  %v3961_v62 = vpop.permute.xlu0 %3960 }
 0x81d   : > { %v13724_v27 = vsel %vm17379_vm3, %v3969_v1, %v3971_v28  ;;  %v3977_v48 = vpop.permute.xlu2 %3976  ;;  %v4008_v44 = vsel %vm17380_vm6, %v3959_v10, %v3961_v62  ;;  %v4009_v46 = vsel %vm17381_vm11, %v3961_v62, %v3963_v39  ;;  %vm17385_vm6 = vmmov %vm17379_vm3 }
 0x81e   : > { %4064 = vst [vmem:[#allocation2 + $0x5f0] sm:$0xff] %v4008_v44  ;;  %vm17386_vm11 = vmmov %vm17379_vm3 }
 0x81f   : > { %4065 = vst [vmem:[#allocation2 + $0x5f8] sm:$0xff] %v4009_v46 }
 0x822   : > { %5264 = vrot.lane.b32.xlu1 %v13525_v23, %s17317_s2  ;;  %4134 = vrot.lane.b32.xlu0 %v13610_v51, %s17366_s20 }
 0x823   : > { %4132 = vrot.lane.b32.xlu2 %v13614_v2, %s17366_s20 }
 0x824   : > { %v3975_v8 = vpop.permute.xlu1 %3974  ;;  %v3967_v20 = vpop.permute.xlu0 %3966 }
 0x825   : > { %v13735_v45 = vsel %vm17382_vm4, %v3975_v8, %v3977_v48  ;;  %v3983_v55 = vpop.permute.xlu2 %3982  ;;  %v4011_v22 = vsel %vm17383_vm12, %v3965_v3, %v3967_v20  ;;  %vm17387_vm4 = vmmov %vm17379_vm3 }
 0x826   : > { %4067 = vst.msk [vmem:[#allocation2 + $0x608] sm:$0xff] %vm17384_vm0, %v4011_v22  ;;  %vm17388_vm12 = vmmov %vm17379_vm3 }
 0x827   : > { %vm17389_vm0 = vmmov %vm17379_vm3 }
 0x82a   : > { %5236 = vrot.lane.b32.xlu1 %v13486_v33, %s17317_s2  ;;  %4140 = vrot.lane.b32.xlu0 %v13077_v29, %s17366_s20 }
 0x82b   : > { %4138 = vrot.lane.b32.xlu2 %v13627_v47, %s17366_s20  ;;  %s10899_s20 = sshll.u32 %s11216_s29, 1 }
 0x82c   : > { %v3981_v51 = vpop.permute.xlu1 %3980  ;;  %v3973_v2 = vpop.permute.xlu0 %3972 }
 0x82d   : > { %v13746_v58 = vsel %vm17379_vm3, %v3981_v51, %v3983_v55  ;;  %v3989_v60 = vpop.permute.xlu2 %3988  ;;  %v13749_v18 = vsel %vm17385_vm6, %v3971_v28, %v3973_v2  ;;  %v13752_v63 = vsel %vm17386_vm11, %v3973_v2, %v3975_v8  ;;  %vm17390_vm3 = vmmov %vm17389_vm0 }
 0x82e   : > { %vm17391_vm6 = vmmov %vm17389_vm0 }
 0x82f   : > { %vm17392_vm11 = vmmov %vm17389_vm0 }
 0x832   : > { %5090 = vrot.lane.b32.xlu1 %v13452_v34, %s17314_s1  ;;  %5234 = vrot.lane.b32.xlu0 %v13452_v34, %s17317_s2 }
 0x833   : > { %5266 = vrot.lane.b32.xlu2 %v13567_v38, %s17317_s2 }
 0x834   : > { %v3987_v47 = vpop.permute.xlu1 %3986  ;;  %v3979_v10 = vpop.permute.xlu0 %3978 }
 0x835   : > { %v4021_v54 = vsel %vm17387_vm4, %v3987_v47, %v3989_v60  ;;  %v3995_v26 = vpop.permute.xlu2 %3994  ;;  %v13762_v13 = vsel %vm17388_vm12, %v3977_v48, %v3979_v10  ;;  %v13765_v3 = vsel %vm17389_vm0, %v3979_v10, %v3981_v51  ;;  %vm17393_vm4 = vcmask 777216   ;;  %vm17394_vm12 = vmmov %vm17389_vm0 }
 0x836   : > { %4077 = vst [vmem:[#allocation2 + $0x660] sm:$0xff] %v4021_v54 }
 0x83a   : > { %4978 = vrot.lane.b32.xlu1 %v13567_v38, %s17313_s0  ;;  %5122 = vrot.lane.b32.xlu0 %v13567_v38, %s17314_s1 }
 0x83b   : > { %5120 = vrot.lane.b32.xlu2 %v13525_v23, %s17314_s1 }
 0x83c   : > { %v3993_v39 = vpop.permute.xlu1 %3992  ;;  %v3985_v49 = vpop.permute.xlu0 %3984 }
 0x83d   : > { %v4024_v19 = vsel %vm17390_vm3, %v3993_v39, %v3995_v26  ;;  %v4085_v28 = vpop.permute.xlu2 %4084  ;;  %v13775_v50 = vsel %vm17391_vm6, %v3983_v55, %v3985_v49  ;;  %v4020_v15 = vsel %vm17392_vm11, %v3985_v49, %v3987_v47  ;;  %vm17395_vm3 = vmmov %vm17393_vm4  ;;  %vm17397_vm11 = vcmask 850944  }
 0x83e   : > { %4080 = vst [vmem:[#allocation2 + $0x678] sm:$0xff] %v4024_v19  ;;  %vm17396_vm6 = vmmov %vm17389_vm0 }
 0x83f   : > { %4076 = vst [vmem:[#allocation2 + $0x658] sm:$0xff] %v4020_v15 }
 0x842   : > { %5268 = vrot.lane.b32.xlu1 %v13563_v21, %s17317_s2  ;;  %4976 = vrot.lane.b32.xlu0 %v13525_v23, %s17313_s0 }
 0x843   : > { %5092 = vrot.lane.b32.xlu2 %v13486_v33, %s17314_s1 }
 0x844   : > { %v4083_v1 = vpop.permute.xlu1 %4082  ;;  %v3991_v62 = vpop.permute.xlu0 %3990 }
 0x845   : > { %v4142_v48 = vsel %vm17393_vm4, %v4083_v1, %v4085_v28  ;;  %v4091_v44 = vpop.permute.xlu2 %4090  ;;  %v4022_v46 = vsel %vm17394_vm12, %v3989_v60, %v3991_v62  ;;  %v4023_v8 = vsel %vm17389_vm0, %v3991_v62, %v3993_v39  ;;  %vm17398_vm4 = vmmov %vm17395_vm3 }
 0x846   : > { %4078 = vst [vmem:[#allocation2 + $0x668] sm:$0xff] %v4022_v46  ;;  %vm17399_vm12 = vmmov %vm17395_vm3 }
 0x847   : > { %4079 = vst [vmem:[#allocation2 + $0x670] sm:$0xff] %v4023_v8  ;;  %vm17400_vm0 = vmmov %vm17395_vm3 }
 0x84a   : > { %5238 = vrot.lane.b32.xlu1 %v13482_v35, %s17317_s2  ;;  %4948 = vrot.lane.b32.xlu0 %v13486_v33, %s17313_s0 }
 0x84b   : > { %4946 = vrot.lane.b32.xlu2 %v13452_v34, %s17313_s0 }
 0x84c   : > { %v4089_v20 = vpop.permute.xlu1 %4088  ;;  %v3997_v55 = vpop.permute.xlu0 %3996 }
 0x84d   : > { %v13794_v22 = vsel %vm17395_vm3, %v4089_v20, %v4091_v44  ;;  %v4097_v51 = vpop.permute.xlu2 %4096  ;;  %v4025_v2 = vsel %vm17396_vm6, %v3995_v26, %v3997_v55  ;;  %vm17401_vm3 = vmmov %vm17400_vm0 }
 0x84e   : > { %4081 = vst.msk [vmem:[#allocation2 + $0x680] sm:$0xff] %vm17397_vm11, %v4025_v2  ;;  %vm17402_vm6 = vmmov %vm17400_vm0 }
 0x84f   : > { %vm17403_vm11 = vmmov %vm17400_vm0 }
 0x852   : > { %5124 = vrot.lane.b32.xlu1 %v13563_v21, %s17314_s1  ;;  %4834 = vrot.lane.b32.xlu0 %v13567_v38, %s17306_s15 }
 0x853   : > { %4832 = vrot.lane.b32.xlu2 %v13525_v23, %s17306_s15 }
 0x854   : > { %v4095_v60 = vpop.permute.xlu1 %4094  ;;  %v4087_v47 = vpop.permute.xlu0 %4086 }
 0x855   : > { %v13805_v10 = vsel %vm17398_vm4, %v4095_v60, %v4097_v51  ;;  %v4103_v54 = vpop.permute.xlu2 %4102  ;;  %v4143_v39 = vsel %vm17399_vm12, %v4085_v28, %v4087_v47  ;;  %v13809_v26 = vsel %vm17400_vm0, %v4087_v47, %v4089_v20  ;;  %vm17404_vm4 = vmmov %vm17400_vm0 }
 0x856   : > { %vm17405_vm12 = vmmov %vm17400_vm0 }
 0x85a   : > { %5094 = vrot.lane.b32.xlu1 %v13482_v35, %s17314_s1  ;;  %4804 = vrot.lane.b32.xlu0 %v13486_v33, %s17306_s15 }
 0x85b   : > { %4802 = vrot.lane.b32.xlu2 %v13452_v34, %s17306_s15 }
 0x85c   : > { %v4101_v49 = vpop.permute.xlu1 %4100  ;;  %v4093_v19 = vpop.permute.xlu0 %4092 }
 0x85d   : > { %v4151_v15 = vsel %vm17401_vm3, %v4101_v49, %v4103_v54  ;;  %v4109_v1 = vpop.permute.xlu2 %4108  ;;  %v13819_v62 = vsel %vm17402_vm6, %v4091_v44, %v4093_v19  ;;  %v13822_v28 = vsel %vm17403_vm11, %v4093_v19, %v4095_v60  ;;  %vm17406_vm3 = vmmov %vm17400_vm0 }
 0x85e   : > { %4207 = vst [vmem:[#allocation2 + $0x6d8] sm:$0xff] %v4151_v15  ;;  %vm17407_vm6 = vmmov %vm17400_vm0 }
 0x85f   : > { %vm17408_vm11 = vmmov %vm17400_vm0 }
 0x862   : > { %4660 = vrot.lane.b32.xlu1 %v13486_v33, %s17297_s30  ;;  %4690 = vrot.lane.b32.xlu0 %v13567_v38, %s17297_s30 }
 0x863   : > { %4688 = vrot.lane.b32.xlu2 %v13525_v23, %s17297_s30 }
 0x864   : > { %v4107_v46 = vpop.permute.xlu1 %4106  ;;  %v4099_v8 = vpop.permute.xlu0 %4098 }
 0x865   : > { %v4154_v20 = vsel %vm17404_vm4, %v4107_v46, %v4109_v1  ;;  %v4115_v55 = vpop.permute.xlu2 %4114  ;;  %v13832_v44 = vsel %vm17405_vm12, %v4097_v51, %v4099_v8  ;;  %v13835_v2 = vsel %vm17400_vm0, %v4099_v8, %v4101_v49  ;;  %vm17409_vm4 = vmmov %vm17400_vm0 }
 0x866   : > { %4210 = vst [vmem:[#allocation2 + $0x6f0] sm:$0xff] %v4154_v20  ;;  %vm17410_vm12 = vmmov %vm17400_vm0  ;;  %vm17411_vm0 = vcmask 842752  }
 0x86a   : > { %4544 = vrot.lane.b32.xlu1 %v13525_v23, %s17296_s24  ;;  %4658 = vrot.lane.b32.xlu0 %v13452_v34, %s17297_s30 }
 0x86b   : > { %5270 = vrot.lane.b32.xlu2 %v13542_v37, %s17317_s2 }
 0x86c   : > { %v4113_v60 = vpop.permute.xlu1 %4112  ;;  %v4105_v47 = vpop.permute.xlu0 %4104 }
 0x86d   : > { %v4156_v19 = vsel %vm17406_vm3, %v4113_v60, %v4115_v55  ;;  %v4121_v15 = vpop.permute.xlu2 %4120  ;;  %v4152_v51 = vsel %vm17407_vm6, %v4103_v54, %v4105_v47  ;;  %v4153_v49 = vsel %vm17408_vm11, %v4105_v47, %v4107_v46  ;;  %vm17412_vm6 = vmmov %vm17406_vm3  ;;  %v5487_v47 = vld [vmem:[#allocation2 + $0x348] sm:$0xff] }
 0x86e   : > { %5874 = vmatpush.msrb.mxu0 %v4156_v19  ;;  %4208 = vst [vmem:[#allocation2 + $0x6e0] sm:$0xff] %v4152_v51  ;;  %vm17413_vm11 = vmmov %vm17406_vm3  ;;  %v5472_v19 = vld [vmem:[#allocation2 + $0x2d0] sm:$0xff] }
 0x86f   : > { %4209 = vst [vmem:[#allocation2 + $0x6e8] sm:$0xff] %v4153_v49 }
 0x870   : > { %5875 = vmatpush.msrb.mxu0 %v4142_v48 }
 0x872   : > { %5126 = vrot.lane.b32.xlu1 %v13542_v37, %s17314_s1  ;;  %5240 = vrot.lane.b32.xlu0 %v13463_v52, %s17317_s2 }
 0x873   : > { %4980 = vrot.lane.b32.xlu2 %v13563_v21, %s17313_s0  ;;  %5876 = vmatpush.msrb.mxu0 %v13724_v27 }
 0x874   : > { %v4119_v8 = vpop.permute.xlu1 %4118  ;;  %v4111_v20 = vpop.permute.xlu0 %4110 }
 0x875   : > { %v13854_v54 = vsel %vm17409_vm4, %v4119_v8, %v4121_v15  ;;  %v4127_v46 = vpop.permute.xlu2 %4126  ;;  %v4155_v60 = vsel %vm17410_vm12, %v4109_v1, %v4111_v20  ;;  %5877 = vmatpush.msrb.mxu0 %v13667_v53  ;;  %vm17414_vm4 = vmmov %vm17406_vm3 }
 0x876   : > { %4211 = vst.msk [vmem:[#allocation2 + $0x6f8] sm:$0xff] %vm17411_vm0, %v4155_v60  ;;  %vm17415_vm12 = vmmov %vm17406_vm3  ;;  %v5427_v60 = vld [vmem:[#allocation2 + $0x168] sm:$0xff] }
 0x877   : > { %5878 = vmatpush.msrb.mxu0 %v13604_v31  ;;  %vm17416_vm0 = vmmov %vm17406_vm3 }
 0x879   : > { %5879 = vmatpush.msrb.mxu0 %v13521_v30 }
 0x87a   : > { %4836 = vrot.lane.b32.xlu1 %v13563_v21, %s17306_s15  ;;  %4950 = vrot.lane.b32.xlu0 %v13482_v35, %s17313_s0 }
 0x87b   : > { %4546 = vrot.lane.b32.xlu2 %v13567_v38, %s17296_s24  ;;  %5880 = vmatpush.msrb.mxu0 %v13448_v42  ;;  %v5457_v42 = vld [vmem:[#allocation2 + $0x258] sm:$0xff] }
 0x87c   : > { %v4125_v27 = vpop.permute.xlu1 %4124  ;;  %v4117_v48 = vpop.permute.xlu0 %4116 }
 0x87d   : > { %v13869_v53 = vsel %vm17406_vm3, %v4125_v27, %v4127_v46  ;;  %v13871_v1 = vpop.permute.xlu2 %4132  ;;  %v4157_v30 = vsel %vm17412_vm6, %v4115_v55, %v4117_v48  ;;  %v4158_v31 = vsel %vm17413_vm11, %v4117_v48, %v4119_v8  ;;  %5881 = vmatpush.msrb.mxu0 %v13397_v59  ;;  %v5442_v59 = vld [vmem:[#allocation2 + $0x1e0] sm:$0xff]  ;;  %vm17417_vm3 = vmmov %vm17416_vm0 }
 0x87e   : > { %5920 = vmatpush.msrb.mxu2 %v4157_v30  ;;  %vm17418_vm6 = vmmov %vm17416_vm0 }
 0x87f   : > { %5882 = vmatpush.msrb.mxu0 %v5487_v47  ;;  %vm17419_vm11 = vmmov %vm17416_vm0  ;;  %v5382_v47 = vld [vmem:[#allocation2] sm:$0xff] }
 0x880   : > { %5921 = vmatpush.msrb.mxu2 %v4143_v39 }
 0x881   : > { %5883 = vmatpush.msrb.mxu0 %v5472_v19 }
 0x882   : > { %4402 = vrot.lane.b32.xlu1 %v13567_v38, %s17295_s23  ;;  %4516 = vrot.lane.b32.xlu0 %v13486_v33, %s17296_s24 }
 0x883   : > { %4514 = vrot.lane.b32.xlu2 %v13452_v34, %s17296_s24  ;;  %5884 = vmatpush.msrb.mxu0 %v5457_v42 }
 0x884   : > { %v4131_v55 = vpop.permute.xlu1 %4130  ;;  %v4123_v51 = vpop.permute.xlu0 %4122  ;;  %5922 = vmatpush.msrb.mxu2 %v13749_v18  ;;  %v5412_v18 = vld [vmem:[#allocation2 + $0xf0] sm:$0xff] }
 0x885   : > { %v13885_v39 = vsel %vm17414_vm4, %v4131_v55, %v13871_v1  ;;  %v13887_v49 = vpop.permute.xlu2 %4138  ;;  %v13890_v8 = vsel %vm17415_vm12, %v4121_v15, %v4123_v51  ;;  %v13893_v20 = vsel %vm17416_vm0, %v4123_v51, %v4125_v27  ;;  %5885 = vmatpush.msrb.mxu0 %v5442_v59  ;;  %v5397_v15 = vld [vmem:[#allocation2 + $0x78] sm:$0xff]  ;;  %vm17420_vm4 = vmmov %vm17416_vm0  ;;  %v5443_v51 = vld [vmem:[#allocation2 + $0x1e8] sm:$0xff] }
 0x886   : > { %5923 = vmatpush.msrb.mxu2 %v13690_v6  ;;  %vm17421_vm12 = vmmov %vm17416_vm0 }
 0x887   : > { %5886 = vmatpush.msrb.mxu0 %v5427_v60 }
 0x888   : > { %5924 = vmatpush.msrb.mxu2 %v13633_v14 }
 0x889   : > { %5887 = vmatpush.msrb.mxu0 %v5412_v18  ;;  %v5504_v18 = vld [vmem:[#allocation2 + $0x3d0] sm:$0xff] }
 0x88a   : > { %4370 = vrot.lane.b32.xlu1 %v13452_v34, %s17295_s23  ;;  %4400 = vrot.lane.b32.xlu0 %v13525_v23, %s17295_s23 }
 0x88b   : > { %5096 = vrot.lane.b32.xlu2 %v13463_v52, %s17314_s1  ;;  %5925 = vmatpush.msrb.mxu2 %v13554_v12  ;;  %v5488_v12 = vld [vmem:[#allocation2 + $0x350] sm:$0xff] }
 0x88c   : > { %v4137_v27 = vpop.permute.xlu1 %4136  ;;  %v4129_v6 = vpop.permute.xlu0 %4128  ;;  %5888 = vmatpush.msrb.mxu0 %v5397_v15  ;;  %v5383_v15 = vld [vmem:[#allocation2 + $0x8] sm:$0xff] }
 0x88d   : > { %v4168_v14 = vsel %vm17417_vm3, %v4137_v27, %v13887_v49  ;;  %v13906_v48 = vpop.permute.xlu2 %5266  ;;  %v13909_v30 = vsel %vm17418_vm6, %v4127_v46, %v4129_v6  ;;  %v13912_v34 = vsel %vm17419_vm11, %v4129_v6, %v4131_v55  ;;  %5926 = vmatpush.msrb.mxu2 %v13473_v5  ;;  %v5473_v46 = vld [vmem:[#allocation2 + $0x2d8] sm:$0xff]  ;;  %vm17423_vm3 = vcmask 842752   ;;  %v5459_v6 = vld [vmem:[#allocation2 + $0x268] sm:$0xff] }
 0x88e   : > { %4224 = vst [vmem:[#allocation2 + $0x768] sm:$0xff] %v4168_v14  ;;  %5889 = vmatpush.msrb.mxu0 %v5382_v47  ;;  %v13924_v5 = vld [vmem:[%s17184_s5] sm:$0xff]  ;;  %v5414_v47 = vld [vmem:[#allocation2 + $0x100] sm:$0xff]  ;;  %vm17424_vm6 = vcmask 310272  }
 0x88f   : > { %5927 = vmatpush.msrb.mxu2 %v13419_v24  ;;  %5890 = vmatmul.f32.vlgmr.msrb.gmra.mxu0 %v13924_v5  ;;  %vm17425_vm11 = vmmov %vm17424_vm6 }
 0x890   : > { %5966 = vmatpush.msra.mxu0 %v4158_v31 }
 0x891   : > { %5928 = vmatpush.msrb.mxu2 %v5488_v12 }
 0x892   : > { %5967 = vmatpush.msra.mxu0 %v13809_v26  ;;  %4952 = vrot.lane.b32.xlu1 %v13463_v52, %s17313_s0  ;;  %v5458_v26 = vld [vmem:[#allocation2 + $0x260] sm:$0xff] }
 0x893   : > { %4982 = vrot.lane.b32.xlu0 %v13542_v37, %s17313_s0  ;;  %4806 = vrot.lane.b32.xlu2 %v13482_v35, %s17306_s15 }
 0x894   : > { %5929 = vmatpush.msrb.mxu2 %v5473_v46  ;;  %v5265_v24 = vpop.permute.xlu1 %5264  ;;  %v4135_v31 = vpop.permute.xlu0 %4134  ;;  %5968 = vmatpush.msra.mxu0 %v13752_v63  ;;  %v5428_v63 = vld [vmem:[#allocation2 + $0x170] sm:$0xff] }
 0x895   : > { %v5308_v52 = vsel %vm803_vm5, %v5265_v24, %v13906_v48  ;;  %v13931_v19 = vpop.permute.xlu2 %5120  ;;  %v13935_v42 = vsel %vm17420_vm4, %v13871_v1, %v4135_v31  ;;  %v4167_v55 = vsel %vm17421_vm12, %v4135_v31, %v4137_v27  ;;  %v5520_v24 = vld [vmem:[#allocation2 + $0x450] sm:$0xff]  ;;  %vm17426_vm4 = vmmov %vm17424_vm6 }
 0x896   : > { %5930 = vmatpush.msrb.mxu2 %v5458_v26  ;;  %5969 = vmatpush.msra.mxu0 %v13693_v32  ;;  %4223 = vst [vmem:[#allocation2 + $0x760] sm:$0xff] %v4167_v55  ;;  %v5413_v32 = vld [vmem:[#allocation2 + $0xf8] sm:$0xff]  ;;  %v5384_v31 = vld [vmem:[#allocation2 + $0x10] sm:$0xff]  ;;  %vm17427_vm12 = vmmov %vm17426_vm4 }
 0x897   : > { %5897 = vmatpush.msrb.mxu1 %v5308_v52  ;;  %v5505_v26 = vld [vmem:[#allocation2 + $0x3d8] sm:$0xff]  ;;  %v11012_v52 = vld [vmem:[#allocation2] sm:$0xff] }
 0x898   : > { %5931 = vmatpush.msrb.mxu2 %v5443_v51  ;;  %5970 = vmatpush.msra.mxu0 %v13636_v11  ;;  %v5475_v51 = vld [vmem:[#allocation2 + $0x2e8] sm:$0xff] }
 0x89a   : > { %5932 = vmatpush.msrb.mxu2 %v5428_v63  ;;  %4258 = vrot.lane.b32.xlu1 %v13567_v38, %s17422_s7  ;;  %v5398_v38 = vld [vmem:[#allocation2 + $0x80] sm:$0xff] }
 0x89b   : > { %4692 = vrot.lane.b32.xlu0 %v13563_v21, %s17297_s30  ;;  %4372 = vrot.lane.b32.xlu2 %v13486_v33, %s17295_s23 }
 0x89c   : > { %5971 = vmatpush.msra.mxu0 %v13557_v61  ;;  %v13948_v1 = vpop.permute.xlu1 %5236  ;;  %v4141_v59 = vpop.permute.xlu0 %4140  ;;  %5933 = vmatpush.msrb.mxu2 %v5413_v32  ;;  %v5489_v61 = vld [vmem:[#allocation2 + $0x358] sm:$0xff] }
 0x89d   : > { %v13950_v60 = vpop.permute.xlu2 %5092  ;;  %v4169_v11 = vsel %vm17416_vm0, %v13887_v49, %v4141_v59  ;;  %v5474_v49 = vld [vmem:[#allocation2 + $0x2e0] sm:$0xff]  ;;  %vm17428_vm0 = vcmask 547840  }
 0x89e   : > { %5972 = vmatpush.msra.mxu0 %v13476_v43  ;;  %4225 = vst.msk [vmem:[#allocation2 + $0x770] sm:$0xff] %vm17423_vm3, %v4169_v11  ;;  %5934 = vmatpush.msrb.mxu2 %v5398_v38  ;;  %v5415_v38 = vld [vmem:[#allocation2 + $0x108] sm:$0xff]  ;;  %vm17429_vm3 = vmmov %vm17428_vm0 }
 0x8a0   : > { %5973 = vmatpush.msra.mxu0 %v5504_v18  ;;  %5935 = vmatpush.msrb.mxu2 %v5383_v15  ;;  %v5400_v18 = vld [vmem:[#allocation2 + $0x90] sm:$0xff]  ;;  %v5506_v15 = vld [vmem:[#allocation2 + $0x3e0] sm:$0xff] }
 0x8a1   : > { %5936 = vmatmul.f32.vlgmr.msrb.gmra.mxu2 %v13924_v5 }
 0x8a2   : > { %5974 = vmatpush.msra.mxu0 %v5489_v61  ;;  %6012 = vmatpush.msra.mxu2 %v13854_v54  ;;  %v5491_v61 = vld [vmem:[#allocation2 + $0x368] sm:$0xff] }
 0x8a3   : > { %5242 = vrot.lane.b32.xlu1 %v13501_v40, %s17317_s2  ;;  %4256 = vrot.lane.b32.xlu0 %v13525_v23, %s17422_s7  ;;  %v5444_v23 = vld [vmem:[#allocation2 + $0x1f0] sm:$0xff] }
 0x8a4   : > { %5272 = vrot.lane.b32.xlu2 %v13584_v16, %s17317_s2  ;;  %5975 = vmatpush.msra.mxu0 %v5474_v49  ;;  %v5091_v43 = vpop.permute.xlu1 %5090  ;;  %v5235_v27 = vpop.permute.xlu0 %5234 }
 0x8a5   : > { %6013 = vmatpush.msra.mxu2 %v13794_v22  ;;  %v5150_v14 = vsel %vm783_vm8, %v5091_v43, %v13950_v60  ;;  %v13966_v54 = vpop.permute.xlu2 %4946  ;;  %v5294_v40 = vsel %vm803_vm5, %v5235_v27, %v13948_v1  ;;  %v5429_v22 = vld [vmem:[#allocation2 + $0x178] sm:$0xff] }
 0x8a6   : > { %5976 = vmatpush.msra.mxu0 %v5459_v6  ;;  %5898 = vmatpush.msrb.mxu1 %v5294_v40  ;;  %v5446_v40 = vld [vmem:[#allocation2 + $0x200] sm:$0xff] }
 0x8a7   : > { %6014 = vmatpush.msra.mxu2 %v13735_v45 }
 0x8a8   : > { %5977 = vmatpush.msra.mxu0 %v5444_v23  ;;  %v11016_v23 = vld [vmem:[#allocation2 + $0x88] sm:$0xff] }
 0x8a9   : > { %6015 = vmatpush.msra.mxu2 %v13678_v56  ;;  %v13987_v56 = vld [vmem:[%s17184_s5 + $0x10] sm:$0xff] }
 0x8aa   : > { %5978 = vmatpush.msra.mxu0 %v5429_v22  ;;  %5939 = vmatmul.f32.gmra.mxu2 %v13987_v56  ;;  %v5431_v22 = vld [vmem:[#allocation2 + $0x188] sm:$0xff] }
 0x8ab   : > { %4548 = vrot.lane.b32.xlu1 %v13563_v21, %s17296_s24  ;;  %4838 = vrot.lane.b32.xlu0 %v13542_v37, %s17306_s15 }
 0x8ac   : > { %4662 = vrot.lane.b32.xlu2 %v13482_v35, %s17297_s30  ;;  %6016 = vmatpush.msra.mxu2 %v13619_v0  ;;  %v13980_v45 = vpop.permute.xlu1 %4978  ;;  %v13982_v12 = vpop.permute.xlu0 %5122  ;;  %v5399_v0 = vld [vmem:[#allocation2 + $0x88] sm:$0xff] }
 0x8ad   : > { %5979 = vmatpush.msra.mxu0 %v5414_v47  ;;  %v13989_v21 = vpop.permute.xlu2 %4832  ;;  %v5164_v46 = vsel %vm783_vm8, %v13931_v19, %v13982_v12 }
 0x8ae   : > { %6017 = vmatpush.msra.mxu2 %v13538_v9  ;;  %5893 = vmatmul.f32.gmra.mxu0 %v13987_v56  ;;  %v5490_v9 = vld [vmem:[#allocation2 + $0x360] sm:$0xff] }
 0x8af   : > { %5980 = vmatpush.msra.mxu0 %v5399_v0  ;;  %5899 = vmatpush.msrb.mxu1 %v5164_v46  ;;  %v5416_v46 = vld [vmem:[#allocation2 + $0x110] sm:$0xff]  ;;  %v5537_v0 = vld [vmem:[#allocation2 + $0x4d8] sm:$0xff] }
 0x8b0   : > { %6018 = vmatpush.msra.mxu2 %v5520_v24  ;;  %v5522_v24 = vld [vmem:[#allocation2 + $0x460] sm:$0xff] }
 0x8b1   : > { %5981 = vmatpush.msra.mxu0 %v5384_v31  ;;  %5900 = vmatpush.msrb.mxu1 %v5150_v14  ;;  %v14090_v31 = vld [vmem:[#allocation2 + $0x28] sm:$0xff] }
 0x8b2   : > { %6019 = vmatpush.msra.mxu2 %v5505_v26  ;;  %v5507_v26 = vld [vmem:[#allocation2 + $0x3e8] sm:$0xff] }
 0x8b3   : > { %6058 = vmatpush.msrb.mxu0 %v13890_v8  ;;  %4518 = vrot.lane.b32.xlu1 %v13482_v35, %s17296_s24 }
 0x8b4   : > { %4228 = vrot.lane.b32.xlu0 %v13486_v33, %s17422_s7  ;;  %4226 = vrot.lane.b32.xlu2 %v11012_v52, %s17422_s7  ;;  %v5269_v19 = vpop.permute.xlu1 %5268  ;;  %v4977_v55 = vpop.permute.xlu0 %4976  ;;  %v5460_v33 = vld [vmem:[#allocation2 + $0x270] sm:$0xff] }
 0x8b5   : > { %6020 = vmatpush.msra.mxu2 %v5490_v9  ;;  %6059 = vmatpush.msrb.mxu0 %v13819_v62  ;;  %v5309_v8 = vsel %vm803_vm5, %v13906_v48, %v5269_v19  ;;  %v14006_v63 = vpop.permute.xlu2 %4802  ;;  %v5020_v35 = vsel %vm763_vm10, %v4977_v55, %v13980_v45  ;;  %v5445_v62 = vld [vmem:[#allocation2 + $0x1f8] sm:$0xff]  ;;  %v5492_v55 = vld [vmem:[#allocation2 + $0x370] sm:$0xff] }
 0x8b6   : > { %5982 = vmatmul.f32.vlgmr.msra.gmra.mxu0 %v13924_v5  ;;  %5901 = vmatpush.msrb.mxu1 %v5020_v35  ;;  %v14017_v48 = vld [vmem:[#allocation2 + $0x18] sm:$0xff]  ;;  %v5447_v35 = vld [vmem:[#allocation2 + $0x208] sm:$0xff] }
 0x8b7   : > { %6021 = vmatpush.msra.mxu2 %v5475_v51  ;;  %6060 = vmatpush.msrb.mxu0 %v13762_v13  ;;  %v5430_v13 = vld [vmem:[#allocation2 + $0x180] sm:$0xff] }
 0x8b8   : > { %5943 = vmatpush.msrb.mxu3 %v5309_v8  ;;  %v5477_v8 = vld [vmem:[#allocation2 + $0x2f8] sm:$0xff] }
 0x8b9   : > { %6022 = vmatpush.msra.mxu2 %v5460_v33  ;;  %6061 = vmatpush.msrb.mxu0 %v13703_v36  ;;  %v14115_v33 = vld [vmem:[#allocation2 + $0xa0] sm:$0xff] }
 0x8bb   : > { %6023 = vmatpush.msra.mxu2 %v5445_v62  ;;  %5274 = vrot.lane.b32.xlu1 %v13580_v25, %s17317_s2 }
 0x8bc   : > { %5128 = vrot.lane.b32.xlu0 %v13584_v16, %s17314_s1  ;;  %4808 = vrot.lane.b32.xlu2 %v14017_v48, %s17306_s15  ;;  %v14022_v32 = vpop.permute.xlu1 %5238  ;;  %v14024_v59 = vpop.permute.xlu0 %4948 }
 0x8bd   : > { %6062 = vmatpush.msrb.mxu0 %v13646_v41  ;;  %6024 = vmatpush.msra.mxu2 %v5430_v13  ;;  %v5295_v25 = vsel %vm803_vm5, %v13948_v1, %v14022_v32  ;;  %v14029_v36 = vpop.permute.xlu2 %4688  ;;  %v5006_v11 = vsel %vm763_vm10, %v13966_v54, %v14024_v59  ;;  %v5521_v41 = vld [vmem:[#allocation2 + $0x458] sm:$0xff]  ;;  %v14038_v1 = vld [vmem:[#allocation2 + $0x20] sm:$0xff]  ;;  %v14064_v54 = vld [vmem:[#allocation2 + $0x90] sm:$0xff] }
 0x8be   : > { %5902 = vmatpush.msrb.mxu1 %v5006_v11  ;;  %5944 = vmatpush.msrb.mxu3 %v5295_v25 }
 0x8bf   : > { %6063 = vmatpush.msrb.mxu0 %v13573_v4  ;;  %6025 = vmatpush.msra.mxu2 %v5415_v38  ;;  %v5385_v4 = vld [vmem:[#allocation2 + $0x18] sm:$0xff]  ;;  %v5538_v38 = vld [vmem:[#allocation2 + $0x4e0] sm:$0xff] }
 0x8c0   : > { %5985 = vmatmul.f32.gmra.mxu0 %v13987_v56 }
 0x8c1   : > { %6064 = vmatpush.msrb.mxu0 %v5521_v41  ;;  %6026 = vmatpush.msra.mxu2 %v5400_v18  ;;  %v5417_v41 = vld [vmem:[#allocation2 + $0x118] sm:$0xff]  ;;  %v5523_v18 = vld [vmem:[#allocation2 + $0x468] sm:$0xff] }
 0x8c3   : > { %6065 = vmatpush.msrb.mxu0 %v5506_v15  ;;  %4984 = vrot.lane.b32.xlu1 %v13584_v16, %s17313_s0  ;;  %v5402_v15 = vld [vmem:[#allocation2 + $0xa0] sm:$0xff] }
 0x8c4   : > { %5098 = vrot.lane.b32.xlu0 %v14038_v1, %s17314_s1  ;;  %4694 = vrot.lane.b32.xlu2 %v13542_v37, %s17297_s30  ;;  %v14044_v49 = vpop.permute.xlu1 %5124  ;;  %v14047_v43 = vpop.permute.xlu0 %4834  ;;  %v5476_v37 = vld [vmem:[#allocation2 + $0x2f0] sm:$0xff] }
 0x8c5   : > { %6027 = vmatpush.msra.mxu2 %v5385_v4  ;;  %6066 = vmatpush.msrb.mxu0 %v5491_v61  ;;  %v5165_v16 = vsel %vm783_vm8, %v13982_v12, %v14044_v49  ;;  %v14052_v27 = vpop.permute.xlu2 %5270  ;;  %v4876_v6 = vsel %vm17424_vm6, %v13989_v21, %v14047_v43  ;;  %v5508_v4 = vld [vmem:[#allocation2 + $0x3f0] sm:$0xff]  ;;  %v5387_v61 = vld [vmem:[#allocation2 + $0x28] sm:$0xff]  ;;  %vm17430_vm6 = vcmask 556032  }
 0x8c6   : > { %6028 = vmatmul.f32.vlgmr.msra.gmra.mxu2 %v13924_v5  ;;  %v14060_v14 = vsel %vm803_vm5, %v5269_v19, %v14052_v27  ;;  %5903 = vmatpush.msrb.mxu1 %v4876_v6  ;;  %v5493_v6 = vld [vmem:[#allocation2 + $0x378] sm:$0xff] }
 0x8c7   : > { %6104 = vmatpush.msrb.mxu2 %v13893_v20  ;;  %6067 = vmatpush.msrb.mxu0 %v5476_v37  ;;  %v5461_v20 = vld [vmem:[#allocation2 + $0x278] sm:$0xff] }
 0x8c8   : > { %5945 = vmatpush.msrb.mxu3 %v5165_v16  ;;  %v14129_v16 = vld [vmem:[#allocation2 + $0x98] sm:$0xff] }
 0x8c9   : > { %6105 = vmatpush.msrb.mxu2 %v13822_v28  ;;  %6068 = vmatpush.msrb.mxu0 %v5461_v20 }
 0x8cb   : > { %6106 = vmatpush.msrb.mxu2 %v13765_v3  ;;  %4550 = vrot.lane.b32.xlu1 %v14064_v54, %s17296_s24 }
 0x8cc   : > { %4664 = vrot.lane.b32.xlu0 %v14017_v48, %s17297_s30  ;;  %4404 = vrot.lane.b32.xlu2 %v11016_v23, %s17295_s23  ;;  %v14072_v28 = vpop.permute.xlu1 %5094  ;;  %v14074_v47 = vpop.permute.xlu0 %4804 }
 0x8cd   : > { %6069 = vmatpush.msrb.mxu0 %v5446_v40  ;;  %6107 = vmatpush.msrb.mxu2 %v13706_v17  ;;  %v5151_v3 = vsel %vm783_vm8, %v13950_v60, %v14072_v28  ;;  %v14079_v12 = vpop.permute.xlu2 %4980  ;;  %v4862_v21 = vsel %vm17425_vm11, %v14006_v63, %v14074_v47  ;;  %v5401_v60 = vld [vmem:[#allocation2 + $0x98] sm:$0xff]  ;;  %v5462_v63 = vld [vmem:[#allocation2 + $0x280] sm:$0xff]  ;;  %vm17431_vm11 = vmmov %vm17426_vm4 }
 0x8ce   : > { %6031 = vmatmul.f32.gmra.mxu2 %v13987_v56  ;;  %v5021_v17 = vsel %vm763_vm10, %v13980_v45, %v14079_v12  ;;  %5904 = vmatpush.msrb.mxu1 %v4862_v21  ;;  %v14094_v45 = vld [vmem:[#allocation2 + $0x10] sm:$0xff]  ;;  %v5478_v21 = vld [vmem:[#allocation2 + $0x300] sm:$0xff] }
 0x8cf   : > { %6070 = vmatpush.msrb.mxu0 %v5431_v22  ;;  %6108 = vmatpush.msrb.mxu2 %v13649_v57  ;;  %v5386_v57 = vld [vmem:[#allocation2 + $0x20] sm:$0xff] }
 0x8d0   : > { %5946 = vmatpush.msrb.mxu3 %v5151_v3 }
 0x8d1   : > { %6071 = vmatpush.msrb.mxu0 %v5416_v46  ;;  %6109 = vmatpush.msrb.mxu2 %v5537_v0 }
 0x8d2   : > { %5947 = vmatpush.msrb.mxu3 %v5021_v17  ;;  %v5554_v17 = vld [vmem:[#allocation2 + $0x560] sm:$0xff] }
 0x8d3   : > { %6072 = vmatpush.msrb.mxu0 %v5401_v60  ;;  %6110 = vmatpush.msrb.mxu2 %v5522_v24 }
 0x8d4   : > { %4260 = vrot.lane.b32.xlu1 %v11016_v23, %s17422_s7  ;;  %5244 = vrot.lane.b32.xlu2 %v14090_v31, %s17317_s2  ;;  %v14098_v9 = vpop.permute.xlu1 %4660  ;;  %v14100_v52 = vpop.permute.xlu0 %4690 }
 0x8d5   : > { %4374 = vrot.lane.b32.xlu0 %v14094_v45, %s17295_s23  ;;  %6073 = vmatpush.msrb.mxu0 %v5386_v57  ;;  %v14103_v19 = vpop.permute.xlu2 %4546  ;;  %v4732_v51 = vsel %vm723_vm13, %v14029_v36, %v14100_v52  ;;  %v5432_v36 = vld [vmem:[#allocation2 + $0x190] sm:$0xff]  ;;  %v5539_v57 = vld [vmem:[#allocation2 + $0x4e8] sm:$0xff] }
 0x8d6   : > { %6111 = vmatpush.msrb.mxu2 %v5507_v26  ;;  %5905 = vmatpush.msrb.mxu1 %v4732_v51  ;;  %v5403_v26 = vld [vmem:[#allocation2 + $0xa8] sm:$0xff]  ;;  %v5509_v51 = vld [vmem:[#allocation2 + $0x3f8] sm:$0xff] }
 0x8d7   : > { %6150 = vmatpush.msra.mxu0 %v13869_v53  ;;  %v5568_v53 = vld [vmem:[#allocation2 + $0x5d0] sm:$0xff] }
 0x8d8   : > { %6112 = vmatpush.msrb.mxu2 %v5492_v55  ;;  %6074 = vmatmul.f32.vlgmr.msrb.gmra.mxu0 %v13924_v5  ;;  %v5524_v55 = vld [vmem:[#allocation2 + $0x470] sm:$0xff] }
 0x8d9   : > { %6151 = vmatpush.msra.mxu0 %v13805_v10  ;;  %v5553_v10 = vld [vmem:[#allocation2 + $0x558] sm:$0xff] }
 0x8da   : > { %6113 = vmatpush.msrb.mxu2 %v5477_v8 }
 0x8db   : > { %6152 = vmatpush.msra.mxu0 %v13746_v58 }
 0x8dc   : > { %6114 = vmatpush.msrb.mxu2 %v5462_v63  ;;  %5100 = vrot.lane.b32.xlu1 %v14090_v31, %s17314_s1  ;;  %v4545_v62 = vpop.permute.xlu1 %4544  ;;  %v4659_v58 = vpop.permute.xlu0 %4658 }
 0x8dd   : > { %6153 = vmatpush.msra.mxu0 %v5568_v53  ;;  %4954 = vrot.lane.b32.xlu2 %v14038_v1, %s17313_s0  ;;  %v4588_v13 = vsel %vm703_vm2, %v4545_v62, %v14103_v19  ;;  %v14121_v25 = vpop.permute.xlu2 %4514  ;;  %v4718_v11 = vsel %vm723_vm13, %v4659_v58, %v14098_v9  ;;  %v5479_v53 = vld [vmem:[#allocation2 + $0x308] sm:$0xff]  ;;  %v5570_v62 = vld [vmem:[#allocation2 + $0x5e0] sm:$0xff]  ;;  %v14199_v58 = vld [vmem:[#allocation2 + $0x30] sm:$0xff] }
 0x8de   : > { %5130 = vrot.lane.b32.xlu0 %v14115_v33, %s17314_s1  ;;  %6115 = vmatpush.msrb.mxu2 %v5447_v35  ;;  %v5585_v35 = vld [vmem:[#allocation2 + $0x658] sm:$0xff] }
 0x8df   : > { %6154 = vmatpush.msra.mxu0 %v5553_v10  ;;  %5906 = vmatpush.msrb.mxu1 %v4718_v11  ;;  %v5464_v10 = vld [vmem:[#allocation2 + $0x290] sm:$0xff] }
 0x8e0   : > { %6116 = vmatpush.msrb.mxu2 %v5432_v36  ;;  %6077 = vmatmul.f32.gmra.mxu0 %v13987_v56 }
 0x8e1   : > { %6155 = vmatpush.msra.mxu0 %v5538_v38  ;;  %5907 = vmatpush.msrb.mxu1 %v4588_v13  ;;  %v14205_v13 = vld [vmem:[#allocation2 + $0xa8] sm:$0xff] }
 0x8e2   : > { %6117 = vmatpush.msrb.mxu2 %v5417_v41 }
 0x8e3   : > { %6156 = vmatpush.msra.mxu0 %v5523_v18 }
 0x8e4   : > { %6118 = vmatpush.msrb.mxu2 %v5402_v15  ;;  %4810 = vrot.lane.b32.xlu1 %v14038_v1, %s17306_s15  ;;  %v14133_v37 = vpop.permute.xlu1 %5126  ;;  %v14135_v20 = vpop.permute.xlu0 %5240 }
 0x8e5   : > { %6157 = vmatpush.msra.mxu0 %v5508_v4  ;;  %4520 = vrot.lane.b32.xlu2 %v14017_v48, %s17296_s24  ;;  %v14141_v40 = vsel %vm783_vm8, %v14044_v49, %v14133_v37  ;;  %v14143_v23 = vpop.permute.xlu2 %5096  ;;  %v14148_v22 = vsel %vm803_vm5, %v14022_v32, %v14135_v20  ;;  %v5448_v49 = vld [vmem:[#allocation2 + $0x210] sm:$0xff]  ;;  %v5569_v32 = vld [vmem:[#allocation2 + $0x5d8] sm:$0xff] }
 0x8e6   : > { %4840 = vrot.lane.b32.xlu0 %v14129_v16, %s17306_s15  ;;  %6119 = vmatpush.msrb.mxu2 %v5387_v61  ;;  %v14153_v3 = vsel %vm783_vm8, %v14072_v28, %v14143_v23  ;;  %v5433_v28 = vld [vmem:[#allocation2 + $0x198] sm:$0xff]  ;;  %v5540_v4 = vld [vmem:[#allocation2 + $0x4f0] sm:$0xff]  ;;  %v5419_v61 = vld [vmem:[#allocation2 + $0x128] sm:$0xff] }
 0x8e7   : > { %6158 = vmatpush.msra.mxu0 %v5493_v6  ;;  %6120 = vmatmul.f32.vlgmr.msrb.gmra.mxu2 %v13924_v5  ;;  %v5525_v6 = vld [vmem:[#allocation2 + $0x478] sm:$0xff] }
 0x8e8   : > { %6196 = vmatpush.msra.mxu2 %v13909_v30  ;;  %v5463_v30 = vld [vmem:[#allocation2 + $0x288] sm:$0xff] }
 0x8e9   : > { %6159 = vmatpush.msra.mxu0 %v5478_v21  ;;  %v5404_v21 = vld [vmem:[#allocation2 + $0xb0] sm:$0xff] }
 0x8ea   : > { %6197 = vmatpush.msra.mxu2 %v13832_v44 }
 0x8eb   : > { %6160 = vmatpush.msra.mxu0 %v5463_v30  ;;  %v5510_v30 = vld [vmem:[#allocation2 + $0x400] sm:$0xff] }
 0x8ec   : > { %6198 = vmatpush.msra.mxu2 %v13775_v50  ;;  %4696 = vrot.lane.b32.xlu1 %v14129_v16, %s17297_s30  ;;  %v14165_v44 = vpop.permute.xlu1 %4836  ;;  %v14167_v46 = vpop.permute.xlu0 %4950 }
 0x8ed   : > { %6161 = vmatpush.msra.mxu0 %v5448_v49  ;;  %4230 = vrot.lane.b32.xlu2 %v14094_v45, %s17422_s7  ;;  %v4877_v50 = vsel %vm17426_vm4, %v14047_v43, %v14165_v44  ;;  %v14172_v0 = vpop.permute.xlu2 %4806  ;;  %v5007_v60 = vsel %vm763_vm10, %v14024_v59, %v14167_v46  ;;  %v5418_v45 = vld [vmem:[#allocation2 + $0x120] sm:$0xff]  ;;  %v5388_v43 = vld [vmem:[#allocation2 + $0x30] sm:$0xff]  ;;  %v5389_v49 = vld [vmem:[#allocation2 + $0x38] sm:$0xff] }
 0x8ee   : > { %6199 = vmatpush.msra.mxu2 %v5569_v32  ;;  %4406 = vrot.lane.b32.xlu0 %v14064_v54, %s17295_s23  ;;  %v4863_v24 = vsel %vm17427_vm12, %v14074_v47, %v14172_v0  ;;  %v5494_v59 = vld [vmem:[#allocation2 + $0x380] sm:$0xff]  ;;  %vm17432_vm12 = vmmov %vm17430_vm6 }
 0x8ef   : > { %6162 = vmatpush.msra.mxu0 %v5433_v28  ;;  %5948 = vmatpush.msrb.mxu3 %v5007_v60 }
 0x8f0   : > { %6200 = vmatpush.msra.mxu2 %v5554_v17 }
 0x8f1   : > { %6123 = vmatmul.f32.gmra.mxu2 %v13987_v56  ;;  %6163 = vmatpush.msra.mxu0 %v5418_v45  ;;  %v5480_v45 = vld [vmem:[#allocation2 + $0x310] sm:$0xff] }
 0x8f2   : > { %6201 = vmatpush.msra.mxu2 %v5539_v57  ;;  %5949 = vmatpush.msrb.mxu3 %v4877_v50  ;;  %v5601_v57 = vld [vmem:[#allocation2 + $0x6d8] sm:$0xff] }
 0x8f3   : > { %6164 = vmatpush.msra.mxu0 %v5403_v26  ;;  %v5450_v26 = vld [vmem:[#allocation2 + $0x220] sm:$0xff] }
 0x8f4   : > { %6202 = vmatpush.msra.mxu2 %v5524_v55  ;;  %4262 = vrot.lane.b32.xlu1 %v14064_v54, %s17422_s7  ;;  %v14187_v47 = vpop.permute.xlu1 %4402  ;;  %v14189_v8 = vpop.permute.xlu0 %4516  ;;  %v5571_v55 = vld [vmem:[#allocation2 + $0x5e8] sm:$0xff] }
 0x8f5   : > { %5950 = vmatpush.msrb.mxu3 %v4863_v24  ;;  %6165 = vmatpush.msra.mxu0 %v5388_v43  ;;  %v14192_v63 = vpop.permute.xlu2 %4372  ;;  %v4574_v54 = vsel %vm703_vm2, %v14121_v25, %v14189_v8  ;;  %v5434_v25 = vld [vmem:[#allocation2 + $0x1a0] sm:$0xff] }
 0x8f6   : > { %6203 = vmatpush.msra.mxu2 %v5509_v51  ;;  %4986 = vrot.lane.b32.xlu2 %v14115_v33, %s17313_s0 }
 0x8f7   : > { %4376 = vrot.lane.b32.xlu0 %v14017_v48, %s17295_s23  ;;  %6242 = vmatpush.msrb.mxu0 %v13912_v34  ;;  %v5449_v34 = vld [vmem:[#allocation2 + $0x218] sm:$0xff] }
 0x8f8   : > { %6204 = vmatpush.msra.mxu2 %v5494_v59  ;;  %5908 = vmatpush.msrb.mxu1 %v4574_v54 }
 0x8f9   : > { %6166 = vmatmul.f32.vlgmr.msra.gmra.mxu0 %v13924_v5 }
 0x8fa   : > { %6243 = vmatpush.msrb.mxu0 %v13835_v2  ;;  %6205 = vmatpush.msra.mxu2 %v5479_v53  ;;  %v5555_v2 = vld [vmem:[#allocation2 + $0x568] sm:$0xff]  ;;  %v5420_v53 = vld [vmem:[#allocation2 + $0x130] sm:$0xff] }
 0x8fc   : > { %6244 = vmatpush.msrb.mxu0 %v5585_v35  ;;  %6206 = vmatpush.msra.mxu2 %v5464_v10  ;;  %v4371_v36 = vpop.permute.xlu1 %4370  ;;  %v4401_v11 = vpop.permute.xlu0 %4400  ;;  %v5541_v35 = vld [vmem:[#allocation2 + $0x4f8] sm:$0xff]  ;;  %v5526_v10 = vld [vmem:[#allocation2 + $0x480] sm:$0xff] }
 0x8fd   : > { %5246 = vrot.lane.b32.xlu1 %v14199_v58, %s17317_s2  ;;  %v4430_v38 = vsel %vm17428_vm0, %v4371_v36, %v14192_v63  ;;  %v4444_v18 = vsel %vm17429_vm3, %v4401_v11, %v14187_v47  ;;  %v5602_v36 = vld [vmem:[#allocation2 + $0x6e0] sm:$0xff]  ;;  %vm17433_vm3 = vmmov %vm17430_vm6 }
 0x8fe   : > { %6245 = vmatpush.msrb.mxu0 %v5570_v62  ;;  %6207 = vmatpush.msra.mxu2 %v5449_v34  ;;  %v14211_v41 = vpop.permute.xlu2 %5272  ;;  %v5390_v62 = vld [vmem:[#allocation2 + $0x40] sm:$0xff]  ;;  %v5511_v34 = vld [vmem:[#allocation2 + $0x408] sm:$0xff] }
 0x8ff   : > { %4956 = vrot.lane.b32.xlu2 %v14090_v31, %s17313_s0  ;;  %5276 = vrot.lane.b32.xlu0 %v14205_v13, %s17317_s2  ;;  %v14218_v15 = vsel %vm803_vm5, %v14052_v27, %v14211_v41  ;;  %v5495_v27 = vld [vmem:[#allocation2 + $0x388] sm:$0xff] }
 0x900   : > { %6246 = vmatpush.msrb.mxu0 %v5555_v2  ;;  %6208 = vmatpush.msra.mxu2 %v5434_v25 }
 0x901   : > { %5909 = vmatpush.msrb.mxu1 %v4444_v18  ;;  %6169 = vmatmul.f32.gmra.mxu0 %v13987_v56 }
 0x902   : > { %6247 = vmatpush.msrb.mxu0 %v5540_v4  ;;  %6209 = vmatpush.msra.mxu2 %v5419_v61  ;;  %v5481_v4 = vld [vmem:[#allocation2 + $0x318] sm:$0xff]  ;;  %v5587_v61 = vld [vmem:[#allocation2 + $0x668] sm:$0xff] }
 0x903   : > { %5910 = vmatpush.msrb.mxu1 %v4430_v38 }
 0x904   : > { %6248 = vmatpush.msrb.mxu0 %v5525_v6  ;;  %6210 = vmatpush.msra.mxu2 %v5404_v21  ;;  %v14227_v32 = vpop.permute.xlu1 %4952  ;;  %v5572_v6 = vld [vmem:[#allocation2 + $0x5f0] sm:$0xff]  ;;  %v5451_v21 = vld [vmem:[#allocation2 + $0x228] sm:$0xff] }
 0x905   : > { %4812 = vrot.lane.b32.xlu1 %v14090_v31, %s17306_s15  ;;  %v14229_v28 = vpop.permute.xlu0 %4982  ;;  %v14235_v17 = vsel %vm763_vm10, %v14167_v46, %v14227_v32  ;;  %v5586_v46 = vld [vmem:[#allocation2 + $0x660] sm:$0xff] }
 0x906   : > { %6249 = vmatpush.msrb.mxu0 %v5510_v30  ;;  %6211 = vmatpush.msra.mxu2 %v5389_v49  ;;  %v14237_v50 = vpop.permute.xlu2 %4662  ;;  %v14242_v60 = vsel %vm763_vm10, %v14079_v12, %v14229_v28  ;;  %v5435_v12 = vld [vmem:[#allocation2 + $0x1a8] sm:$0xff]  ;;  %v14288_v30 = vld [vmem:[#allocation2 + $0x38] sm:$0xff]  ;;  %v5436_v49 = vld [vmem:[#allocation2 + $0x1b0] sm:$0xff] }
 0x907   : > { %4666 = vrot.lane.b32.xlu2 %v14038_v1, %s17297_s30  ;;  %4842 = vrot.lane.b32.xlu0 %v14115_v33, %s17306_s15  ;;  %v4719_v24 = vsel %vm723_vm13, %v14098_v9, %v14237_v50  ;;  %v5556_v9 = vld [vmem:[#allocation2 + $0x570] sm:$0xff] }
 0x908   : > { %6250 = vmatpush.msrb.mxu0 %v5495_v27  ;;  %6288 = vmatpush.msrb.mxu2 %v13885_v39  ;;  %v5465_v39 = vld [vmem:[#allocation2 + $0x298] sm:$0xff] }
 0x909   : > { %6212 = vmatmul.f32.vlgmr.msra.gmra.mxu2 %v13924_v5 }
 0x90a   : > { %6251 = vmatpush.msrb.mxu0 %v5480_v45  ;;  %6289 = vmatpush.msrb.mxu2 %v5601_v57  ;;  %v5542_v45 = vld [vmem:[#allocation2 + $0x500] sm:$0xff] }
 0x90c   : > { %6252 = vmatpush.msrb.mxu0 %v5465_v39  ;;  %6290 = vmatpush.msrb.mxu2 %v5586_v46  ;;  %v14254_v43 = vpop.permute.xlu1 %4258 }
 0x90d   : > { %4698 = vrot.lane.b32.xlu1 %v14115_v33, %s17297_s30  ;;  %v14256_v51 = vpop.permute.xlu0 %4692 }
 0x90e   : > { %6253 = vmatpush.msrb.mxu0 %v5450_v26  ;;  %6291 = vmatpush.msrb.mxu2 %v5571_v55  ;;  %v14258_v59 = vpop.permute.xlu2 %4226  ;;  %v4733_v54 = vsel %vm723_vm13, %v14100_v52, %v14256_v51  ;;  %v5496_v52 = vld [vmem:[#allocation2 + $0x390] sm:$0xff]  ;;  %v5421_v55 = vld [vmem:[#allocation2 + $0x138] sm:$0xff] }
 0x90f   : > { %4232 = vrot.lane.b32.xlu2 %v14017_v48, %s17422_s7  ;;  %4552 = vrot.lane.b32.xlu0 %v14129_v16, %s17296_s24  ;;  %v5405_v48 = vld [vmem:[#allocation2 + $0xb8] sm:$0xff] }
 0x910   : > { %6254 = vmatpush.msrb.mxu0 %v5435_v12  ;;  %6292 = vmatpush.msrb.mxu2 %v5556_v9  ;;  %v5527_v12 = vld [vmem:[#allocation2 + $0x488] sm:$0xff]  ;;  %v5512_v9 = vld [vmem:[#allocation2 + $0x410] sm:$0xff] }
 0x911   : > { %5951 = vmatpush.msrb.mxu3 %v4733_v54  ;;  %6215 = vmatmul.f32.gmra.mxu2 %v13987_v56  ;;  %v5391_v54 = vld [vmem:[#allocation2 + $0x48] sm:$0xff] }
 0x912   : > { %6255 = vmatpush.msrb.mxu0 %v5420_v53  ;;  %6293 = vmatpush.msrb.mxu2 %v5541_v35  ;;  %v5618_v53 = vld [vmem:[#allocation2 + $0x760] sm:$0xff] }
 0x913   : > { %5952 = vmatpush.msrb.mxu3 %v4719_v24  ;;  %v14298_v24 = vld [vmem:[#allocation2 + $0xb0] sm:$0xff] }
 0x914   : > { %6256 = vmatpush.msrb.mxu0 %v5405_v48  ;;  %6294 = vmatpush.msrb.mxu2 %v5526_v10  ;;  %v5482_v48 = vld [vmem:[#allocation2 + $0x320] sm:$0xff]  ;;  %v5603_v10 = vld [vmem:[#allocation2 + $0x6e8] sm:$0xff] }
 0x915   : > { %4408 = vrot.lane.b32.xlu1 %v14129_v16, %s17295_s23  ;;  %v14269_v2 = vpop.permute.xlu1 %5242  ;;  %v4257_v25 = vpop.permute.xlu0 %4256 }
 0x916   : > { %6257 = vmatpush.msrb.mxu0 %v5390_v62  ;;  %6295 = vmatpush.msrb.mxu2 %v5511_v34  ;;  %v14276_v11 = vsel %vm803_vm5, %v14135_v20, %v14269_v2  ;;  %v14278_v38 = vpop.permute.xlu2 %4808  ;;  %v5466_v20 = vld [vmem:[#allocation2 + $0x2a0] sm:$0xff] }
 0x917   : > { %5132 = vrot.lane.b32.xlu2 %v14205_v13, %s17314_s1  ;;  %4522 = vrot.lane.b32.xlu0 %v14038_v1, %s17296_s24  ;;  %v14285_v18 = vsel %vm17431_vm11, %v14172_v0, %v14278_v38  ;;  %v5557_v0 = vld [vmem:[#allocation2 + $0x578] sm:$0xff]  ;;  %vm17435_vm11 = vmmov %vm17433_vm3 }
 0x918   : > { %6334 = vmatpush.msra.mxu0 %v13935_v42  ;;  %6296 = vmatpush.msrb.mxu2 %v5496_v52  ;;  %v4300_v42 = vsel %vm17430_vm6, %v4257_v25, %v14254_v43  ;;  %vm17434_vm6 = vmmov %vm17428_vm0 }
 0x919   : > { %5911 = vmatpush.msrb.mxu1 %v4300_v42  ;;  %6258 = vmatmul.f32.vlgmr.msrb.gmra.mxu0 %v13924_v5  ;;  %v5588_v42 = vld [vmem:[#allocation2 + $0x670] sm:$0xff] }
 0x91a   : > { %6335 = vmatpush.msra.mxu0 %v5602_v36  ;;  %6297 = vmatpush.msrb.mxu2 %v5481_v4  ;;  %v5467_v36 = vld [vmem:[#allocation2 + $0x2a8] sm:$0xff]  ;;  %v5452_v4 = vld [vmem:[#allocation2 + $0x230] sm:$0xff] }
 0x91c   : > { %6336 = vmatpush.msra.mxu0 %v5587_v61  ;;  %6298 = vmatpush.msrb.mxu2 %v5466_v20  ;;  %v5558_v61 = vld [vmem:[#allocation2 + $0x580] sm:$0xff] }
 0x91d   : > { %5248 = vrot.lane.b32.xlu1 %v14288_v30, %s17317_s2  ;;  %v14294_v27 = vpop.permute.xlu1 %4548  ;;  %v14296_v5 = vpop.permute.xlu0 %4838 }
 0x91e   : > { %6337 = vmatpush.msra.mxu0 %v5572_v6  ;;  %6299 = vmatpush.msrb.mxu2 %v5451_v21  ;;  %v4589_v57 = vsel %vm703_vm2, %v14103_v19, %v14294_v27  ;;  %v14305_v39 = vpop.permute.xlu2 %4694  ;;  %v14310_v46 = vsel %vm17426_vm4, %v14165_v44, %v14296_v5  ;;  %v5406_v19 = vld [vmem:[#allocation2 + $0xc0] sm:$0xff]  ;;  %v5497_v44 = vld [vmem:[#allocation2 + $0x398] sm:$0xff]  ;;  %v5543_v6 = vld [vmem:[#allocation2 + $0x508] sm:$0xff] }
 0x91f   : > { %5102 = vrot.lane.b32.xlu2 %v14199_v58, %s17314_s1  ;;  %5278 = vrot.lane.b32.xlu0 %v14298_v24, %s17317_s2  ;;  %v14315_v26 = vsel %vm723_vm13, %v14256_v51, %v14305_v39 }
 0x920   : > { %6338 = vmatpush.msra.mxu0 %v5557_v0  ;;  %6300 = vmatpush.msrb.mxu2 %v5436_v49 }
 0x921   : > { %5953 = vmatpush.msrb.mxu3 %v4589_v57  ;;  %6261 = vmatmul.f32.gmra.mxu0 %v13987_v56  ;;  %v5528_v57 = vld [vmem:[#allocation2 + $0x490] sm:$0xff] }
 0x922   : > { %6339 = vmatpush.msra.mxu0 %v5542_v45  ;;  %6301 = vmatpush.msrb.mxu2 %v5421_v55  ;;  %v5407_v45 = vld [vmem:[#allocation2 + $0xc8] sm:$0xff]  ;;  %v5513_v55 = vld [vmem:[#allocation2 + $0x418] sm:$0xff] }
 0x924   : > { %6340 = vmatpush.msra.mxu0 %v5527_v12  ;;  %6302 = vmatpush.msrb.mxu2 %v5406_v19  ;;  %v5498_v12 = vld [vmem:[#allocation2 + $0x3a0] sm:$0xff] }
 0x925   : > { %4958 = vrot.lane.b32.xlu1 %v14199_v58, %s17313_s0  ;;  %v14320_v51 = vpop.permute.xlu1 %4518 }
 0x926   : > { %6341 = vmatpush.msra.mxu0 %v5512_v9  ;;  %6303 = vmatpush.msrb.mxu2 %v5391_v54  ;;  %v14322_v35 = vpop.permute.xlu0 %4228  ;;  %v4575_v62 = vsel %vm703_vm2, %v14189_v8, %v14320_v51  ;;  %v14331_v34 = vpop.permute.xlu2 %4404  ;;  %v5573_v8 = vld [vmem:[#allocation2 + $0x5f8] sm:$0xff]  ;;  %v5483_v9 = vld [vmem:[#allocation2 + $0x328] sm:$0xff] }
 0x927   : > { %4668 = vrot.lane.b32.xlu2 %v14090_v31, %s17297_s30  ;;  %4988 = vrot.lane.b32.xlu0 %v14205_v13, %s17313_s0  ;;  %v4286_v52 = vsel %vm17432_vm12, %v14258_v59, %v14322_v35  ;;  %v4445_v25 = vsel %vm17428_vm0, %v14187_v47, %v14331_v34  ;;  %v5437_v59 = vld [vmem:[#allocation2 + $0x1b8] sm:$0xff]  ;;  %vm17436_vm12 = vmmov %vm17426_vm4 }
 0x928   : > { %6342 = vmatpush.msra.mxu0 %v5497_v44  ;;  %6380 = vmatpush.msra.mxu2 %v5618_v53  ;;  %v5468_v53 = vld [vmem:[#allocation2 + $0x2b0] sm:$0xff] }
 0x929   : > { %5912 = vmatpush.msrb.mxu1 %v4286_v52  ;;  %5954 = vmatpush.msrb.mxu3 %v4575_v62 }
 0x92a   : > { %6343 = vmatpush.msra.mxu0 %v5482_v48  ;;  %6381 = vmatpush.msra.mxu2 %v5603_v10  ;;  %v5453_v48 = vld [vmem:[#allocation2 + $0x238] sm:$0xff]  ;;  %v5438_v10 = vld [vmem:[#allocation2 + $0x1c0] sm:$0xff] }
 0x92b   : > { %5989 = vmatpush.msra.mxu1 %v14060_v14  ;;  %5955 = vmatpush.msrb.mxu3 %v4445_v25  ;;  %v5422_v14 = vld [vmem:[#allocation2 + $0x140] sm:$0xff] }
 0x92c   : > { %6344 = vmatpush.msra.mxu0 %v5467_v36  ;;  %6382 = vmatpush.msra.mxu2 %v5588_v42  ;;  %v5529_v36 = vld [vmem:[#allocation2 + $0x498] sm:$0xff]  ;;  %v5408_v42 = vld [vmem:[#allocation2 + $0xd0] sm:$0xff] }
 0x92d   : > { %4524 = vrot.lane.b32.xlu1 %v14090_v31, %s17296_s24  ;;  %5990 = vmatpush.msra.mxu1 %v14148_v22  ;;  %v14343_v47 = vpop.permute.xlu1 %5274 }
 0x92e   : > { %6345 = vmatpush.msra.mxu0 %v5452_v4  ;;  %6383 = vmatpush.msra.mxu2 %v5573_v8  ;;  %v14345_v20 = vpop.permute.xlu0 %5128  ;;  %v14354_v21 = vsel %vm803_vm5, %v14211_v41, %v14343_v47  ;;  %v14356_v22 = vpop.permute.xlu2 %5244  ;;  %v14372_v41 = vld [vmem:[%s17184_s5] sm:$0xff]  ;;  %v5620_v8 = vld [vmem:[#allocation2 + $0x770] sm:$0xff] }
 0x92f   : > { %4378 = vrot.lane.b32.xlu2 %v14038_v1, %s17295_s23  ;;  %4554 = vrot.lane.b32.xlu0 %v14115_v33, %s17296_s24  ;;  %v14361_v0 = vsel %vm783_vm8, %v14133_v37, %v14345_v20  ;;  %v14366_v49 = vsel %vm803_vm5, %v14269_v2, %v14356_v22  ;;  %v5392_v37 = vld [vmem:[#allocation2 + $0x50] sm:$0xff]  ;;  %v5619_v2 = vld [vmem:[#allocation2 + $0x768] sm:$0xff]  ;;  %v5393_v4 = vld [vmem:[#allocation2 + $0x58] sm:$0xff] }
 0x930   : > { %6346 = vmatpush.msra.mxu0 %v5437_v59  ;;  %6384 = vmatpush.msra.mxu2 %v5558_v61  ;;  %v5484_v59 = vld [vmem:[#allocation2 + $0x330] sm:$0xff]  ;;  %v5605_v61 = vld [vmem:[#allocation2 + $0x6f8] sm:$0xff] }
 0x931   : > { %5991 = vmatpush.msra.mxu1 %v14141_v40  ;;  %6304 = vmatmul.f32.vlgmr.msrb.gmra.mxu2 %v14372_v41 }
 0x932   : > { %6347 = vmatpush.msra.mxu0 %v5422_v14  ;;  %6385 = vmatpush.msra.mxu2 %v5543_v6 }
 0x933   : > { %5992 = vmatpush.msra.mxu1 %v14153_v3  ;;  %v5604_v3 = vld [vmem:[#allocation2 + $0x6f0] sm:$0xff] }
 0x934   : > { %6348 = vmatpush.msra.mxu0 %v5407_v45  ;;  %6386 = vmatpush.msra.mxu2 %v5528_v57 }
 0x935   : > { %4234 = vrot.lane.b32.xlu1 %v14038_v1, %s17422_s7  ;;  %v14378_v40 = vpop.permute.xlu1 %4984  ;;  %5993 = vmatpush.msra.mxu1 %v14242_v60  ;;  %v5589_v60 = vld [vmem:[#allocation2 + $0x678] sm:$0xff] }
 0x936   : > { %6349 = vmatpush.msra.mxu0 %v5392_v37  ;;  %6387 = vmatpush.msra.mxu2 %v5513_v55  ;;  %v14380_v19 = vpop.permute.xlu0 %5098  ;;  %v14390_v54 = vsel %vm763_vm10, %v14229_v28, %v14378_v40  ;;  %v5574_v28 = vld [vmem:[#allocation2 + $0x600] sm:$0xff]  ;;  %v5469_v55 = vld [vmem:[#allocation2 + $0x2b8] sm:$0xff] }
 0x937   : > { %5134 = vrot.lane.b32.xlu2 %v14298_v24, %s17314_s1  ;;  %4264 = vrot.lane.b32.xlu0 %v14129_v16, %s17422_s7  ;;  %v14392_v1 = vpop.permute.xlu2 %4954  ;;  %v14397_v44 = vsel %vm783_vm8, %v14143_v23, %v14380_v19  ;;  %v5559_v23 = vld [vmem:[#allocation2 + $0x588] sm:$0xff] }
 0x938   : > { %6426 = vmatpush.msrb.mxu0 %v5619_v2  ;;  %6388 = vmatpush.msra.mxu2 %v5498_v12  ;;  %v14402_v16 = vsel %vm763_vm10, %v14227_v32, %v14392_v1  ;;  %v5590_v2 = vld [vmem:[#allocation2 + $0x680] sm:$0xff]  ;;  %v5575_v12 = vld [vmem:[#allocation2 + $0x608] sm:$0xff] }
 0x939   : > { %5994 = vmatpush.msra.mxu1 %v14235_v17  ;;  %6350 = vmatmul.f32.vlgmr.msra.gmra.mxu0 %v14372_v41 }
 0x93a   : > { %6427 = vmatpush.msrb.mxu0 %v5604_v3  ;;  %6389 = vmatpush.msra.mxu2 %v5483_v9  ;;  %v5439_v3 = vld [vmem:[#allocation2 + $0x1c8] sm:$0xff]  ;;  %v5560_v9 = vld [vmem:[#allocation2 + $0x590] sm:$0xff] }
 0x93b   : > { %5995 = vmatpush.msra.mxu1 %v14310_v46  ;;  %6307 = vmatmul.f32.gmra.mxu2 %v13987_v56  ;;  %v5544_v56 = vld [vmem:[#allocation2 + $0x510] sm:$0xff]  ;;  %v5423_v46 = vld [vmem:[#allocation2 + $0x148] sm:$0xff] }
 0x93c   : > { %6428 = vmatpush.msrb.mxu0 %v5589_v60  ;;  %6390 = vmatpush.msra.mxu2 %v5468_v53  ;;  %v5545_v60 = vld [vmem:[#allocation2 + $0x518] sm:$0xff] }
 0x93d   : > { %4990 = vrot.lane.b32.xlu1 %v14298_v24, %s17313_s0  ;;  %5996 = vmatpush.msra.mxu1 %v14285_v18  ;;  %v14411_v32 = vpop.permute.xlu1 %4550 }
 0x93e   : > { %6429 = vmatpush.msrb.mxu0 %v5574_v28  ;;  %6391 = vmatpush.msra.mxu2 %v5453_v48  ;;  %v14413_v17 = vpop.permute.xlu0 %4664  ;;  %v4590_v62 = vsel %vm703_vm2, %v14294_v27, %v14411_v32  ;;  %v14434_v27 = vld [vmem:[%s17184_s5 + $0x10] sm:$0xff] }
 0x93f   : > { %4844 = vrot.lane.b32.xlu2 %v14205_v13, %s17306_s15  ;;  %5104 = vrot.lane.b32.xlu0 %v14288_v30, %s17314_s1  ;;  %v14422_v52 = vpop.permute.xlu2 %4520  ;;  %v4720_v18 = vsel %vm723_vm13, %v14237_v50, %v14413_v17  ;;  %v5514_v50 = vld [vmem:[#allocation2 + $0x420] sm:$0xff] }
 0x940   : > { %6430 = vmatpush.msrb.mxu0 %v5559_v23  ;;  %6392 = vmatpush.msra.mxu2 %v5438_v10  ;;  %v4576_v25 = vsel %vm703_vm2, %v14320_v51, %v14422_v52  ;;  %v5499_v51 = vld [vmem:[#allocation2 + $0x3a8] sm:$0xff]  ;;  %v5409_v10 = vld [vmem:[#allocation2 + $0xd8] sm:$0xff] }
 0x941   : > { %5997 = vmatpush.msra.mxu1 %v14315_v26  ;;  %6353 = vmatmul.f32.gmra.mxu0 %v14434_v27 }
 0x942   : > { %6431 = vmatpush.msrb.mxu0 %v5544_v56  ;;  %6393 = vmatpush.msra.mxu2 %v5423_v46  ;;  %v5530_v56 = vld [vmem:[#allocation2 + $0x4a0] sm:$0xff] }
 0x943   : > { %5998 = vmatpush.msra.mxu1 %v4720_v18  ;;  %v5515_v18 = vld [vmem:[#allocation2 + $0x428] sm:$0xff] }
 0x944   : > { %6432 = vmatpush.msrb.mxu0 %v5529_v36  ;;  %6394 = vmatpush.msra.mxu2 %v5408_v42  ;;  %v14494_v36 = vld [vmem:[#allocation2 + $0xb8] sm:$0xff] }
 0x945   : > { %4960 = vrot.lane.b32.xlu1 %v14288_v30, %s17313_s0  ;;  %5999 = vmatpush.msra.mxu1 %v4590_v62  ;;  %v5394_v62 = vld [vmem:[#allocation2 + $0x60] sm:$0xff] }
 0x946   : > { %6433 = vmatpush.msrb.mxu0 %v5514_v50  ;;  %6395 = vmatpush.msra.mxu2 %v5393_v4  ;;  %v14439_v26 = vpop.permute.xlu1 %4260  ;;  %v14510_v4 = vld [vmem:[%s17184_s5 + $0x8] sm:$0xff] }
 0x947   : > { %4410 = vrot.lane.b32.xlu2 %v14115_v33, %s17295_s23  ;;  %4814 = vrot.lane.b32.xlu0 %v14199_v58, %s17306_s15  ;;  %v4301_v14 = vsel %vm17433_vm3, %v14254_v43, %v14439_v26  ;;  %v14448_v6 = vpop.permute.xlu0 %4374  ;;  %v14450_v45 = vpop.permute.xlu2 %4230  ;;  %v5454_v43 = vld [vmem:[#allocation2 + $0x240] sm:$0xff] }
 0x948   : > { %6472 = vmatpush.msrb.mxu2 %v5620_v8  ;;  %6434 = vmatpush.msrb.mxu0 %v5499_v51  ;;  %v4431_v57 = vsel %vm17434_vm6, %v14192_v63, %v14448_v6  ;;  %v4287_v37 = vsel %vm17435_vm11, %v14322_v35, %v14450_v45  ;;  %v5424_v35 = vld [vmem:[#allocation2 + $0x150] sm:$0xff]  ;;  %v5561_v51 = vld [vmem:[#allocation2 + $0x598] sm:$0xff]  ;;  %vm17437_vm6 = vmmov %vm17433_vm3 }
 0x949   : > { %6000 = vmatpush.msra.mxu1 %v4576_v25  ;;  %5956 = vmatpush.msrb.mxu3 %v4431_v57  ;;  %v5500_v25 = vld [vmem:[#allocation2 + $0x3b0] sm:$0xff]  ;;  %v14534_v57 = vld [vmem:[#allocation2 + $0x40] sm:$0xff]  ;;  %vm17438_vm11 = vmmov %vm17428_vm0 }
 0x94a   : > { %6435 = vmatpush.msrb.mxu0 %v5484_v59  ;;  %6473 = vmatpush.msrb.mxu2 %v5605_v61  ;;  %v5455_v59 = vld [vmem:[#allocation2 + $0x248] sm:$0xff]  ;;  %v5546_v61 = vld [vmem:[#allocation2 + $0x520] sm:$0xff] }
 0x94b   : > { %5957 = vmatpush.msrb.mxu3 %v4301_v14  ;;  %6396 = vmatmul.f32.vlgmr.msra.gmra.mxu2 %v14372_v41 }
 0x94c   : > { %6436 = vmatpush.msrb.mxu0 %v5469_v55  ;;  %6474 = vmatpush.msrb.mxu2 %v5590_v2 }
 0x94d   : > { %4670 = vrot.lane.b32.xlu1 %v14199_v58, %s17297_s30  ;;  %5958 = vmatpush.msrb.mxu3 %v4287_v37 }
 0x94e   : > { %6437 = vmatpush.msrb.mxu0 %v5454_v43  ;;  %6475 = vmatpush.msrb.mxu2 %v5575_v12  ;;  %v14461_v63 = vpop.permute.xlu1 %5100  ;;  %v5410_v43 = vld [vmem:[#allocation2 + $0xe0] sm:$0xff]  ;;  %v5395_v12 = vld [vmem:[#allocation2 + $0x68] sm:$0xff] }
 0x94f   : > { %4380 = vrot.lane.b32.xlu2 %v14090_v31, %s17295_s23  ;;  %4700 = vrot.lane.b32.xlu0 %v14205_v13, %s17297_s30  ;;  %v14470_v53 = vsel %vm783_vm8, %v14380_v19, %v14461_v63  ;;  %v5621_v19 = vld [vmem:[#allocation2 + $0x778] sm:$0xff] }
 0x950   : > { %6438 = vmatpush.msrb.mxu0 %v5439_v3  ;;  %6476 = vmatpush.msrb.mxu2 %v5560_v9  ;;  %v14472_v28 = vpop.permute.xlu2 %4986  ;;  %v14474_v48 = vpop.permute.xlu0 %5130  ;;  %v5501_v3 = vld [vmem:[#allocation2 + $0x3b8] sm:$0xff] }
 0x951   : > { %v14479_v23 = vsel %vm763_vm10, %v14378_v40, %v14472_v28  ;;  %v14484_v46 = vsel %vm783_vm8, %v14345_v20, %v14474_v48  ;;  %6035 = vmatpush.msra.mxu3 %v14218_v15  ;;  %v5606_v40 = vld [vmem:[#allocation2 + $0x700] sm:$0xff]  ;;  %v5591_v20 = vld [vmem:[#allocation2 + $0x688] sm:$0xff]  ;;  %5913 = vmatmul.f32.vlgmr.msrb.gmra.mxu1 %v14510_v4 }
 0x952   : > { %6439 = vmatpush.msrb.mxu0 %v5424_v35  ;;  %6477 = vmatpush.msrb.mxu2 %v5545_v60  ;;  %v5471_v35 = vld [vmem:[#allocation2 + $0x2c8] sm:$0xff] }
 0x953   : > { %6036 = vmatpush.msra.mxu3 %v14276_v11  ;;  %6399 = vmatmul.f32.gmra.mxu2 %v14434_v27  ;;  %v5485_v11 = vld [vmem:[#allocation2 + $0x338] sm:$0xff] }
 0x954   : > { %6440 = vmatpush.msrb.mxu0 %v5409_v10  ;;  %6478 = vmatpush.msrb.mxu2 %v5530_v56 }
 0x955   : > { %4236 = vrot.lane.b32.xlu1 %v14090_v31, %s17422_s7  ;;  %6037 = vmatpush.msra.mxu3 %v14361_v0  ;;  %v5576_v0 = vld [vmem:[#allocation2 + $0x610] sm:$0xff] }
 0x956   : > { %6441 = vmatpush.msrb.mxu0 %v5394_v62  ;;  %6479 = vmatpush.msrb.mxu2 %v5515_v18  ;;  %v14491_v15 = vpop.permute.xlu1 %4810  ;;  %v5456_v62 = vld [vmem:[#allocation2 + $0x250] sm:$0xff]  ;;  %v5426_v18 = vld [vmem:[#allocation2 + $0x160] sm:$0xff] }
 0x957   : > { %5280 = vrot.lane.b32.xlu2 %v14494_v36, %s17317_s2  ;;  %v4865_v42 = vsel %vm17426_vm4, %v14278_v38, %v14491_v15  ;;  %4266 = vrot.lane.b32.xlu0 %v14115_v33, %s17422_s7  ;;  %v5470_v38 = vld [vmem:[#allocation2 + $0x2c0] sm:$0xff] }
 0x958   : > { %6518 = vmatpush.msra.mxu0 %v5621_v19  ;;  %6480 = vmatpush.msrb.mxu2 %v5500_v25  ;;  %v14505_v50 = vpop.permute.xlu0 %4840 }
 0x959   : > { %v14503_v31 = vpop.permute.xlu2 %4956  ;;  %v4879_v33 = vsel %vm17436_vm12, %v14296_v5, %v14505_v50  ;;  %6038 = vmatpush.msra.mxu3 %v14397_v44  ;;  %v5531_v5 = vld [vmem:[#allocation2 + $0x4a8] sm:$0xff]  ;;  %6442 = vmatmul.f32.vlgmr.msrb.gmra.mxu0 %v14372_v41  ;;  %vm17439_vm12 = vmmov %vm17426_vm4 }
 0x95a   : > { %6519 = vmatpush.msra.mxu0 %v5606_v40  ;;  %6481 = vmatpush.msrb.mxu2 %v5485_v11  ;;  %v14515_v8 = vsel %vm763_vm10, %v14392_v1, %v14503_v31  ;;  %v5440_v1 = vld [vmem:[#allocation2 + $0x1d0] sm:$0xff] }
 0x95b   : > { %6039 = vmatpush.msra.mxu3 %v14390_v54  ;;  %v5425_v54 = vld [vmem:[#allocation2 + $0x158] sm:$0xff] }
 0x95c   : > { %6520 = vmatpush.msra.mxu0 %v5591_v20  ;;  %6482 = vmatpush.msrb.mxu2 %v5470_v38 }
 0x95d   : > { %5959 = vmatmul.f32.vlgmr.msrb.gmra.mxu3 %v14510_v4  ;;  %5136 = vrot.lane.b32.xlu1 %v14494_v36, %s17314_s1 }
 0x95e   : > { %6521 = vmatpush.msra.mxu0 %v5576_v0  ;;  %6483 = vmatpush.msrb.mxu2 %v5455_v59  ;;  %v14526_v44 = vpop.permute.xlu1 %4696  ;;  %v5396_v0 = vld [vmem:[#allocation2 + $0x70] sm:$0xff] }
 0x95f   : > { %6040 = vmatpush.msra.mxu3 %v14402_v16  ;;  %4846 = vrot.lane.b32.xlu2 %v14298_v24, %s17306_s15  ;;  %v4735_v14 = vsel %vm723_vm13, %v14305_v39, %v14526_v44  ;;  %v5516_v16 = vld [vmem:[#allocation2 + $0x430] sm:$0xff] }
 0x960   : > { %6522 = vmatpush.msra.mxu0 %v5561_v51  ;;  %6484 = vmatpush.msrb.mxu2 %v5440_v1  ;;  %v14540_v55 = vpop.permute.xlu0 %4406 }
 0x961   : > { %5250 = vrot.lane.b32.xlu0 %v14534_v57, %s17317_s2  ;;  %v14538_v37 = vpop.permute.xlu2 %4666  ;;  %v4446_v39 = vsel %vm17428_vm0, %v14331_v34, %v14540_v55  ;;  %6041 = vmatpush.msra.mxu3 %v4879_v33 }
 0x962   : > { %6523 = vmatpush.msra.mxu0 %v5546_v61  ;;  %6485 = vmatpush.msrb.mxu2 %v5425_v54  ;;  %v4721_v2 = vsel %vm723_vm13, %v14413_v17, %v14538_v37  ;;  %v5486_v17 = vld [vmem:[#allocation2 + $0x340] sm:$0xff] }
 0x963   : > { %6001 = vmatpush.msra.mxu1 %v4446_v39  ;;  %6042 = vmatpush.msra.mxu3 %v4865_v42  ;;  %v14688_v39 = vld [vmem:[#allocation2 + $0xc8] sm:$0xff] }
 0x964   : > { %6524 = vmatpush.msra.mxu0 %v5531_v5  ;;  %6486 = vmatpush.msrb.mxu2 %v5410_v43 }
 0x965   : > { %5106 = vrot.lane.b32.xlu1 %v14534_v57, %s17314_s1  ;;  %6043 = vmatpush.msra.mxu3 %v4735_v14 }
 0x966   : > { %6525 = vmatpush.msra.mxu0 %v5516_v16  ;;  %6487 = vmatpush.msrb.mxu2 %v5395_v12  ;;  %v14551_v9 = vpop.permute.xlu1 %4262 }
 0x967   : > { %6488 = vmatmul.f32.vlgmr.msrb.gmra.mxu2 %v14372_v41  ;;  %4556 = vrot.lane.b32.xlu2 %v14205_v13, %s17296_s24  ;;  %v4302_v34 = vsel %vm17433_vm3, %v14439_v26, %v14551_v9  ;;  %v5441_v26 = vld [vmem:[#allocation2 + $0x1d8] sm:$0xff]  ;;  %vm17440_vm3 = vmmov %vm17428_vm0 }
 0x968   : > { %6526 = vmatpush.msra.mxu0 %v5501_v3  ;;  %6044 = vmatpush.msra.mxu3 %v4721_v2 }
 0x969   : > { %4816 = vrot.lane.b32.xlu0 %v14288_v30, %s17306_s15  ;;  %v14561_v60 = vpop.permute.xlu2 %4232  ;;  %v14563_v10 = vpop.permute.xlu0 %4376  ;;  %6445 = vmatmul.f32.gmra.mxu0 %v14434_v27 }
 0x96a   : > { %6527 = vmatpush.msra.mxu0 %v5486_v17  ;;  %v4288_v56 = vsel %vm17437_vm6, %v14450_v45, %v14561_v60  ;;  %v4432_v19 = vsel %vm17438_vm11, %v14448_v6, %v14563_v10  ;;  %v5411_v45 = vld [vmem:[#allocation2 + $0xe8] sm:$0xff]  ;;  %vm17441_vm6 = vmmov %vm17426_vm4 }
 0x96b   : > { %6002 = vmatpush.msra.mxu1 %v4432_v19  ;;  %vm17442_vm11 = vmmov %vm17428_vm0 }
 0x96c   : > { %6528 = vmatpush.msra.mxu0 %v5471_v35 }
 0x96d   : > { %6003 = vmatpush.msra.mxu1 %v4302_v34  ;;  %4672 = vrot.lane.b32.xlu1 %v14288_v30, %s17297_s30 }
 0x96e   : > { %6529 = vmatpush.msra.mxu0 %v5456_v62 }
 0x96f   : > { %v14574_v40 = vpop.permute.xlu1 %5246  ;;  %6004 = vmatpush.msra.mxu1 %v4288_v56  ;;  %6491 = vmatmul.f32.gmra.mxu2 %v14434_v27 }
 0x970   : > { %6530 = vmatpush.msra.mxu0 %v5441_v26  ;;  %4526 = vrot.lane.b32.xlu2 %v14199_v58, %s17296_s24  ;;  %v14582_v6 = vsel %vm803_vm5, %v14356_v22, %v14574_v40  ;;  %v14603_v22 = vld [vmem:[#allocation2 + $0xc0] sm:$0xff] }
 0x971   : > { %4702 = vrot.lane.b32.xlu0 %v14298_v24, %s17297_s30  ;;  %v5133_v25 = vpop.permute.xlu2 %5132  ;;  %v5277_v20 = vpop.permute.xlu0 %5276  ;;  %6081 = vmatpush.msrb.mxu1 %v14354_v21 }
 0x972   : > { %6531 = vmatpush.msra.mxu0 %v5426_v18  ;;  %v14589_v11 = vsel %vm783_vm8, %v14474_v48, %v5133_v25  ;;  %v14593_v42 = vsel %vm803_vm5, %v14343_v47, %v5277_v20  ;;  %v14725_v18 = vld [vmem:[%s17184_s5 + $0x18] sm:$0xff] }
 0x973   : > { %6082 = vmatpush.msrb.mxu1 %v14366_v49  ;;  %5962 = vmatmul.f32.gmra.mxu3 %v14725_v18 }
 0x974   : > { %6532 = vmatpush.msra.mxu0 %v5411_v45  ;;  %5916 = vmatmul.f32.gmra.mxu1 %v14725_v18 }
 0x975   : > { %6083 = vmatpush.msrb.mxu1 %v14484_v46  ;;  %4382 = vrot.lane.b32.xlu1 %v14199_v58, %s17295_s23 }
 0x976   : > { %6533 = vmatpush.msra.mxu0 %v5396_v0 }
 0x977   : > { %6534 = vmatmul.f32.vlgmr.msra.gmra.mxu0 %v14372_v41  ;;  %v14600_v21 = vpop.permute.xlu1 %4812  ;;  %6084 = vmatpush.msrb.mxu1 %v14470_v53 }
 0x978   : > { %5282 = vrot.lane.b32.xlu2 %v14603_v22, %s17317_s2  ;;  %v4866_v47 = vsel %vm17426_vm4, %v14491_v15, %v14600_v21  ;;  %vm17443_vm4 = vcmask 556032  }
 0x979   : > { %4412 = vrot.lane.b32.xlu0 %v14205_v13, %s17295_s23  ;;  %v14612_v49 = vpop.permute.xlu2 %5102  ;;  %v4843_v41 = vpop.permute.xlu0 %4842  ;;  %6085 = vmatpush.msrb.mxu1 %v14479_v23  ;;  %v14633_v23 = vld [vmem:[#allocation2 + $0x48] sm:$0xff] }
 0x97a   : > { %v14618_v58 = vsel %vm783_vm8, %v14461_v63, %v14612_v49  ;;  %v4880_v53 = vsel %vm17439_vm12, %v14505_v50, %v4843_v41  ;;  %vm17444_vm12 = vmmov %vm17428_vm0 }
 0x97b   : > { %6086 = vmatpush.msrb.mxu1 %v14515_v8 }
 0x97c   : > { %6005 = vmatmul.f32.vlgmr.msra.gmra.mxu1 %v14510_v4 }
 0x97d   : > { %6087 = vmatpush.msrb.mxu1 %v4880_v53  ;;  %5138 = vrot.lane.b32.xlu1 %v14603_v22, %s17314_s1 }
 0x97f   : > { %6537 = vmatmul.f32.gmra.mxu0 %v14434_v27  ;;  %v14626_v48 = vpop.permute.xlu1 %4698  ;;  %6088 = vmatpush.msrb.mxu1 %v4866_v47 }
 0x980   : > { %4992 = vrot.lane.b32.xlu2 %v14494_v36, %s17313_s0  ;;  %v4736_v63 = vsel %vm723_vm13, %v14526_v44, %v14626_v48 }
 0x981   : > { %5252 = vrot.lane.b32.xlu0 %v14633_v23, %s17317_s2  ;;  %v4553_v46 = vpop.permute.xlu0 %4552  ;;  %6089 = vmatpush.msrb.mxu1 %v4736_v63  ;;  %v14637_v27 = vpop.permute.xlu2 %4668 }
 0x982   : > { %v4591_v15 = vsel %vm703_vm2, %v14411_v32, %v4553_v46  ;;  %v4722_v50 = vsel %vm723_vm13, %v14538_v37, %v14637_v27  ;;  %v11031_v37 = vld [vmem:[#allocation2 + $0x30] sm:$0xff] }
 0x983   : > { %6045 = vmatpush.msra.mxu3 %v4591_v15  ;;  %6090 = vmatpush.msrb.mxu1 %v4722_v50 }
 0x984   : > { %6008 = vmatmul.f32.gmra.mxu1 %v14725_v18 }
 0x985   : > { %4848 = vrot.lane.b32.xlu1 %v14494_v36, %s17306_s15 }
 0x987   : > { %v4409_v8 = vpop.permute.xlu1 %4408 }
 0x988   : > { %4558 = vrot.lane.b32.xlu2 %v14298_v24, %s17296_s24  ;;  %v4447_v38 = vsel %vm17428_vm0, %v14540_v55, %v4409_v8  ;;  %vm17445_vm0 = vmmov %vm17443_vm4 }
 0x989   : > { %4962 = vrot.lane.b32.xlu0 %v14534_v57, %s17313_s0  ;;  %v4379_v32 = vpop.permute.xlu2 %4378  ;;  %v4523_v33 = vpop.permute.xlu0 %4522 }
 0x98a   : > { %v4433_v51 = vsel %vm17440_vm3, %v14563_v10, %v4379_v32  ;;  %v4577_v59 = vsel %vm703_vm2, %v14422_v52, %v4523_v33  ;;  %vm17446_vm3 = vmmov %vm17441_vm6 }
 0x98b   : > { %6046 = vmatpush.msra.mxu3 %v4577_v59 }
 0x98d   : > { %4414 = vrot.lane.b32.xlu1 %v14298_v24, %s17295_s23  ;;  %6047 = vmatpush.msra.mxu3 %v4447_v38 }
 0x98f   : > { %v14658_v61 = vpop.permute.xlu1 %5248  ;;  %6048 = vmatpush.msra.mxu3 %v4433_v51 }
 0x990   : > { %4268 = vrot.lane.b32.xlu2 %v14205_v13, %s17422_s7  ;;  %v14665_v1 = vsel %vm803_vm5, %v14574_v40, %v14658_v61 }
 0x991   : > { %4528 = vrot.lane.b32.xlu0 %v14288_v30, %s17296_s24  ;;  %v14669_v52 = vpop.permute.xlu2 %5134  ;;  %v5279_v5 = vpop.permute.xlu0 %5278 }
 0x992   : > { %v14673_v44 = vsel %vm783_vm8, %v5133_v25, %v14669_v52  ;;  %v14676_v54 = vsel %vm803_vm5, %v5277_v20, %v5279_v5 }
 0x995   : > { %4384 = vrot.lane.b32.xlu1 %v14288_v30, %s17295_s23 }
 0x997   : > { %v4959_v13 = vpop.permute.xlu1 %4958 }
 0x998   : > { %5108 = vrot.lane.b32.xlu2 %v14633_v23, %s17314_s1  ;;  %v5011_v14 = vsel %vm763_vm10, %v14503_v31, %v4959_v13 }
 0x999   : > { %4238 = vrot.lane.b32.xlu0 %v11031_v37, %s17422_s7  ;;  %v4845_v55 = vpop.permute.xlu2 %4844  ;;  %v4989_v16 = vpop.permute.xlu0 %4988 }
 0x99a   : > { %v4881_v2 = vsel %vm17441_vm6, %v4843_v41, %v4845_v55  ;;  %v5025_v43 = vsel %vm763_vm10, %v14472_v28, %v4989_v16  ;;  %vm17447_vm6 = vmmov %vm17446_vm3  ;;  %v14773_v41 = vld [vmem:[#allocation2 + $0xd0] sm:$0xff] }
 0x99d   : > { %5284 = vrot.lane.b32.xlu1 %v14688_v39, %s17317_s2 }
 0x99f   : > { %v14694_v12 = vpop.permute.xlu1 %4524 }
 0x9a0   : > { %4818 = vrot.lane.b32.xlu2 %v14534_v57, %s17306_s15  ;;  %v4578_v31 = vsel %vm703_vm2, %v4523_v33, %v14694_v12 }
 0x9a1   : > { %4994 = vrot.lane.b32.xlu0 %v14603_v22, %s17313_s0  ;;  %v14700_v3 = vpop.permute.xlu2 %4410  ;;  %v4555_v17 = vpop.permute.xlu0 %4554 }
 0x9a2   : > { %v4448_v28 = vsel %vm17442_vm11, %v4409_v8, %v14700_v3  ;;  %v4592_v34 = vsel %vm703_vm2, %v4553_v46, %v4555_v17  ;;  %vm17448_vm11 = vmmov %vm17445_vm0 }
 0x9a3   : > { %6091 = vmatpush.msrb.mxu1 %v4592_v34 }
 0x9a5   : > { %4850 = vrot.lane.b32.xlu1 %v14603_v22, %s17306_s15  ;;  %6092 = vmatpush.msrb.mxu1 %v4578_v31 }
 0x9a7   : > { %v14709_v35 = vpop.permute.xlu1 %4234  ;;  %6093 = vmatpush.msrb.mxu1 %v4448_v28 }
 0x9a8   : > { %4704 = vrot.lane.b32.xlu2 %v14494_v36, %s17297_s30  ;;  %v4289_v10 = vsel %vm17443_vm4, %v14561_v60, %v14709_v35  ;;  %vm17449_vm4 = vmmov %vm17445_vm0 }
 0x9a9   : > { %4964 = vrot.lane.b32.xlu0 %v14633_v23, %s17313_s0  ;;  %v14716_v56 = vpop.permute.xlu2 %4380  ;;  %v4265_v19 = vpop.permute.xlu0 %4264 }
 0x9aa   : > { %v4434_v62 = vsel %vm17444_vm12, %v4379_v32, %v14716_v56  ;;  %v4303_v26 = vsel %vm17445_vm0, %v14551_v9, %v4265_v19  ;;  %vm17450_vm12 = vmmov %vm17446_vm3  ;;  %vm17451_vm0 = vcmask 547840  }
 0x9ab   : > { %6049 = vmatpush.msra.mxu3 %v4303_v26  ;;  %6094 = vmatpush.msrb.mxu1 %v4434_v62 }
 0x9ad   : > { %4560 = vrot.lane.b32.xlu1 %v14494_v36, %s17296_s24  ;;  %6050 = vmatpush.msra.mxu3 %v4289_v10 }
 0x9ae   : > { %6051 = vmatmul.f32.vlgmr.msra.gmra.mxu3 %v14510_v4 }
 0x9af   : > { %6127 = vmatpush.msrb.mxu3 %v14593_v42  ;;  %v14733_v60 = vpop.permute.xlu1 %4990 }
 0x9b0   : > { %4270 = vrot.lane.b32.xlu2 %v14298_v24, %s17422_s7  ;;  %v14740_v9 = vsel %vm763_vm10, %v4989_v16, %v14733_v60 }
 0x9b1   : > { %4674 = vrot.lane.b32.xlu0 %v14534_v57, %s17297_s30  ;;  %6128 = vmatpush.msrb.mxu3 %v14582_v6  ;;  %v5281_v40 = vpop.permute.xlu2 %5280  ;;  %v14743_v45 = vpop.permute.xlu0 %5104  ;;  %v14756_v6 = vld [vmem:[#allocation2 + $0x50] sm:$0xff] }
 0x9b2   : > { %v14746_v25 = vsel %vm803_vm5, %v5279_v5, %v5281_v40  ;;  %v5156_v24 = vsel %vm783_vm8, %v14612_v49, %v14743_v45 }
 0x9b3   : > { %6129 = vmatpush.msrb.mxu3 %v14589_v11 }
 0x9b5   : > { %6130 = vmatpush.msrb.mxu3 %v14618_v58  ;;  %4530 = vrot.lane.b32.xlu1 %v14534_v57, %s17296_s24 }
 0x9b6   : > { %6054 = vmatmul.f32.gmra.mxu3 %v14725_v18 }
 0x9b7   : > { %6131 = vmatpush.msrb.mxu3 %v5025_v43  ;;  %v14760_v20 = vpop.permute.xlu1 %4960 }
 0x9b8   : > { %5254 = vrot.lane.b32.xlu2 %v14756_v6, %s17317_s2  ;;  %v5012_v11 = vsel %vm763_vm10, %v4959_v13, %v14760_v20 }
 0x9b9   : > { %4240 = vrot.lane.b32.xlu0 %v14288_v30, %s17422_s7  ;;  %6132 = vmatpush.msrb.mxu3 %v5011_v14  ;;  %v14767_v42 = vpop.permute.xlu2 %4846  ;;  %v4815_v0 = vpop.permute.xlu0 %4814 }
 0x9ba   : > { %v4882_v47 = vsel %vm17446_vm3, %v4845_v55, %v14767_v42  ;;  %v4867_v49 = vsel %vm17447_vm6, %v14600_v21, %v4815_v0  ;;  %vm17452_vm3 = vmmov %vm17449_vm4 }
 0x9bb   : > { %6133 = vmatpush.msrb.mxu3 %v4881_v2  ;;  %vm17453_vm6 = vmmov %vm17451_vm0 }
 0x9bd   : > { %6134 = vmatpush.msrb.mxu3 %v4867_v49  ;;  %5286 = vrot.lane.b32.xlu1 %v14773_v41, %s17317_s2 }
 0x9bf   : > { %v4671_v30 = vpop.permute.xlu1 %4670 }
 0x9c0   : > { %4820 = vrot.lane.b32.xlu2 %v14633_v23, %s17306_s15  ;;  %v4723_v21 = vsel %vm723_vm13, %v14637_v27, %v4671_v30 }
 0x9c1   : > { %5140 = vrot.lane.b32.xlu0 %v14688_v39, %s17314_s1  ;;  %v4557_v58 = vpop.permute.xlu2 %4556  ;;  %v4701_v53 = vpop.permute.xlu0 %4700 }
 0x9c2   : > { %v4593_v63 = vsel %vm703_vm2, %v4555_v17, %v4557_v58  ;;  %v4737_v46 = vsel %vm723_vm13, %v14626_v48, %v4701_v53 }
 0x9c3   : > { %6135 = vmatpush.msrb.mxu3 %v4737_v46 }
 0x9c5   : > { %4996 = vrot.lane.b32.xlu1 %v14688_v39, %s17313_s0  ;;  %6136 = vmatpush.msrb.mxu3 %v4723_v21 }
 0x9c7   : > { %v14792_v15 = vpop.permute.xlu1 %4236  ;;  %6137 = vmatpush.msrb.mxu3 %v4593_v63 }
 0x9c8   : > { %4706 = vrot.lane.b32.xlu2 %v14603_v22, %s17297_s30  ;;  %v4290_v27 = vsel %vm17448_vm11, %v14709_v35, %v14792_v15  ;;  %vm17454_vm11 = vmmov %vm17450_vm12 }
 0x9c9   : > { %5110 = vrot.lane.b32.xlu0 %v14756_v6, %s17314_s1  ;;  %v4267_v8 = vpop.permute.xlu0 %4266 }
 0x9ca   : > { %v14799_v50 = vpop.permute.xlu2 %4526  ;;  %v4304_v38 = vsel %vm17449_vm4, %v4265_v19, %v4267_v8  ;;  %vm17455_vm4 = vmmov %vm17454_vm11 }
 0x9cb   : > { %v4579_v48 = vsel %vm703_vm2, %v14694_v12, %v14799_v50  ;;  %6095 = vmatpush.msrb.mxu1 %v4304_v38 }
 0x9cc   : > { %6138 = vmatpush.msrb.mxu3 %v4579_v48 }
 0x9cd   : > { %4562 = vrot.lane.b32.xlu1 %v14603_v22, %s17296_s24  ;;  %6096 = vmatpush.msrb.mxu1 %v4290_v27 }
 0x9ce   : > { %6097 = vmatmul.f32.vlgmr.msrb.gmra.mxu1 %v14510_v4 }
 0x9cf   : > { %v5137_v32 = vpop.permute.xlu1 %5136  ;;  %6173 = vmatpush.msra.mxu1 %v14676_v54 }
 0x9d0   : > { %4416 = vrot.lane.b32.xlu2 %v14494_v36, %s17295_s23  ;;  %v14814_v33 = vsel %vm783_vm8, %v14669_v52, %v5137_v32  ;;  %v14831_v52 = vld [vmem:[#allocation2 + $0x58] sm:$0xff] }
 0x9d1   : > { %4676 = vrot.lane.b32.xlu0 %v14633_v23, %s17297_s30  ;;  %6174 = vmatpush.msra.mxu1 %v14665_v1 }
 0x9d2   : > { %v14817_v51 = vpop.permute.xlu2 %5282 }
 0x9d3   : > { %v14822_v59 = vsel %vm803_vm5, %v5281_v40, %v14817_v51  ;;  %v5251_v5 = vpop.permute.xlu0 %5250  ;;  %6175 = vmatpush.msra.mxu1 %v14673_v44 }
 0x9d4   : > { %v14826_v54 = vsel %vm803_vm5, %v14658_v61, %v5251_v5 }
 0x9d5   : > { %4272 = vrot.lane.b32.xlu1 %v14494_v36, %s17422_s7  ;;  %6176 = vmatpush.msra.mxu1 %v5156_v24 }
 0x9d6   : > { %6100 = vmatmul.f32.gmra.mxu1 %v14725_v18 }
 0x9d7   : > { %v5107_v1 = vpop.permute.xlu1 %5106  ;;  %6177 = vmatpush.msra.mxu1 %v14740_v9 }
 0x9d8   : > { %5256 = vrot.lane.b32.xlu2 %v14831_v52, %s17317_s2  ;;  %v14840_v61 = vsel %vm783_vm8, %v14743_v45, %v5107_v1 }
 0x9d9   : > { %4386 = vrot.lane.b32.xlu0 %v14534_v57, %s17295_s23  ;;  %6178 = vmatpush.msra.mxu1 %v5012_v11 }
 0x9da   : > { %v14843_v44 = vpop.permute.xlu2 %4992 }
 0x9db   : > { %v14848_v36 = vsel %vm763_vm10, %v14733_v60, %v14843_v44  ;;  %v4817_v13 = vpop.permute.xlu0 %4816  ;;  %6179 = vmatpush.msra.mxu1 %v4882_v47  ;;  %v14917_v47 = vld [vmem:[#allocation2 + $0xd8] sm:$0xff] }
 0x9dc   : > { %v4868_v14 = vsel %vm17450_vm12, %v4815_v0, %v4817_v13  ;;  %v14909_v0 = vld [vmem:[#allocation2 + $0x60] sm:$0xff]  ;;  %vm17456_vm12 = vmmov %vm17451_vm0 }
 0x9dd   : > { %5112 = vrot.lane.b32.xlu1 %v14831_v52, %s17314_s1  ;;  %6180 = vmatpush.msra.mxu1 %v4868_v14 }
 0x9df   : > { %v14855_v37 = vpop.permute.xlu1 %4672 }
 0x9e0   : > { %4966 = vrot.lane.b32.xlu2 %v14756_v6, %s17313_s0  ;;  %v4724_v55 = vsel %vm723_vm13, %v4671_v30, %v14855_v37 }
 0x9e1   : > { %5142 = vrot.lane.b32.xlu0 %v14773_v41, %s17314_s1 }
 0x9e2   : > { %v14861_v16 = vpop.permute.xlu2 %4558 }
 0x9e3   : > { %v4594_v2 = vsel %vm703_vm2, %v4557_v58, %v14861_v16  ;;  %v4703_v43 = vpop.permute.xlu0 %4702 }
 0x9e4   : > { %v4738_v12 = vsel %vm723_vm13, %v4701_v53, %v4703_v43 }
 0x9e5   : > { %6181 = vmatpush.msra.mxu1 %v4738_v12  ;;  %4822 = vrot.lane.b32.xlu1 %v14756_v6, %s17306_s15 }
 0x9e7   : > { %6182 = vmatpush.msra.mxu1 %v4724_v55  ;;  %v4383_v31 = vpop.permute.xlu1 %4382 }
 0x9e8   : > { %4532 = vrot.lane.b32.xlu2 %v14633_v23, %s17296_s24  ;;  %v4435_v17 = vsel %vm17451_vm0, %v14716_v56, %v4383_v31 }
 0x9e9   : > { %4852 = vrot.lane.b32.xlu0 %v14688_v39, %s17306_s15  ;;  %6183 = vmatpush.msra.mxu1 %v4594_v2 }
 0x9ea   : > { %v4269_v28 = vpop.permute.xlu2 %4268 }
 0x9eb   : > { %v4305_v34 = vsel %vm17452_vm3, %v4267_v8, %v4269_v28  ;;  %v4413_v35 = vpop.permute.xlu0 %4412 }
 0x9ec   : > { %v4449_v10 = vsel %vm17453_vm6, %v14700_v3, %v4413_v35  ;;  %vm17457_vm6 = vmmov %vm17452_vm3 }
 0x9ed   : > { %6139 = vmatpush.msrb.mxu3 %v4449_v10  ;;  %4708 = vrot.lane.b32.xlu1 %v14688_v39, %s17297_s30 }
 0x9ef   : > { %6140 = vmatpush.msrb.mxu3 %v4435_v17  ;;  %v14881_v19 = vpop.permute.xlu1 %5138 }
 0x9f0   : > { %4242 = vrot.lane.b32.xlu2 %v14534_v57, %s17422_s7  ;;  %v14887_v56 = vsel %vm783_vm8, %v5137_v32, %v14881_v19 }
 0x9f1   : > { %4418 = vrot.lane.b32.xlu0 %v14603_v22, %s17295_s23  ;;  %6141 = vmatpush.msrb.mxu3 %v4305_v34 }
 0x9f2   : > { %v14889_v62 = vpop.permute.xlu2 %5108 }
 0x9f3   : > { %v14893_v3 = vsel %vm783_vm8, %v5107_v1, %v14889_v62  ;;  %v5253_v26 = vpop.permute.xlu0 %5252 }
 0x9f4   : > { %v14896_v60 = vsel %vm803_vm5, %v5251_v5, %v5253_v26 }
 0x9f5   : > { %4274 = vrot.lane.b32.xlu1 %v14603_v22, %s17422_s7 }
 0x9f7   : > { %v4849_v57 = vpop.permute.xlu1 %4848 }
 0x9f8   : > { %4998 = vrot.lane.b32.xlu2 %v14773_v41, %s17313_s0  ;;  %v4883_v9 = vsel %vm17454_vm11, %v14767_v42, %v4849_v57  ;;  %vm17458_vm11 = vmmov %vm17455_vm4 }
 0x9f9   : > { %4388 = vrot.lane.b32.xlu0 %v14633_v23, %s17295_s23 }
 0x9fa   : > { %v4819_v40 = vpop.permute.xlu2 %4818 }
 0x9fb   : > { %v4869_v45 = vsel %vm17455_vm4, %v4817_v13, %v4819_v40  ;;  %v4963_v24 = vpop.permute.xlu0 %4962 }
 0x9fc   : > { %v5013_v11 = vsel %vm763_vm10, %v14760_v20, %v4963_v24 }
 0x9fd   : > { %5258 = vrot.lane.b32.xlu1 %v14909_v0, %s17317_s2 }
 0x9ff   : > { %v14915_v22 = vpop.permute.xlu1 %4414 }
 0xa00   : > { %4968 = vrot.lane.b32.xlu2 %v14831_v52, %s17313_s0  ;;  %v4450_v42 = vsel %vm17456_vm12, %v4413_v35, %v14915_v22  ;;  %vm17459_vm12 = vmmov %vm17451_vm0 }
 0xa01   : > { %5288 = vrot.lane.b32.xlu0 %v14917_v47, %s17317_s2 }
 0xa02   : > { %v4705_v49 = vpop.permute.xlu2 %4704 }
 0xa03   : > { %v4739_v20 = vsel %vm723_vm13, %v4703_v43, %v4705_v49  ;;  %v14924_v30 = vpop.permute.xlu0 %4528 }
 0xa04   : > { %v4580_v21 = vsel %vm703_vm2, %v14799_v50, %v14924_v30 }
 0xa05   : > { %6184 = vmatpush.msra.mxu1 %v4580_v21  ;;  %4824 = vrot.lane.b32.xlu1 %v14831_v52, %s17306_s15 }
 0xa07   : > { %6185 = vmatpush.msra.mxu1 %v4450_v42  ;;  %v14933_v58 = vpop.permute.xlu1 %4384 }
 0xa08   : > { %4678 = vrot.lane.b32.xlu2 %v14756_v6, %s17297_s30  ;;  %v4436_v53 = vsel %vm17451_vm0, %v4383_v31, %v14933_v58  ;;  %vm17460_vm0 = vmmov %vm17452_vm3 }
 0xa09   : > { %4854 = vrot.lane.b32.xlu0 %v14773_v41, %s17306_s15  ;;  %6186 = vmatpush.msra.mxu1 %v4436_v53 }
 0xa0a   : > { %v14939_v63 = vpop.permute.xlu2 %4270 }
 0xa0b   : > { %v4306_v46 = vsel %vm17452_vm3, %v4269_v28, %v14939_v63  ;;  %v4239_v27 = vpop.permute.xlu0 %4238  ;;  %vm17461_vm3 = vmmov %vm17460_vm0 }
 0xa0c   : > { %v4291_v50 = vsel %vm17457_vm6, %v14792_v15, %v4239_v27  ;;  %6187 = vmatpush.msra.mxu1 %v4306_v46  ;;  %vm17462_vm6 = vmmov %vm17460_vm0 }
 0xa0d   : > { %6142 = vmatpush.msrb.mxu3 %v4291_v50  ;;  %4710 = vrot.lane.b32.xlu1 %v14773_v41, %s17297_s30 }
 0xa0e   : > { %6143 = vmatmul.f32.vlgmr.msrb.gmra.mxu3 %v14510_v4 }
 0xa0f   : > { %6219 = vmatpush.msra.mxu3 %v14746_v25  ;;  %v5285_v48 = vpop.permute.xlu1 %5284 }
 0xa10   : > { %4244 = vrot.lane.b32.xlu2 %v14633_v23, %s17422_s7  ;;  %v14956_v15 = vsel %vm803_vm5, %v14817_v51, %v5285_v48 }
 0xa11   : > { %6220 = vmatpush.msra.mxu3 %v14826_v54  ;;  %4564 = vrot.lane.b32.xlu0 %v14688_v39, %s17296_s24 }
 0xa12   : > { %v5255_v8 = vpop.permute.xlu2 %5254 }
 0xa13   : > { %6221 = vmatpush.msra.mxu3 %v14814_v33  ;;  %v14960_v25 = vsel %vm803_vm5, %v5253_v26, %v5255_v8  ;;  %v14962_v38 = vpop.permute.xlu0 %4994 }
 0xa14   : > { %v5028_v23 = vsel %vm763_vm10, %v14843_v44, %v14962_v38 }
 0xa15   : > { %6222 = vmatpush.msra.mxu3 %v14840_v61  ;;  %4420 = vrot.lane.b32.xlu1 %v14688_v39, %s17295_s23  ;;  %v14985_v61 = vld [vmem:[#allocation2 + $0x68] sm:$0xff] }
 0xa16   : > { %6146 = vmatmul.f32.gmra.mxu3 %v14725_v18 }
 0xa17   : > { %6223 = vmatpush.msra.mxu3 %v14848_v36  ;;  %v14974_v32 = vpop.permute.xlu1 %4850  ;;  %v14991_v36 = vld [vmem:[#allocation2 + $0xe0] sm:$0xff] }
 0xa18   : > { %5144 = vrot.lane.b32.xlu2 %v14917_v47, %s17314_s1  ;;  %v4884_v33 = vsel %vm17458_vm11, %v4849_v57, %v14974_v32  ;;  %vm17463_vm11 = vmmov %vm17459_vm12 }
 0xa19   : > { %6224 = vmatpush.msra.mxu3 %v5013_v11  ;;  %4534 = vrot.lane.b32.xlu0 %v14756_v6, %s17296_s24 }
 0xa1a   : > { %v14980_v51 = vpop.permute.xlu2 %4820 }
 0xa1b   : > { %6225 = vmatpush.msra.mxu3 %v4883_v9  ;;  %v4870_v5 = vsel %vm17455_vm4, %v4819_v40, %v14980_v51  ;;  %v4965_v54 = vpop.permute.xlu0 %4964 }
 0xa1c   : > { %v5014_v1 = vsel %vm763_vm10, %v4963_v24, %v4965_v54 }
 0xa1d   : > { %6226 = vmatpush.msra.mxu3 %v4869_v45  ;;  %5260 = vrot.lane.b32.xlu1 %v14985_v61, %s17317_s2 }
 0xa1f   : > { %6227 = vmatpush.msra.mxu3 %v4739_v20  ;;  %v4561_v44 = vpop.permute.xlu1 %4560 }
 0xa20   : > { %5114 = vrot.lane.b32.xlu2 %v14909_v0, %s17314_s1  ;;  %v4595_v13 = vsel %vm703_vm2, %v14861_v16, %v4561_v44 }
 0xa21   : > { %5290 = vrot.lane.b32.xlu0 %v14991_v36, %s17317_s2 }
 0xa22   : > { %v14997_v14 = vpop.permute.xlu2 %4706 }
 0xa23   : > { %v4740_v55 = vsel %vm723_vm13, %v4705_v49, %v14997_v14  ;;  %v4675_v2 = vpop.permute.xlu0 %4674 }
 0xa24   : > { %v4725_v43 = vsel %vm723_vm13, %v14855_v37, %v4675_v2 }
 0xa25   : > { %6228 = vmatpush.msra.mxu3 %v4725_v43  ;;  %4970 = vrot.lane.b32.xlu1 %v14909_v0, %s17313_s0 }
 0xa27   : > { %6229 = vmatpush.msra.mxu3 %v4595_v13  ;;  %v4531_v12 = vpop.permute.xlu1 %4530 }
 0xa28   : > { %4680 = vrot.lane.b32.xlu2 %v14831_v52, %s17297_s30  ;;  %v4581_v16 = vsel %vm703_vm2, %v14924_v30, %v4531_v12 }
 0xa29   : > { %5000 = vrot.lane.b32.xlu0 %v14917_v47, %s17313_s0  ;;  %6230 = vmatpush.msra.mxu3 %v4581_v16 }
 0xa2a   : > { %v15011_v31 = vpop.permute.xlu2 %4416 }
 0xa2b   : > { %v4451_v37 = vsel %vm17459_vm12, %v14915_v22, %v15011_v31  ;;  %v4241_v17 = vpop.permute.xlu0 %4240  ;;  %vm17464_vm12 = vmmov %vm17455_vm4 }
 0xa2c   : > { %v4292_v28 = vsel %vm17460_vm0, %v4239_v27, %v4241_v17  ;;  %6231 = vmatpush.msra.mxu3 %v4451_v37  ;;  %v15102_v27 = vld [vmem:[%s17184_s5 + $0x8] sm:$0xff]  ;;  %vm17465_vm0 = vmmov %vm17463_vm11 }
 0xa2d   : > { %6188 = vmatpush.msra.mxu1 %v4292_v28  ;;  %4536 = vrot.lane.b32.xlu1 %v14831_v52, %s17296_s24 }
 0xa2e   : > { %6189 = vmatmul.f32.vlgmr.msra.gmra.mxu1 %v14510_v4 }
 0xa2f   : > { %6265 = vmatpush.msrb.mxu1 %v14822_v59  ;;  %v15023_v34 = vpop.permute.xlu1 %5286 }
 0xa30   : > { %4390 = vrot.lane.b32.xlu2 %v14756_v6, %s17295_s23  ;;  %v15030_v35 = vsel %vm803_vm5, %v5285_v48, %v15023_v34 }
 0xa31   : > { %6266 = vmatpush.msrb.mxu1 %v14896_v60  ;;  %4566 = vrot.lane.b32.xlu0 %v14773_v41, %s17296_s24 }
 0xa32   : > { %v15032_v10 = vpop.permute.xlu2 %5256 }
 0xa33   : > { %6267 = vmatpush.msrb.mxu1 %v14887_v56  ;;  %v15037_v4 = vsel %vm803_vm5, %v5255_v8, %v15032_v10  ;;  %v5141_v59 = vpop.permute.xlu0 %5140 }
 0xa34   : > { %v5173_v26 = vsel %vm783_vm8, %v14881_v19, %v5141_v59 }
 0xa35   : > { %6268 = vmatpush.msrb.mxu1 %v14893_v3  ;;  %4246 = vrot.lane.b32.xlu1 %v14756_v6, %s17422_s7 }
 0xa36   : > { %6192 = vmatmul.f32.gmra.mxu1 %v14725_v18 }
 0xa37   : > { %6269 = vmatpush.msrb.mxu1 %v5028_v23  ;;  %v4997_v56 = vpop.permute.xlu1 %4996 }
 0xa38   : > { %5146 = vrot.lane.b32.xlu2 %v14991_v36, %s17314_s1  ;;  %v5029_v60 = vsel %vm763_vm10, %v14962_v38, %v4997_v56 }
 0xa39   : > { %6270 = vmatpush.msrb.mxu1 %v5014_v1  ;;  %4276 = vrot.lane.b32.xlu0 %v14688_v39, %s17422_s7 }
 0xa3a   : > { %v4967_v19 = vpop.permute.xlu2 %4966 }
 0xa3b   : > { %6271 = vmatpush.msrb.mxu1 %v4884_v33  ;;  %v5015_v3 = vsel %vm763_vm10, %v4965_v54, %v4967_v19  ;;  %v5111_v57 = vpop.permute.xlu0 %5110 }
 0xa3c   : > { %v5159_v6 = vsel %vm783_vm8, %v14889_v62, %v5111_v57 }
 0xa3d   : > { %6272 = vmatpush.msrb.mxu1 %v4870_v5  ;;  %5002 = vrot.lane.b32.xlu1 %v14991_v36, %s17313_s0 }
 0xa3f   : > { %6273 = vmatpush.msrb.mxu1 %v4740_v55  ;;  %v15058_v39 = vpop.permute.xlu1 %4562 }
 0xa40   : > { %4856 = vrot.lane.b32.xlu2 %v14917_v47, %s17306_s15  ;;  %v4596_v9 = vsel %vm703_vm2, %v4561_v44, %v15058_v39 }
 0xa41   : > { %5116 = vrot.lane.b32.xlu0 %v14985_v61, %s17314_s1 }
 0xa42   : > { %v15064_v40 = vpop.permute.xlu2 %4532 }
 0xa43   : > { %v4582_v62 = vsel %vm703_vm2, %v4531_v12, %v15064_v40  ;;  %v4677_v45 = vpop.permute.xlu0 %4676 }
 0xa44   : > { %v4726_v24 = vsel %vm723_vm13, %v4675_v2, %v4677_v45 }
 0xa45   : > { %6274 = vmatpush.msrb.mxu1 %v4726_v24  ;;  %4972 = vrot.lane.b32.xlu1 %v14985_v61, %s17313_s0 }
 0xa47   : > { %6275 = vmatpush.msrb.mxu1 %v4596_v9  ;;  %v4273_v11 = vpop.permute.xlu1 %4272 }
 0xa48   : > { %4422 = vrot.lane.b32.xlu2 %v14773_v41, %s17295_s23  ;;  %v4307_v22 = vsel %vm17461_vm3, %v14939_v63, %v4273_v11 }
 0xa49   : > { %4826 = vrot.lane.b32.xlu0 %v14909_v0, %s17306_s15  ;;  %6276 = vmatpush.msrb.mxu1 %v4582_v62 }
 0xa4a   : > { %v4243_v42 = vpop.permute.xlu2 %4242 }
 0xa4b   : > { %v4293_v49 = vsel %vm17462_vm6, %v4241_v17, %v4243_v42  ;;  %v4387_v20 = vpop.permute.xlu0 %4386  ;;  %vm17466_vm6 = vmmov %vm17461_vm3 }
 0xa4c   : > { %v4437_v30 = vsel %vm17463_vm11, %v14933_v58, %v4387_v20  ;;  %vm17467_vm11 = vmmov %vm17465_vm0 }
 0xa4d   : > { %6232 = vmatpush.msra.mxu3 %v4437_v30  ;;  %4682 = vrot.lane.b32.xlu1 %v14909_v0, %s17297_s30 }
 0xa4f   : > { %6233 = vmatpush.msra.mxu3 %v4307_v22  ;;  %v15084_v21 = vpop.permute.xlu1 %5112 }
 0xa50   : > { %4392 = vrot.lane.b32.xlu2 %v14831_v52, %s17295_s23  ;;  %v15090_v53 = vsel %vm783_vm8, %v5111_v57, %v15084_v21 }
 0xa51   : > { %4712 = vrot.lane.b32.xlu0 %v14917_v47, %s17297_s30  ;;  %6234 = vmatpush.msra.mxu3 %v4293_v49 }
 0xa52   : > { %v15092_v63 = vpop.permute.xlu2 %4998  ;;  %6235 = vmatmul.f32.vlgmr.msra.gmra.mxu3 %v15102_v27 }
 0xa53   : > { %6311 = vmatpush.msrb.mxu3 %v14956_v15  ;;  %v15097_v58 = vsel %vm763_vm10, %v4997_v56, %v15092_v63  ;;  %v5143_v46 = vpop.permute.xlu0 %5142 }
 0xa54   : > { %v5174_v50 = vsel %vm783_vm8, %v5141_v59, %v5143_v46 }
 0xa55   : > { %6312 = vmatpush.msrb.mxu3 %v14960_v25  ;;  %4248 = vrot.lane.b32.xlu1 %v14831_v52, %s17422_s7 }
 0xa57   : > { %6313 = vmatpush.msrb.mxu3 %v5173_v26  ;;  %v4823_v48 = vpop.permute.xlu1 %4822 }
 0xa58   : > { %5292 = vrot.lane.b32.xlu2 %v13077_v29, %s17317_s2  ;;  %v4871_v15 = vsel %vm17455_vm4, %v14980_v51, %v4823_v48 }
 0xa59   : > { %6314 = vmatpush.msrb.mxu3 %v5159_v6  ;;  %4278 = vrot.lane.b32.xlu0 %v14773_v41, %s17422_s7 }
 0xa5a   : > { %v15115_v8 = vpop.permute.xlu2 %4968  ;;  %6238 = vmatmul.f32.gmra.mxu3 %v14725_v18 }
 0xa5b   : > { %6315 = vmatpush.msrb.mxu3 %v5029_v60  ;;  %v5016_v25 = vsel %vm763_vm10, %v4967_v19, %v15115_v8  ;;  %v4853_v38 = vpop.permute.xlu0 %4852 }
 0xa5c   : > { %v4885_v52 = vsel %vm17464_vm12, %v14974_v32, %v4853_v38  ;;  %vm17468_vm12 = vmmov %vm17455_vm4 }
 0xa5d   : > { %6316 = vmatpush.msrb.mxu3 %v5015_v3  ;;  %5148 = vrot.lane.b32.xlu1 %v13077_v29, %s17314_s1 }
 0xa5f   : > { %6317 = vmatpush.msrb.mxu3 %v4885_v52  ;;  %v4709_v41 = vpop.permute.xlu1 %4708 }
 0xa60   : > { %4858 = vrot.lane.b32.xlu2 %v14991_v36, %s17306_s15  ;;  %v4741_v23 = vsel %vm723_vm13, %v14997_v14, %v4709_v41 }
 0xa61   : > { %6318 = vmatpush.msrb.mxu3 %v4871_v15  ;;  %5262 = vrot.lane.b32.xlu0 %v13008_v7, %s17317_s2 }
 0xa62   : > { %v4679_v33 = vpop.permute.xlu2 %4678 }
 0xa63   : > { %6319 = vmatpush.msrb.mxu3 %v4741_v23  ;;  %v4727_v32 = vsel %vm723_vm13, %v4677_v45, %v4679_v33  ;;  %v4419_v51 = vpop.permute.xlu0 %4418 }
 0xa64   : > { %v4452_v5 = vsel %vm17465_vm0, %v15011_v31, %v4419_v51 }
 0xa65   : > { %6320 = vmatpush.msrb.mxu3 %v4727_v32  ;;  %6277 = vmatpush.msrb.mxu1 %v4452_v5  ;;  %v15296_v5 = vld [vmem:[%s17184_s5 + $0x18] sm:$0xff] }
 0xa66   : > { %5118 = vrot.lane.b32.xlu1 %v13008_v7, %s17314_s1 }
 0xa67   : > { %v15137_v54 = vpop.permute.xlu1 %4274 }
 0xa68   : > { %4568 = vrot.lane.b32.xlu2 %v14917_v47, %s17296_s24  ;;  %v4308_v1 = vsel %vm17461_vm3, %v4273_v11, %v15137_v54  ;;  %vm17469_vm3 = vmmov %vm17465_vm0 }
 0xa69   : > { %4828 = vrot.lane.b32.xlu0 %v14985_v61, %s17306_s15 }
 0xa6a   : > { %v15143_v44 = vpop.permute.xlu2 %4244 }
 0xa6b   : > { %v4294_v13 = vsel %vm17466_vm6, %v4243_v42, %v15143_v44  ;;  %v4389_v14 = vpop.permute.xlu0 %4388  ;;  %vm17470_vm6 = vmmov %vm17455_vm4 }
 0xa6c   : > { %v4438_v55 = vsel %vm17467_vm11, %v4387_v20, %v4389_v14  ;;  %vm17471_vm11 = vmmov %vm17465_vm0 }
 0xa6d   : > { %6278 = vmatpush.msrb.mxu1 %v4438_v55 }
 0xa6e   : > { %5004 = vrot.lane.b32.xlu1 %v13077_v29, %s17313_s0 }
 0xa6f   : > { %6279 = vmatpush.msrb.mxu1 %v4308_v1  ;;  %v5259_v2 = vpop.permute.xlu1 %5258 }
 0xa70   : > { %4538 = vrot.lane.b32.xlu2 %v14909_v0, %s17296_s24  ;;  %v15156_v43 = vsel %vm803_vm5, %v15032_v10, %v5259_v2 }
 0xa71   : > { %4714 = vrot.lane.b32.xlu0 %v14991_v36, %s17297_s30  ;;  %6280 = vmatpush.msrb.mxu1 %v4294_v13 }
 0xa72   : > { %v5145_v12 = vpop.permute.xlu2 %5144  ;;  %6281 = vmatmul.f32.vlgmr.msrb.gmra.mxu1 %v15102_v27 }
 0xa73   : > { %6357 = vmatpush.msra.mxu1 %v15030_v35  ;;  %v15160_v16 = vsel %vm783_vm8, %v5143_v46, %v5145_v12  ;;  %v5289_v31 = vpop.permute.xlu0 %5288 }
 0xa74   : > { %v15165_v37 = vsel %vm803_vm5, %v15023_v34, %v5289_v31 }
 0xa75   : > { %6358 = vmatpush.msra.mxu1 %v15037_v4 }
 0xa76   : > { %4974 = vrot.lane.b32.xlu1 %v13008_v7, %s17313_s0  ;;  %s10782_s0 = scalar_lea.hbm %s17192_s13, %s10899_s20 }
 0xa77   : > { %6359 = vmatpush.msra.mxu1 %v5174_v50  ;;  %v15172_v17 = vpop.permute.xlu1 %4824 }
 0xa78   : > { %4424 = vrot.lane.b32.xlu2 %v14917_v47, %s17295_s23  ;;  %v4872_v28 = vsel %vm17455_vm4, %v4823_v48, %v15172_v17  ;;  %vm17472_vm4 = vcmask 556032  }
 0xa79   : > { %6360 = vmatpush.msra.mxu1 %v15090_v53  ;;  %4684 = vrot.lane.b32.xlu0 %v14985_v61, %s17297_s30 }
 0xa7a   : > { %v15179_v34 = vpop.permute.xlu2 %5114  ;;  %6284 = vmatmul.f32.gmra.mxu1 %v14725_v18 }
 0xa7b   : > { %6361 = vmatpush.msra.mxu1 %v15097_v58  ;;  %v15185_v35 = vsel %vm783_vm8, %v15084_v21, %v15179_v34  ;;  %v4855_v10 = vpop.permute.xlu0 %4854 }
 0xa7c   : > { %v4886_v4 = vsel %vm17468_vm12, %v4853_v38, %v4855_v10  ;;  %vm17473_vm12 = vmmov %vm17465_vm0 }
 0xa7d   : > { %6362 = vmatpush.msra.mxu1 %v5016_v25 }
 0xa7e   : > { %4860 = vrot.lane.b32.xlu1 %v13077_v29, %s17306_s15 }
 0xa7f   : > { %6363 = vmatpush.msra.mxu1 %v4886_v4  ;;  %v15193_v59 = vpop.permute.xlu1 %4710 }
 0xa80   : > { %4394 = vrot.lane.b32.xlu2 %v14909_v0, %s17295_s23  ;;  %v4742_v26 = vsel %vm723_vm13, %v4709_v41, %v15193_v59 }
 0xa81   : > { %6364 = vmatpush.msra.mxu1 %v4872_v28  ;;  %4570 = vrot.lane.b32.xlu0 %v14991_v36, %s17296_s24 }
 0xa82   : > { %v15199_v18 = vpop.permute.xlu2 %4680 }
 0xa83   : > { %6365 = vmatpush.msra.mxu1 %v4742_v26  ;;  %v4728_v56 = vsel %vm723_vm13, %v4679_v33, %v15199_v18  ;;  %v4565_v60 = vpop.permute.xlu0 %4564 }
 0xa84   : > { %v4597_v19 = vsel %vm703_vm2, %v15058_v39, %v4565_v60 }
 0xa85   : > { %6366 = vmatpush.msra.mxu1 %v4728_v56  ;;  %6321 = vmatpush.msrb.mxu3 %v4597_v19 }
 0xa86   : > { %4830 = vrot.lane.b32.xlu1 %v13008_v7, %s17306_s15  ;;  %s11124_s15 = smov 124  }
 0xa87   : > { %v4421_v3 = vpop.permute.xlu1 %4420 }
 0xa88   : > { %4280 = vrot.lane.b32.xlu2 %v14917_v47, %s17422_s7  ;;  %v4453_v57 = vsel %vm17465_vm0, %v4419_v51, %v4421_v3  ;;  %vm17474_vm0 = vmmov %vm17472_vm4 }
 0xa89   : > { %4540 = vrot.lane.b32.xlu0 %v14985_v61, %s17296_s24 }
 0xa8a   : > { %v4391_v6 = vpop.permute.xlu2 %4390 }
 0xa8b   : > { %v4439_v9 = vsel %vm17469_vm3, %v4389_v14, %v4391_v6  ;;  %v4535_v62 = vpop.permute.xlu0 %4534  ;;  %vm17475_vm3 = vmmov %vm17470_vm6 }
 0xa8c   : > { %v4583_v39 = vsel %vm703_vm2, %v15064_v40, %v4535_v62 }
 0xa8d   : > { %6322 = vmatpush.msrb.mxu3 %v4583_v39 }
 0xa8e   : > { %4282 = vrot.lane.b32.xlu1 %v14991_v36, %s17422_s7 }
 0xa8f   : > { %6323 = vmatpush.msrb.mxu3 %v4453_v57  ;;  %v15219_v47 = vpop.permute.xlu1 %5260 }
 0xa90   : > { %4250 = vrot.lane.b32.xlu2 %v14909_v0, %s17422_s7  ;;  %v15225_v45 = vsel %vm803_vm5, %v5259_v2, %v15219_v47 }
 0xa91   : > { %4426 = vrot.lane.b32.xlu0 %v14991_v36, %s17295_s23  ;;  %6324 = vmatpush.msrb.mxu3 %v4439_v9 }
 0xa92   : > { %v15227_v24 = vpop.permute.xlu2 %5146 }
 0xa93   : > { %v15231_v40 = vsel %vm783_vm8, %v5145_v12, %v15227_v24  ;;  %v5291_v11 = vpop.permute.xlu0 %5290 }
 0xa94   : > { %v15234_v22 = vsel %vm803_vm5, %v5289_v31, %v5291_v11 }
 0xa96   : > { %4572 = vrot.lane.b32.xlu1 %v13077_v29, %s17296_s24 }
 0xa97   : > { %v4971_v0 = vpop.permute.xlu1 %4970 }
 0xa98   : > { %4396 = vrot.lane.b32.xlu2 %v14985_v61, %s17295_s23  ;;  %v5017_v36 = vsel %vm763_vm10, %v15115_v8, %v4971_v0 }
 0xa99   : > { %4716 = vrot.lane.b32.xlu0 %v13077_v29, %s17297_s30 }
 0xa9a   : > { %v4857_v42 = vpop.permute.xlu2 %4856 }
 0xa9b   : > { %v4887_v49 = vsel %vm17470_vm6, %v4855_v10, %v4857_v42  ;;  %v5001_v20 = vpop.permute.xlu0 %5000  ;;  %vm17476_vm6 = vmmov %vm17475_vm3 }
 0xa9c   : > { %v5031_v30 = vsel %vm763_vm10, %v15092_v63, %v5001_v20  ;;  %v5862_v63 = vld [vmem:[%s17185_s6] sm:$0xff] }
 0xa9e   : > { %4398 = vrot.lane.b32.xlu1 %v13008_v7, %s17295_s23 }
 0xa9f   : > { %v4537_v21 = vpop.permute.xlu1 %4536 }
 0xaa0   : > { %4686 = vrot.lane.b32.xlu2 %v13008_v7, %s17297_s30  ;;  %v4584_v53 = vsel %vm703_vm2, %v4535_v62, %v4537_v21  ;;  %s10786_s30 = sshll.u32 %s10782_s0, 4  ;;  %s10787_s30 = int_to_ptr.hbm [resolvable:$true] %s10786_s30 }
 0xaa1   : > { %4252 = vrot.lane.b32.xlu0 %v14985_v61, %s17422_s7 }
 0xaa2   : > { %v15254_v58 = vpop.permute.xlu2 %4422 }
 0xaa3   : > { %v4454_v46 = vsel %vm17471_vm11, %v4421_v3, %v15254_v58  ;;  %v4567_v50 = vpop.permute.xlu0 %4566  ;;  %vm17477_vm11 = vmmov %vm17474_vm0 }
 0xaa4   : > { %v4598_v48 = vsel %vm703_vm2, %v4565_v60, %v4567_v50 }
 0xaa5   : > { %6367 = vmatpush.msra.mxu1 %v4598_v48 }
 0xaa6   : > { %5866 = vperm.xlu1 %10962, %v5862_v63  }
 0xaa7   : > { %6368 = vmatpush.msra.mxu1 %v4584_v53  ;;  %v4247_v61 = vpop.permute.xlu1 %4246 }
 0xaa8   : > { %4542 = vrot.lane.b32.xlu2 %v13008_v7, %s17296_s24  ;;  %v4295_v15 = vsel %vm17472_vm4, %v15143_v44, %v4247_v61  ;;  %vm17478_vm4 = vmmov %vm17474_vm0 }
 0xaa9   : > { %4428 = vrot.lane.b32.xlu0 %v13077_v29, %s17295_s23  ;;  %6369 = vmatpush.msra.mxu1 %v4454_v46  ;;  %s11056_s23 = sshra.s32 %s10787_s30, 4  ;;  %s11057_s23 = int_to_ptr.hbm [resolvable:$true] %s11056_s23 }
 0xaaa   : > { %v15268_v8 = vpop.permute.xlu2 %4392  ;;  %s11058_s24 = scalar_lea.hbm %s11057_s23, 2  ;;  %p11063_p0 = scmp.lt.s32.totalorder %s11057_s23, %s17192_s13 }
 0xaab   : > { %v4440_v25 = vsel %vm17473_vm12, %v4391_v6, %v15268_v8  ;;  %v4277_v38 = vpop.permute.xlu0 %4276  ;;  %vm17479_vm12 = vcmask 359424   ;;  %p11059_p11 = scmp.ne.s32.totalorder %s11057_s23, %s11058_s24 }
 0xaac   : > { %v4309_v52 = vsel %vm17474_vm0, %v15137_v54, %v4277_v38  ;;  %6370 = vmatpush.msra.mxu1 %v4440_v25  ;;  %vm17480_vm0 = vcmask 547840  }
 0xaad   : > { %6325 = vmatpush.msrb.mxu3 %v4309_v52  ;;  %p11060_p12 = pnand %p11059_p11, %p11233_p5 }
 0xaaf   : > { %6326 = vmatpush.msrb.mxu3 %v4295_v15  ;;  %v15276_v41 = vpop.permute.xlu1 %5002  ;;  %p11061_p13 = pneg %p11060_p12 }
 0xab0   : > { %4284 = vrot.lane.b32.xlu2 %v13077_v29, %s17422_s7  ;;  %6327 = vmatmul.f32.vlgmr.msrb.gmra.mxu3 %v15102_v27  ;;  %v5032_v23 = vsel %vm763_vm10, %v5001_v20, %v15276_v41 }
 0xab1   : > { %4254 = vrot.lane.b32.xlu0 %v13008_v7, %s17422_s7  ;;  %6403 = vmatpush.msra.mxu3 %v15165_v37 }
 0xab2   : > { %v5293_v33 = vpop.permute.xlu2 %5292 }
 0xab3   : > { %v5321_v32 = vsel %vm803_vm5, %v5291_v11, %v5293_v33  ;;  %v5117_v51 = vpop.permute.xlu0 %5116  ;;  %6404 = vmatpush.msra.mxu3 %v15156_v43 }
 0xab4   : > { %5377 = vst.msk [vmem:[#allocation2 + $0xef0] sm:$0xff] %vm2382_vm15, %v5321_v32  ;;  %v5162_v29 = vsel %vm783_vm8, %v15179_v34, %v5117_v51 }
 0xab5   : > { %6405 = vmatpush.msra.mxu3 %v15160_v16 }
 0xab7   : > { %6406 = vmatpush.msra.mxu3 %v15185_v35  ;;  %v15291_v7 = vpop.permute.xlu1 %4972 }
 0xab8   : > { %6330 = vmatmul.f32.gmra.mxu3 %v15296_v5  ;;  %v5018_v54 = vsel %vm763_vm10, %v4971_v0, %v15291_v7 }
 0xab9   : > { %6407 = vmatpush.msra.mxu3 %v5031_v30 }
 0xaba   : > { %v15301_v1 = vpop.permute.xlu2 %4858 }
 0xabb   : > { %v4888_v44 = vsel %vm17475_vm3, %v4857_v42, %v15301_v1  ;;  %v4827_v13 = vpop.permute.xlu0 %4826  ;;  %6408 = vmatpush.msra.mxu3 %v5017_v36  ;;  %vm17481_vm3 = vmmov %vm17479_vm12  ;;  %v5860_v30 = vld [vmem:[#allocation2 + $0xef0] sm:$0xff] }
 0xabc   : > { %v4873_v14 = vsel %vm17476_vm6, %v15172_v17, %v4827_v13  ;;  %vm17482_vm6 = vmmov %vm17480_vm0 }
 0xabd   : > { %6409 = vmatpush.msra.mxu3 %v4887_v49 }
 0xabf   : > { %6410 = vmatpush.msra.mxu3 %v4873_v14  ;;  %v4683_v55 = vpop.permute.xlu1 %4682 }
 0xac0   : > { %v4729_v2 = vsel %vm723_vm13, %v15199_v18, %v4683_v55 }
 0xac2   : > { %v15309_v43 = vpop.permute.xlu2 %4568 }
 0xac3   : > { %v4599_v12 = vsel %vm703_vm2, %v4567_v50, %v15309_v43  ;;  %v4713_v16 = vpop.permute.xlu0 %4712 }
 0xac4   : > { %v4743_v31 = vsel %vm723_vm13, %v15193_v59, %v4713_v16 }
 0xac5   : > { %6411 = vmatpush.msra.mxu3 %v4743_v31 }
 0xac7   : > { %6412 = vmatpush.msra.mxu3 %v4729_v2  ;;  %v4249_v37 = vpop.permute.xlu1 %4248 }
 0xac8   : > { %v4296_v17 = vsel %vm17477_vm11, %v4247_v61, %v4249_v37 }
 0xac9   : > { %6413 = vmatpush.msra.mxu3 %v4599_v12 }
 0xaca   : > { %v15316_v28 = vpop.permute.xlu2 %4538 }
 0xacb   : > { %v4585_v34 = vsel %vm703_vm2, %v4537_v21, %v15316_v28  ;;  %v4279_v35 = vpop.permute.xlu0 %4278 }
 0xacc   : > { %v4310_v10 = vsel %vm17478_vm4, %v4277_v38, %v4279_v35  ;;  %6414 = vmatpush.msra.mxu3 %v4585_v34 }
 0xacd   : > { %6371 = vmatpush.msra.mxu1 %v4310_v10  ;;  %v5861_v10 = vld [vmem:[#allocation2 + $0xef8] sm:$0xff] }
 0xacf   : > { %6372 = vmatpush.msra.mxu1 %v4296_v17  ;;  %v5149_v4 = vpop.permute.xlu1 %5148 }
 0xad0   : > { %6373 = vmatmul.f32.vlgmr.msra.gmra.mxu1 %v15102_v27  ;;  %v5177_v59 = vsel %vm783_vm8, %v15227_v24, %v5149_v4 }
 0xad1   : > { %6449 = vmatpush.msrb.mxu1 %v15234_v22  ;;  %5233 = vst.msk [vmem:[#allocation2 + $0xe00] sm:$0xff] %vm17479_vm12, %v5177_v59  ;;  %vm17488_vm12 = vcmask 375808   ;;  %v5846_v59 = vld [vmem:[#allocation2 + $0xe80] sm:$0xff] }
 0xad2   : > { %v15326_v26 = vpop.permute.xlu2 %4424 }
 0xad3   : > { %v4455_v18 = vsel %vm17480_vm0, %v15254_v58, %v15326_v26  ;;  %v5263_v56 = vpop.permute.xlu0 %5262  ;;  %6450 = vmatpush.msrb.mxu1 %v15225_v45 }
 0xad4   : > { %v5307_v60 = vsel %vm803_vm5, %v15219_v47, %v5263_v56  ;;  %6415 = vmatpush.msra.mxu3 %v4455_v18  ;;  %vm17483_vm5 = vcmask 310272   ;;  %v5831_v18 = vld [vmem:[#allocation2 + $0xe08] sm:$0xff] }
 0xad5   : > { %5363 = vst.msk [vmem:[#allocation2 + $0xe78] sm:$0xff] %vm2382_vm15, %v5307_v60  ;;  %6451 = vmatpush.msrb.mxu1 %v15231_v40  ;;  %vm17484_vm15 = vcmask 367616  }
 0xad6   : > { %vm17486_vm11 = vmmov %vm17484_vm15 }
 0xad7   : > { %6452 = vmatpush.msrb.mxu1 %v5162_v29 }
 0xad8   : > { %v5119_v19 = vpop.permute.xlu1 %5118  ;;  %6376 = vmatmul.f32.gmra.mxu1 %v15296_v5  ;;  %v5830_v46 = vld [vmem:[#allocation2 + $0xe00] sm:$0xff] }
 0xad9   : > { %v5163_v3 = vsel %vm783_vm8, %v5117_v51, %v5119_v19  ;;  %6453 = vmatpush.msrb.mxu1 %v5032_v23  ;;  %vm17485_vm8 = vmmov %vm17478_vm4  ;;  %v5816_v19 = vld [vmem:[#allocation2 + $0xd90] sm:$0xff] }
 0xada   : > { %5219 = vst.msk [vmem:[#allocation2 + $0xd88] sm:$0xff] %vm17481_vm3, %v5163_v3  ;;  %v4395_v57 = vpop.permute.xlu2 %4394  ;;  %vm17489_vm3 = vmmov %vm17483_vm5 }
 0xadb   : > { %v4441_v6 = vsel %vm17482_vm6, %v15268_v8, %v4395_v57  ;;  %v4829_v9 = vpop.permute.xlu0 %4828  ;;  %6454 = vmatpush.msrb.mxu1 %v5018_v54  ;;  %vm17490_vm6 = vmmov %vm17488_vm12 }
 0xadc   : > { %v4874_v62 = vsel %vm17483_vm5, %v4827_v13, %v4829_v9  ;;  %6416 = vmatpush.msra.mxu3 %v4441_v6  ;;  %v5845_v21 = vld [vmem:[#allocation2 + $0xe78] sm:$0xff]  ;;  %v5786_v6 = vld [vmem:[#allocation2 + $0xca0] sm:$0xff] }
 0xadd   : > { %6455 = vmatpush.msrb.mxu1 %v4888_v44 }
 0xadf   : > { %6456 = vmatpush.msrb.mxu1 %v4874_v62 }
 0xae0   : > { %v5005_v39 = vpop.permute.xlu1 %5004 }
 0xae1   : > { %v5033_v47 = vsel %vm763_vm10, %v15276_v41, %v5005_v39  ;;  %v5815_v61 = vld [vmem:[#allocation2 + $0xd88] sm:$0xff]  ;;  %v5756_v39 = vld [vmem:[#allocation2 + $0xbb0] sm:$0xff] }
 0xae2   : > { %5089 = vst.msk [vmem:[#allocation2 + $0xd10] sm:$0xff] %vm17484_vm15, %v5033_v47  ;;  %v4281_v45 = vpop.permute.xlu2 %4280  ;;  %vm17492_vm15 = vmmov %vm17478_vm4  ;;  %v15392_v47 = vpop.f32.mrf.mxu0 }
 0xae3   : > { %v4311_v24 = vsel %vm17485_vm8, %v4279_v35, %v4281_v45  ;;  %v15346_v40 = vpop.permute.xlu0 %4714  ;;  %vm17493_vm8 = vcmask 605184  }
 0xae4   : > { %v4744_v11 = vsel %vm723_vm13, %v4713_v16, %v15346_v40  ;;  %6417 = vmatpush.msra.mxu3 %v4311_v24 }
 0xae5   : > { %6457 = vmatpush.msrb.mxu1 %v4744_v11 }
 0xae8   : > { %v4975_v22 = vpop.permute.xlu1 %4974 }
 0xae9   : > { %v5019_v0 = vsel %vm763_vm10, %v15291_v7, %v4975_v22  ;;  %vm17487_vm10 = vmmov %vm17483_vm5  ;;  %v5800_v8 = vld [vmem:[#allocation2 + $0xd10] sm:$0xff]  ;;  %vm17491_vm5 = vcmask 596992   ;;  %v5726_v22 = vld [vmem:[#allocation2 + $0xac0] sm:$0xff] }
 0xaea   : > { %5075 = vst.msk [vmem:[#allocation2 + $0xc98] sm:$0xff] %vm17486_vm11, %v5019_v0  ;;  %v15353_v36 = vpop.permute.xlu2 %4250  ;;  %vm17494_vm11 = vmmov %vm17480_vm0 }
 0xaeb   : > { %v4297_v42 = vsel %vm17478_vm4, %v4249_v37, %v15353_v36  ;;  %v4685_v49 = vpop.permute.xlu0 %4684  ;;  %vm17495_vm4 = vmmov %vm17493_vm8 }
 0xaec   : > { %v4730_v20 = vsel %vm723_vm13, %v4683_v55, %v4685_v49  ;;  %6418 = vmatpush.msra.mxu3 %v4297_v42  ;;  %v5696_v42 = vld [vmem:[#allocation2 + $0x9d0] sm:$0xff] }
 0xaed   : > { %6458 = vmatpush.msrb.mxu1 %v4730_v20  ;;  %6419 = vmatmul.f32.vlgmr.msra.gmra.mxu3 %v15102_v27  ;;  %v5681_v20 = vld [vmem:[#allocation2 + $0x958] sm:$0xff] }
 0xaee   : > { %6495 = vmatpush.msrb.mxu3 %v5860_v30  ;;  %v15396_v30 = vpop.f32.mrf.mxu0 }
 0xaef   : > { %17506 = vst [vmem:[#allocation8_spill] sm:$0xff] %v15396_v30 }
 0xaf0   : > { %v4861_v53 = vpop.permute.xlu1 %4860  ;;  %6496 = vmatpush.msrb.mxu3 %v5845_v21  ;;  %v15398_v21 = vpop.f32.mrf.mxu1 }
 0xaf1   : > { %v4889_v58 = vsel %vm17487_vm10, %v15301_v1, %v4861_v53  ;;  %v5785_v25 = vld [vmem:[#allocation2 + $0xc98] sm:$0xff]  ;;  %vm17496_vm10 = vmmov %vm17492_vm15  ;;  %v5666_v53 = vld [vmem:[#allocation2 + $0x8e0] sm:$0xff] }
 0xaf2   : > { %4945 = vst.msk [vmem:[#allocation2 + $0xc20] sm:$0xff] %vm17488_vm12, %v4889_v58  ;;  %v4397_v50 = vpop.permute.xlu2 %4396  ;;  %6497 = vmatpush.msrb.mxu3 %v5830_v46  ;;  %vm17497_vm12 = vcmask 621568   ;;  %v5651_v58 = vld [vmem:[#allocation2 + $0x868] sm:$0xff]  ;;  %v5636_v46 = vld [vmem:[#allocation2 + $0x7f0] sm:$0xff] }
 0xaf3   : > { %v4442_v63 = vsel %vm17480_vm0, %v4395_v57, %v4397_v50  ;;  %v4571_v48 = vpop.permute.xlu0 %4570  ;;  %vm17498_vm0 = vmmov %vm17491_vm5  ;;  %v5801_v57 = vld [vmem:[#allocation2 + $0xd18] sm:$0xff] }
 0xaf4   : > { %v4600_v15 = vsel %vm703_vm2, %v15309_v43, %v4571_v48  ;;  %6498 = vmatpush.msrb.mxu3 %v5815_v61 }
 0xaf5   : > { %6459 = vmatpush.msrb.mxu1 %v4600_v15  ;;  %6422 = vmatmul.f32.gmra.mxu3 %v15296_v5  ;;  %v15411_v15 = vpop.f32.mrf.mxu3 }
 0xaf6   : > { %6499 = vmatpush.msrb.mxu3 %v5800_v8 }
 0xaf8   : > { %v4831_v38 = vpop.permute.xlu1 %4830  ;;  %6500 = vmatpush.msrb.mxu3 %v5785_v25 }
 0xaf9   : > { %v4875_v52 = vsel %vm17489_vm3, %v4829_v9, %v4831_v38  ;;  %v5770_v41 = vld [vmem:[#allocation2 + $0xc20] sm:$0xff]  ;;  %vm17499_vm3 = vmmov %vm17494_vm11  ;;  %v5771_v9 = vld [vmem:[#allocation2 + $0xc28] sm:$0xff] }
 0xafa   : > { %4931 = vst.msk [vmem:[#allocation2 + $0xba8] sm:$0xff] %vm17490_vm6, %v4875_v52  ;;  %v4687_v23 = vpop.permute.xlu2 %4686  ;;  %6501 = vmatpush.msrb.mxu3 %v5770_v41  ;;  %vm17500_vm6 = vcmask 613376  }
 0xafb   : > { %v4731_v33 = vsel %vm723_vm13, %v4685_v49, %v4687_v23  ;;  %v4541_v32 = vpop.permute.xlu0 %4540 }
 0xafc   : > { %4787 = vst.msk [vmem:[#allocation2 + $0xab8] sm:$0xff] %vm17491_vm5, %v4731_v33  ;;  %v4586_v51 = vsel %vm703_vm2, %v15316_v28, %v4541_v32  ;;  %vm17503_vm5 = vmmov %vm17500_vm6 }
 0xafd   : > { %6460 = vmatpush.msrb.mxu1 %v4586_v51  ;;  %v15420_v52 = vpop.f32.mrf.mxu3 }
 0xafe   : > { %17508 = vst [vmem:[#allocation18_spill] sm:$0xff] %v15420_v52 }
 0xb00   : > { %v4283_v29 = vpop.permute.xlu1 %4282 }
 0xb01   : > { %v4312_v7 = vsel %vm17492_vm15, %v4281_v45, %v4283_v29  ;;  %v5755_v54 = vld [vmem:[#allocation2 + $0xba8] sm:$0xff] }
 0xb02   : > { %v4543_v1 = vpop.permute.xlu2 %4542  ;;  %6502 = vmatpush.msrb.mxu3 %v5755_v54 }
 0xb03   : > { %v4587_v44 = vsel %vm703_vm2, %v4541_v32, %v4543_v1  ;;  %v4427_v13 = vpop.permute.xlu0 %4426  ;;  %v5725_v4 = vld [vmem:[#allocation2 + $0xab8] sm:$0xff] }
 0xb04   : > { %4643 = vst.msk [vmem:[#allocation2 + $0x9c8] sm:$0xff] %vm17493_vm8, %v4587_v44  ;;  %v4456_v14 = vsel %vm17494_vm11, %v15326_v26, %v4427_v13  ;;  %vm17505_vm8 = vmmov %vm17497_vm12  ;;  %vm17517_vm11 = vcmask 859136  }
 0xb05   : > { %6461 = vmatpush.msrb.mxu1 %v4456_v14  ;;  %v15428_v33 = vpop.f32.mrf.mxu3 }
 0xb07   : > { %6462 = vmatpush.msrb.mxu1 %v4442_v63  ;;  %v15405_v63 = vpop.f32.mrf.mxu0 }
 0xb08   : > { %v4573_v55 = vpop.permute.xlu1 %4572 }
 0xb09   : > { %v4601_v2 = vsel %vm703_vm2, %v4571_v48, %v4573_v55  ;;  %6463 = vmatpush.msrb.mxu1 %v4312_v7  ;;  %vm17501_vm2 = vmmov %vm17496_vm10  ;;  %v15407_v48 = vpop.f32.mrf.mxu1 }
 0xb0a   : > { %4657 = vst.msk [vmem:[#allocation2 + $0xa40] sm:$0xff] %vm17495_vm4, %v4601_v2  ;;  %v4285_v43 = vpop.permute.xlu2 %4284  ;;  %vm17504_vm15 = vmmov %vm17501_vm2  ;;  %vm17518_vm4 = vcmask 867328  }
 0xb0b   : > { %v4313_v12 = vsel %vm17496_vm10, %v4283_v29, %v4285_v43  ;;  %v4717_v16 = vpop.permute.xlu0 %4716  ;;  %v5695_v56 = vld [vmem:[#allocation2 + $0x9c8] sm:$0xff]  ;;  %17507 = vst [vmem:[#allocation16_spill] sm:$0xff] %v15407_v48  ;;  %vm17519_vm10 = vcmask 56320  }
 0xb0c   : > { %4369 = vst.msk [vmem:[#allocation2 + $0x860] sm:$0xff] %vm17497_vm12, %v4313_v12  ;;  %v4745_v31 = vsel %vm723_vm13, %v15346_v40, %v4717_v16  ;;  %vm17502_vm13 = vmmov %vm17499_vm3  ;;  %v5741_v40 = vld [vmem:[#allocation2 + $0xb38] sm:$0xff]  ;;  %vm7104_vm12 = vcmask 1044484  }
 0xb0d   : > { %4801 = vst.msk [vmem:[#allocation2 + $0xb30] sm:$0xff] %vm17498_vm0, %v4745_v31  ;;  %v15436_v29 = vpop.f32.mrf.mxu3  ;;  %vm7114_vm0 = vcmask 1043459  }
 0xb0e   : > { %17511 = vst [vmem:[#allocation15_spill] sm:$0xff] %v15436_v29 }
 0xb0f   : > { %v15414_v8 = vpop.f32.mrf.mxu0 }
 0xb10   : > { %v4399_v37 = vpop.permute.xlu1 %4398 }
 0xb11   : > { %v4443_v17 = vsel %vm17499_vm3, %v4397_v50, %v4399_v37  ;;  %v5710_v26 = vld [vmem:[#allocation2 + $0xa40] sm:$0xff]  ;;  %v15401_v50 = vpop.f32.mrf.mxu2  ;;  %v15416_v25 = vpop.f32.mrf.mxu1  ;;  %vm7118_vm3 = vcmask 1045509  }
 0xb12   : > { %4499 = vst.msk [vmem:[#allocation2 + $0x8d8] sm:$0xff] %vm17500_vm6, %v4443_v17  ;;  %vm7098_vm6 = vcmask 1040384  }
 0xb13   : > { %v4253_v28 = vpop.permute.xlu0 %4252  ;;  %v5650_v0 = vld [vmem:[#allocation2 + $0x860] sm:$0xff] }
 0xb14   : > { %v4298_v34 = vsel %vm17501_vm2, %v15353_v36, %v4253_v28  ;;  %v5740_v35 = vld [vmem:[#allocation2 + $0xb30] sm:$0xff]  ;;  %v5711_v36 = vld [vmem:[#allocation2 + $0xa48] sm:$0xff]  ;;  %vm7100_vm2 = vcmask 1042434  }
 0xb15   : > { %6503 = vmatpush.msrb.mxu3 %v5740_v35  ;;  %6464 = vmatpush.msrb.mxu1 %v4298_v34  ;;  %v15444_v44 = vpop.f32.mrf.mxu3 }
 0xb16   : > { %6465 = vmatmul.f32.vlgmr.msrb.gmra.mxu1 %v15102_v27 }
 0xb17   : > { %6504 = vmatpush.msrb.mxu3 %v5725_v4  ;;  %6541 = vmatpush.msra.mxu1 %v5861_v10  ;;  %v15422_v41 = vpop.f32.mrf.mxu0 }
 0xb19   : > { %6505 = vmatpush.msrb.mxu3 %v5710_v26  ;;  %6542 = vmatpush.msra.mxu1 %v5846_v59  ;;  %v5665_v11 = vld [vmem:[#allocation2 + $0x8d8] sm:$0xff]  ;;  %v15409_v61 = vpop.f32.mrf.mxu2 }
 0xb1b   : > { %6506 = vmatpush.msrb.mxu3 %v5695_v56  ;;  %v4429_v60 = vpop.permute.xlu0 %4428  ;;  %6543 = vmatpush.msra.mxu1 %v5831_v18 }
 0xb1c   : > { %v4457_v3 = vsel %vm17502_vm13, %v4427_v13, %v4429_v60  ;;  %vm17266_vm13 = vcmask 1046534  }
 0xb1d   : > { %4513 = vst.msk [vmem:[#allocation2 + $0x950] sm:$0xff] %vm17503_vm5, %v4457_v3  ;;  %6544 = vmatpush.msra.mxu1 %v5816_v19  ;;  %v15452_v2 = vpop.f32.mrf.mxu3  ;;  %vm17262_vm5 = vcmask 1045508  }
 0xb1e   : > { %6468 = vmatmul.f32.gmra.mxu1 %v15296_v5  ;;  %17515 = vst [vmem:[#allocation10_spill] sm:$0xff] %v15452_v2 }
 0xb1f   : > { %6545 = vmatpush.msra.mxu1 %v5801_v57  ;;  %v15430_v32 = vpop.f32.mrf.mxu0 }
 0xb20   : > { %17510 = vst [vmem:[#allocation12_spill] sm:$0xff] %v15430_v32 }
 0xb21   : > { %6546 = vmatpush.msra.mxu1 %v5786_v6  ;;  %v15418_v38 = vpop.f32.mrf.mxu2 }
 0xb23   : > { %v4255_v62 = vpop.permute.xlu0 %4254  ;;  %6547 = vmatpush.msra.mxu1 %v5771_v9 }
 0xb24   : > { %v4299_v45 = vsel %vm17504_vm15, %v4253_v28, %v4255_v62  ;;  %v5680_v24 = vld [vmem:[#allocation2 + $0x950] sm:$0xff]  ;;  %vm7112_vm15 = vcmask 1041409  }
 0xb25   : > { %4355 = vst.msk [vmem:[#allocation2 + $0x7e8] sm:$0xff] %vm17505_vm8, %v4299_v45  ;;  %6507 = vmatpush.msrb.mxu3 %v5680_v24  ;;  %6548 = vmatpush.msra.mxu1 %v5756_v39  ;;  %v15458_v31 = vpop.f32.mrf.mxu3  ;;  %v15482_v24 = vpop.permute.xlu1 %5866  ;;  %vm17265_vm8 = vcmask 1044481  }
 0xb27   : > { %6508 = vmatpush.msrb.mxu3 %v5665_v11  ;;  %6549 = vmatpush.msra.mxu1 %v5741_v40  ;;  %v15438_v7 = vpop.f32.mrf.mxu0 }
 0xb29   : > { %6509 = vmatpush.msrb.mxu3 %v5650_v0  ;;  %6550 = vmatpush.msra.mxu1 %v5726_v22  ;;  %v15426_v23 = vpop.f32.mrf.mxu2 }
 0xb2b   : > { %6551 = vmatpush.msra.mxu1 %v5711_v36 }
 0xb2c   : > { %v5635_v49 = vld [vmem:[#allocation2 + $0x7e8] sm:$0xff] }
 0xb2d   : > { %6510 = vmatpush.msrb.mxu3 %v5635_v49  ;;  %6552 = vmatpush.msra.mxu1 %v5696_v42  ;;  %v15462_v28 = vpop.f32.mrf.mxu3 }
 0xb2e   : > { %6511 = vmatmul.f32.vlgmr.msrb.gmra.mxu3 %v15102_v27 }
 0xb2f   : > { %6553 = vmatpush.msra.mxu1 %v5681_v20  ;;  %v15446_v13 = vpop.f32.mrf.mxu0 }
 0xb30   : > { %17514 = vst [vmem:[#allocation11_spill] sm:$0xff] %v15446_v13 }
 0xb31   : > { %6554 = vmatpush.msra.mxu1 %v5666_v53 }
 0xb33   : > { %6555 = vmatpush.msra.mxu1 %v5651_v58 }
 0xb35   : > { %6556 = vmatpush.msra.mxu1 %v5636_v46  ;;  %v6328_v4 = vpop.f32.mrf.mxu3 }
 0xb36   : > { %6514 = vmatmul.f32.gmra.mxu3 %v15296_v5  ;;  %6557 = vmatmul.f32.vlgmr.msra.gmra.mxu1 %v15102_v27  ;;  %v15424_v27 = vpop.f32.mrf.mxu1 }
 0xb37   : > { %17509 = vst [vmem:[#allocation17_spill] sm:$0xff] %v15424_v27  ;;  %v6259_v43 = vpop.f32.mrf.mxu0 }
 0xb38   : > { %v6260_v46 = vadd.f32 %v6259_v43, %v15482_v24 }
 0xb3d   : > { %v15470_v56 = vpop.f32.mrf.mxu3 }
 0xb3e   : > { %6560 = vmatmul.f32.gmra.mxu1 %v15296_v5  ;;  %v15432_v51 = vpop.f32.mrf.mxu1  ;;  %v15434_v5 = vpop.f32.mrf.mxu2 }
 0xb3f   : > { %v15460_v37 = vpop.f32.mrf.mxu0 }
 0xb46   : > { %v15440_v54 = vpop.f32.mrf.mxu1  ;;  %v15442_v1 = vpop.f32.mrf.mxu2 }
 0xb47   : > { %17512 = vst [vmem:[#allocation14_spill] sm:$0xff] %v15440_v54  ;;  %v6351_v10 = vpop.f32.mrf.mxu0 }
 0xb48   : > { %17513 = vst [vmem:[#allocation9_spill] sm:$0xff] %v15442_v1 }
 0xb4e   : > { %v15448_v14 = vpop.f32.mrf.mxu1  ;;  %v15450_v55 = vpop.f32.mrf.mxu2 }
 0xb4f   : > { %v15468_v18 = vpop.f32.mrf.mxu0 }
 0xb56   : > { %v15454_v12 = vpop.f32.mrf.mxu1  ;;  %v15456_v16 = vpop.f32.mrf.mxu2 }
 0xb57   : > { %17516 = vst [vmem:[#allocation13_spill] sm:$0xff] %v15454_v12  ;;  %v6443_v3 = vpop.f32.mrf.mxu0 }
 0xb5e   : > { %v6282_v17 = vpop.f32.mrf.mxu1  ;;  %v6305_v34 = vpop.f32.mrf.mxu2 }
 0xb5f   : > { %v15476_v62 = vpop.f32.mrf.mxu0  ;;  %v6306_v58 = vadd.f32 %v6305_v34, %v15482_v24  ;;  %v6444_v34 = vadd.f32 %v6443_v3, %v15482_v24 }
 0xb61   : > { %v6329_v48 = vadd.f32 %v6328_v4, %v6306_v58 }
 0xb66   : > { %v15464_v35 = vpop.f32.mrf.mxu1  ;;  %v15466_v59 = vpop.f32.mrf.mxu2 }
 0xb67   : > { %v6535_v22 = vpop.f32.mrf.mxu0 }
 0xb68   : > { %v6536_v42 = vadd.f32 %v6535_v22, %v15482_v24  ;;  %v15498_v22 = vmax.f32 %v6329_v48, 0.0 }
 0xb6e   : > { %v6374_v26 = vpop.f32.mrf.mxu1  ;;  %v6397_v19 = vpop.f32.mrf.mxu2 }
 0xb70   : > { %v6420_v57 = vpop.f32.mrf.mxu3 }
 0xb76   : > { %v15472_v60 = vpop.f32.mrf.mxu1  ;;  %v15474_v9 = vpop.f32.mrf.mxu2 }
 0xb78   : > { %v15478_v39 = vpop.f32.mrf.mxu3 }
 0xb7e   : > { %v6489_v40 = vpop.f32.mrf.mxu2 }
 0xb7f   : > { %v6490_v11 = vadd.f32 %v6489_v40, %v15482_v24 }
 0xb93   : > { %v6466_v6 = vpop.f32.mrf.mxu1 }
 0xb94   : > { %v6467_v4 = vadd.f32 %v6466_v6, %v6444_v34  ;;  %v6030_v6 = vadd.f32 %v15418_v38, %v15482_v24 }
 0xb9b   : > { %v15480_v45 = vpop.f32.mrf.mxu1 }
 0xbb1   : > { %v6512_v0 = vpop.f32.mrf.mxu3 }
 0xbb2   : > { %v6513_v36 = vadd.f32 %v6512_v0, %v6490_v11  ;;  %v6283_v11 = vadd.f32 %v6282_v17, %v6260_v46  ;;  %v6352_v0 = vadd.f32 %v6351_v10, %v15482_v24  ;;  %v15513_v10 = vmax.f32 %v6467_v4, 0.0 }
 0xbb3   : > { %v6558_v20 = vpop.f32.mrf.mxu1  ;;  %v6168_v46 = vadd.f32 %v15438_v7, %v15482_v24 }
 0xbb4   : > { %v15486_v49 = vmax.f32 %v6513_v36, 0.0  ;;  %v6559_v53 = vadd.f32 %v6558_v20, %v6536_v42  ;;  %v15506_v43 = vmax.f32 %v6283_v11, 0.0  ;;  %v6375_v36 = vadd.f32 %v6374_v26, %v6352_v0 }
 0xbb5   : > { %v6398_v42 = vadd.f32 %v6397_v19, %v15482_v24  ;;  %v6214_v26 = vadd.f32 %v15450_v55, %v15482_v24  ;;  %v5938_v20 = vadd.f32 %v15401_v50, %v15482_v24  ;;  %v5984_v55 = vadd.f32 %v15405_v63, %v15482_v24 }
 0xbb6   : > { %6918 = vrot.lane.b32.xlu1 %v15486_v49, %s17291_s22  ;;  %6800 = vrot.lane.b32.xlu2 %v15486_v49, %s17290_s21  ;;  %v15494_v40 = vmax.f32 %v6559_v53, 0.0  ;;  %v15511_v17 = vmax.f32 %v6375_v36, 0.0  ;;  %v6076_v11 = vadd.f32 %v15422_v41, %v15482_v24 }
 0xbb7   : > { %v6421_v48 = vadd.f32 %v6420_v57, %v6398_v42  ;;  %v6237_v19 = vadd.f32 %v15458_v31, %v6214_v26  ;;  %v6053_v31 = vadd.f32 %v15428_v33, %v6030_v6  ;;  %v5961_v53 = vadd.f32 %v15411_v15, %v5938_v20 }
 0xbb8   : > { %6802 = vrot.lane.b32.xlu0 %v15494_v40, %s17290_s21  ;;  %v6007_v38 = vadd.f32 %v15416_v25, %v5984_v55  ;;  %v6122_v15 = vadd.f32 %v15434_v5, %v15482_v24  ;;  %v6191_v25 = vadd.f32 %v15448_v14, %v6168_v46  ;;  %v6099_v33 = vadd.f32 %v15432_v51, %v6076_v11 }
 0xbb9   : > { %v15519_v3 = vmax.f32 %v6421_v48, 0.0  ;;  %v15550_v57 = vmax.f32 %v6237_v19, 0.0  ;;  %v15567_v58 = vmax.f32 %v6053_v31, 0.0  ;;  %v15569_v50 = vmax.f32 %v5961_v53, 0.0 }
 0xbba   : > { %v15579_v63 = vmax.f32 %v6007_v38, 0.0  ;;  %v6145_v41 = vadd.f32 %v15444_v44, %v6122_v15  ;;  %v15588_v7 = vmax.f32 %v6191_v25, 0.0  ;;  %v15590_v0 = vmax.f32 %v6099_v33, 0.0 }
 0xbbb   : > { %v5892_v14 = vadd.f32 %v15392_v47, %v15482_v24 }
 0xbbc   : > { %v15596_v5 = vmax.f32 %v6145_v41, 0.0 }
 0xbbd   : > { %v5915_v36 = vadd.f32 %v15398_v21, %v5892_v14 }
 0xbbe   : > { %6642 = vrot.lane.b32.xlu1 %v15498_v22, %s17356_s3  ;;  %6920 = vrot.lane.b32.xlu2 %v15494_v40, %s17291_s22 }
 0xbbf   : > { %v15627_v4 = vmax.f32 %v5915_v36, 0.0 }
 0xbc0   : > { %6640 = vrot.lane.b32.xlu0 %v15506_v43, %s17356_s3 }
 0xbc6   : > { %6648 = vrot.lane.b32.xlu1 %v15513_v10, %s17356_s3  ;;  %6644 = vrot.lane.b32.xlu2 %v15511_v17, %s17356_s3 }
 0xbc8   : > { %6646 = vrot.lane.b32.xlu0 %v15519_v3, %s17356_s3 }
 0xbce   : > { %6790 = vrot.lane.b32.xlu1 %v15506_v43, %s17290_s21  ;;  %6650 = vrot.lane.b32.xlu2 %v15486_v49, %s17356_s3 }
 0xbd0   : > { %6652 = vrot.lane.b32.xlu0 %v15494_v40, %s17356_s3 }
 0xbd6   : > { %6796 = vrot.lane.b32.xlu1 %v15519_v3, %s17290_s21  ;;  %6792 = vrot.lane.b32.xlu2 %v15498_v22, %s17290_s21 }
 0xbd8   : > { %6794 = vrot.lane.b32.xlu0 %v15511_v17, %s17290_s21 }
 0xbde   : > { %6910 = vrot.lane.b32.xlu1 %v15498_v22, %s17291_s22  ;;  %6798 = vrot.lane.b32.xlu2 %v15513_v10, %s17290_s21 }
 0xbe0   : > { %6908 = vrot.lane.b32.xlu0 %v15506_v43, %s17291_s22 }
 0xbe6   : > { %6916 = vrot.lane.b32.xlu1 %v15513_v10, %s17291_s22  ;;  %6912 = vrot.lane.b32.xlu2 %v15511_v17, %s17291_s22 }
 0xbe8   : > { %6914 = vrot.lane.b32.xlu0 %v15519_v3, %s17291_s22 }
 0xbee   : > { %6906 = vrot.lane.b32.xlu1 %v15550_v57, %s17291_s22  ;;  %6638 = vrot.lane.b32.xlu2 %v15550_v57, %s17356_s3 }
 0xbf0   : > { %6788 = vrot.lane.b32.xlu0 %v15550_v57, %s17290_s21 }
 0xbf6   : > { %6630 = vrot.lane.b32.xlu1 %v15567_v58, %s17356_s3  ;;  %6626 = vrot.lane.b32.xlu2 %v15569_v50, %s17356_s3 }
 0xbf8   : > { %6628 = vrot.lane.b32.xlu0 %v15579_v63, %s17356_s3 }
 0xbfe   : > { %6636 = vrot.lane.b32.xlu1 %v15588_v7, %s17356_s3  ;;  %6632 = vrot.lane.b32.xlu2 %v15590_v0, %s17356_s3 }
 0xc00   : > { %6634 = vrot.lane.b32.xlu0 %v15596_v5, %s17356_s3 }
 0xc06   : > { %6780 = vrot.lane.b32.xlu1 %v15567_v58, %s17290_s21  ;;  %6776 = vrot.lane.b32.xlu2 %v15569_v50, %s17290_s21 }
 0xc08   : > { %6778 = vrot.lane.b32.xlu0 %v15579_v63, %s17290_s21 }
 0xc0e   : > { %6786 = vrot.lane.b32.xlu1 %v15588_v7, %s17290_s21  ;;  %6782 = vrot.lane.b32.xlu2 %v15590_v0, %s17290_s21 }
 0xc10   : > { %v6801_v51 = vpop.permute.xlu2 %6800  ;;  %6784 = vrot.lane.b32.xlu0 %v15596_v5, %s17290_s21 }
 0xc16   : > { %6898 = vrot.lane.b32.xlu1 %v15567_v58, %s17291_s22  ;;  %6894 = vrot.lane.b32.xlu2 %v15569_v50, %s17291_s22 }
 0xc18   : > { %v6921_v44 = vpop.permute.xlu2 %6920  ;;  %6896 = vrot.lane.b32.xlu0 %v15579_v63, %s17291_s22 }
 0xc1e   : > { %6904 = vrot.lane.b32.xlu1 %v15588_v7, %s17291_s22  ;;  %6900 = vrot.lane.b32.xlu2 %v15590_v0, %s17291_s22 }
 0xc20   : > { %v6645_v34 = vpop.permute.xlu2 %6644  ;;  %6902 = vrot.lane.b32.xlu0 %v15596_v5, %s17291_s22 }
 0xc26   : > { %6892 = vrot.lane.b32.xlu1 %v15627_v4, %s17291_s22  ;;  %6624 = vrot.lane.b32.xlu2 %v15627_v4, %s17356_s3 }
 0xc28   : > { %v6919_v47 = vpop.permute.xlu1 %6918  ;;  %v6651_v24 = vpop.permute.xlu2 %6650  ;;  %6774 = vrot.lane.b32.xlu0 %v15627_v4, %s17290_s21 }
 0xc29   : > { %v6965_v55 = vsel %vm17259_vm14, %v6919_v47, %v6921_v44 }
 0xc2a   : > { %v6803_v42 = vpop.permute.xlu0 %6802  ;;  %v7008_v46 = vsel %vm17517_vm11, %v6965_v55, 0.0  ;;  %vm17264_vm11 = vcmask 1045506  }
 0xc2b   : > { %v6847_v31 = vsel %vm17260_vm9, %v6801_v51, %v6803_v42 }
 0xc2c   : > { %v6890_v11 = vsel %vm17518_vm4, %v6847_v31, 0.0  ;;  %vm17524_vm4 = vcmask 1043458  }
 0xc2d   : > { %v7023_v41 = vmax.f32 %v6890_v11, %v7008_v46 }
 0xc30   : > { %v6643_v48 = vpop.permute.xlu1 %6642  ;;  %v6793_v26 = vpop.permute.xlu2 %6792 }
 0xc32   : > { %v6641_v21 = vpop.permute.xlu0 %6640 }
 0xc38   : > { %v6649_v19 = vpop.permute.xlu1 %6648  ;;  %v6799_v6 = vpop.permute.xlu2 %6798 }
 0xc39   : > { %v6846_v1 = vsel %vm17260_vm9, %v6799_v6, %v6801_v51 }
 0xc3a   : > { %v6647_v20 = vpop.permute.xlu0 %6646 }
 0xc40   : > { %v15637_v53 = vpop.permute.xlu1 %6790  ;;  %v6913_v38 = vpop.permute.xlu2 %6912 }
 0xc42   : > { %v6653_v15 = vpop.permute.xlu0 %6652 }
 0xc43   : > { %v6697_v25 = vsel %vm17258_vm7, %v6651_v24, %v6653_v15  ;;  %v6742_v33 = vsel %vm17519_vm10, %v6653_v15, 0.0  ;;  %vm17261_vm10 = vcmask 1042433  }
 0xc44   : > { %v6757_v14 = vmax.f32 %v15486_v49, %v6697_v25  ;;  %v6758_v36 = vmax.f32 %v15494_v40, %v6742_v33  ;;  %v6696_v25 = vsel %vm17258_vm7, %v6649_v19, %v6651_v24  ;;  %v6694_v33 = vsel %vm17258_vm7, %v6645_v34, %v6647_v20 }
 0xc45   : > { %v6756_v12 = vmax.f32 %v15513_v10, %v6696_v25  ;;  %v6754_v27 = vmax.f32 %v15511_v17, %v6694_v33 }
 0xc46   : > { %v7051_v44 = vmax.f32 %v6757_v14, %v7023_v41  ;;  %v7052_v30 = vmax.f32 %v6758_v36, 0.0  ;;  %v6695_v41 = vsel %vm17258_vm7, %v6647_v20, %v6649_v19  ;;  %v6693_v14 = vsel %vm17258_vm7, %v6643_v48, %v6645_v34 }
 0xc47   : > { %v6692_v36 = vsel %vm17258_vm7, %v6641_v21, %v6643_v48  ;;  %v6755_v24 = vmax.f32 %v15519_v3, %v6695_v41  ;;  %v6842_v34 = vsel %vm17260_vm9, %v15637_v53, %v6793_v26  ;;  %v6753_v33 = vmax.f32 %v15498_v22, %v6693_v14 }
 0xc48   : > { %v6797_v42 = vpop.permute.xlu1 %6796  ;;  %v15645_v2 = vrot.slane %v7051_v44, 2  ;;  %v15647_v54 = vrot.slane %v7052_v30, 1  ;;  %v15649_v55 = vpop.permute.xlu2 %6638 }
 0xc49   : > { %v6845_v48 = vsel %vm17260_vm9, %v6797_v42, %v6799_v6 }
 0xc4a   : > { %v6795_v31 = vpop.permute.xlu0 %6794  ;;  %v15654_v46 = vsel %vm7114_vm0, %v15645_v2, %v15647_v54  ;;  %v15659_v49 = vsel %vm7118_vm3, %v15645_v2, %v15647_v54  ;;  %v15664_v30 = vsel %vm7104_vm12, %v15645_v2, %v15647_v54 }
 0xc4b   : > { %v6843_v10 = vsel %vm17260_vm9, %v6793_v26, %v6795_v31  ;;  %v6844_v51 = vsel %vm17260_vm9, %v6795_v31, %v6797_v42  ;;  %v6752_v26 = vmax.f32 %v15506_v43, %v6692_v36 }
 0xc50   : > { %v6911_v40 = vpop.permute.xlu1 %6910  ;;  %v15666_v15 = vpop.permute.xlu2 %6626 }
 0xc51   : > { %v6961_v32 = vsel %vm17259_vm14, %v6911_v40, %v6913_v38 }
 0xc52   : > { %v6909_v11 = vpop.permute.xlu0 %6908  ;;  %v7019_v25 = vmax.f32 %v6843_v10, %v6961_v32 }
 0xc53   : > { %v6960_v19 = vsel %vm17259_vm14, %v6909_v11, %v6911_v40 }
 0xc54   : > { %v7047_v42 = vmax.f32 %v6753_v33, %v7019_v25 }
 0xc58   : > { %v6917_v44 = vpop.permute.xlu1 %6916 }
 0xc59   : > { %v6964_v13 = vsel %vm17259_vm14, %v6917_v44, %v6919_v47 }
 0xc5a   : > { %v7022_v52 = vmax.f32 %v6846_v1, %v6964_v13  ;;  %v6915_v20 = vpop.permute.xlu0 %6914  ;;  %v6691_v1 = vsel %vm17258_vm7, %v15649_v55, %v6641_v21  ;;  %v7018_v13 = vmax.f32 %v6842_v34, %v6960_v19  ;;  %vm17520_vm7 = vcmask 1046528  }
 0xc5b   : > { %v6962_v47 = vsel %vm17259_vm14, %v6913_v38, %v6915_v20  ;;  %v6963_v17 = vsel %vm17259_vm14, %v6915_v20, %v6917_v44  ;;  %v6751_v38 = vmax.f32 %v15550_v57, %v6691_v1  ;;  %v7339_v57 = vsel %vm7098_vm6, %v15645_v2, %v15647_v54 }
 0xc5c   : > { %v7050_v29 = vmax.f32 %v6756_v12, %v7022_v52  ;;  %v7020_v3 = vmax.f32 %v6844_v51, %v6962_v47  ;;  %v7021_v40 = vmax.f32 %v6845_v48, %v6963_v17  ;;  %v15693_v52 = vpop.permute.xlu2 %6632  ;;  %v7046_v31 = vmax.f32 %v6752_v26, %v7018_v13 }
 0xc5d   : > { %v7331_v36 = vsel %vm17520_vm7, %v15647_v54, %v15645_v2  ;;  %v7307_v44 = vrot.slane %v7047_v42, 6 }
 0xc5e   : > { %v15691_v6 = vrot.slane %v7050_v29, 3  ;;  %v7048_v32 = vmax.f32 %v6754_v27, %v7020_v3  ;;  %v7049_v12 = vmax.f32 %v6755_v24, %v7021_v40  ;;  %v7324_v29 = vsel %vm17266_vm13, %v15645_v2, %v15647_v54 }
 0xc5f   : > { %v7355_v24 = vsel %vm7100_vm2, %v15645_v2, %v15647_v54  ;;  %v7306_v19 = vrot.slane %v7046_v31, 7 }
 0xc60   : > { %v15696_v21 = vpop.permute.xlu1 %6906  ;;  %v15698_v22 = vrot.slane %v7049_v12, 4  ;;  %v7308_v43 = vrot.slane %v7048_v32, 5 }
 0xc61   : > { %v6959_v27 = vsel %vm17259_vm14, %v15696_v21, %v6909_v11  ;;  %vm17268_vm14 = vcmask 1043456  }
 0xc62   : > { %v15708_v41 = vpop.permute.xlu0 %6788  ;;  %v7323_v14 = vsel %vm7104_vm12, %v15698_v22, %v15691_v6  ;;  %v7321_v48 = vsel %vm7100_vm2, %v7307_v44, %v7308_v43  ;;  %v7336_v51 = vsel %vm7104_vm12, %v7307_v44, %v7308_v43  ;;  %v7330_v25 = vsel %vm7118_vm3, %v15698_v22, %v15691_v6 }
 0xc63   : > { %v6841_v11 = vsel %vm17260_vm9, %v15708_v41, %v15637_v53  ;;  %v7325_v10 = vsel %vm17262_vm5, %v7323_v14, %v7324_v29  ;;  %v7338_v53 = vsel %vm17266_vm13, %v15698_v22, %v15691_v6  ;;  %vm17521_vm9 = vmmov %vm17520_vm7  ;;  %v7362_v17 = vsel %vm7112_vm15, %v15698_v22, %v15691_v6 }
 0xc64   : > { %v7017_v34 = vmax.f32 %v6841_v11, %v6959_v27  ;;  %v7360_v47 = vsel %vm17521_vm9, %v7308_v43, %v7307_v44  ;;  %v7364_v13 = vsel %vm17261_vm10, %v7362_v17, %v15654_v46  ;;  %v7376_v3 = vsel %vm7112_vm15, %v7307_v44, %v7308_v43  ;;  %v15746_v26 = vpop.permute.xlu2 %6776 }
 0xc65   : > { %v7378_v40 = vsel %vm7114_vm0, %v15698_v22, %v15691_v6  ;;  %v7368_v33 = vsel %vm7098_vm6, %v7307_v44, %v7308_v43  ;;  %vm17522_vm9 = vcmask 1045504   ;;  %v7328_v46 = vsel %vm7114_vm0, %v7307_v44, %v7308_v43 }
 0xc66   : > { %v15728_v20 = vmax.f32 %v6751_v38, %v7017_v34  ;;  %v7340_v38 = vsel %vm17522_vm9, %v7339_v57, %v7338_v53  ;;  %vm17523_vm7 = vcmask 1041408   ;;  %v7332_v27 = vsel %vm7121_vm1, %v7330_v25, %v7331_v36 }
 0xc67   : > { %v7352_v53 = vsel %vm17266_vm13, %v7307_v44, %v7308_v43  ;;  %v7344_v25 = vsel %vm7118_vm3, %v7307_v44, %v7308_v43  ;;  %v7347_v44 = vsel %vm7112_vm15, %v15645_v2, %v15647_v54  ;;  %v5863_v54 = vld [vmem:[%s17185_s6 + $0x8] sm:$0xff] }
 0xc68   : > { %v15737_v1 = vpop.permute.xlu1 %6630  ;;  %v7320_v32 = vsel %vm7098_vm6, %v15728_v20, %v7306_v19  ;;  %v7335_v12 = vsel %vm7100_vm2, %v15728_v20, %v7306_v19  ;;  %v7327_v29 = vsel %vm7112_vm15, %v15728_v20, %v7306_v19  ;;  %v7351_v57 = vsel %vm7104_vm12, %v15728_v20, %v7306_v19 }
 0xc69   : > { %v7322_v42 = vsel %vm17523_vm7, %v7320_v32, %v7321_v48  ;;  %v7337_v31 = vsel %vm17524_vm4, %v7335_v12, %v7336_v51  ;;  %v7329_v17 = vsel %vm17261_vm10, %v7327_v29, %v7328_v46  ;;  %vm17263_vm4 = vcmask 1046531  }
 0xc6a   : > { %v15759_v14 = vpop.permute.xlu0 %6628  ;;  %v7326_v11 = vsel %vm17268_vm14, %v7322_v42, %v7325_v10  ;;  %v7341_v34 = vsel %vm17264_vm11, %v7337_v31, %v7340_v38  ;;  %v7333_v51 = vsel %vm17265_vm8, %v7329_v17, %v7332_v27  ;;  %v7354_v10 = vsel %vm7098_vm6, %v15698_v22, %v15691_v6 }
 0xc6b   : > { %7446 = vrot.lane.b32.xlu2 %v7326_v11, %s11124_s15  ;;  %v7342_v48 = vrot.slane %v7341_v34, 2  ;;  %v7334_v36 = vrot.slane %v7333_v51, 1  ;;  %vm17525_vm7 = vcmask 1046528   ;;  %v7353_v12 = vsel %vm17262_vm5, %v7351_v57, %v7352_v53 }
 0xc6c   : > { %v7346_v32 = vsel %vm17525_vm7, %v15691_v6, %v15698_v22  ;;  %v7343_v38 = vsel %vm7114_vm0, %v15728_v20, %v7306_v19  ;;  %v7359_v46 = vsel %vm7118_vm3, %v15728_v20, %v7306_v19  ;;  %vm17526_vm9 = vmmov %vm17525_vm7  ;;  %vm17527_vm10 = vcmask 1044483  }
 0xc6d   : > { %7450 = vrot.lane.b32.xlu1 %v7342_v48, %s11124_s15  ;;  %v7375_v42 = vsel %vm17526_vm9, %v7306_v19, %v15728_v20  ;;  %7448 = vrot.lane.b32.xlu0 %v7334_v36, %s11124_s15  ;;  %v7345_v43 = vsel %vm17527_vm10, %v7343_v38, %v7344_v25  ;;  %v7361_v31 = vsel %vm7121_vm1, %v7359_v46, %v7360_v47  ;;  %vm17528_vm7 = vcmask 1046529   ;;  %vm17530_vm9 = vmmov %vm17527_vm10 }
 0xc6e   : > { %v7377_v29 = vsel %vm17528_vm7, %v7376_v3, %v7375_v42  ;;  %vm17529_vm5 = vcmask 1041408   ;;  %v15793_v34 = vsel %vm17265_vm8, %v7364_v13, %v7361_v31  ;;  %v7380_v17 = vsel %vm17530_vm9, %v7378_v40, %v15659_v49  ;;  %vm17531_vm10 = vmmov %vm17528_vm7 }
 0xc6f   : > { %v7356_v11 = vsel %vm17529_vm5, %v7354_v10, %v7355_v24  ;;  %v7367_v57 = vsel %vm17266_vm13, %v15728_v20, %v7306_v19  ;;  %v7348_v47 = vsel %vm17531_vm10, %v7347_v44, %v7346_v32  ;;  %v15805_v3 = vsel %vm17263_vm4, %v7380_v17, %v7377_v29  ;;  %v6783_v19 = vpop.permute.xlu2 %6782 }
 0xc70   : > { %v6637_v27 = vpop.permute.xlu1 %6636  ;;  %v7357_v2 = vsel %vm17268_vm14, %v7356_v11, %v7353_v12  ;;  %v7349_v24 = vsel %vm17263_vm4, %v7345_v43, %v7348_v47  ;;  %vm17532_vm5 = vcmask 1045504   ;;  %v7370_v49 = vsel %vm7100_vm2, %v15698_v22, %v15691_v6 }
 0xc71   : > { %v7369_v13 = vsel %vm17532_vm5, %v7368_v33, %v7367_v57  ;;  %vm17533_vm7 = vcmask 1043458   ;;  %v7358_v51 = vrot.slane %v7357_v2, 4  ;;  %v7350_v36 = vrot.slane %v7349_v24, 3 }
 0xc72   : > { %v6635_v40 = vpop.permute.xlu0 %6634  ;;  %v7372_v48 = vsel %vm17533_vm7, %v7370_v49, %v15664_v30  ;;  %vm17534_vm9 = vcmask 793600   ;;  %vm17536_vm5 = vcmask 1039360   ;;  %vm17538_vm4 = vcmask 801792  }
 0xc73   : > { %5871 = vperm.xlu2 %10963, %v5863_v54   ;;  %v15815_v53 = vsel %vm17264_vm11, %v7372_v48, %v7369_v13  ;;  %vm17535_vm10 = vmmov %vm17534_vm9  ;;  %v6687_v42 = vsel %vm17536_vm5, %v15737_v1, %v15693_v52 }
 0xc74   : > { %vm17537_vm7 = vmmov %vm17536_vm5  ;;  %v6747_v54 = vmax.f32 %v15567_v58, %v6687_v42 }
 0xc75   : > { %7454 = vrot.lane.b32.xlu1 %v7358_v51, %s11124_s15  ;;  %7452 = vrot.lane.b32.xlu0 %v7350_v36, %s11124_s15  ;;  %v6686_v43 = vsel %vm17537_vm7, %v15759_v14, %v15737_v1  ;;  %vm17539_vm11 = vmmov %vm17538_vm4 }
 0xc76   : > { %vm17540_vm8 = vmmov %vm17534_vm9  ;;  %v6746_v47 = vmax.f32 %v15579_v63, %v6686_v43 }
 0xc77   : > { %v6895_v25 = vpop.permute.xlu2 %6894 }
 0xc78   : > { %v6781_v33 = vpop.permute.xlu1 %6780 }
 0xc79   : > { %v6837_v44 = vsel %vm17538_vm4, %v6781_v33, %v6783_v19 }
 0xc7a   : > { %v6779_v10 = vpop.permute.xlu0 %6778 }
 0xc7b   : > { %v6836_v31 = vsel %vm17539_vm11, %v6779_v10, %v6781_v33  ;;  %vm17544_vm11 = vmmov %vm17538_vm4 }
 0xc7f   : > { %v6901_v22 = vpop.permute.xlu2 %6900 }
 0xc80   : > { %v6787_v32 = vpop.permute.xlu1 %6786 }
 0xc81   : > { %v6840_v13 = vsel %vm17544_vm11, %v6787_v32, %v15708_v41  ;;  %vm17549_vm11 = vmmov %vm17540_vm8 }
 0xc82   : > { %v6785_v6 = vpop.permute.xlu0 %6784 }
 0xc87   : > { %v6625_v49 = vpop.permute.xlu2 %6624 }
 0xc88   : > { %v6899_v12 = vpop.permute.xlu1 %6898 }
 0xc89   : > { %v6955_v38 = vsel %vm17534_vm9, %v6899_v12, %v6901_v22  ;;  %vm17541_vm9 = vmmov %vm17536_vm5 }
 0xc8a   : > { %v6897_v30 = vpop.permute.xlu0 %6896  ;;  %v7013_v29 = vmax.f32 %v6837_v44, %v6955_v38  ;;  %v6690_v57 = vsel %vm17541_vm9, %v6637_v27, %v15649_v55 }
 0xc8b   : > { %v6954_v46 = vsel %vm17535_vm10, %v6897_v30, %v6899_v12  ;;  %v6953_v11 = vsel %vm17540_vm8, %v6895_v25, %v6897_v30  ;;  %vm17542_vm10 = vmmov %vm17536_vm5  ;;  %v6750_v58 = vmax.f32 %v15588_v7, %v6690_v57 }
 0xc8c   : > { %v7012_v17 = vmax.f32 %v6836_v31, %v6954_v46  ;;  %v6685_v2 = vsel %vm17542_vm10, %v15666_v15, %v15759_v14  ;;  %vm17543_vm5 = vmmov %vm17538_vm4  ;;  %v7041_v51 = vmax.f32 %v6747_v54, %v7013_v29 }
 0xc8d   : > { %v6835_v1 = vsel %vm17543_vm5, %v15746_v26, %v6779_v10  ;;  %v6745_v14 = vmax.f32 %v15569_v50, %v6685_v2  ;;  %vm17545_vm4 = vmmov %vm17537_vm7  ;;  %v6839_v30 = vsel %vm17543_vm5, %v6785_v6, %v6787_v32 }
 0xc8e   : > { %v7011_v55 = vmax.f32 %v6835_v1, %v6953_v11  ;;  %v7040_v33 = vmax.f32 %v6746_v47, %v7012_v17  ;;  %v6688_v63 = vsel %vm17545_vm4, %v15693_v52, %v6635_v40  ;;  %vm17546_vm7 = vmmov %vm17545_vm4  ;;  %v7086_v50 = vrot.slane %v7041_v51, 5 }
 0xc8f   : > { %v6689_v12 = vsel %vm17546_vm7, %v6635_v40, %v6637_v27  ;;  %vm17547_vm9 = vmmov %vm17545_vm4  ;;  %v6748_v31 = vmax.f32 %v15590_v0, %v6688_v63  ;;  %v17551_v1 = vlaneseq }
 0xc90   : > { %v6905_v24 = vpop.permute.xlu1 %6904  ;;  %v6684_v41 = vsel %vm17547_vm9, %v6625_v49, %v15666_v15  ;;  %vm17548_vm10 = vmmov %vm17543_vm5  ;;  %v7039_v7 = vmax.f32 %v6745_v14, %v7011_v55  ;;  %v7085_v43 = vrot.slane %v7040_v33, 6  ;;  %v6749_v27 = vmax.f32 %v15596_v5, %v6689_v12 }
 0xc91   : > { %v6958_v48 = vsel %vm17540_vm8, %v6905_v24, %v15696_v21  ;;  %v6838_v38 = vsel %vm17548_vm10, %v6783_v19, %v6785_v6  ;;  %v7090_v19 = vrot.slane %v15728_v20, 1  ;;  %v6744_v29 = vmax.f32 %v15627_v4, %v6684_v41  ;;  %vm17550_vm4 = vmmov %vm17540_vm8 }
 0xc92   : > { %v7016_v36 = vmax.f32 %v6840_v13, %v6958_v48  ;;  %v6903_v10 = vpop.permute.xlu0 %6902  ;;  %v15858_v32 = vrot.slane %v7039_v7, 7  ;;  %v7101_v6 = vsel %vm7100_vm2, %v7085_v43, %v7086_v50  ;;  %v7127_v57 = vsel %vm7104_vm12, %v7085_v43, %v7086_v50  ;;  %vm17554_vm9 = vmmov %vm17543_vm5 }
 0xc93   : > { %v6956_v46 = vsel %vm17549_vm11, %v6901_v22, %v6903_v10  ;;  %v6957_v42 = vsel %vm17540_vm8, %v6903_v10, %v6905_v24  ;;  %v7115_v22 = vsel %vm7114_vm0, %v7085_v43, %v7086_v50  ;;  %v7138_v0 = vsel %vm7118_vm3, %v7085_v43, %v7086_v50 }
 0xc94   : > { %v7044_v21 = vmax.f32 %v6750_v58, %v7016_v36  ;;  %v7014_v44 = vmax.f32 %v6838_v38, %v6956_v46  ;;  %v7015_v52 = vmax.f32 %v6839_v30, %v6957_v42  ;;  %v7149_v5 = vsel %vm17266_vm13, %v7085_v43, %v7086_v50 }
 0xc95   : > { %vm15868_vm7 = vcmp.lt.s32.totalorder %v17551_v1, 900  ;;  %vm17555_vm10 = vcmask 1046528   ;;  %v7165_v7 = vsel %vm7098_vm6, %v7085_v43, %v7086_v50  ;;  %v7173_v46 = vsel %vm7112_vm15, %v7085_v43, %v7086_v50 }
 0xc96   : > { %v7089_v40 = vrot.slane %v7044_v21, 2  ;;  %v7042_v11 = vmax.f32 %v6748_v31, %v7014_v44  ;;  %v7043_v17 = vmax.f32 %v6749_v27, %v7015_v52  ;;  %vm17556_vm5 = vmmov %vm17555_vm10  ;;  %vm17558_vm8 = vcmask 1045508  }
 0xc97   : > { %vm17557_vm11 = vmmov %vm17556_vm5 }
 0xc98   : > { %v6893_v15 = vpop.permute.xlu1 %6892  ;;  %v7107_v20 = vsel %vm17266_vm13, %v7089_v40, %v7090_v19  ;;  %v7087_v4 = vrot.slane %v7042_v11, 4  ;;  %v7088_v47 = vrot.slane %v7043_v17, 3  ;;  %v7120_v49 = vsel %vm17555_vm10, %v7090_v19, %v7089_v40 }
 0xc99   : > { %v6952_v54 = vsel %vm17550_vm4, %v6893_v15, %v6895_v25  ;;  %v7131_v48 = vsel %vm7098_vm6, %v7089_v40, %v7090_v19  ;;  %v7142_v55 = vsel %vm7112_vm15, %v7089_v40, %v7090_v19  ;;  %v7152_v25 = vsel %vm7100_vm2, %v7089_v40, %v7090_v19 }
 0xc9a   : > { %v6775_v2 = vpop.permute.xlu0 %6774  ;;  %v7160_v58 = vsel %vm7114_vm0, %v7089_v40, %v7090_v19  ;;  %v7168_v51 = vsel %vm7104_vm12, %v7089_v40, %v7090_v19  ;;  %v7105_v36 = vsel %vm7104_vm12, %v7087_v4, %v7088_v47  ;;  %v7176_v14 = vsel %vm7118_vm3, %v7089_v40, %v7090_v19 }
 0xc9b   : > { %v6834_v13 = vsel %vm17554_vm9, %v6775_v2, %v15746_v26  ;;  %v7119_v63 = vsel %vm7118_vm3, %v7087_v4, %v7088_v47  ;;  %v7130_v26 = vsel %vm17266_vm13, %v7087_v4, %v7088_v47  ;;  %v7141_v10 = vsel %vm17556_vm5, %v7088_v47, %v7087_v4 }
 0xc9c   : > { %v7010_v33 = vmax.f32 %v6834_v13, %v6952_v54  ;;  %v7151_v12 = vsel %vm7098_vm6, %v7087_v4, %v7088_v47  ;;  %v7159_v41 = vsel %vm7112_vm15, %v7087_v4, %v7088_v47  ;;  %v7167_v38 = vsel %vm7100_vm2, %v7087_v4, %v7088_v47 }
 0xc9d   : > { %v7175_v21 = vsel %vm7114_vm0, %v7087_v4, %v7088_v47  ;;  %v7157_v30 = vsel %vm17557_vm11, %v7086_v50, %v7085_v43  ;;  %v7109_v42 = vsel %vm17558_vm8, %v7105_v36, %v7107_v20  ;;  %v7122_v44 = vsel %vm7121_vm1, %v7119_v63, %v7120_v49 }
 0xc9e   : > { %vm17559_vm4 = vcmask 1045504   ;;  %vm17560_vm9 = vcmask 1046529   ;;  %v7038_v27 = vmax.f32 %v6744_v29, %v7010_v33  ;;  %vm17561_vm10 = vcmask 1041408  }
 0xc9f   : > { %v7133_v52 = vsel %vm17559_vm4, %v7131_v48, %v7130_v26  ;;  %v7144_v31 = vsel %vm17560_vm9, %v7142_v55, %v7141_v10  ;;  %v7153_v40 = vsel %vm17561_vm10, %v7151_v12, %v7152_v25  ;;  %vm17562_vm5 = vcmask 1042433   ;;  %vm17565_vm8 = vmmov %vm17561_vm10 }
 0xca0   : > { %v7161_v15 = vsel %vm17562_vm5, %v7159_v41, %v7160_v58  ;;  %vm17563_vm13 = vcmask 1043458   ;;  %vm17564_vm11 = vcmask 1044483   ;;  %v7099_v50 = vsel %vm7098_vm6, %v7038_v27, %v15858_v32  ;;  %vm17566_vm4 = vmmov %vm17562_vm5 }
 0xca1   : > { %v7169_v19 = vsel %vm17563_vm13, %v7167_v38, %v7168_v51  ;;  %v7177_v11 = vsel %vm17564_vm11, %v7175_v21, %v7176_v14  ;;  %v7113_v43 = vsel %vm7112_vm15, %v7038_v27, %v15858_v32  ;;  %v7126_v17 = vsel %vm7100_vm2, %v7038_v27, %v15858_v32  ;;  %vm17567_vm9 = vmmov %vm17563_vm13  ;;  %v7591_v38 = vld [vmem:[%s17188_s9] sm:$0xff]  ;;  %v7592_v21 = vld [vmem:[%s17188_s9 + $0x8] sm:$0xff] }
 0xca2   : > { %v7137_v29 = vsel %vm7114_vm0, %v7038_v27, %v15858_v32  ;;  %v7103_v54 = vsel %vm17565_vm8, %v7099_v50, %v7101_v6  ;;  %v7117_v2 = vsel %vm17566_vm4, %v7113_v43, %v7115_v22  ;;  %v7129_v20 = vsel %vm17567_vm9, %v7126_v17, %v7127_v57  ;;  %vm17568_vm13 = vmmov %vm17564_vm11  ;;  %7760 = vmatpush.xpose.msra.mxu2 %v7591_v38  ;;  %v6561_v43 = vpop.f32.mrf.mxu1 }
 0xca3   : > { %v7140_v4 = vsel %vm17568_vm13, %v7137_v29, %v7138_v0  ;;  %v7111_v47 = vsel %vm17268_vm14, %v7103_v54, %v7109_v42  ;;  %vm17569_vm10 = vcmask 1044481   ;;  %vm17570_vm5 = vcmask 1045506   ;;  %7780 = vmatpush.xpose.msra.mxu3 %v7592_v21  ;;  %v7596_v42 = vld [vmem:[%s17188_s9 + $0x28] sm:$0xff] }
 0xca4   : > { %v7124_v1 = vsel %vm17569_vm10, %v7117_v2, %v7122_v44  ;;  %v7135_v13 = vsel %vm17570_vm5, %v7129_v20, %v7133_v52  ;;  %vm17571_vm11 = vcmask 1046531   ;;  %v7148_v6 = vsel %vm7104_vm12, %v7038_v27, %v15858_v32  ;;  %7261 = vst.msk [vmem:[#allocation3] ss:$2 sm:$0xff] %vm15868_vm7, %v7111_v47  ;;  %v7597_v44 = vld [vmem:[%s17188_s9 + $0x30] sm:$0xff]  ;;  %v7598_v52 = vld [vmem:[%s17188_s9 + $0x38] sm:$0xff] }
 0xca5   : > { %v7146_v49 = vsel %vm17571_vm11, %v7140_v4, %v7144_v31  ;;  %v7125_v48 = vrot.slane %v7124_v1, 1  ;;  %v7136_v55 = vrot.slane %v7135_v13, 2  ;;  %vm17572_vm8 = vcmask 1045508  }
 0xca6   : > { %v7147_v25 = vrot.slane %v7146_v49, 3  ;;  %v7150_v22 = vsel %vm17572_vm8, %v7148_v6, %v7149_v5  ;;  %v7156_v57 = vsel %vm7118_vm3, %v7038_v27, %v15858_v32  ;;  %vm17573_vm4 = vcmask 1046534  }
 0xca7   : > { %v7164_v0 = vsel %vm17573_vm4, %v7038_v27, %v15858_v32  ;;  %vm17574_vm9 = vcmask 1046528   ;;  %v7154_v51 = vsel %vm17268_vm14, %v7153_v40, %v7150_v22  ;;  %v7158_v36 = vsel %vm7121_vm1, %v7156_v57, %v7157_v30  ;;  %7263 = vst.msk [vmem:[#allocation3 + $0x10] ss:$2 sm:$0xff] %vm15868_vm7, %v7125_v48  ;;  %v7593_v30 = vld [vmem:[%s17188_s9 + $0x10] sm:$0xff]  ;;  %7860 = vmatpush.xpose.msrb.mxu3 %v7596_v42  ;;  %v7606_v42 = vld [vmem:[%s17188_s9 + $0x78] sm:$0xff] }
 0xca8   : > { %v7172_v58 = vsel %vm17574_vm9, %v15858_v32, %v7038_v27  ;;  %vm17575_vm13 = vcmask 1045504   ;;  %vm17576_vm10 = vcmask 1046529   ;;  %v7155_v5 = vrot.slane %v7154_v51, 4  ;;  %7265 = vst.msk [vmem:[#allocation3 + $0x20] ss:$2 sm:$0xff] %vm15868_vm7, %v7136_v55  ;;  %7800 = vmatpush.xpose.msrb.mxu0 %v7593_v30  ;;  %v7599_v55 = vld [vmem:[%s17188_s9 + $0x40] sm:$0xff] }
 0xca9   : > { %v7166_v33 = vsel %vm17575_vm13, %v7165_v7, %v7164_v0  ;;  %v7174_v14 = vsel %vm17576_vm10, %v7173_v46, %v7172_v58  ;;  %vm17577_vm5 = vcmask 1044481   ;;  %vm17578_vm11 = vcmask 1045506   ;;  %7267 = vst.msk [vmem:[#allocation3 + $0x30] ss:$2 sm:$0xff] %vm15868_vm7, %v7147_v25  ;;  %v7594_v7 = vld [vmem:[%s17188_s9 + $0x18] sm:$0xff]  ;;  %v7595_v46 = vld [vmem:[%s17188_s9 + $0x20] sm:$0xff] }
 0xcaa   : > { %v7162_v63 = vsel %vm17577_vm5, %v7161_v15, %v7158_v36  ;;  %v7170_v26 = vsel %vm17578_vm11, %v7169_v19, %v7166_v33  ;;  %vm17579_vm8 = vcmask 1046531   ;;  %7269 = vst.msk [vmem:[#allocation3 + $0x40] ss:$2 sm:$0xff] %vm15868_vm7, %v7155_v5  ;;  %7820 = vmatpush.xpose.msrb.mxu1 %v7594_v7  ;;  %vm7739_vm4 = vcmask 31744   ;;  %7840 = vmatpush.xpose.msrb.mxu2 %v7595_v46  ;;  %v6492_v15 = vpop.f32.mrf.mxu2  ;;  %v6538_v19 = vpop.f32.mrf.mxu0  ;;  %v7601_v0 = vld [vmem:[%s17188_s9 + $0x50] sm:$0xff]  ;;  %v7603_v5 = vld [vmem:[%s17188_s9 + $0x60] sm:$0xff] }
 0xcab   : > { %v7178_v10 = vsel %vm17579_vm8, %v7177_v11, %v7174_v14  ;;  %v7163_v32 = vrot.slane %v7162_v63, 5  ;;  %v7171_v12 = vrot.slane %v7170_v26, 6  ;;  %vm17267_vm9 = vcmask 1014784   ;;  %v6515_v11 = vpop.f32.mrf.mxu3  ;;  %v7604_v63 = vld [vmem:[%s17188_s9 + $0x68] sm:$0xff] }
 0xcac   : > { %v7179_v41 = vrot.slane %v7178_v10, 7  ;;  %7880 = vmatpush.xpose.msra.mxu0 %v7597_v44  ;;  %vm17590_vm13 = vcmask 793600   ;;  %vm17591_vm10 = vcmask 801792   ;;  %vm17592_vm5 = vcmask 859136  }
 0xcad   : > { %7271 = vst.msk [vmem:[#allocation3 + $0x50] ss:$2 sm:$0xff] %vm15868_vm7, %v7163_v32  ;;  %vm17593_vm11 = vcmask 867328   ;;  %vm17597_vm8 = vcmask 1039360  }
 0xcae   : > { %7273 = vst.msk [vmem:[#allocation3 + $0x60] ss:$2 sm:$0xff] %vm15868_vm7, %v7171_v12  ;;  %10865 = vmatpush.xpose.msk.msra.mxu1 %vm7739_vm4, %v7598_v52 }
 0xcaf   : > { %7275 = vst.msk [vmem:[#allocation3 + $0x70] ss:$2 sm:$0xff] %vm15868_vm7, %v7179_v41 }
 0xcc5   : > { %v7447_v31 = vpop.permute.xlu2 %7446 }
 0xcc6   : > { %v7478_v27 = vrot.slane %v7447_v31, 1 }
 0xcc8   : > { %v7495_v40 = vsel %vm17267_vm9, %v7447_v31, %v7478_v27 }
 0xcc9   : > { %7528 = vst.msk [vmem:[#allocation3 + $0x1] ss:$2 sm:$0xff] %vm15868_vm7, %v7495_v40 }
 0xccd   : > { %v15976_v50 = vpop.permute.xlu2 %5871 }
 0xcce   : > { %v6493_v17 = vadd.f32 %v6492_v15, %v15976_v50  ;;  %v6539_v29 = vadd.f32 %v6538_v19, %v15976_v50  ;;  %v6309_v13 = vadd.f32 %v15466_v59, %v15976_v50  ;;  %v6263_v49 = vadd.f32 %v15460_v37, %v15976_v50  ;;  %v7600_v59 = vld [vmem:[%s17188_s9 + $0x48] sm:$0xff] }
 0xccf   : > { %v6355_v57 = vadd.f32 %v15468_v18, %v15976_v50  ;;  %v6401_v36 = vadd.f32 %v15474_v9, %v15976_v50  ;;  %v7602_v18 = vld [vmem:[%s17188_s9 + $0x58] sm:$0xff] }
 0xcd0   : > { %v7559_v54 = vld [vmem:[#allocation3] sm:$0xff]  ;;  %v7560_v2 = vld [vmem:[#allocation3 + $0x8] sm:$0xff]  ;;  %v6516_v20 = vadd.f32 %v6515_v11, %v6493_v17  ;;  %v6562_v4 = vadd.f32 %v6561_v43, %v6539_v29  ;;  %v6332_v48 = vadd.f32 %v15470_v56, %v6309_v13  ;;  %v6286_v22 = vadd.f32 %v15464_v35, %v6263_v49  ;;  %v7607_v17 = vld [vmem:[%s17188_s9 + $0x80] sm:$0xff] }
 0xcd1   : > { %7721 = vst [vmem:[#allocation1] ss:$4 sm:$0xff] %v7559_v54  ;;  %v6447_v56 = vadd.f32 %v15476_v62, %v15976_v50  ;;  %v6378_v62 = vadd.f32 %v15472_v60, %v6355_v57  ;;  %v6424_v12 = vadd.f32 %v15478_v39, %v6401_v36  ;;  %v7605_v39 = vld [vmem:[%s17188_s9 + $0x70] sm:$0xff] }
 0xcd2   : > { %7723 = vst [vmem:[#allocation1 + $0x20] ss:$4 sm:$0xff] %v7560_v2  ;;  %v15980_v47 = vmax.f32 %v6516_v20, 0.0  ;;  %v15982_v1 = vmax.f32 %v6562_v4, 0.0  ;;  %v16002_v37 = vmax.f32 %v6332_v48, 0.0  ;;  %v16011_v35 = vmax.f32 %v6286_v22, 0.0 }
 0xcd3   : > { %v6470_v33 = vadd.f32 %v15480_v45, %v6447_v56  ;;  %v16034_v38 = vmax.f32 %v6378_v62, 0.0  ;;  %v16047_v46 = vmax.f32 %v6424_v12, 0.0  ;;  %v7608_v2 = vld [vmem:[%s17188_s9 + $0x88] sm:$0xff]  ;;  %v7609_v49 = vld [vmem:[%s17188_s9 + $0x90] sm:$0xff]  ;;  %v7610_v48 = vld [vmem:[%s17188_s9 + $0x98] sm:$0xff]  ;;  %v6217_v12 = vadd.f32 %v15456_v16, %v15976_v50 }
 0xcd4   : > { %6832 = vrot.lane.b32.xlu0 %v15982_v1, %s17290_s21  ;;  %6948 = vrot.lane.b32.xlu1 %v15980_v47, %s17291_s22  ;;  %v7611_v22 = vld [vmem:[%s17188_s9 + $0xa0] sm:$0xff]  ;;  %v7612_v56 = vld [vmem:[%s17188_s9 + $0xa8] sm:$0xff] }
 0xcd5   : > { %6830 = vrot.lane.b32.xlu2 %v15980_v47, %s17290_s21  ;;  %v16036_v21 = vmax.f32 %v6470_v33, 0.0  ;;  %v7614_v33 = vld [vmem:[%s17188_s9 + $0xb8] sm:$0xff] }
 0xcd8   : > { %v7724_v25 = vld.sshfl [vmem:[#allocation1] sm:$0xff pattern:$0x73625140]  ;;  %v7725_v6 = vld.sshfl [vmem:[#allocation1 + $0x8] sm:$0xff pattern:$0x73625140] }
 0xcd9   : > { %7761 = vmatmul.f32.vlgmr.msra.gmra.mxu2 %v7724_v25  ;;  %7781 = vmatmul.f32.vlgmr.msra.gmra.mxu3 %v7725_v6  ;;  %v7726_v58 = vld.sshfl [vmem:[#allocation1 + $0x10] sm:$0xff pattern:$0x73625140]  ;;  %v7727_v51 = vld.sshfl [vmem:[#allocation1 + $0x18] sm:$0xff pattern:$0x73625140] }
 0xcda   : > { %7945 = vmatpush.xpose.msra.mxu2 %v7599_v55  ;;  %7965 = vmatpush.xpose.msra.mxu3 %v7600_v59  ;;  %v7728_v14 = vld.sshfl [vmem:[#allocation1 + $0x20] sm:$0xff pattern:$0x73625140]  ;;  %v7729_v26 = vld.sshfl [vmem:[#allocation1 + $0x28] sm:$0xff pattern:$0x73625140] }
 0xcdb   : > { %7801 = vmatmul.f32.vlgmr.msrb.gmra.mxu0 %v7726_v58  ;;  %7821 = vmatmul.f32.vlgmr.msrb.gmra.mxu1 %v7727_v51  ;;  %v7730_v45 = vld.sshfl [vmem:[#allocation1 + $0x30] sm:$0xff pattern:$0x73625140]  ;;  %v7731_v30 = vld.sshfl [vmem:[#allocation1 + $0x38] sm:$0xff pattern:$0x73625140] }
 0xcdc   : > { %6672 = vrot.lane.b32.xlu1 %v16002_v37, %s17356_s3  ;;  %6670 = vrot.lane.b32.xlu0 %v16011_v35, %s17356_s3 }
 0xcdd   : > { %6950 = vrot.lane.b32.xlu2 %v15982_v1, %s17291_s22  ;;  %7985 = vmatpush.xpose.msrb.mxu0 %v7601_v0  ;;  %v7613_v0 = vld [vmem:[%s17188_s9 + $0xb0] sm:$0xff] }
 0xcde   : > { %8005 = vmatpush.xpose.msrb.mxu1 %v7602_v18 }
 0xcdf   : > { %v7451_v9 = vpop.permute.xlu1 %7450  ;;  %v7449_v32 = vpop.permute.xlu0 %7448 }
 0xce0   : > { %v7480_v10 = vrot.slane %v7451_v9, 1  ;;  %v7479_v60 = vrot.slane %v7449_v32, 1 }
 0xce1   : > { %7841 = vmatmul.f32.vlgmr.msrb.gmra.mxu2 %v7728_v14  ;;  %7861 = vmatmul.f32.vlgmr.msrb.gmra.mxu3 %v7729_v26  ;;  %v7615_v26 = vld [vmem:[%s17188_s9 + $0xc0] sm:$0xff] }
 0xce2   : > { %v7497_v41 = vsel %vm17267_vm9, %v7451_v9, %v7480_v10  ;;  %8025 = vmatpush.xpose.msrb.mxu2 %v7603_v5  ;;  %8045 = vmatpush.xpose.msrb.mxu3 %v7604_v63  ;;  %v7496_v7 = vsel %vm17267_vm9, %v7449_v32, %v7479_v60  ;;  %v7616_v10 = vld [vmem:[%s17188_s9 + $0xc8] sm:$0xff]  ;;  %v7617_v60 = vld [vmem:[%s17188_s9 + $0xd0] sm:$0xff] }
 0xce3   : > { %7532 = vst.msk [vmem:[#allocation3 + $0x21] ss:$2 sm:$0xff] %vm15868_vm7, %v7497_v41  ;;  %7881 = vmatmul.f32.vlgmr.msra.gmra.mxu0 %v7730_v45  ;;  %10866 = vmatmul.msk.f32.vlgmr.msra.gmra.mxu1 %vm7739_vm4, %v7731_v30  ;;  %v7618_v45 = vld [vmem:[%s17188_s9 + $0xd8] sm:$0xff] }
 0xce4   : > { %7530 = vst.msk [vmem:[#allocation3 + $0x11] ss:$2 sm:$0xff] %vm15868_vm7, %v7496_v7  ;;  %6678 = vrot.lane.b32.xlu1 %v16036_v21, %s17356_s3  ;;  %6676 = vrot.lane.b32.xlu0 %v16047_v46, %s17356_s3 }
 0xce5   : > { %6674 = vrot.lane.b32.xlu2 %v16034_v38, %s17356_s3  ;;  %8065 = vmatpush.xpose.msra.mxu0 %v7605_v39 }
 0xce6   : > { %10867 = vmatpush.xpose.msk.msra.mxu1 %vm7739_vm4, %v7606_v42  ;;  %v6240_v42 = vadd.f32 %v15462_v28, %v6217_v12  ;;  %v7620_v28 = vld [vmem:[%s17188_s9 + $0xe8] sm:$0xff] }
 0xce7   : > { %v7455_v44 = vpop.permute.xlu1 %7454  ;;  %v7453_v31 = vpop.permute.xlu0 %7452 }
 0xce8   : > { %v7482_v52 = vrot.slane %v7455_v44, 1  ;;  %v7481_v27 = vrot.slane %v7453_v31, 1 }
 0xcea   : > { %v7499_v40 = vsel %vm17267_vm9, %v7455_v44, %v7482_v52  ;;  %v7498_v11 = vsel %vm17267_vm9, %v7453_v31, %v7481_v27  ;;  %v7563_v43 = vld [vmem:[#allocation3 + $0x20] sm:$0xff]  ;;  %v7564_v13 = vld [vmem:[#allocation3 + $0x28] sm:$0xff] }
 0xceb   : > { %v7561_v15 = vld [vmem:[#allocation3 + $0x10] sm:$0xff]  ;;  %v7562_v19 = vld [vmem:[#allocation3 + $0x18] sm:$0xff]  ;;  %7536 = vst.msk [vmem:[#allocation3 + $0x41] ss:$2 sm:$0xff] %vm15868_vm7, %v7499_v40  ;;  %v7366_v40 = vrot.slane %v15793_v34, 5 }
 0xcec   : > { %7907 = vst [vmem:[#allocation1] ss:$4 sm:$0xff] %v7561_v15  ;;  %6820 = vrot.lane.b32.xlu1 %v16011_v35, %s17290_s21  ;;  %6682 = vrot.lane.b32.xlu0 %v15982_v1, %s17356_s3  ;;  %v16131_v15 = vmax.f32 %v6240_v42, 0.0  ;;  %v7622_v34 = vld [vmem:[%s17188_s9 + $0xf8] sm:$0xff] }
 0xced   : > { %7909 = vst [vmem:[#allocation1 + $0x20] ss:$4 sm:$0xff] %v7562_v19  ;;  %6680 = vrot.lane.b32.xlu2 %v15980_v47, %s17356_s3  ;;  %v7619_v19 = vld [vmem:[%s17188_s9 + $0xe0] sm:$0xff] }
 0xcee   : > { %7534 = vst.msk [vmem:[#allocation3 + $0x31] ss:$2 sm:$0xff] %vm15868_vm7, %v7498_v11  ;;  %v7621_v11 = vld [vmem:[%s17188_s9 + $0xf0] sm:$0xff] }
 0xcf2   : > { %v7567_v32 = vld [vmem:[#allocation3 + $0x40] sm:$0xff]  ;;  %v7568_v39 = vld [vmem:[#allocation3 + $0x48] sm:$0xff] }
 0xcf3   : > { %v7910_v29 = vld.sshfl [vmem:[#allocation1] sm:$0xff pattern:$0x73625140]  ;;  %v7911_v54 = vld.sshfl [vmem:[#allocation1 + $0x8] sm:$0xff pattern:$0x73625140] }
 0xcf4   : > { %7946 = vmatmul.f32.vlgmr.msra.gmra.mxu2 %v7910_v29  ;;  %7966 = vmatmul.f32.vlgmr.msra.gmra.mxu3 %v7911_v54  ;;  %v7912_v20 = vld.sshfl [vmem:[#allocation1 + $0x10] sm:$0xff pattern:$0x73625140]  ;;  %v7913_v4 = vld.sshfl [vmem:[#allocation1 + $0x18] sm:$0xff pattern:$0x73625140]  ;;  %v5941_v29 = vadd.f32 %v15409_v61, %v15976_v50 }
 0xcf5   : > { %7986 = vmatmul.f32.vlgmr.msrb.gmra.mxu0 %v7912_v20  ;;  %8006 = vmatmul.f32.vlgmr.msrb.gmra.mxu1 %v7913_v4  ;;  %8092 = vst [vmem:[#allocation1] ss:$4 sm:$0xff] %v7563_v43  ;;  %v7914_v55 = vld.sshfl [vmem:[#allocation1 + $0x20] sm:$0xff pattern:$0x73625140]  ;;  %v7565_v57 = vld [vmem:[#allocation3 + $0x30] sm:$0xff]  ;;  %v5987_v20 = vadd.f32 %v15414_v8, %v15976_v50 }
 0xcf6   : > { %6822 = vrot.lane.b32.xlu2 %v16002_v37, %s17290_s21  ;;  %6826 = vrot.lane.b32.xlu1 %v16047_v46, %s17290_s21  ;;  %v7915_v59 = vld.sshfl [vmem:[#allocation1 + $0x28] sm:$0xff pattern:$0x73625140]  ;;  %v7916_v25 = vld.sshfl [vmem:[#allocation1 + $0x30] sm:$0xff pattern:$0x73625140] }
 0xcf7   : > { %6824 = vrot.lane.b32.xlu0 %v16034_v38, %s17290_s21  ;;  %v7917_v6 = vld.sshfl [vmem:[#allocation1 + $0x38] sm:$0xff pattern:$0x73625140]  ;;  %8130 = vmatpush.xpose.msra.mxu2 %v7607_v17  ;;  %v7566_v62 = vld [vmem:[#allocation3 + $0x38] sm:$0xff]  ;;  %v7382_v43 = vrot.slane %v15805_v3, 7  ;;  %v6033_v17 = vadd.f32 %v15426_v23, %v15976_v50  ;;  %v7624_v3 = vld [vmem:[%s17188_s9 + $0x108] sm:$0xff] }
 0xcf8   : > { %8094 = vst [vmem:[#allocation1 + $0x20] ss:$4 sm:$0xff] %v7564_v13  ;;  %8150 = vmatpush.xpose.msra.mxu3 %v7608_v2  ;;  %8170 = vmatpush.xpose.msrb.mxu0 %v7609_v49  ;;  %v7623_v54 = vld [vmem:[%s17188_s9 + $0x100] sm:$0xff]  ;;  %v7374_v2 = vrot.slane %v15815_v53, 6  ;;  %v7625_v23 = vld [vmem:[%s17188_s9 + $0x110] sm:$0xff]  ;;  %v7626_v61 = vld [vmem:[%s17188_s9 + $0x118] sm:$0xff] }
 0xcf9   : > { %8190 = vmatpush.xpose.msrb.mxu1 %v7610_v48  ;;  %v17580_v8 = vld [vmem:[#allocation15_spill] sm:$0xff]  ;;  %v17581_v4 = vld [vmem:[#allocation18_spill] sm:$0xff]  ;;  %v17582_v49 = vld [vmem:[#allocation17_spill] sm:$0xff] }
 0xcfa   : > { %v6056_v53 = vadd.f32 %v17580_v8, %v6033_v17  ;;  %v5964_v13 = vadd.f32 %v17581_v4, %v5941_v29  ;;  %v6010_v48 = vadd.f32 %v17582_v49, %v5987_v20  ;;  %v17594_v29 = vld [vmem:[#allocation16_spill] sm:$0xff] }
 0xcfc   : > { %8026 = vmatmul.f32.vlgmr.msrb.gmra.mxu2 %v7914_v55  ;;  %8046 = vmatmul.f32.vlgmr.msrb.gmra.mxu3 %v7915_v59  ;;  %v8095_v58 = vld.sshfl [vmem:[#allocation1] sm:$0xff pattern:$0x73625140]  ;;  %v8096_v51 = vld.sshfl [vmem:[#allocation1 + $0x8] sm:$0xff pattern:$0x73625140] }
 0xcfd   : > { %8066 = vmatmul.f32.vlgmr.msra.gmra.mxu0 %v7916_v25  ;;  %10868 = vmatmul.msk.f32.vlgmr.msra.gmra.mxu1 %vm7739_vm4, %v7917_v6  ;;  %v8097_v36 = vld.sshfl [vmem:[#allocation1 + $0x10] sm:$0xff pattern:$0x73625140]  ;;  %v8098_v18 = vld.sshfl [vmem:[#allocation1 + $0x18] sm:$0xff pattern:$0x73625140] }
 0xcfe   : > { %6828 = vrot.lane.b32.xlu2 %v16036_v21, %s17290_s21  ;;  %6940 = vrot.lane.b32.xlu1 %v16002_v37, %s17291_s22  ;;  %8277 = vst [vmem:[#allocation1] ss:$4 sm:$0xff] %v7565_v57  ;;  %v17583_v55 = vld [vmem:[#allocation11_spill] sm:$0xff]  ;;  %v17584_v25 = vld [vmem:[#allocation12_spill] sm:$0xff]  ;;  %v16185_v57 = vmax.f32 %v5964_v13, 0.0 }
 0xcff   : > { %6938 = vrot.lane.b32.xlu0 %v16011_v35, %s17291_s22  ;;  %8210 = vmatpush.xpose.msrb.mxu2 %v7611_v22  ;;  %v8099_v14 = vld.sshfl [vmem:[#allocation1 + $0x20] sm:$0xff pattern:$0x73625140]  ;;  %v8100_v9 = vld.sshfl [vmem:[#allocation1 + $0x28] sm:$0xff pattern:$0x73625140]  ;;  %v6171_v59 = vadd.f32 %v17583_v55, %v15976_v50  ;;  %v6079_v6 = vadd.f32 %v17584_v25, %v15976_v50 }
 0xd00   : > { %8230 = vmatpush.xpose.msrb.mxu3 %v7612_v56  ;;  %8250 = vmatpush.xpose.msra.mxu0 %v7613_v0  ;;  %v8101_v5 = vld.sshfl [vmem:[#allocation1 + $0x30] sm:$0xff pattern:$0x73625140]  ;;  %v8102_v63 = vld.sshfl [vmem:[#allocation1 + $0x38] sm:$0xff pattern:$0x73625140] }
 0xd01   : > { %10869 = vmatpush.xpose.msk.msra.mxu1 %vm7739_vm4, %v7614_v33  ;;  %8279 = vst [vmem:[#allocation1 + $0x20] ss:$4 sm:$0xff] %v7566_v62  ;;  %v16183_v22 = vmax.f32 %v6056_v53, 0.0  ;;  %v7627_v56 = vld [vmem:[%s17188_s9 + $0x120] sm:$0xff]  ;;  %v16191_v0 = vmax.f32 %v6010_v48, 0.0  ;;  %v17586_v62 = vld [vmem:[#allocation13_spill] sm:$0xff] }
 0xd02   : > { %v6194_v33 = vadd.f32 %v17586_v62, %v6171_v59  ;;  %v7631_v55 = vld [vmem:[%s17188_s9 + $0x140] sm:$0xff]  ;;  %v7632_v59 = vld [vmem:[%s17188_s9 + $0x148] sm:$0xff]  ;;  %v7633_v25 = vld [vmem:[%s17188_s9 + $0x150] sm:$0xff] }
 0xd04   : > { %8131 = vmatmul.f32.vlgmr.msra.gmra.mxu2 %v8095_v58  ;;  %8151 = vmatmul.f32.vlgmr.msra.gmra.mxu3 %v8096_v51  ;;  %v17585_v58 = vld [vmem:[#allocation9_spill] sm:$0xff] }
 0xd05   : > { %8171 = vmatmul.f32.vlgmr.msrb.gmra.mxu0 %v8097_v36  ;;  %8191 = vmatmul.f32.vlgmr.msrb.gmra.mxu1 %v8098_v18  ;;  %v8280_v41 = vld.sshfl [vmem:[#allocation1] sm:$0xff pattern:$0x73625140]  ;;  %v8281_v30 = vld.sshfl [vmem:[#allocation1 + $0x8] sm:$0xff pattern:$0x73625140]  ;;  %v6125_v51 = vadd.f32 %v17585_v58, %v15976_v50 }
 0xd06   : > { %6942 = vrot.lane.b32.xlu2 %v16034_v38, %s17291_s22  ;;  %6946 = vrot.lane.b32.xlu1 %v16036_v21, %s17291_s22  ;;  %v8282_v7 = vld.sshfl [vmem:[#allocation1 + $0x10] sm:$0xff pattern:$0x73625140]  ;;  %v8283_v16 = vld.sshfl [vmem:[#allocation1 + $0x18] sm:$0xff pattern:$0x73625140] }
 0xd07   : > { %6944 = vrot.lane.b32.xlu0 %v16047_v46, %s17291_s22  ;;  %8315 = vmatpush.xpose.msra.mxu2 %v7615_v26  ;;  %8462 = vst [vmem:[#allocation1] ss:$4 sm:$0xff] %v7567_v32  ;;  %v7628_v36 = vld [vmem:[%s17188_s9 + $0x128] sm:$0xff]  ;;  %v7629_v18 = vld [vmem:[%s17188_s9 + $0x130] sm:$0xff]  ;;  %v7634_v58 = vld [vmem:[%s17188_s9 + $0x158] sm:$0xff] }
 0xd08   : > { %8335 = vmatpush.xpose.msra.mxu3 %v7616_v10  ;;  %8355 = vmatpush.xpose.msrb.mxu0 %v7617_v60  ;;  %v8284_v44 = vld.sshfl [vmem:[#allocation1 + $0x20] sm:$0xff pattern:$0x73625140]  ;;  %v8285_v52 = vld.sshfl [vmem:[#allocation1 + $0x28] sm:$0xff pattern:$0x73625140] }
 0xd09   : > { %8375 = vmatpush.xpose.msrb.mxu1 %v7618_v45  ;;  %v8286_v31 = vld.sshfl [vmem:[#allocation1 + $0x30] sm:$0xff pattern:$0x73625140]  ;;  %v8287_v27 = vld.sshfl [vmem:[#allocation1 + $0x38] sm:$0xff pattern:$0x73625140] }
 0xd0a   : > { %8464 = vst [vmem:[#allocation1 + $0x20] ss:$4 sm:$0xff] %v7568_v39  ;;  %v16214_v10 = vmax.f32 %v6194_v33, 0.0 }
 0xd0c   : > { %8211 = vmatmul.f32.vlgmr.msrb.gmra.mxu2 %v8099_v14  ;;  %8231 = vmatmul.f32.vlgmr.msrb.gmra.mxu3 %v8100_v9  ;;  %v17587_v14 = vld [vmem:[#allocation14_spill] sm:$0xff] }
 0xd0d   : > { %8251 = vmatmul.f32.vlgmr.msra.gmra.mxu0 %v8101_v5  ;;  %10870 = vmatmul.msk.f32.vlgmr.msra.gmra.mxu1 %vm7739_vm4, %v8102_v63  ;;  %v6102_v9 = vadd.f32 %v17587_v14, %v6079_v6  ;;  %v7630_v5 = vld [vmem:[%s17188_s9 + $0x138] sm:$0xff] }
 0xd0e   : > { %7456 = vrot.lane.b32.xlu2 %v7366_v40, %s11124_s15  ;;  %6818 = vrot.lane.b32.xlu1 %v16131_v15, %s17290_s21  ;;  %v17588_v63 = vld [vmem:[#allocation10_spill] sm:$0xff]  ;;  %v8466_v60 = vld.sshfl [vmem:[#allocation1 + $0x8] sm:$0xff pattern:$0x73625140] }
 0xd0f   : > { %6668 = vrot.lane.b32.xlu0 %v16131_v15, %s17356_s3  ;;  %8395 = vmatpush.xpose.msrb.mxu2 %v7619_v19  ;;  %v6148_v26 = vadd.f32 %v17588_v63, %v6125_v51  ;;  %v16216_v32 = vmax.f32 %v6102_v9, 0.0  ;;  %v8465_v12 = vld.sshfl [vmem:[#allocation1] sm:$0xff pattern:$0x73625140]  ;;  %v7637_v63 = vld [vmem:[%s17188_s9 + $0x170] sm:$0xff] }
 0xd10   : > { %8415 = vmatpush.xpose.msrb.mxu3 %v7620_v28  ;;  %8435 = vmatpush.xpose.msra.mxu0 %v7621_v11  ;;  %v8467_v45 = vld.sshfl [vmem:[#allocation1 + $0x10] sm:$0xff pattern:$0x73625140]  ;;  %v7635_v9 = vld [vmem:[%s17188_s9 + $0x160] sm:$0xff] }
 0xd11   : > { %10871 = vmatpush.xpose.msk.msra.mxu1 %vm7739_vm4, %v7622_v34  ;;  %v8471_v39 = vld.sshfl [vmem:[#allocation1 + $0x30] sm:$0xff pattern:$0x73625140]  ;;  %v8472_v42 = vld.sshfl [vmem:[#allocation1 + $0x38] sm:$0xff pattern:$0x73625140] }
 0xd14   : > { %8316 = vmatmul.f32.vlgmr.msra.gmra.mxu2 %v8280_v41  ;;  %8336 = vmatmul.f32.vlgmr.msra.gmra.mxu3 %v8281_v30  ;;  %v8468_v41 = vld.sshfl [vmem:[#allocation1 + $0x18] sm:$0xff pattern:$0x73625140]  ;;  %v16218_v30 = vmax.f32 %v6148_v26, 0.0 }
 0xd15   : > { %8356 = vmatmul.f32.vlgmr.msrb.gmra.mxu0 %v8282_v7  ;;  %8376 = vmatmul.f32.vlgmr.msrb.gmra.mxu1 %v8283_v16  ;;  %v8469_v7 = vld.sshfl [vmem:[#allocation1 + $0x20] sm:$0xff pattern:$0x73625140]  ;;  %v8470_v16 = vld.sshfl [vmem:[#allocation1 + $0x28] sm:$0xff pattern:$0x73625140] }
 0xd16   : > { %6936 = vrot.lane.b32.xlu2 %v16131_v15, %s17291_s22  ;;  %7460 = vrot.lane.b32.xlu1 %v7382_v43, %s11124_s15 }
 0xd17   : > { %7458 = vrot.lane.b32.xlu0 %v7374_v2, %s11124_s15  ;;  %8500 = vmatpush.xpose.msra.mxu2 %v7623_v54 }
 0xd18   : > { %8520 = vmatpush.xpose.msra.mxu3 %v7624_v3  ;;  %8540 = vmatpush.xpose.msrb.mxu0 %v7625_v23 }
 0xd19   : > { %8560 = vmatpush.xpose.msrb.mxu1 %v7626_v61 }
 0xd1c   : > { %8396 = vmatmul.f32.vlgmr.msrb.gmra.mxu2 %v8284_v44  ;;  %8416 = vmatmul.f32.vlgmr.msrb.gmra.mxu3 %v8285_v52 }
 0xd1d   : > { %8436 = vmatmul.f32.vlgmr.msra.gmra.mxu0 %v8286_v31  ;;  %10872 = vmatmul.msk.f32.vlgmr.msra.gmra.mxu1 %vm7739_vm4, %v8287_v27  ;;  %v17589_v27 = vld [vmem:[#allocation8_spill] sm:$0xff] }
 0xd1e   : > { %6660 = vrot.lane.b32.xlu1 %v16183_v22, %s17356_s3  ;;  %6656 = vrot.lane.b32.xlu2 %v16185_v57, %s17356_s3  ;;  %v5895_v40 = vadd.f32 %v17589_v27, %v15976_v50 }
 0xd1f   : > { %6658 = vrot.lane.b32.xlu0 %v16191_v0, %s17356_s3  ;;  %8580 = vmatpush.xpose.msrb.mxu2 %v7627_v56 }
 0xd20   : > { %8600 = vmatpush.xpose.msrb.mxu3 %v7628_v36  ;;  %8620 = vmatpush.xpose.msra.mxu0 %v7629_v18  ;;  %v5918_v54 = vadd.f32 %v17594_v29, %v5895_v40 }
 0xd21   : > { %10873 = vmatpush.xpose.msk.msra.mxu1 %vm7739_vm4, %v7630_v5  ;;  %v7636_v5 = vld [vmem:[%s17188_s9 + $0x168] sm:$0xff] }
 0xd22   : > { %v16266_v20 = vmax.f32 %v5918_v54, 0.0 }
 0xd24   : > { %8501 = vmatmul.f32.vlgmr.msra.gmra.mxu2 %v8465_v12  ;;  %8521 = vmatmul.f32.vlgmr.msra.gmra.mxu3 %v8466_v60  ;;  %v7638_v60 = vld [vmem:[%s17188_s9 + $0x178] sm:$0xff] }
 0xd25   : > { %8541 = vmatmul.f32.vlgmr.msrb.gmra.mxu0 %v8467_v45  ;;  %8561 = vmatmul.f32.vlgmr.msrb.gmra.mxu1 %v8468_v41 }
 0xd26   : > { %6666 = vrot.lane.b32.xlu1 %v16214_v10, %s17356_s3  ;;  %6662 = vrot.lane.b32.xlu2 %v16216_v32, %s17356_s3 }
 0xd27   : > { %6664 = vrot.lane.b32.xlu0 %v16218_v30, %s17356_s3  ;;  %8685 = vmatpush.xpose.msra.mxu2 %v7631_v55 }
 0xd28   : > { %8705 = vmatpush.xpose.msra.mxu3 %v7632_v59  ;;  %8725 = vmatpush.xpose.msrb.mxu0 %v7633_v25 }
 0xd29   : > { %8745 = vmatpush.xpose.msrb.mxu1 %v7634_v58 }
 0xd2c   : > { %8581 = vmatmul.f32.vlgmr.msrb.gmra.mxu2 %v8469_v7  ;;  %8601 = vmatmul.f32.vlgmr.msrb.gmra.mxu3 %v8470_v16 }
 0xd2d   : > { %8621 = vmatmul.f32.vlgmr.msra.gmra.mxu0 %v8471_v39  ;;  %10874 = vmatmul.msk.f32.vlgmr.msra.gmra.mxu1 %vm7739_vm4, %v8472_v42 }
 0xd2e   : > { %6810 = vrot.lane.b32.xlu1 %v16183_v22, %s17290_s21  ;;  %6806 = vrot.lane.b32.xlu2 %v16185_v57, %s17290_s21 }
 0xd2f   : > { %6808 = vrot.lane.b32.xlu0 %v16191_v0, %s17290_s21  ;;  %v16233_v44 = vpop.permute.xlu2 %6830  ;;  %8765 = vmatpush.xpose.msrb.mxu2 %v7635_v9 }
 0xd30   : > { %8785 = vmatpush.xpose.msrb.mxu3 %v7636_v5  ;;  %8805 = vmatpush.xpose.msra.mxu0 %v7637_v63 }
 0xd31   : > { %10875 = vmatpush.xpose.msk.msra.mxu1 %vm7739_vm4, %v7638_v60 }
 0xd36   : > { %6816 = vrot.lane.b32.xlu1 %v16214_v10, %s17290_s21  ;;  %6812 = vrot.lane.b32.xlu2 %v16216_v32, %s17290_s21 }
 0xd37   : > { %6814 = vrot.lane.b32.xlu0 %v16218_v30, %s17290_s21  ;;  %v6951_v52 = vpop.permute.xlu2 %6950 }
 0xd3e   : > { %6928 = vrot.lane.b32.xlu1 %v16183_v22, %s17291_s22  ;;  %6924 = vrot.lane.b32.xlu2 %v16185_v57, %s17291_s22 }
 0xd3f   : > { %6926 = vrot.lane.b32.xlu0 %v16191_v0, %s17291_s22  ;;  %v16247_v31 = vpop.permute.xlu2 %6674 }
 0xd46   : > { %6934 = vrot.lane.b32.xlu1 %v16214_v10, %s17291_s22  ;;  %6930 = vrot.lane.b32.xlu2 %v16216_v32, %s17291_s22  ;;  %v16255_v19 = vpop.permute.xlu1 %6948  ;;  %v6833_v28 = vpop.permute.xlu0 %6832 }
 0xd47   : > { %6932 = vrot.lane.b32.xlu0 %v16218_v30, %s17291_s22  ;;  %v6979_v11 = vsel %vm17590_vm13, %v16255_v19, %v6951_v52  ;;  %v6681_v34 = vpop.permute.xlu2 %6680  ;;  %v6861_v43 = vsel %vm17591_vm10, %v16233_v44, %v6833_v28  ;;  %vm17598_vm13 = vcmask 56320   ;;  %vm17599_vm10 = vmmov %vm17597_vm8 }
 0xd48   : > { %v7009_v50 = vsel %vm17592_vm5, %v6979_v11, 0.0  ;;  %v6891_v17 = vsel %vm17593_vm11, %v6861_v43, 0.0  ;;  %vm17600_vm5 = vmmov %vm17597_vm8  ;;  %vm17601_vm11 = vcmask 793600  }
 0xd49   : > { %v7037_v2 = vmax.f32 %v6891_v17, %v7009_v50 }
 0xd4e   : > { %6922 = vrot.lane.b32.xlu1 %v16266_v20, %s17291_s22  ;;  %6654 = vrot.lane.b32.xlu2 %v16266_v20, %s17356_s3  ;;  %v16274_v3 = vpop.permute.xlu1 %6672  ;;  %v16278_v61 = vpop.permute.xlu0 %6670  ;;  %s11062_s3 = scalar_lea.hbm %s17192_s13, 4 }
 0xd4f   : > { %6804 = vrot.lane.b32.xlu0 %v16266_v20, %s17290_s21  ;;  %v6707_v17 = vsel %vm17599_vm10, %v16274_v3, %v16247_v31  ;;  %vm17604_vm10 = vmmov %vm17600_vm5  ;;  %s429_s21 = sand.u32 1, %s11096_s26   ;;  %p11064_p1 = scmp.lt.s32.totalorder %s11062_s3, %s11058_s24 }
 0xd50   : > { %v16276_v23 = vpop.permute.xlu2 %6822  ;;  %v6768_v59 = vmax.f32 %v16002_v37, %v6707_v17  ;;  %s10850_s7 = sshll.u32 %s429_s21, 1  ;;  %s10772_s29 = scalar_lea.sflag [#allocation5], %s429_s21 }
 0xd51   : > { %s431_s1 = scalar_lea.vmem [#allocation4], %s10850_s7  ;;  %p11065_p2 = por %p11064_p1, %p11063_p0 }
 0xd52   : > { %s10784_s2 = sshll.u32 %s431_s1, 4  ;;  %s10785_s2 = int_to_ptr.vmem [resolvable:$true] %s10784_s2 }
 0xd53   : > { %p11066_p3 = pnand %p11065_p2, %p11061_p13 }
 0xd56   : > { %v6679_v8 = vpop.permute.xlu1 %6678  ;;  %v6677_v4 = vpop.permute.xlu0 %6676 }
 0xd57   : > { %v6710_v29 = vsel %vm17600_vm5, %v6679_v8, %v6681_v34 }
 0xd58   : > { %v16280_v53 = vpop.permute.xlu2 %6828  ;;  %v16282_v13 = vpop.f32.mrf.mxu0 }
 0xd59   : > { %v16284_v49 = vpop.f32.mrf.mxu1 }
 0xd5c   : > { %v16302_v51 = vpop.f32.mrf.mxu2  ;;  %v16304_v36 = vpop.f32.mrf.mxu3 }
 0xd5e   : > { %v16286_v48 = vpop.permute.xlu1 %6820  ;;  %v6683_v56 = vpop.permute.xlu0 %6682 }
 0xd5f   : > { %v6711_v41 = vsel %vm17597_vm8, %v6681_v34, %v6683_v56  ;;  %v6743_v7 = vsel %vm17598_vm13, %v6683_v56, 0.0  ;;  %vm17602_vm8 = vcmask 801792   ;;  %v6771_v56 = vmax.f32 %v16036_v21, %v6710_v29  ;;  %vm17603_vm13 = vmmov %vm17600_vm5 }
 0xd60   : > { %v16297_v6 = vpop.permute.xlu2 %6942  ;;  %v16315_v26 = vpop.f32.mrf.mxu0  ;;  %v6772_v42 = vmax.f32 %v15980_v47, %v6711_v41  ;;  %v6773_v52 = vmax.f32 %v15982_v1, %v6743_v7  ;;  %v6860_v25 = vsel %vm17602_vm8, %v16280_v53, %v16233_v44  ;;  %v6708_v34 = vsel %vm17603_vm13, %v16247_v31, %v6677_v4  ;;  %vm17605_vm5 = vmmov %vm17602_vm8 }
 0xd61   : > { %17595 = vst [vmem:[#allocation15_spill] sm:$0xff] %v16315_v26  ;;  %v16317_v12 = vpop.f32.mrf.mxu1  ;;  %vm17607_vm8 = vmmov %vm17605_vm5  ;;  %vm17608_vm13 = vcmask 793600  }
 0xd62   : > { %17596 = vst [vmem:[#allocation18_spill] sm:$0xff] %v16317_v12  ;;  %v7066_v54 = vmax.f32 %v6772_v42, %v7037_v2  ;;  %v7067_v55 = vmax.f32 %v6773_v52, 0.0 }
 0xd64   : > { %v16328_v16 = vpop.f32.mrf.mxu2  ;;  %v16330_v39 = vpop.f32.mrf.mxu3  ;;  %v16362_v9 = vrot.slane %v7067_v55, 1 }
 0xd68   : > { %v7457_v18 = vpop.permute.xlu2 %7456  ;;  %v6827_v62 = vpop.permute.xlu1 %6826 }
 0xd69   : > { %v7483_v33 = vrot.slane %v7457_v18, 1  ;;  %v6825_v14 = vpop.permute.xlu0 %6824 }
 0xd6a   : > { %v6857_v37 = vsel %vm17605_vm5, %v16276_v23, %v6825_v14  ;;  %v6858_v44 = vsel %vm17607_vm8, %v6825_v14, %v6827_v62 }
 0xd6b   : > { %v7500_v45 = vsel %vm17267_vm9, %v7457_v18, %v7483_v33  ;;  %v6709_v18 = vsel %vm17604_vm10, %v6677_v4, %v6679_v8  ;;  %v16360_v33 = vrot.slane %v7066_v54, 2  ;;  %vm17609_vm10 = vmmov %vm17608_vm13 }
 0xd6c   : > { %7538 = vst.msk [vmem:[#allocation3 + $0x51] ss:$2 sm:$0xff] %vm15868_vm7, %v7500_v45  ;;  %vm17610_vm9 = vmmov %vm17609_vm10 }
 0xd6d   : > { %vm17611_vm14 = vmmov %vm17610_vm9 }
 0xd70   : > { %v6941_v27 = vpop.permute.xlu1 %6940  ;;  %v16346_v1 = vpop.permute.xlu2 %6936 }
 0xd71   : > { %v16334_v40 = vpop.permute.xlu0 %6938  ;;  %v6975_v47 = vsel %vm17601_vm11, %v6941_v27, %v16297_v6  ;;  %vm17606_vm11 = vmmov %vm17605_vm5  ;;  %vm17614_vm5 = vcmask 1039360  }
 0xd72   : > { %v16336_v28 = vpop.f32.mrf.mxu0  ;;  %v16338_v11 = vpop.f32.mrf.mxu1  ;;  %v6859_v21 = vsel %vm17606_vm11, %v6827_v62, %v16280_v53  ;;  %v7033_v31 = vmax.f32 %v6857_v37, %v6975_v47  ;;  %v6974_v8 = vsel %vm17609_vm10, %v16334_v40, %v6941_v27  ;;  %v6706_v53 = vsel %vm17614_vm5, %v16278_v61, %v16274_v3 }
 0xd73   : > { %v7569_v43 = vld [vmem:[#allocation3 + $0x50] sm:$0xff]  ;;  %v7570_v50 = vld [vmem:[#allocation3 + $0x58] sm:$0xff]  ;;  %vm17617_vm11 = vcmask 1046534  }
 0xd74   : > { %8647 = vst [vmem:[#allocation1] ss:$4 sm:$0xff] %v7569_v43  ;;  %v6769_v43 = vmax.f32 %v16034_v38, %v6708_v34  ;;  %v7062_v54 = vmax.f32 %v6768_v59, %v7033_v31  ;;  %v7639_v38 = vld [vmem:[%s17188_s9 + $0x180] sm:$0xff]  ;;  %v7642_v31 = vld [vmem:[%s17188_s9 + $0x198] sm:$0xff] }
 0xd75   : > { %8649 = vst [vmem:[#allocation1 + $0x20] ss:$4 sm:$0xff] %v7570_v50 }
 0xd77   : > { %v16355_v2 = vpop.f32.mrf.mxu2  ;;  %v16357_v58 = vpop.f32.mrf.mxu3 }
 0xd78   : > { %v6947_v5 = vpop.permute.xlu1 %6946 }
 0xd79   : > { %v6978_v63 = vsel %vm17608_vm13, %v6947_v5, %v16255_v19  ;;  %v6945_v60 = vpop.permute.xlu0 %6944  ;;  %v6770_v19 = vmax.f32 %v16047_v46, %v6709_v18  ;;  %v7641_v18 = vld [vmem:[%s17188_s9 + $0x190] sm:$0xff]  ;;  %vm17618_vm13 = vmmov %vm17614_vm5 }
 0xd7a   : > { %v7036_v4 = vmax.f32 %v6860_v25, %v6978_v63  ;;  %v6976_v45 = vsel %vm17610_vm9, %v16297_v6, %v6945_v60  ;;  %v6977_v41 = vsel %vm17611_vm14, %v6945_v60, %v6947_v5  ;;  %v16376_v7 = vpop.f32.mrf.mxu0  ;;  %v16378_v42 = vpop.f32.mrf.mxu1  ;;  %vm17615_vm9 = vmmov %vm17607_vm8  ;;  %v6767_v25 = vmax.f32 %v16011_v35, %v6706_v53 }
 0xd7b   : > { %17612 = vst [vmem:[#allocation17_spill] sm:$0xff] %v16376_v7  ;;  %v7034_v62 = vmax.f32 %v6858_v44, %v6976_v45  ;;  %v7035_v14 = vmax.f32 %v6859_v21, %v6977_v41  ;;  %v8650_v52 = vld.sshfl [vmem:[#allocation1] sm:$0xff pattern:$0x73625140]  ;;  %v6856_v6 = vsel %vm17615_vm9, %v16286_v48, %v16276_v23  ;;  %v7640_v23 = vld [vmem:[%s17188_s9 + $0x188] sm:$0xff]  ;;  %vm17616_vm14 = vmmov %vm17609_vm10  ;;  %v16409_v5 = vpop.permute.xlu2 %6656  ;;  %v7387_v35 = vsel %vm17617_vm11, %v16360_v33, %v16362_v9 }
 0xd7c   : > { %17613 = vst [vmem:[#allocation11_spill] sm:$0xff] %v16378_v42  ;;  %v8651_v27 = vld.sshfl [vmem:[#allocation1 + $0x8] sm:$0xff pattern:$0x73625140]  ;;  %v7065_v50 = vmax.f32 %v6771_v56, %v7036_v4  ;;  %8686 = vmatmul.f32.vlgmr.msra.gmra.mxu2 %v8650_v52  ;;  %v7032_v55 = vmax.f32 %v6856_v6, %v6974_v8  ;;  %v6973_v37 = vsel %vm17616_vm14, %v16346_v1, %v16334_v40  ;;  %v16422_v63 = vrot.slane %v7062_v54, 6  ;;  %vm17620_vm5 = vmmov %vm17617_vm11 }
 0xd7d   : > { %8706 = vmatmul.f32.vlgmr.msra.gmra.mxu3 %v8651_v27  ;;  %v8652_v17 = vld.sshfl [vmem:[#allocation1 + $0x10] sm:$0xff pattern:$0x73625140]  ;;  %v8653_v29 = vld.sshfl [vmem:[#allocation1 + $0x18] sm:$0xff pattern:$0x73625140]  ;;  %v7064_v3 = vmax.f32 %v6770_v19, %v7035_v14  ;;  %v7063_v47 = vmax.f32 %v6769_v43, %v7034_v62  ;;  %8870 = vmatpush.xpose.msra.mxu2 %v7639_v38  ;;  %v7402_v44 = vsel %vm7098_vm6, %v16360_v33, %v16362_v9 }
 0xd7e   : > { %8726 = vmatmul.f32.vlgmr.msrb.gmra.mxu0 %v8652_v17  ;;  %8746 = vmatmul.f32.vlgmr.msrb.gmra.mxu1 %v8653_v29  ;;  %v16388_v46 = vrot.slane %v7065_v50, 3  ;;  %v7061_v40 = vmax.f32 %v6767_v25, %v7032_v55  ;;  %vm17619_vm10 = vcmask 1045508   ;;  %v8654_v52 = vld.sshfl [vmem:[#allocation1 + $0x20] sm:$0xff pattern:$0x73625140]  ;;  %vm17621_vm9 = vcmask 1046528  }
 0xd7f   : > { %v16397_v56 = vrot.slane %v7064_v3, 4  ;;  %v16399_v59 = vpop.f32.mrf.mxu2  ;;  %v16401_v34 = vpop.f32.mrf.mxu3  ;;  %8890 = vmatpush.xpose.msra.mxu3 %v7640_v23  ;;  %8910 = vmatpush.xpose.msrb.mxu0 %v7641_v18  ;;  %v16432_v45 = vrot.slane %v7063_v47, 5  ;;  %v8655_v27 = vld.sshfl [vmem:[#allocation1 + $0x28] sm:$0xff pattern:$0x73625140]  ;;  %vm17622_vm14 = vcmask 1045504   ;;  %vm17623_vm11 = vmmov %vm17621_vm9  ;;  %v7410_v47 = vsel %vm7112_vm15, %v16360_v33, %v16362_v9 }
 0xd80   : > { %v16411_v21 = vpop.permute.xlu1 %6818  ;;  %8930 = vmatpush.xpose.msrb.mxu1 %v7642_v31  ;;  %v8656_v50 = vld.sshfl [vmem:[#allocation1 + $0x30] sm:$0xff pattern:$0x73625140]  ;;  %v8657_v17 = vld.sshfl [vmem:[#allocation1 + $0x38] sm:$0xff pattern:$0x73625140] }
 0xd81   : > { %v6855_v60 = vsel %vm17607_vm8, %v16411_v21, %v16286_v48  ;;  %v16427_v8 = vpop.permute.xlu0 %6668  ;;  %v7386_v4 = vsel %vm7104_vm12, %v16397_v56, %v16388_v46  ;;  %v7401_v43 = vsel %vm17620_vm5, %v16397_v56, %v16388_v46  ;;  %v7393_v6 = vsel %vm7118_vm3, %v16397_v56, %v16388_v46 }
 0xd82   : > { %v7031_v41 = vmax.f32 %v6855_v60, %v6973_v37  ;;  %v6705_v53 = vsel %vm17618_vm13, %v16427_v8, %v16278_v61  ;;  %v16437_v19 = vpop.f32.mrf.mxu0  ;;  %v16439_v62 = vpop.f32.mrf.mxu1  ;;  %v7388_v48 = vsel %vm17619_vm10, %v7386_v4, %v7387_v35  ;;  %v7394_v61 = vsel %vm17621_vm9, %v16362_v9, %v16360_v33 }
 0xd83   : > { %v6766_v14 = vmax.f32 %v16131_v15, %v6705_v53  ;;  %v7403_v15 = vsel %vm17622_vm14, %v7402_v44, %v7401_v43  ;;  %v7395_v29 = vsel %vm7121_vm1, %v7393_v6, %v7394_v61  ;;  %v16454_v54 = vrot.slane %v7061_v40, 7  ;;  %v7643_v61 = vld [vmem:[%s17188_s9 + $0x1a0] sm:$0xff] }
 0xd84   : > { %8766 = vmatmul.f32.vlgmr.msrb.gmra.mxu2 %v8654_v52  ;;  %v7409_v3 = vsel %vm17623_vm11, %v16388_v46, %v16397_v56  ;;  %v7384_v38 = vsel %vm7100_vm2, %v16422_v63, %v16432_v45  ;;  %vm17624_vm8 = vcmask 1046529   ;;  %v7399_v44 = vsel %vm7104_vm12, %v16422_v63, %v16432_v45 }
 0xd85   : > { %8786 = vmatmul.f32.vlgmr.msrb.gmra.mxu3 %v8655_v27  ;;  %v16456_v55 = vmax.f32 %v6766_v14, %v7031_v41  ;;  %v7411_v23 = vsel %vm17624_vm8, %v7410_v47, %v7409_v3  ;;  %vm17625_vm13 = vcmask 1041408   ;;  %vm17626_vm10 = vcmask 1043458   ;;  %8950 = vmatpush.xpose.msrb.mxu2 %v7643_v61 }
 0xd86   : > { %8806 = vmatmul.f32.vlgmr.msra.gmra.mxu0 %v8656_v50  ;;  %10876 = vmatmul.msk.f32.vlgmr.msra.gmra.mxu1 %vm7739_vm4, %v8657_v17  ;;  %v7391_v41 = vsel %vm7114_vm0, %v16422_v63, %v16432_v45  ;;  %v7426_v53 = vsel %vm7114_vm0, %v16360_v33, %v16362_v9  ;;  %vm17627_vm5 = vcmask 1043456   ;;  %vm17628_vm9 = vcmask 1045506   ;;  %v7644_v50 = vld [vmem:[%s17188_s9 + $0x1a8] sm:$0xff]  ;;  %v16504_v17 = vpop.permute.xlu2 %6662 }
 0xd87   : > { %v16469_v25 = vpop.f32.mrf.mxu2  ;;  %v16471_v18 = vpop.f32.mrf.mxu3  ;;  %v7383_v37 = vsel %vm7098_vm6, %v16456_v55, %v16454_v54  ;;  %v7398_v35 = vsel %vm7100_vm2, %v16456_v55, %v16454_v54  ;;  %v7390_v31 = vsel %vm7112_vm15, %v16456_v55, %v16454_v54  ;;  %v7407_v6 = vsel %vm7118_vm3, %v16422_v63, %v16432_v45  ;;  %8970 = vmatpush.xpose.msrb.mxu3 %v7644_v50 }
 0xd88   : > { %v7461_v40 = vpop.permute.xlu1 %7460  ;;  %v7385_v60 = vsel %vm17625_vm13, %v7383_v37, %v7384_v38  ;;  %v7400_v4 = vsel %vm17626_vm10, %v7398_v35, %v7399_v44  ;;  %vm17630_vm14 = vcmask 1042433   ;;  %v7425_v38 = vsel %vm7112_vm15, %v16397_v56, %v16388_v46 }
 0xd89   : > { %v7485_v14 = vrot.slane %v7461_v40, 1  ;;  %v7459_v52 = vpop.permute.xlu0 %7458  ;;  %v7389_v27 = vsel %vm17627_vm5, %v7385_v60, %v7388_v48  ;;  %v7404_v43 = vsel %vm17628_vm9, %v7400_v4, %v7403_v15  ;;  %v7392_v47 = vsel %vm17630_vm14, %v7390_v31, %v7391_v41  ;;  %v7645_v31 = vld [vmem:[%s17188_s9 + $0x1b0] sm:$0xff] }
 0xd8a   : > { %v7484_v3 = vrot.slane %v7459_v52, 1  ;;  %7462 = vrot.lane.b32.xlu2 %v7389_v27, %s11124_s15  ;;  %v16507_v48 = vpop.f32.mrf.mxu0  ;;  %v7405_v15 = vrot.slane %v7404_v43, 2  ;;  %vm17631_vm11 = vcmask 1014784   ;;  %vm17632_vm8 = vcmask 1044481   ;;  %v16527_v4 = vpop.f32.mrf.mxu1  ;;  %v7646_v27 = vld [vmem:[%s17188_s9 + $0x1b8] sm:$0xff]  ;;  %8990 = vmatpush.xpose.msra.mxu0 %v7645_v31 }
 0xd8b   : > { %17629 = vst [vmem:[#allocation12_spill] sm:$0xff] %v16507_v48  ;;  %v7502_v37 = vsel %vm17631_vm11, %v7461_v40, %v7485_v14  ;;  %v7396_v35 = vsel %vm17632_vm8, %v7392_v47, %v7395_v29  ;;  %v7406_v44 = vsel %vm7114_vm0, %v16456_v55, %v16454_v54  ;;  %v7422_v60 = vsel %vm7118_vm3, %v16456_v55, %v16454_v54  ;;  %vm17633_vm13 = vmmov %vm17631_vm11 }
 0xd8c   : > { %7542 = vst.msk [vmem:[#allocation3 + $0x71] ss:$2 sm:$0xff] %vm15868_vm7, %v7502_v37  ;;  %v7501_v40 = vsel %vm17633_vm13, %v7459_v52, %v7484_v3  ;;  %7466 = vrot.lane.b32.xlu1 %v7405_v15, %s11124_s15  ;;  %v7397_v29 = vrot.slane %v7396_v35, 1  ;;  %vm17635_vm10 = vcmask 1044483   ;;  %vm17636_vm5 = vcmask 1046528   ;;  %10877 = vmatpush.xpose.msk.msra.mxu1 %vm7739_vm4, %v7646_v27 }
 0xd8d   : > { %17634 = vst [vmem:[#allocation9_spill] sm:$0xff] %v16527_v4  ;;  %v7408_v41 = vsel %vm17635_vm10, %v7406_v44, %v7407_v6  ;;  %v7423_v14 = vsel %vm17636_vm5, %v16432_v45, %v16422_v63  ;;  %vm17637_vm9 = vcmask 1046531   ;;  %v7427_v61 = vsel %vm17630_vm14, %v7425_v38, %v7426_v53 }
 0xd8e   : > { %7540 = vst.msk [vmem:[#allocation3 + $0x61] ss:$2 sm:$0xff] %vm15868_vm7, %v7501_v40  ;;  %v7412_v52 = vsel %vm17637_vm9, %v7408_v41, %v7411_v23  ;;  %v7424_v43 = vsel %vm7121_vm1, %v7422_v60, %v7423_v14  ;;  %v7414_v6 = vsel %vm7104_vm12, %v16456_v55, %v16454_v54  ;;  %7464 = vrot.lane.b32.xlu0 %v7397_v29, %s11124_s15  ;;  %vm17638_vm11 = vcmask 1046534  }
 0xd8f   : > { %v7415_v50 = vsel %vm17638_vm11, %v16422_v63, %v16432_v45  ;;  %v7417_v3 = vsel %vm7098_vm6, %v16397_v56, %v16388_v46  ;;  %v7418_v23 = vsel %vm7100_vm2, %v16360_v33, %v16362_v9  ;;  %v16555_v53 = vpop.f32.mrf.mxu2  ;;  %v16557_v15 = vpop.f32.mrf.mxu3  ;;  %v7428_v47 = vsel %vm17632_vm8, %v7427_v61, %v7424_v43  ;;  %vm17641_vm5 = vmmov %vm17638_vm11 }
 0xd90   : > { %vm17639_vm13 = vcmask 1045508   ;;  %vm17640_vm10 = vcmask 1041408   ;;  %v7430_v35 = vsel %vm17641_vm5, %v16456_v55, %v16454_v54  ;;  %v16566_v44 = vpop.permute.xlu1 %6660  ;;  %v7413_v60 = vrot.slane %v7412_v52, 3 }
 0xd91   : > { %v7416_v38 = vsel %vm17639_vm13, %v7414_v6, %v7415_v50  ;;  %v7419_v37 = vsel %vm17640_vm10, %v7417_v3, %v7418_v23  ;;  %v7433_v31 = vsel %vm7100_vm2, %v16397_v56, %v16388_v46  ;;  %v7434_v40 = vsel %vm7104_vm12, %v16360_v33, %v16362_v9  ;;  %v16574_v29 = vpop.permute.xlu0 %6658  ;;  %v16586_v6 = vpop.permute.xlu2 %6806 }
 0xd92   : > { %vm17642_vm9 = vcmask 1043456   ;;  %v7431_v14 = vsel %vm7098_vm6, %v16422_v63, %v16432_v45  ;;  %vm17643_vm14 = vcmask 1043458   ;;  %7468 = vrot.lane.b32.xlu2 %v7413_v60, %s11124_s15  ;;  %v7429_v52 = vrot.slane %v7428_v47, 5  ;;  %v16588_v23 = vpop.f32.mrf.mxu0 }
 0xd93   : > { %v7420_v41 = vsel %vm17642_vm9, %v7419_v37, %v7416_v38  ;;  %v7435_v27 = vsel %vm17643_vm14, %v7433_v31, %v7434_v40  ;;  %vm17644_vm11 = vcmask 1045504   ;;  %vm17645_vm8 = vcmask 1046528   ;;  %v16603_v40 = vpop.f32.mrf.mxu1 }
 0xd94   : > { %v7432_v43 = vsel %vm17644_vm11, %v7431_v14, %v7430_v35  ;;  %v7438_v61 = vsel %vm17645_vm8, %v16454_v54, %v16456_v55  ;;  %7472 = vrot.lane.b32.xlu1 %v7429_v52, %s11124_s15  ;;  %v7421_v38 = vrot.slane %v7420_v41, 4  ;;  %v7439_v37 = vsel %vm7112_vm15, %v16422_v63, %v16432_v45  ;;  %v7647_v41 = vld [vmem:[%s17188_s9 + $0x1c0] sm:$0xff]  ;;  %v7573_v14 = vld [vmem:[#allocation3 + $0x70] sm:$0xff]  ;;  %v7648_v52 = vld [vmem:[%s17188_s9 + $0x1c8] sm:$0xff] }
 0xd95   : > { %v7571_v50 = vld [vmem:[#allocation3 + $0x60] sm:$0xff]  ;;  %v7572_v3 = vld [vmem:[#allocation3 + $0x68] sm:$0xff]  ;;  %v7441_v47 = vsel %vm7114_vm0, %v16397_v56, %v16388_v46  ;;  %v7442_v54 = vsel %vm7118_vm3, %v16360_v33, %v16362_v9  ;;  %vm17646_vm13 = vcmask 1045506   ;;  %vm17647_vm10 = vcmask 1046529  }
 0xd96   : > { %8832 = vst [vmem:[#allocation1] ss:$4 sm:$0xff] %v7571_v50  ;;  %v7436_v35 = vsel %vm17646_vm13, %v7435_v27, %v7432_v43  ;;  %v7440_v60 = vsel %vm17647_vm10, %v7439_v37, %v7438_v61  ;;  %vm17648_vm5 = vcmask 1044483   ;;  %7470 = vrot.lane.b32.xlu0 %v7421_v38, %s11124_s15  ;;  %vm17649_vm9 = vcmask 1046531   ;;  %v7649_v43 = vld [vmem:[%s17188_s9 + $0x1d0] sm:$0xff] }
 0xd97   : > { %v7443_v31 = vsel %vm17648_vm5, %v7441_v47, %v7442_v54  ;;  %8834 = vst [vmem:[#allocation1 + $0x20] ss:$4 sm:$0xff] %v7572_v3  ;;  %v16606_v63 = vpop.f32.mrf.mxu2  ;;  %v16608_v45 = vpop.f32.mrf.mxu3  ;;  %v7437_v56 = vrot.slane %v7436_v35, 6  ;;  %v7650_v35 = vld [vmem:[%s17188_s9 + $0x1d8] sm:$0xff]  ;;  %vm17653_vm14 = vcmask 1039360   ;;  %vm17657_vm10 = vcmask 793600  }
 0xd98   : > { %v16610_v46 = vpop.permute.xlu1 %6666  ;;  %v7444_v33 = vsel %vm17649_vm9, %v7443_v31, %v7440_v60  ;;  %vm17654_vm11 = vmmov %vm17653_vm14 }
 0xd99   : > { %v16613_v9 = vpop.permute.xlu0 %6664  ;;  %v7445_v27 = vrot.slane %v7444_v33, 7  ;;  %v16625_v37 = vpop.permute.xlu2 %6812  ;;  %vm17655_vm8 = vmmov %vm17654_vm11 }
 0xd9a   : > { %7474 = vrot.lane.b32.xlu2 %v7437_v56, %s11124_s15  ;;  %v16627_v47 = vpop.f32.mrf.mxu0  ;;  %vm17656_vm13 = vmmov %vm17655_vm8 }
 0xd9b   : > { %17650 = vst [vmem:[#allocation13_spill] sm:$0xff] %v16627_v47  ;;  %vm17658_vm5 = vmmov %vm17657_vm10 }
 0xd9c   : > { %vm17659_vm9 = vmmov %vm17655_vm8 }
 0xd9d   : > { %v8835_v61 = vld.sshfl [vmem:[#allocation1] sm:$0xff pattern:$0x73625140]  ;;  %v8836_v50 = vld.sshfl [vmem:[#allocation1 + $0x8] sm:$0xff pattern:$0x73625140] }
 0xd9e   : > { %8871 = vmatmul.f32.vlgmr.msra.gmra.mxu2 %v8835_v61  ;;  %8891 = vmatmul.f32.vlgmr.msra.gmra.mxu3 %v8836_v50  ;;  %v8837_v3 = vld.sshfl [vmem:[#allocation1 + $0x10] sm:$0xff pattern:$0x73625140]  ;;  %v8838_v38 = vld.sshfl [vmem:[#allocation1 + $0x18] sm:$0xff pattern:$0x73625140] }
 0xd9f   : > { %7476 = vrot.lane.b32.xlu0 %v7445_v27, %s11124_s15  ;;  %8911 = vmatmul.f32.vlgmr.msrb.gmra.mxu0 %v8837_v3  ;;  %9017 = vst [vmem:[#allocation1] ss:$4 sm:$0xff] %v7573_v14  ;;  %v8839_v54 = vld.sshfl [vmem:[#allocation1 + $0x20] sm:$0xff pattern:$0x73625140]  ;;  %v16633_v60 = vpop.f32.mrf.mxu2  ;;  %v16635_v31 = vpop.f32.mrf.mxu3 }
 0xda0   : > { %8931 = vmatmul.f32.vlgmr.msrb.gmra.mxu1 %v8838_v38  ;;  %17651 = vst [vmem:[#allocation14_spill] sm:$0xff] %v16635_v31  ;;  %v8840_v56 = vld.sshfl [vmem:[#allocation1 + $0x28] sm:$0xff pattern:$0x73625140]  ;;  %9055 = vmatpush.xpose.msra.mxu2 %v7647_v41  ;;  %v7574_v61 = vld [vmem:[#allocation3 + $0x78] sm:$0xff]  ;;  %v6811_v50 = vpop.permute.xlu1 %6810  ;;  %v16637_v27 = vpop.f32.mrf.mxu1  ;;  %v7653_v41 = vld [vmem:[%s17188_s9 + $0x1f0] sm:$0xff] }
 0xda1   : > { %v8841_v33 = vld.sshfl [vmem:[#allocation1 + $0x30] sm:$0xff pattern:$0x73625140]  ;;  %v8842_v4 = vld.sshfl [vmem:[#allocation1 + $0x38] sm:$0xff pattern:$0x73625140]  ;;  %9075 = vmatpush.xpose.msra.mxu3 %v7648_v52  ;;  %9095 = vmatpush.xpose.msrb.mxu0 %v7649_v43  ;;  %v16639_v14 = vpop.permute.xlu0 %6808 }
 0xda2   : > { %17652 = vst [vmem:[#allocation10_spill] sm:$0xff] %v16637_v27  ;;  %9115 = vmatpush.xpose.msrb.mxu1 %v7650_v35  ;;  %v7651_v3 = vld [vmem:[%s17188_s9 + $0x1e0] sm:$0xff]  ;;  %v7652_v38 = vld [vmem:[%s17188_s9 + $0x1e8] sm:$0xff]  ;;  %v7654_v52 = vld [vmem:[%s17188_s9 + $0x1f8] sm:$0xff] }
 0xda3   : > { %9019 = vst [vmem:[#allocation1 + $0x20] ss:$4 sm:$0xff] %v7574_v61  ;;  %v16654_v61 = vpop.permute.xlu2 %6924 }
 0xda6   : > { %8951 = vmatmul.f32.vlgmr.msrb.gmra.mxu2 %v8839_v54  ;;  %8971 = vmatmul.f32.vlgmr.msrb.gmra.mxu3 %v8840_v56  ;;  %v8542_v56 = vpop.f32.mrf.mxu0  ;;  %v9020_v48 = vld.sshfl [vmem:[#allocation1] sm:$0xff pattern:$0x73625140]  ;;  %v9021_v26 = vld.sshfl [vmem:[#allocation1 + $0x8] sm:$0xff pattern:$0x73625140] }
 0xda7   : > { %8991 = vmatmul.f32.vlgmr.msra.gmra.mxu0 %v8841_v33  ;;  %9135 = vmatpush.xpose.msrb.mxu2 %v7651_v3  ;;  %v8502_v43 = vpop.f32.mrf.mxu2  ;;  %v8522_v35 = vpop.f32.mrf.mxu3  ;;  %v9023_v3 = vld.sshfl [vmem:[#allocation1 + $0x18] sm:$0xff pattern:$0x73625140] }
 0xda8   : > { %10878 = vmatmul.msk.f32.vlgmr.msra.gmra.mxu1 %vm7739_vm4, %v8842_v4  ;;  %9155 = vmatpush.xpose.msrb.mxu3 %v7652_v38  ;;  %v6817_v27 = vpop.permute.xlu1 %6816  ;;  %v8523_v54 = vadd.f32 %v8522_v35, %v8502_v43  ;;  %v8562_v42 = vpop.f32.mrf.mxu1  ;;  %v9022_v4 = vld.sshfl [vmem:[#allocation1 + $0x10] sm:$0xff pattern:$0x73625140] }
 0xda9   : > { %9175 = vmatpush.xpose.msra.mxu0 %v7653_v41  ;;  %10879 = vmatpush.xpose.msk.msra.mxu1 %vm7739_vm4, %v7654_v52  ;;  %v6815_v12 = vpop.permute.xlu0 %6814  ;;  %v6701_v41 = vsel %vm17653_vm14, %v16566_v44, %v16504_v17  ;;  %vm17660_vm14 = vmmov %vm17655_vm8 }
 0xdaa   : > { %v8543_v47 = vadd.f32 %v8542_v56, %v8523_v54  ;;  %v9024_v52 = vld.sshfl [vmem:[#allocation1 + $0x20] sm:$0xff pattern:$0x73625140]  ;;  %v9025_v35 = vld.sshfl [vmem:[#allocation1 + $0x28] sm:$0xff pattern:$0x73625140] }
 0xdab   : > { %v6931_v43 = vpop.permute.xlu2 %6930 }
 0xdac   : > { %v16657_v33 = vadd.f32 %v8562_v42, %v8543_v47  ;;  %v6700_v42 = vsel %vm17654_vm11, %v16574_v29, %v16566_v44  ;;  %v6702_v47 = vsel %vm17656_vm13, %v16504_v17, %v16613_v9  ;;  %v6699_v44 = vsel %vm17659_vm9, %v16409_v5, %v16574_v29  ;;  %vm17663_vm13 = vmmov %vm17658_vm5 }
 0xdad   : > { %v6761_v17 = vmax.f32 %v16191_v0, %v6700_v42  ;;  %vm17661_vm11 = vcmask 801792  }
 0xdae   : > { %9056 = vmatmul.f32.vlgmr.msra.gmra.mxu2 %v9020_v48  ;;  %9076 = vmatmul.f32.vlgmr.msra.gmra.mxu3 %v9021_v26  ;;  %v6704_v26 = vsel %vm17655_vm8, %v16610_v46, %v16427_v8  ;;  %v9026_v48 = vld.sshfl [vmem:[#allocation1 + $0x30] sm:$0xff pattern:$0x73625140]  ;;  %v6703_v8 = vsel %vm17660_vm14, %v16613_v9, %v16610_v46  ;;  %vm17662_vm8 = vmmov %vm17661_vm11 }
 0xdaf   : > { %9096 = vmatmul.f32.vlgmr.msrb.gmra.mxu0 %v9022_v4  ;;  %v9027_v4 = vld.sshfl [vmem:[#allocation1 + $0x38] sm:$0xff pattern:$0x73625140] }
 0xdb0   : > { %9116 = vmatmul.f32.vlgmr.msrb.gmra.mxu1 %v9023_v3  ;;  %v6929_v38 = vpop.permute.xlu1 %6928  ;;  %v6762_v3 = vmax.f32 %v16183_v22, %v6701_v41  ;;  %v6850_v22 = vsel %vm17662_vm8, %v16639_v14, %v6811_v50 }
 0xdb1   : > { %v6927_v31 = vpop.permute.xlu0 %6926  ;;  %v6969_v54 = vsel %vm17657_vm10, %v6929_v38, %v6931_v43  ;;  %vm17664_vm10 = vmmov %vm17662_vm8 }
 0xdb2   : > { %v6968_v56 = vsel %vm17658_vm5, %v6927_v31, %v6929_v38  ;;  %v6851_v38 = vsel %vm17661_vm11, %v6811_v50, %v16625_v37  ;;  %v6849_v0 = vsel %vm17664_vm10, %v16586_v6, %v16639_v14  ;;  %vm17665_vm5 = vmmov %vm17662_vm8  ;;  %vm17671_vm10 = vcmask 1039360  }
 0xdb3   : > { %v7027_v29 = vmax.f32 %v6851_v38, %v6969_v54  ;;  %v7026_v46 = vmax.f32 %v6850_v22, %v6968_v56  ;;  %vm17666_vm9 = vmmov %vm17665_vm5  ;;  %v6655_v14 = vpop.permute.xlu2 %6654 }
 0xdb4   : > { %v6852_v50 = vsel %vm17666_vm9, %v16625_v37, %v6815_v12  ;;  %vm17667_vm14 = vmmov %vm17665_vm5  ;;  %vm17673_vm9 = vcmask 1046528  }
 0xdb5   : > { %vm17668_vm11 = vmmov %vm17663_vm13  ;;  %v7055_v38 = vmax.f32 %v6761_v17, %v7026_v46 }
 0xdb6   : > { %9136 = vmatmul.f32.vlgmr.msrb.gmra.mxu2 %v9024_v52  ;;  %9156 = vmatmul.f32.vlgmr.msrb.gmra.mxu3 %v9025_v35  ;;  %v6765_v52 = vmax.f32 %v16214_v10, %v6704_v26  ;;  %v6763_v35 = vmax.f32 %v16216_v32, %v6702_v47  ;;  %v6854_v10 = vsel %vm17665_vm5, %v6817_v27, %v16411_v21  ;;  %vm17669_vm8 = vmmov %vm17668_vm11  ;;  %vm17672_vm5 = vcmask 1046534  }
 0xdb7   : > { %9176 = vmatmul.f32.vlgmr.msra.gmra.mxu0 %v9026_v48  ;;  %v6967_v48 = vsel %vm17663_vm13, %v16654_v61, %v6927_v31  ;;  %v6853_v32 = vsel %vm17667_vm14, %v6815_v12, %v6817_v27  ;;  %vm17670_vm13 = vmmov %vm17669_vm8  ;;  %v6760_v21 = vmax.f32 %v16185_v57, %v6699_v44  ;;  %v7097_v12 = vrot.slane %v16456_v55, 1 }
 0xdb8   : > { %10880 = vmatmul.msk.f32.vlgmr.msra.gmra.mxu1 %vm7739_vm4, %v9027_v4  ;;  %v6935_v41 = vpop.permute.xlu1 %6934  ;;  %v6764_v4 = vmax.f32 %v16218_v30, %v6703_v8  ;;  %v7025_v30 = vmax.f32 %v6849_v0, %v6967_v48  ;;  %v7056_v8 = vmax.f32 %v6762_v3, %v7027_v29  ;;  %v7092_v48 = vrot.slane %v7055_v38, 6  ;;  %vm17674_vm14 = vmmov %vm17669_vm8 }
 0xdb9   : > { %v6933_v9 = vpop.permute.xlu0 %6932  ;;  %v6972_v42 = vsel %vm17668_vm11, %v6935_v41, %v16346_v1  ;;  %v6698_v1 = vsel %vm17671_vm10, %v6655_v14, %v16409_v5  ;;  %vm17675_vm11 = vmmov %vm17672_vm5  ;;  %vm17678_vm10 = vcmask 801792  }
 0xdba   : > { %v6970_v31 = vsel %vm17669_vm8, %v6931_v43, %v6933_v9  ;;  %v6971_v26 = vsel %vm17670_vm13, %v6933_v9, %v6935_v41  ;;  %v7030_v47 = vmax.f32 %v6854_v10, %v6972_v42  ;;  %v7054_v27 = vmax.f32 %v6760_v21, %v7025_v30  ;;  %vm17676_vm8 = vmmov %vm17672_vm5 }
 0xdbb   : > { %v7028_v54 = vmax.f32 %v6852_v50, %v6970_v31  ;;  %v7029_v56 = vmax.f32 %v6853_v32, %v6971_v26  ;;  %v7093_v41 = vrot.slane %v7056_v8, 5  ;;  %v6759_v29 = vmax.f32 %v16266_v20, %v6698_v1  ;;  %vm17677_vm13 = vmmov %vm17673_vm9 }
 0xdbc   : > { %v7059_v22 = vmax.f32 %v6765_v52, %v7030_v47 }
 0xdbd   : > { %v7057_v37 = vmax.f32 %v6763_v35, %v7028_v54  ;;  %v7058_v7 = vmax.f32 %v6764_v4, %v7029_v56  ;;  %v7181_v4 = vsel %vm7100_vm2, %v7092_v48, %v7093_v41  ;;  %v7188_v50 = vsel %vm7114_vm0, %v7092_v48, %v7093_v41 }
 0xdbe   : > { %v7096_v43 = vrot.slane %v7059_v22, 2  ;;  %v7196_v32 = vsel %vm7104_vm12, %v7092_v48, %v7093_v41  ;;  %v7204_v31 = vsel %vm7118_vm3, %v7092_v48, %v7093_v41  ;;  %v7212_v26 = vsel %vm17675_vm11, %v7092_v48, %v7093_v41 }
 0xdbf   : > { %v7094_v9 = vrot.slane %v7057_v37, 4  ;;  %v7095_v0 = vrot.slane %v7058_v7, 3  ;;  %v7091_v7 = vrot.slane %v7054_v27, 7  ;;  %v7228_v37 = vsel %vm7098_vm6, %v7092_v48, %v7093_v41 }
 0xdc0   : > { %v7184_v10 = vsel %vm17672_vm5, %v7096_v43, %v7097_v12  ;;  %v7191_v3 = vsel %vm17673_vm9, %v7097_v12, %v7096_v43  ;;  %v7199_v57 = vsel %vm7098_vm6, %v7096_v43, %v7097_v12  ;;  %v7207_v44 = vsel %vm7112_vm15, %v7096_v43, %v7097_v12  ;;  %v6923_v35 = vpop.permute.xlu1 %6922  ;;  %vm17679_vm5 = vmmov %vm17673_vm9 }
 0xdc1   : > { %v7215_v17 = vsel %vm7100_vm2, %v7096_v43, %v7097_v12  ;;  %v7223_v55 = vsel %vm7114_vm0, %v7096_v43, %v7097_v12  ;;  %v7231_v5 = vsel %vm7104_vm12, %v7096_v43, %v7097_v12  ;;  %v7239_v52 = vsel %vm7118_vm3, %v7096_v43, %v7097_v12  ;;  %v6805_v46 = vpop.permute.xlu0 %6804 }
 0xdc2   : > { %v6966_v42 = vsel %vm17674_vm14, %v6923_v35, %v16654_v61  ;;  %v7183_v30 = vsel %vm7104_vm12, %v7094_v9, %v7095_v0  ;;  %v7190_v47 = vsel %vm7118_vm3, %v7094_v9, %v7095_v0  ;;  %v7198_v20 = vsel %vm17676_vm8, %v7094_v9, %v7095_v0 }
 0xdc3   : > { %v7206_v54 = vsel %vm17677_vm13, %v7095_v0, %v7094_v9  ;;  %v7214_v56 = vsel %vm7098_vm6, %v7094_v9, %v7095_v0  ;;  %v6848_v14 = vsel %vm17678_vm10, %v6805_v46, %v16586_v6  ;;  %v7222_v8 = vsel %vm7112_vm15, %v7094_v9, %v7095_v0 }
 0xdc4   : > { %v7230_v61 = vsel %vm7100_vm2, %v7094_v9, %v7095_v0  ;;  %v7238_v38 = vsel %vm7114_vm0, %v7094_v9, %v7095_v0  ;;  %v7024_v21 = vmax.f32 %v6848_v14, %v6966_v42  ;;  %v7220_v22 = vsel %vm17679_vm5, %v7093_v41, %v7092_v48 }
 0xdc5   : > { %v7236_v12 = vsel %vm7112_vm15, %v7092_v48, %v7093_v41  ;;  %vm17680_vm9 = vcmask 1045508   ;;  %v7192_v27 = vsel %vm7121_vm1, %v7190_v47, %v7191_v3  ;;  %vm17681_vm14 = vcmask 1045504  }
 0xdc6   : > { %v7185_v1 = vsel %vm17680_vm9, %v7183_v30, %v7184_v10  ;;  %v7200_v43 = vsel %vm17681_vm14, %v7199_v57, %v7198_v20  ;;  %vm17682_vm11 = vcmask 1046529   ;;  %v7053_v35 = vmax.f32 %v6759_v29, %v7024_v21 }
 0xdc7   : > { %v7208_v6 = vsel %vm17682_vm11, %v7207_v44, %v7206_v54  ;;  %vm17683_vm8 = vcmask 1041408   ;;  %vm17684_vm13 = vcmask 1042433   ;;  %vm17685_vm10 = vcmask 1043458  }
 0xdc8   : > { %v7216_v46 = vsel %vm17683_vm8, %v7214_v56, %v7215_v17  ;;  %v7224_v9 = vsel %vm17684_vm13, %v7222_v8, %v7223_v55  ;;  %v7232_v0 = vsel %vm17685_vm10, %v7230_v61, %v7231_v5  ;;  %vm17686_vm5 = vcmask 1044483   ;;  %vm17687_vm9 = vmmov %vm17683_vm8 }
 0xdc9   : > { %v7240_v42 = vsel %vm17686_vm5, %v7238_v38, %v7239_v52  ;;  %v7180_v14 = vsel %vm7098_vm6, %v7053_v35, %v7091_v7  ;;  %v7187_v41 = vsel %vm7112_vm15, %v7053_v35, %v7091_v7  ;;  %v7195_v48 = vsel %vm7100_vm2, %v7053_v35, %v7091_v7  ;;  %vm17688_vm14 = vmmov %vm17684_vm13 }
 0xdca   : > { %v7203_v10 = vsel %vm7114_vm0, %v7053_v35, %v7091_v7  ;;  %v7182_v3 = vsel %vm17687_vm9, %v7180_v14, %v7181_v4  ;;  %v7189_v57 = vsel %vm17688_vm14, %v7187_v41, %v7188_v50  ;;  %vm17689_vm11 = vmmov %vm17685_vm10  ;;  %vm17691_vm13 = vcmask 1043456  }
 0xdcb   : > { %v7197_v44 = vsel %vm17689_vm11, %v7195_v48, %v7196_v32  ;;  %vm17690_vm8 = vmmov %vm17686_vm5  ;;  %v7186_v55 = vsel %vm17691_vm13, %v7182_v3, %v7185_v1  ;;  %vm17692_vm10 = vcmask 1044481   ;;  %vm17693_vm5 = vcmask 1045506  }
 0xdcc   : > { %v7205_v17 = vsel %vm17690_vm8, %v7203_v10, %v7204_v31  ;;  %v7193_v5 = vsel %vm17692_vm10, %v7189_v57, %v7192_v27  ;;  %v7201_v52 = vsel %vm17693_vm5, %v7197_v44, %v7200_v43  ;;  %vm17694_vm6 = vcmask 1046531   ;;  %7277 = vst.msk [vmem:[#allocation3 + $0x80] ss:$2 sm:$0xff] %vm15868_vm7, %v7186_v55  ;;  %vm17698_vm9 = vmmov %vm17691_vm13 }
 0xdcd   : > { %v7209_v29 = vsel %vm17694_vm6, %v7205_v17, %v7208_v6  ;;  %v7194_v30 = vrot.slane %v7193_v5, 1  ;;  %v7202_v47 = vrot.slane %v7201_v52, 2  ;;  %v7211_v54 = vsel %vm7104_vm12, %v7053_v35, %v7091_v7  ;;  %vm17701_vm12 = vmmov %vm17692_vm10  ;;  %v7657_v6 = vld [vmem:[%s17188_s9 + $0x210] sm:$0xff] }
 0xdce   : > { %v7210_v20 = vrot.slane %v7209_v29, 3  ;;  %vm17695_vm0 = vcmask 1045508   ;;  %v7219_v50 = vsel %vm7118_vm3, %v7053_v35, %v7091_v7  ;;  %vm17696_vm2 = vcmask 1046534   ;;  %vm17702_vm8 = vmmov %vm17693_vm5  ;;  %9280 = vmatpush.xpose.msrb.mxu0 %v7657_v6  ;;  %v17710_v6 = vld [vmem:[#allocation12_spill] sm:$0xff] }
 0xdcf   : > { %v7213_v4 = vsel %vm17695_vm0, %v7211_v54, %v7212_v26  ;;  %v7227_v32 = vsel %vm17696_vm2, %v7053_v35, %v7091_v7  ;;  %vm17697_vm15 = vcmask 1046528   ;;  %v7221_v8 = vsel %vm7121_vm1, %v7219_v50, %v7220_v22  ;;  %7279 = vst.msk [vmem:[#allocation3 + $0x90] ss:$2 sm:$0xff] %vm15868_vm7, %v7194_v30  ;;  %vm17703_vm3 = vmmov %vm17694_vm6  ;;  %v8622_v50 = vpop.f32.mrf.mxu0 }
 0xdd0   : > { %v7235_v31 = vsel %vm17697_vm15, %v7091_v7, %v7053_v35  ;;  %v7217_v56 = vsel %vm17698_vm9, %v7216_v46, %v7213_v4  ;;  %vm17699_vm14 = vcmask 1045504   ;;  %vm17700_vm11 = vcmask 1046529   ;;  %7281 = vst.msk [vmem:[#allocation3 + $0xa0] ss:$2 sm:$0xff] %vm15868_vm7, %v7202_v47  ;;  %v7658_v35 = vld [vmem:[%s17188_s9 + $0x218] sm:$0xff]  ;;  %v7659_v46 = vld [vmem:[%s17188_s9 + $0x220] sm:$0xff] }
 0xdd1   : > { %v7229_v61 = vsel %vm17699_vm14, %v7228_v37, %v7227_v32  ;;  %v7237_v38 = vsel %vm17700_vm11, %v7236_v12, %v7235_v31  ;;  %v7218_v21 = vrot.slane %v7217_v56, 4  ;;  %v7225_v26 = vsel %vm17701_vm12, %v7224_v9, %v7221_v8  ;;  %7283 = vst.msk [vmem:[#allocation3 + $0xb0] ss:$2 sm:$0xff] %vm15868_vm7, %v7210_v20  ;;  %v7655_v37 = vld [vmem:[%s17188_s9 + $0x200] sm:$0xff]  ;;  %v7656_v12 = vld [vmem:[%s17188_s9 + $0x208] sm:$0xff]  ;;  %9300 = vmatpush.xpose.msrb.mxu1 %v7658_v35  ;;  %v8642_v56 = vpop.f32.mrf.mxu1 }
 0xdd2   : > { %v7233_v1 = vsel %vm17702_vm8, %v7232_v0, %v7229_v61  ;;  %v7241_v27 = vsel %vm17703_vm3, %v7240_v42, %v7237_v38  ;;  %v7226_v7 = vrot.slane %v7225_v26, 5  ;;  %9240 = vmatpush.xpose.msra.mxu2 %v7655_v37  ;;  %9260 = vmatpush.xpose.msra.mxu3 %v7656_v12  ;;  %v7660_v9 = vld [vmem:[%s17188_s9 + $0x228] sm:$0xff]  ;;  %v7661_v0 = vld [vmem:[%s17188_s9 + $0x230] sm:$0xff]  ;;  %v7662_v42 = vld [vmem:[%s17188_s9 + $0x238] sm:$0xff]  ;;  %vm17704_vm1 = vcmask 1014784  }
 0xdd3   : > { %v7234_v43 = vrot.slane %v7233_v1, 6  ;;  %v7242_v22 = vrot.slane %v7241_v27, 7  ;;  %7285 = vst.msk [vmem:[#allocation3 + $0xc0] ss:$2 sm:$0xff] %vm15868_vm7, %v7218_v21  ;;  %9360 = vmatpush.xpose.msra.mxu0 %v7661_v0  ;;  %v7968_v10 = vadd.f32 %v16357_v58, %v16355_v2  ;;  %v7783_v57 = vadd.f32 %v16304_v36, %v16302_v51  ;;  %vm17705_vm13 = vmmov %vm17704_vm1  ;;  %v7665_v61 = vld [vmem:[%s17188_s9 + $0x250] sm:$0xff]  ;;  %v7666_v38 = vld [vmem:[%s17188_s9 + $0x258] sm:$0xff] }
 0xdd4   : > { %7287 = vst.msk [vmem:[#allocation3 + $0xd0] ss:$2 sm:$0xff] %vm15868_vm7, %v7226_v7  ;;  %v8153_v17 = vadd.f32 %v16471_v18, %v16469_v25  ;;  %v8338_v30 = vadd.f32 %v16608_v45, %v16606_v63  ;;  %v8582_v45 = vpop.f32.mrf.mxu2  ;;  %vm17706_vm10 = vmmov %vm17704_vm1  ;;  %v17708_v21 = vld [vmem:[#allocation14_spill] sm:$0xff]  ;;  %v7668_v12 = vld [vmem:[%s17188_s9 + $0x268] sm:$0xff]  ;;  %vm10680_vm0 = vcmask 58368  }
 0xdd5   : > { %7289 = vst.msk [vmem:[#allocation3 + $0xe0] ss:$2 sm:$0xff] %vm15868_vm7, %v7234_v43  ;;  %10881 = vmatpush.xpose.msk.msra.mxu1 %vm7739_vm4, %v7662_v42  ;;  %v7988_v29 = vadd.f32 %v16336_v28, %v7968_v10  ;;  %v7803_v2 = vadd.f32 %v16282_v13, %v7783_v57  ;;  %v7663_v13 = vld [vmem:[%s17188_s9 + $0x240] sm:$0xff]  ;;  %v8583_v8 = vadd.f32 %v8582_v45, %v16657_v33  ;;  %vm17711_vm5 = vmmov %vm17704_vm1 }
 0xdd6   : > { %7291 = vst.msk [vmem:[#allocation3 + $0xf0] ss:$2 sm:$0xff] %vm15868_vm7, %v7242_v22  ;;  %9320 = vmatpush.xpose.msrb.mxu2 %v7659_v46  ;;  %9340 = vmatpush.xpose.msrb.mxu3 %v7660_v9  ;;  %v8173_v58 = vadd.f32 %v16437_v19, %v8153_v17  ;;  %v8358_v36 = vadd.f32 %v16588_v23, %v8338_v30  ;;  %v7664_v19 = vld [vmem:[%s17188_s9 + $0x248] sm:$0xff]  ;;  %v8602_v23 = vpop.f32.mrf.mxu3  ;;  %vm17714_vm6 = vmmov %vm17704_vm1 }
 0xdd7   : > { %v8008_v51 = vadd.f32 %v16338_v11, %v7988_v29  ;;  %v7823_v18 = vadd.f32 %v16284_v49, %v7803_v2  ;;  %v17709_v33 = vld [vmem:[#allocation15_spill] sm:$0xff]  ;;  %v8603_v46 = vadd.f32 %v8602_v23, %v8583_v8  ;;  %v17715_v2 = vld [vmem:[#allocation18_spill] sm:$0xff]  ;;  %vm17718_vm2 = vmmov %vm17704_vm1 }
 0xdd8   : > { %v8193_v63 = vadd.f32 %v16439_v62, %v8173_v58  ;;  %v8378_v62 = vadd.f32 %v16603_v40, %v8358_v36  ;;  %vm17719_vm15 = vmmov %vm17704_vm1 }
 0xdd9   : > { %v8028_v47 = vadd.f32 %v16399_v59, %v8008_v51  ;;  %v7843_v11 = vadd.f32 %v16328_v16, %v7823_v18  ;;  %v17716_v51 = vld [vmem:[#allocation9_spill] sm:$0xff]  ;;  %vm17720_vm9 = vmmov %vm17704_vm1 }
 0xdda   : > { %v8213_v59 = vadd.f32 %v16555_v53, %v8193_v63  ;;  %v8398_v31 = vadd.f32 %v16633_v60, %v8378_v62 }
 0xddb   : > { %v8048_v16 = vadd.f32 %v16401_v34, %v8028_v47  ;;  %v7863_v53 = vadd.f32 %v16330_v39, %v7843_v11  ;;  %v17707_v34 = vld [vmem:[#allocation17_spill] sm:$0xff]  ;;  %v17717_v47 = vld [vmem:[#allocation10_spill] sm:$0xff] }
 0xddc   : > { %v8233_v40 = vadd.f32 %v16557_v15, %v8213_v59  ;;  %v8418_v26 = vadd.f32 %v17708_v21, %v8398_v31  ;;  %v7667_v15 = vld [vmem:[%s17188_s9 + $0x260] sm:$0xff] }
 0xddd   : > { %v8068_v60 = vadd.f32 %v17707_v34, %v8048_v16  ;;  %v7883_v27 = vadd.f32 %v17709_v33, %v7863_v53 }
 0xdde   : > { %v8253_v35 = vadd.f32 %v17710_v6, %v8233_v40 }
 0xddf   : > { %v7903_v58 = vadd.f32 %v17715_v2, %v7883_v27  ;;  %v7671_v27 = vld [vmem:[%s17188_s9 + $0x280] sm:$0xff] }
 0xde0   : > { %v8273_v36 = vadd.f32 %v17716_v51, %v8253_v35  ;;  %v7674_v35 = vld [vmem:[%s17188_s9 + $0x298] sm:$0xff] }
 0xde1   : > { %v10681_v45 = vsel %vm10680_vm0, %v7903_v58, 0.0 }
 0xde2   : > { %v10684_v23 = vsel %vm10680_vm0, %v8273_v36, 0.0 }
 0xde4   : > { %v7463_v14 = vpop.permute.xlu2 %7462 }
 0xde5   : > { %v7486_v41 = vrot.slane %v7463_v14, 1 }
 0xde7   : > { %v7503_v48 = vsel %vm17704_vm1, %v7463_v14, %v7486_v41  ;;  %v7669_v14 = vld [vmem:[%s17188_s9 + $0x270] sm:$0xff]  ;;  %v7670_v41 = vld [vmem:[%s17188_s9 + $0x278] sm:$0xff] }
 0xde8   : > { %7544 = vst.msk [vmem:[#allocation3 + $0x81] ss:$2 sm:$0xff] %vm15868_vm7, %v7503_v48 }
 0xdec   : > { %v7469_v3 = vpop.permute.xlu2 %7468 }
 0xded   : > { %v7489_v44 = vrot.slane %v7469_v3, 1 }
 0xdef   : > { %v7575_v55 = vld [vmem:[#allocation3 + $0x80] sm:$0xff]  ;;  %v7576_v5 = vld [vmem:[#allocation3 + $0x88] sm:$0xff]  ;;  %v7506_v52 = vsel %vm17705_vm13, %v7469_v3, %v7489_v44 }
 0xdf0   : > { %9202 = vst [vmem:[#allocation1] ss:$4 sm:$0xff] %v7575_v55  ;;  %v17712_v44 = vld [vmem:[#allocation11_spill] sm:$0xff]  ;;  %v17713_v55 = vld [vmem:[#allocation13_spill] sm:$0xff] }
 0xdf1   : > { %9204 = vst [vmem:[#allocation1 + $0x20] ss:$4 sm:$0xff] %v7576_v5  ;;  %v8088_v17 = vadd.f32 %v17712_v44, %v8068_v60  ;;  %v8438_v5 = vadd.f32 %v17713_v55, %v8418_v26  ;;  %v7678_v44 = vld [vmem:[%s17188_s9 + $0x2b8] sm:$0xff] }
 0xdf2   : > { %7550 = vst.msk [vmem:[#allocation3 + $0xb1] ss:$2 sm:$0xff] %vm15868_vm7, %v7506_v52 }
 0xdf3   : > { %v8458_v63 = vadd.f32 %v17717_v47, %v8438_v5 }
 0xdf4   : > { %v7475_v25 = vpop.permute.xlu2 %7474 }
 0xdf5   : > { %v7492_v28 = vrot.slane %v7475_v25, 1 }
 0xdf7   : > { %v7509_v20 = vsel %vm17706_vm10, %v7475_v25, %v7492_v28  ;;  %v9205_v49 = vld.sshfl [vmem:[#allocation1] sm:$0xff pattern:$0x73625140]  ;;  %v9206_v54 = vld.sshfl [vmem:[#allocation1 + $0x8] sm:$0xff pattern:$0x73625140]  ;;  %v8623_v25 = vadd.f32 %v8622_v50, %v8603_v46 }
 0xdf8   : > { %7556 = vst.msk [vmem:[#allocation3 + $0xe1] ss:$2 sm:$0xff] %vm15868_vm7, %v7509_v20  ;;  %9241 = vmatmul.f32.vlgmr.msra.gmra.mxu2 %v9205_v49  ;;  %9261 = vmatmul.f32.vlgmr.msra.gmra.mxu3 %v9206_v54  ;;  %v9207_v4 = vld.sshfl [vmem:[#allocation1 + $0x10] sm:$0xff pattern:$0x73625140]  ;;  %v10682_v28 = vsel %vm10680_vm0, %v8088_v17, 0.0 }
 0xdf9   : > { %9281 = vmatmul.f32.vlgmr.msrb.gmra.mxu0 %v9207_v4  ;;  %v9208_v32 = vld.sshfl [vmem:[#allocation1 + $0x18] sm:$0xff pattern:$0x73625140]  ;;  %9425 = vmatpush.xpose.msra.mxu2 %v7663_v13  ;;  %v9209_v1 = vld.sshfl [vmem:[#allocation1 + $0x20] sm:$0xff pattern:$0x73625140]  ;;  %v8643_v20 = vadd.f32 %v8642_v56, %v8623_v25  ;;  %v10683_v59 = vadd.f32 %v10682_v28, %v10681_v45 }
 0xdfa   : > { %9301 = vmatmul.f32.vlgmr.msrb.gmra.mxu1 %v9208_v32  ;;  %9445 = vmatpush.xpose.msra.mxu3 %v7664_v19  ;;  %v9210_v37 = vld.sshfl [vmem:[#allocation1 + $0x28] sm:$0xff pattern:$0x73625140]  ;;  %v9211_v42 = vld.sshfl [vmem:[#allocation1 + $0x30] sm:$0xff pattern:$0x73625140] }
 0xdfb   : > { %9465 = vmatpush.xpose.msrb.mxu0 %v7665_v61  ;;  %9485 = vmatpush.xpose.msrb.mxu1 %v7666_v38  ;;  %v8727_v48 = vpop.f32.mrf.mxu0  ;;  %v9212_v57 = vld.sshfl [vmem:[#allocation1 + $0x38] sm:$0xff pattern:$0x73625140]  ;;  %v8747_v29 = vpop.f32.mrf.mxu1  ;;  %v10686_v32 = vsel %vm10680_vm0, %v8458_v63, 0.0  ;;  %v10685_v31 = vadd.f32 %v10684_v23, %v10683_v59  ;;  %v10688_v56 = vsel %vm10680_vm0, %v8643_v20, 0.0  ;;  %v7679_v63 = vld [vmem:[%s17188_s9 + $0x2c0] sm:$0xff] }
 0xdfc   : > { %v7682_v45 = vld [vmem:[%s17188_s9 + $0x2d8] sm:$0xff] }
 0xdfd   : > { %v10687_v34 = vadd.f32 %v10686_v32, %v10685_v31  ;;  %v7683_v31 = vld [vmem:[%s17188_s9 + $0x2e0] sm:$0xff] }
 0xdfe   : > { %v7467_v39 = vpop.permute.xlu1 %7466 }
 0xdff   : > { %v7488_v7 = vrot.slane %v7467_v39, 1  ;;  %v8687_v43 = vpop.f32.mrf.mxu2  ;;  %v10689_v26 = vadd.f32 %v10688_v56, %v10687_v34 }
 0xe00   : > { %v8707_v22 = vpop.f32.mrf.mxu3  ;;  %v7465_v9 = vpop.permute.xlu0 %7464  ;;  %9321 = vmatmul.f32.vlgmr.msrb.gmra.mxu2 %v9209_v1  ;;  %9341 = vmatmul.f32.vlgmr.msrb.gmra.mxu3 %v9210_v37 }
 0xe01   : > { %v8708_v0 = vadd.f32 %v8707_v22, %v8687_v43  ;;  %v7505_v10 = vsel %vm17711_vm5, %v7467_v39, %v7488_v7  ;;  %v7487_v3 = vrot.slane %v7465_v9, 1  ;;  %9361 = vmatmul.f32.vlgmr.msra.gmra.mxu0 %v9211_v42  ;;  %9505 = vmatpush.xpose.msrb.mxu2 %v7667_v15  ;;  %v7672_v7 = vld [vmem:[%s17188_s9 + $0x288] sm:$0xff]  ;;  %v7673_v43 = vld [vmem:[%s17188_s9 + $0x290] sm:$0xff] }
 0xe02   : > { %7548 = vst.msk [vmem:[#allocation3 + $0xa1] ss:$2 sm:$0xff] %vm15868_vm7, %v7505_v10  ;;  %10882 = vmatmul.msk.f32.vlgmr.msra.gmra.mxu1 %vm7739_vm4, %v9212_v57  ;;  %9525 = vmatpush.xpose.msrb.mxu3 %v7668_v12  ;;  %v7676_v10 = vld [vmem:[%s17188_s9 + $0x2a8] sm:$0xff]  ;;  %v7677_v57 = vld [vmem:[%s17188_s9 + $0x2b0] sm:$0xff] }
 0xe03   : > { %v8728_v52 = vadd.f32 %v8727_v48, %v8708_v0  ;;  %v7504_v30 = vsel %vm17714_vm6, %v7465_v9, %v7487_v3  ;;  %9545 = vmatpush.xpose.msra.mxu0 %v7669_v14  ;;  %10883 = vmatpush.xpose.msk.msra.mxu1 %vm7739_vm4, %v7670_v41  ;;  %v8807_v8 = vpop.f32.mrf.mxu0  ;;  %v8827_v60 = vpop.f32.mrf.mxu1  ;;  %v7675_v48 = vld [vmem:[%s17188_s9 + $0x2a0] sm:$0xff]  ;;  %v7581_v3 = vld [vmem:[#allocation3 + $0xb0] sm:$0xff] }
 0xe04   : > { %7546 = vst.msk [vmem:[#allocation3 + $0x91] ss:$2 sm:$0xff] %vm15868_vm7, %v7504_v30  ;;  %v7582_v30 = vld [vmem:[#allocation3 + $0xb8] sm:$0xff] }
 0xe05   : > { %v8748_v18 = vadd.f32 %v8747_v29, %v8728_v52 }
 0xe06   : > { %v7473_v13 = vpop.permute.xlu1 %7472 }
 0xe07   : > { %v7491_v19 = vrot.slane %v7473_v13, 1  ;;  %v8767_v11 = vpop.f32.mrf.mxu2 }
 0xe08   : > { %v7471_v49 = vpop.permute.xlu0 %7470  ;;  %v8768_v54 = vadd.f32 %v8767_v11, %v8748_v18  ;;  %v8787_v50 = vpop.f32.mrf.mxu3  ;;  %v7681_v11 = vld [vmem:[%s17188_s9 + $0x2d0] sm:$0xff] }
 0xe09   : > { %v7508_v62 = vsel %vm17718_vm2, %v7473_v13, %v7491_v19  ;;  %v7490_v4 = vrot.slane %v7471_v49, 1  ;;  %v7579_v46 = vld [vmem:[#allocation3 + $0xa0] sm:$0xff]  ;;  %v7580_v24 = vld [vmem:[#allocation3 + $0xa8] sm:$0xff] }
 0xe0a   : > { %7554 = vst.msk [vmem:[#allocation3 + $0xd1] ss:$2 sm:$0xff] %vm15868_vm7, %v7508_v62  ;;  %v8788_v16 = vadd.f32 %v8787_v50, %v8768_v54  ;;  %v7680_v19 = vld [vmem:[%s17188_s9 + $0x2c8] sm:$0xff] }
 0xe0b   : > { %v7577_v53 = vld [vmem:[#allocation3 + $0x90] sm:$0xff]  ;;  %v7578_v40 = vld [vmem:[#allocation3 + $0x98] sm:$0xff]  ;;  %v7507_v61 = vsel %vm17719_vm15, %v7471_v49, %v7490_v4 }
 0xe0c   : > { %9387 = vst [vmem:[#allocation1] ss:$4 sm:$0xff] %v7577_v53  ;;  %v8808_v38 = vadd.f32 %v8807_v8, %v8788_v16 }
 0xe0d   : > { %9389 = vst [vmem:[#allocation1 + $0x20] ss:$4 sm:$0xff] %v7578_v40 }
 0xe0e   : > { %7552 = vst.msk [vmem:[#allocation3 + $0xc1] ss:$2 sm:$0xff] %vm15868_vm7, %v7507_v61  ;;  %v8828_v21 = vadd.f32 %v8827_v60, %v8808_v38  ;;  %v7684_v60 = vld [vmem:[%s17188_s9 + $0x2e8] sm:$0xff] }
 0xe10   : > { %v10690_v39 = vsel %vm10680_vm0, %v8828_v21, 0.0  ;;  %v7685_v21 = vld [vmem:[%s17188_s9 + $0x2f0] sm:$0xff] }
 0xe11   : > { %v7477_v1 = vpop.permute.xlu0 %7476  ;;  %v16895_v15 = vadd.f32 %v10690_v39, %v10689_v26  ;;  %v7686_v26 = vld [vmem:[%s17188_s9 + $0x2f8] sm:$0xff] }
 0xe12   : > { %v7493_v33 = vrot.slane %v7477_v1, 1 }
 0xe13   : > { %v9390_v37 = vld.sshfl [vmem:[#allocation1] sm:$0xff pattern:$0x73625140]  ;;  %v9391_v12 = vld.sshfl [vmem:[#allocation1 + $0x8] sm:$0xff pattern:$0x73625140] }
 0xe14   : > { %v7510_v22 = vsel %vm17720_vm9, %v7477_v1, %v7493_v33  ;;  %9426 = vmatmul.f32.vlgmr.msra.gmra.mxu2 %v9390_v37  ;;  %9446 = vmatmul.f32.vlgmr.msra.gmra.mxu3 %v9391_v12  ;;  %v9392_v6 = vld.sshfl [vmem:[#allocation1 + $0x10] sm:$0xff pattern:$0x73625140]  ;;  %v9393_v9 = vld.sshfl [vmem:[#allocation1 + $0x18] sm:$0xff pattern:$0x73625140] }
 0xe15   : > { %7558 = vst.msk [vmem:[#allocation3 + $0xf1] ss:$2 sm:$0xff] %vm15868_vm7, %v7510_v22  ;;  %9466 = vmatmul.f32.vlgmr.msrb.gmra.mxu0 %v9392_v6  ;;  %9610 = vmatpush.xpose.msra.mxu2 %v7671_v27  ;;  %v9394_v0 = vld.sshfl [vmem:[#allocation1 + $0x20] sm:$0xff pattern:$0x73625140]  ;;  %v7583_v23 = vld [vmem:[#allocation3 + $0xc0] sm:$0xff] }
 0xe16   : > { %9486 = vmatmul.f32.vlgmr.msrb.gmra.mxu1 %v9393_v9  ;;  %9572 = vst [vmem:[#allocation1] ss:$4 sm:$0xff] %v7579_v46  ;;  %9630 = vmatpush.xpose.msra.mxu3 %v7672_v7  ;;  %v9395_v42 = vld.sshfl [vmem:[#allocation1 + $0x28] sm:$0xff pattern:$0x73625140]  ;;  %v7584_v50 = vld [vmem:[#allocation3 + $0xc8] sm:$0xff] }
 0xe17   : > { %v9396_v14 = vld.sshfl [vmem:[#allocation1 + $0x30] sm:$0xff pattern:$0x73625140]  ;;  %9650 = vmatpush.xpose.msrb.mxu0 %v7673_v43  ;;  %9670 = vmatpush.xpose.msrb.mxu1 %v7674_v35  ;;  %v9397_v41 = vld.sshfl [vmem:[#allocation1 + $0x38] sm:$0xff pattern:$0x73625140] }
 0xe18   : > { %9574 = vst [vmem:[#allocation1 + $0x20] ss:$4 sm:$0xff] %v7580_v24  ;;  %v7585_v1 = vld [vmem:[#allocation3 + $0xd0] sm:$0xff]  ;;  %v7586_v6 = vld [vmem:[#allocation3 + $0xd8] sm:$0xff]  ;;  %vm17721_vm7 = vcmask 64512  }
 0xe19   : > { %v7687_v9 = vld [vmem:[%s17188_s9 + $0x300] sm:$0xff] }
 0xe1c   : > { %9506 = vmatmul.f32.vlgmr.msrb.gmra.mxu2 %v9394_v0  ;;  %9526 = vmatmul.f32.vlgmr.msrb.gmra.mxu3 %v9395_v42  ;;  %v8912_v17 = vpop.f32.mrf.mxu0  ;;  %v7688_v0 = vld [vmem:[%s17188_s9 + $0x308] sm:$0xff] }
 0xe1d   : > { %9546 = vmatmul.f32.vlgmr.msra.gmra.mxu0 %v9396_v14  ;;  %v9575_v55 = vld.sshfl [vmem:[#allocation1] sm:$0xff pattern:$0x73625140]  ;;  %v9576_v5 = vld.sshfl [vmem:[#allocation1 + $0x8] sm:$0xff pattern:$0x73625140]  ;;  %9690 = vmatpush.xpose.msrb.mxu2 %v7675_v48  ;;  %v8932_v2 = vpop.f32.mrf.mxu1 }
 0xe1e   : > { %10884 = vmatmul.msk.f32.vlgmr.msra.gmra.mxu1 %vm7739_vm4, %v9397_v41  ;;  %v9577_v52 = vld.sshfl [vmem:[#allocation1 + $0x10] sm:$0xff pattern:$0x73625140]  ;;  %v9578_v29 = vld.sshfl [vmem:[#allocation1 + $0x18] sm:$0xff pattern:$0x73625140]  ;;  %9710 = vmatpush.xpose.msrb.mxu3 %v7676_v10 }
 0xe1f   : > { %9757 = vst [vmem:[#allocation1] ss:$4 sm:$0xff] %v7581_v3  ;;  %9730 = vmatpush.xpose.msra.mxu0 %v7677_v57  ;;  %10885 = vmatpush.xpose.msk.msra.mxu1 %vm7739_vm4, %v7678_v44  ;;  %v9579_v36 = vld.sshfl [vmem:[#allocation1 + $0x20] sm:$0xff pattern:$0x73625140]  ;;  %v7689_v44 = vld [vmem:[%s17188_s9 + $0x310] sm:$0xff] }
 0xe20   : > { %v9580_v25 = vld.sshfl [vmem:[#allocation1 + $0x28] sm:$0xff pattern:$0x73625140]  ;;  %v9581_v28 = vld.sshfl [vmem:[#allocation1 + $0x30] sm:$0xff pattern:$0x73625140] }
 0xe21   : > { %v8872_v58 = vpop.f32.mrf.mxu2  ;;  %v8892_v51 = vpop.f32.mrf.mxu3  ;;  %v9582_v47 = vld.sshfl [vmem:[#allocation1 + $0x38] sm:$0xff pattern:$0x73625140] }
 0xe22   : > { %v8893_v18 = vadd.f32 %v8892_v51, %v8872_v58  ;;  %9759 = vst [vmem:[#allocation1 + $0x20] ss:$4 sm:$0xff] %v7582_v30 }
 0xe24   : > { %v8913_v13 = vadd.f32 %v8912_v17, %v8893_v18  ;;  %9611 = vmatmul.f32.vlgmr.msra.gmra.mxu2 %v9575_v55  ;;  %9631 = vmatmul.f32.vlgmr.msra.gmra.mxu3 %v9576_v5  ;;  %v8992_v59 = vpop.f32.mrf.mxu0  ;;  %v7587_v55 = vld [vmem:[#allocation3 + $0xe0] sm:$0xff] }
 0xe25   : > { %9651 = vmatmul.f32.vlgmr.msrb.gmra.mxu0 %v9577_v52  ;;  %9795 = vmatpush.xpose.msra.mxu2 %v7679_v63  ;;  %v9012_v61 = vpop.f32.mrf.mxu1  ;;  %v7691_v52 = vld [vmem:[%s17188_s9 + $0x320] sm:$0xff]  ;;  %v7692_v18 = vld [vmem:[%s17188_s9 + $0x328] sm:$0xff] }
 0xe26   : > { %v8933_v20 = vadd.f32 %v8932_v2, %v8913_v13  ;;  %9671 = vmatmul.f32.vlgmr.msrb.gmra.mxu1 %v9578_v29  ;;  %9815 = vmatpush.xpose.msra.mxu3 %v7680_v19  ;;  %v9760_v49 = vld.sshfl [vmem:[#allocation1] sm:$0xff pattern:$0x73625140]  ;;  %v9761_v54 = vld.sshfl [vmem:[#allocation1 + $0x8] sm:$0xff pattern:$0x73625140] }
 0xe27   : > { %9835 = vmatpush.xpose.msrb.mxu0 %v7681_v11  ;;  %9855 = vmatpush.xpose.msrb.mxu1 %v7682_v45  ;;  %v9762_v62 = vld.sshfl [vmem:[#allocation1 + $0x10] sm:$0xff pattern:$0x73625140]  ;;  %v9763_v4 = vld.sshfl [vmem:[#allocation1 + $0x18] sm:$0xff pattern:$0x73625140] }
 0xe28   : > { %9942 = vst [vmem:[#allocation1] ss:$4 sm:$0xff] %v7583_v23 }
 0xe29   : > { %v8952_v32 = vpop.f32.mrf.mxu2  ;;  %v8972_v16 = vpop.f32.mrf.mxu3  ;;  %v16941_v40 = vld.sshfl [vmem:[#allocation1 + $0x20] sm:$0xff pattern:$0x73625140]  ;;  %v16943_v8 = vld.sshfl [vmem:[#allocation1 + $0x28] sm:$0xff pattern:$0x73625140] }
 0xe2a   : > { %v8953_v53 = vadd.f32 %v8952_v32, %v8933_v20  ;;  %v16945_v56 = vld.sshfl [vmem:[#allocation1 + $0x30] sm:$0xff pattern:$0x73625140]  ;;  %v16947_v38 = vld.sshfl [vmem:[#allocation1 + $0x38] sm:$0xff pattern:$0x73625140] }
 0xe2b   : > { %9944 = vst [vmem:[#allocation1 + $0x20] ss:$4 sm:$0xff] %v7584_v50 }
 0xe2c   : > { %v8973_v34 = vadd.f32 %v8972_v16, %v8953_v53  ;;  %9691 = vmatmul.f32.vlgmr.msrb.gmra.mxu2 %v9579_v36  ;;  %9711 = vmatmul.f32.vlgmr.msrb.gmra.mxu3 %v9580_v25  ;;  %v9097_v14 = vpop.f32.mrf.mxu0  ;;  %v7588_v36 = vld [vmem:[#allocation3 + $0xe8] sm:$0xff]  ;;  %v7696_v53 = vld [vmem:[%s17188_s9 + $0x348] sm:$0xff] }
 0xe2d   : > { %9731 = vmatmul.f32.vlgmr.msra.gmra.mxu0 %v9581_v28  ;;  %9875 = vmatpush.xpose.msrb.mxu2 %v7683_v31  ;;  %v9117_v57 = vpop.f32.mrf.mxu1  ;;  %v7693_v28 = vld [vmem:[%s17188_s9 + $0x330] sm:$0xff] }
 0xe2e   : > { %v8993_v39 = vadd.f32 %v8992_v59, %v8973_v34  ;;  %10886 = vmatmul.msk.f32.vlgmr.msra.gmra.mxu1 %vm7739_vm4, %v9582_v47  ;;  %9895 = vmatpush.xpose.msrb.mxu3 %v7684_v60  ;;  %v7694_v47 = vld [vmem:[%s17188_s9 + $0x338] sm:$0xff]  ;;  %v7590_v60 = vld [vmem:[#allocation3 + $0xf8] sm:$0xff] }
 0xe2f   : > { %9915 = vmatpush.xpose.msra.mxu0 %v7685_v21  ;;  %10887 = vmatpush.xpose.msk.msra.mxu1 %vm7739_vm4, %v7686_v26  ;;  %v16960_v27 = vld.sshfl [vmem:[#allocation1] sm:$0xff pattern:$0x73625140]  ;;  %v16962_v7 = vld.sshfl [vmem:[#allocation1 + $0x8] sm:$0xff pattern:$0x73625140] }
 0xe30   : > { %v9013_v33 = vadd.f32 %v9012_v61, %v8993_v39  ;;  %v16964_v37 = vld.sshfl [vmem:[#allocation1 + $0x10] sm:$0xff pattern:$0x73625140]  ;;  %v16966_v12 = vld.sshfl [vmem:[#allocation1 + $0x18] sm:$0xff pattern:$0x73625140] }
 0xe31   : > { %v9057_v43 = vpop.f32.mrf.mxu2  ;;  %v9077_v22 = vpop.f32.mrf.mxu3  ;;  %10127 = vst [vmem:[#allocation1] ss:$4 sm:$0xff] %v7585_v1  ;;  %v7589_v59 = vld [vmem:[#allocation3 + $0xf0] sm:$0xff]  ;;  %v7699_v26 = vld [vmem:[%s17188_s9 + $0x360] sm:$0xff]  ;;  %v7700_v39 = vld [vmem:[%s17188_s9 + $0x368] sm:$0xff] }
 0xe32   : > { %v10692_v35 = vsel %vm10680_vm0, %v9013_v33, 0.0  ;;  %v9078_v46 = vadd.f32 %v9077_v22, %v9057_v43  ;;  %v16976_v24 = vld.sshfl [vmem:[#allocation1 + $0x20] sm:$0xff pattern:$0x73625140]  ;;  %v7698_v61 = vld [vmem:[%s17188_s9 + $0x358] sm:$0xff]  ;;  %v7701_v1 = vld [vmem:[%s17188_s9 + $0x370] sm:$0xff] }
 0xe33   : > { %v10693_v42 = vadd.f32 %v10692_v35, %v16895_v15  ;;  %v16978_v41 = vld.sshfl [vmem:[#allocation1 + $0x28] sm:$0xff pattern:$0x73625140]  ;;  %v16980_v10 = vld.sshfl [vmem:[#allocation1 + $0x30] sm:$0xff pattern:$0x73625140] }
 0xe34   : > { %v9098_v48 = vadd.f32 %v9097_v14, %v9078_v46  ;;  %v16982_v3 = vld.sshfl [vmem:[#allocation1 + $0x38] sm:$0xff pattern:$0x73625140]  ;;  %9796 = vmatmul.f32.vlgmr.msra.gmra.mxu2 %v9760_v49  ;;  %9816 = vmatmul.f32.vlgmr.msra.gmra.mxu3 %v9761_v54  ;;  %v9177_v11 = vpop.f32.mrf.mxu0  ;;  %v7705_v43 = vld [vmem:[%s17188_s9 + $0x390] sm:$0xff]  ;;  %v7711_v46 = vld [vmem:[%s17188_s9 + $0x3c0] sm:$0xff] }
 0xe35   : > { %v7690_v15 = vld [vmem:[%s17188_s9 + $0x318] sm:$0xff]  ;;  %10129 = vst [vmem:[#allocation1 + $0x20] ss:$4 sm:$0xff] %v7586_v6  ;;  %9836 = vmatmul.f32.vlgmr.msrb.gmra.mxu0 %v9762_v62  ;;  %9980 = vmatpush.xpose.msra.mxu2 %v7687_v9  ;;  %v9197_v49 = vpop.f32.mrf.mxu1  ;;  %v7709_v6 = vld [vmem:[%s17188_s9 + $0x3b0] sm:$0xff]  ;;  %v7712_v9 = vld [vmem:[%s17188_s9 + $0x3c8] sm:$0xff] }
 0xe36   : > { %v9118_v17 = vadd.f32 %v9117_v57, %v9098_v48  ;;  %9856 = vmatmul.f32.vlgmr.msrb.gmra.mxu1 %v9763_v4  ;;  %10000 = vmatpush.xpose.msra.mxu3 %v7688_v0  ;;  %v7695_v4 = vld [vmem:[%s17188_s9 + $0x340] sm:$0xff]  ;;  %v7702_v33 = vld [vmem:[%s17188_s9 + $0x378] sm:$0xff]  ;;  %v7713_v0 = vld [vmem:[%s17188_s9 + $0x3d0] sm:$0xff] }
 0xe37   : > { %10020 = vmatpush.xpose.msrb.mxu0 %v7689_v44  ;;  %10040 = vmatpush.xpose.msrb.mxu1 %v7690_v15  ;;  %v7706_v22 = vld [vmem:[%s17188_s9 + $0x398] sm:$0xff]  ;;  %v7715_v14 = vld [vmem:[%s17188_s9 + $0x3e0] sm:$0xff] }
 0xe38   : > { %v16993_v29 = vld.sshfl [vmem:[#allocation1] sm:$0xff pattern:$0x73625140]  ;;  %v16995_v30 = vld.sshfl [vmem:[#allocation1 + $0x8] sm:$0xff pattern:$0x73625140] }
 0xe39   : > { %v9137_v5 = vpop.f32.mrf.mxu2  ;;  %v16997_v58 = vld.sshfl [vmem:[#allocation1 + $0x10] sm:$0xff pattern:$0x73625140]  ;;  %v16999_v51 = vld.sshfl [vmem:[#allocation1 + $0x18] sm:$0xff pattern:$0x73625140]  ;;  %v9157_v25 = vpop.f32.mrf.mxu3 }
 0xe3a   : > { %v9138_v2 = vadd.f32 %v9137_v5, %v9118_v17  ;;  %10312 = vst [vmem:[#allocation1] ss:$4 sm:$0xff] %v7587_v55  ;;  %v7710_v35 = vld [vmem:[%s17188_s9 + $0x3b8] sm:$0xff] }
 0xe3b   : > { %v7718_v48 = vld [vmem:[%s17188_s9 + $0x3f8] sm:$0xff] }
 0xe3c   : > { %v9158_v63 = vadd.f32 %v9157_v25, %v9138_v2  ;;  %v17010_v13 = vld.sshfl [vmem:[#allocation1 + $0x20] sm:$0xff pattern:$0x73625140]  ;;  %v17012_v19 = vld.sshfl [vmem:[#allocation1 + $0x28] sm:$0xff pattern:$0x73625140]  ;;  %9876 = vmatmul.f32.vlgmr.msrb.gmra.mxu2 %v16941_v40  ;;  %9896 = vmatmul.f32.vlgmr.msrb.gmra.mxu3 %v16943_v8 }
 0xe3d   : > { %v17016_v45 = vld.sshfl [vmem:[#allocation1 + $0x30] sm:$0xff pattern:$0x73625140]  ;;  %v17018_v23 = vld.sshfl [vmem:[#allocation1 + $0x38] sm:$0xff pattern:$0x73625140]  ;;  %9916 = vmatmul.f32.vlgmr.msra.gmra.mxu0 %v16945_v56  ;;  %10060 = vmatpush.xpose.msrb.mxu2 %v7691_v52 }
 0xe3e   : > { %v9178_v20 = vadd.f32 %v9177_v11, %v9158_v63  ;;  %10314 = vst [vmem:[#allocation1 + $0x20] ss:$4 sm:$0xff] %v7588_v36  ;;  %10888 = vmatmul.msk.f32.vlgmr.msra.gmra.mxu1 %vm7739_vm4, %v16947_v38  ;;  %10080 = vmatpush.xpose.msrb.mxu3 %v7692_v18  ;;  %v7697_v40 = vld [vmem:[%s17188_s9 + $0x350] sm:$0xff] }
 0xe3f   : > { %10100 = vmatpush.xpose.msra.mxu0 %v7693_v28  ;;  %10889 = vmatpush.xpose.msk.msra.mxu1 %vm7739_vm4, %v7694_v47 }
 0xe40   : > { %v9198_v54 = vadd.f32 %v9197_v49, %v9178_v20 }
 0xe41   : > { %v10315_v50 = vld.sshfl [vmem:[#allocation1] sm:$0xff pattern:$0x73625140]  ;;  %v10316_v16 = vld.sshfl [vmem:[#allocation1 + $0x8] sm:$0xff pattern:$0x73625140] }
 0xe42   : > { %v10694_v62 = vsel %vm10680_vm0, %v9198_v54, 0.0  ;;  %v10317_v31 = vld.sshfl [vmem:[#allocation1 + $0x10] sm:$0xff pattern:$0x73625140] }
 0xe43   : > { %v17028_v32 = vadd.f32 %v10694_v62, %v10693_v42  ;;  %v10318_v8 = vld.sshfl [vmem:[#allocation1 + $0x18] sm:$0xff pattern:$0x73625140] }
 0xe44   : > { %9981 = vmatmul.f32.vlgmr.msra.gmra.mxu2 %v16960_v27  ;;  %10001 = vmatmul.f32.vlgmr.msra.gmra.mxu3 %v16962_v7  ;;  %10497 = vst [vmem:[#allocation1] ss:$4 sm:$0xff] %v7589_v59  ;;  %v7703_v27 = vld [vmem:[%s17188_s9 + $0x380] sm:$0xff]  ;;  %v7704_v7 = vld [vmem:[%s17188_s9 + $0x388] sm:$0xff]  ;;  %v7714_v42 = vld [vmem:[%s17188_s9 + $0x3d8] sm:$0xff] }
 0xe45   : > { %v10319_v56 = vld.sshfl [vmem:[#allocation1 + $0x20] sm:$0xff pattern:$0x73625140]  ;;  %10021 = vmatmul.f32.vlgmr.msrb.gmra.mxu0 %v16964_v37  ;;  %10165 = vmatpush.xpose.msra.mxu2 %v7695_v4  ;;  %v10320_v38 = vld.sshfl [vmem:[#allocation1 + $0x28] sm:$0xff pattern:$0x73625140] }
 0xe46   : > { %v10321_v34 = vld.sshfl [vmem:[#allocation1 + $0x30] sm:$0xff pattern:$0x73625140]  ;;  %10041 = vmatmul.f32.vlgmr.msrb.gmra.mxu1 %v16966_v12  ;;  %10185 = vmatpush.xpose.msra.mxu3 %v7696_v53  ;;  %v10322_v21 = vld.sshfl [vmem:[#allocation1 + $0x38] sm:$0xff pattern:$0x73625140] }
 0xe47   : > { %10205 = vmatpush.xpose.msrb.mxu0 %v7697_v40  ;;  %10225 = vmatpush.xpose.msrb.mxu1 %v7698_v61  ;;  %10499 = vst [vmem:[#allocation1 + $0x20] ss:$4 sm:$0xff] %v7590_v60  ;;  %v7707_v37 = vld [vmem:[%s17188_s9 + $0x3a0] sm:$0xff]  ;;  %v7708_v12 = vld [vmem:[%s17188_s9 + $0x3a8] sm:$0xff] }
 0xe4b   : > { %v10502_v57 = vld.sshfl [vmem:[#allocation1 + $0x10] sm:$0xff pattern:$0x73625140]  ;;  %v10503_v44 = vld.sshfl [vmem:[#allocation1 + $0x18] sm:$0xff pattern:$0x73625140] }
 0xe4c   : > { %10061 = vmatmul.f32.vlgmr.msrb.gmra.mxu2 %v16976_v24  ;;  %10081 = vmatmul.f32.vlgmr.msrb.gmra.mxu3 %v16978_v41  ;;  %v7716_v24 = vld [vmem:[%s17188_s9 + $0x3e8] sm:$0xff]  ;;  %v7717_v41 = vld [vmem:[%s17188_s9 + $0x3f0] sm:$0xff] }
 0xe4d   : > { %10101 = vmatmul.f32.vlgmr.msra.gmra.mxu0 %v16980_v10  ;;  %10245 = vmatpush.xpose.msrb.mxu2 %v7699_v26  ;;  %v10500_v10 = vld.sshfl [vmem:[#allocation1] sm:$0xff pattern:$0x73625140] }
 0xe4e   : > { %10890 = vmatmul.msk.f32.vlgmr.msra.gmra.mxu1 %vm7739_vm4, %v16982_v3  ;;  %10265 = vmatpush.xpose.msrb.mxu3 %v7700_v39  ;;  %v10501_v3 = vld.sshfl [vmem:[#allocation1 + $0x8] sm:$0xff pattern:$0x73625140]  ;;  %v10504_v15 = vld.sshfl [vmem:[#allocation1 + $0x20] sm:$0xff pattern:$0x73625140] }
 0xe4f   : > { %10285 = vmatpush.xpose.msra.mxu0 %v7701_v1  ;;  %10891 = vmatpush.xpose.msk.msra.mxu1 %vm7739_vm4, %v7702_v33  ;;  %v10505_v17 = vld.sshfl [vmem:[#allocation1 + $0x28] sm:$0xff pattern:$0x73625140]  ;;  %v10506_v52 = vld.sshfl [vmem:[#allocation1 + $0x30] sm:$0xff pattern:$0x73625140] }
 0xe50   : > { %v10507_v2 = vld.sshfl [vmem:[#allocation1 + $0x38] sm:$0xff pattern:$0x73625140] }
 0xe54   : > { %10166 = vmatmul.f32.vlgmr.msra.gmra.mxu2 %v16993_v29  ;;  %10186 = vmatmul.f32.vlgmr.msra.gmra.mxu3 %v16995_v30 }
 0xe55   : > { %10206 = vmatmul.f32.vlgmr.msrb.gmra.mxu0 %v16997_v58  ;;  %10350 = vmatpush.xpose.msra.mxu2 %v7703_v27 }
 0xe56   : > { %10226 = vmatmul.f32.vlgmr.msrb.gmra.mxu1 %v16999_v51  ;;  %10370 = vmatpush.xpose.msra.mxu3 %v7704_v7 }
 0xe57   : > { %10390 = vmatpush.xpose.msrb.mxu0 %v7705_v43  ;;  %10410 = vmatpush.xpose.msrb.mxu1 %v7706_v22 }
 0xe5c   : > { %10246 = vmatmul.f32.vlgmr.msrb.gmra.mxu2 %v17010_v13  ;;  %10266 = vmatmul.f32.vlgmr.msrb.gmra.mxu3 %v17012_v19 }
 0xe5d   : > { %10286 = vmatmul.f32.vlgmr.msra.gmra.mxu0 %v17016_v45  ;;  %10430 = vmatpush.xpose.msrb.mxu2 %v7707_v37 }
 0xe5e   : > { %10892 = vmatmul.msk.f32.vlgmr.msra.gmra.mxu1 %vm7739_vm4, %v17018_v23  ;;  %10450 = vmatpush.xpose.msrb.mxu3 %v7708_v12 }
 0xe5f   : > { %10470 = vmatpush.xpose.msra.mxu0 %v7709_v6  ;;  %10893 = vmatpush.xpose.msk.msra.mxu1 %vm7739_vm4, %v7710_v35 }
 0xe64   : > { %10351 = vmatmul.f32.vlgmr.msra.gmra.mxu2 %v10315_v50  ;;  %10371 = vmatmul.f32.vlgmr.msra.gmra.mxu3 %v10316_v16 }
 0xe65   : > { %10391 = vmatmul.f32.vlgmr.msrb.gmra.mxu0 %v10317_v31  ;;  %10535 = vmatpush.xpose.msra.mxu2 %v7711_v46 }
 0xe66   : > { %10411 = vmatmul.f32.vlgmr.msrb.gmra.mxu1 %v10318_v8  ;;  %10555 = vmatpush.xpose.msra.mxu3 %v7712_v9 }
 0xe67   : > { %10575 = vmatpush.xpose.msrb.mxu0 %v7713_v0  ;;  %10595 = vmatpush.xpose.msrb.mxu1 %v7714_v42 }
 0xe6c   : > { %10431 = vmatmul.f32.vlgmr.msrb.gmra.mxu2 %v10319_v56  ;;  %10451 = vmatmul.f32.vlgmr.msrb.gmra.mxu3 %v10320_v38 }
 0xe6d   : > { %10471 = vmatmul.f32.vlgmr.msra.gmra.mxu0 %v10321_v34  ;;  %10615 = vmatpush.xpose.msrb.mxu2 %v7715_v14 }
 0xe6e   : > { %10894 = vmatmul.msk.f32.vlgmr.msra.gmra.mxu1 %vm7739_vm4, %v10322_v21  ;;  %10635 = vmatpush.xpose.msrb.mxu3 %v7716_v24 }
 0xe6f   : > { %10655 = vmatpush.xpose.msra.mxu0 %v7717_v41  ;;  %10895 = vmatpush.xpose.msk.msra.mxu1 %vm7739_vm4, %v7718_v48 }
 0xe74   : > { %10536 = vmatmul.f32.vlgmr.msra.gmra.mxu2 %v10500_v10  ;;  %10556 = vmatmul.f32.vlgmr.msra.gmra.mxu3 %v10501_v3 }
 0xe75   : > { %10576 = vmatmul.f32.vlgmr.msrb.gmra.mxu0 %v10502_v57 }
 0xe76   : > { %10596 = vmatmul.f32.vlgmr.msrb.gmra.mxu1 %v10503_v44  ;;  %v9282_v30 = vpop.f32.mrf.mxu0 }
 0xe77   : > { %v9302_v51 = vpop.f32.mrf.mxu1 }
 0xe7b   : > { %v9242_v55 = vpop.f32.mrf.mxu2  ;;  %v9262_v5 = vpop.f32.mrf.mxu3 }
 0xe7c   : > { %10616 = vmatmul.f32.vlgmr.msrb.gmra.mxu2 %v10504_v15  ;;  %10636 = vmatmul.f32.vlgmr.msrb.gmra.mxu3 %v10505_v17  ;;  %v9263_v29 = vadd.f32 %v9262_v5, %v9242_v55 }
 0xe7d   : > { %10656 = vmatmul.f32.vlgmr.msra.gmra.mxu0 %v10506_v52 }
 0xe7e   : > { %10896 = vmatmul.msk.f32.vlgmr.msra.gmra.mxu1 %vm7739_vm4, %v10507_v2  ;;  %v9283_v58 = vadd.f32 %v9282_v30, %v9263_v29  ;;  %v9362_v63 = vpop.f32.mrf.mxu0  ;;  %vm10745_vm4 = vcmask 74752  }
 0xe7f   : > { %v9382_v19 = vpop.f32.mrf.mxu1 }
 0xe80   : > { %v9303_v36 = vadd.f32 %v9302_v51, %v9283_v58 }
 0xe83   : > { %v9322_v25 = vpop.f32.mrf.mxu2  ;;  %v9342_v28 = vpop.f32.mrf.mxu3 }
 0xe84   : > { %v9323_v18 = vadd.f32 %v9322_v25, %v9303_v36 }
 0xe86   : > { %v9343_v47 = vadd.f32 %v9342_v28, %v9323_v18 }
 0xe88   : > { %v9363_v13 = vadd.f32 %v9362_v63, %v9343_v47 }
 0xe8a   : > { %v9383_v11 = vadd.f32 %v9382_v19, %v9363_v13 }
 0xe8c   : > { %v10696_v45 = vsel %vm10680_vm0, %v9383_v11, 0.0 }
 0xe8d   : > { %v10697_v23 = vadd.f32 %v10696_v45, %v17028_v32 }
 0xe92   : > { %v9467_v20 = vpop.f32.mrf.mxu0 }
 0xe93   : > { %v9487_v49 = vpop.f32.mrf.mxu1 }
 0xe97   : > { %v9427_v54 = vpop.f32.mrf.mxu2  ;;  %v9447_v59 = vpop.f32.mrf.mxu3 }
 0xe98   : > { %v9448_v62 = vadd.f32 %v9447_v59, %v9427_v54 }
 0xe9a   : > { %v9468_v4 = vadd.f32 %v9467_v20, %v9448_v62  ;;  %v9547_v50 = vpop.f32.mrf.mxu0  ;;  %v10717_v62 = vld [vmem:[%s17190_s11] sm:$0xff] }
 0xe9b   : > { %v9567_v16 = vpop.f32.mrf.mxu1  ;;  %10740 = vmatpush.msra.mxu2 %v10717_v62 }
 0xe9c   : > { %v9488_v31 = vadd.f32 %v9487_v49, %v9468_v4 }
 0xe9f   : > { %v9507_v53 = vpop.f32.mrf.mxu2  ;;  %v9527_v40 = vpop.f32.mrf.mxu3 }
 0xea0   : > { %v9508_v8 = vadd.f32 %v9507_v53, %v9488_v31 }
 0xea2   : > { %v9528_v61 = vadd.f32 %v9527_v40, %v9508_v8  ;;  %v9652_v56 = vpop.f32.mrf.mxu0 }
 0xea3   : > { %v9672_v38 = vpop.f32.mrf.mxu1 }
 0xea4   : > { %v9548_v34 = vadd.f32 %v9547_v50, %v9528_v61 }
 0xea6   : > { %v9568_v60 = vadd.f32 %v9567_v16, %v9548_v34 }
 0xea7   : > { %v9612_v21 = vpop.f32.mrf.mxu2  ;;  %v9632_v26 = vpop.f32.mrf.mxu3 }
 0xea8   : > { %v10698_v32 = vsel %vm10680_vm0, %v9568_v60, 0.0  ;;  %v9633_v39 = vadd.f32 %v9632_v26, %v9612_v21 }
 0xea9   : > { %v10699_v1 = vadd.f32 %v10698_v32, %v10697_v23 }
 0xeaa   : > { %v9653_v33 = vadd.f32 %v9652_v56, %v9633_v39  ;;  %v9732_v27 = vpop.f32.mrf.mxu0 }
 0xeab   : > { %v9752_v7 = vpop.f32.mrf.mxu1 }
 0xeac   : > { %v9673_v43 = vadd.f32 %v9672_v38, %v9653_v33 }
 0xeaf   : > { %v9692_v22 = vpop.f32.mrf.mxu2  ;;  %v9712_v37 = vpop.f32.mrf.mxu3 }
 0xeb0   : > { %v9693_v12 = vadd.f32 %v9692_v22, %v9673_v43 }
 0xeb2   : > { %v9713_v6 = vadd.f32 %v9712_v37, %v9693_v12  ;;  %v9837_v35 = vpop.f32.mrf.mxu0 }
 0xeb3   : > { %v9857_v46 = vpop.f32.mrf.mxu1 }
 0xeb4   : > { %v9733_v9 = vadd.f32 %v9732_v27, %v9713_v6 }
 0xeb6   : > { %v9753_v0 = vadd.f32 %v9752_v7, %v9733_v9 }
 0xeb7   : > { %v9797_v42 = vpop.f32.mrf.mxu2  ;;  %v9817_v14 = vpop.f32.mrf.mxu3 }
 0xeb8   : > { %v10700_v24 = vsel %vm10680_vm0, %v9753_v0, 0.0  ;;  %v9818_v63 = vadd.f32 %v9817_v14, %v9797_v42 }
 0xeb9   : > { %v17126_v41 = vadd.f32 %v10700_v24, %v10699_v1 }
 0xeba   : > { %v9917_v48 = vpop.f32.mrf.mxu0  ;;  %v9838_v20 = vadd.f32 %v9837_v35, %v9818_v63  ;;  %v10965_v63 = vld [vmem:[%s17191_s12] ss:$0 sm:$0xff] }
 0xebb   : > { %v9937_v10 = vpop.f32.mrf.mxu1 }
 0xebc   : > { %v9858_v4 = vadd.f32 %v9857_v46, %v9838_v20 }
 0xebf   : > { %v9877_v3 = vpop.f32.mrf.mxu2  ;;  %v9897_v57 = vpop.f32.mrf.mxu3 }
 0xec0   : > { %v9878_v16 = vadd.f32 %v9877_v3, %v9858_v4 }
 0xec2   : > { %v10022_v44 = vpop.f32.mrf.mxu0  ;;  %v9898_v60 = vadd.f32 %v9897_v57, %v9878_v16 }
 0xec3   : > { %v10042_v15 = vpop.f32.mrf.mxu1 }
 0xec4   : > { %v9918_v1 = vadd.f32 %v9917_v48, %v9898_v60 }
 0xec6   : > { %v9938_v6 = vadd.f32 %v9937_v10, %v9918_v1 }
 0xec7   : > { %v9982_v17 = vpop.f32.mrf.mxu2  ;;  %v10002_v55 = vpop.f32.mrf.mxu3 }
 0xec8   : > { %v10003_v19 = vadd.f32 %v10002_v55, %v9982_v17  ;;  %v10702_v14 = vsel %vm10680_vm0, %v9938_v6, 0.0 }
 0xec9   : > { %v10703_v17 = vadd.f32 %v10702_v14, %v17126_v41 }
 0xeca   : > { %v10102_v5 = vpop.f32.mrf.mxu0  ;;  %v10023_v54 = vadd.f32 %v10022_v44, %v10003_v19 }
 0xecb   : > { %v10122_v52 = vpop.f32.mrf.mxu1 }
 0xecc   : > { %v10043_v31 = vadd.f32 %v10042_v15, %v10023_v54 }
 0xecf   : > { %v10062_v29 = vpop.f32.mrf.mxu2  ;;  %v10082_v30 = vpop.f32.mrf.mxu3 }
 0xed0   : > { %v10063_v56 = vadd.f32 %v10062_v29, %v10043_v31 }
 0xed2   : > { %v10207_v2 = vpop.f32.mrf.mxu0  ;;  %v10083_v32 = vadd.f32 %v10082_v30, %v10063_v56 }
 0xed3   : > { %v10227_v58 = vpop.f32.mrf.mxu1 }
 0xed4   : > { %v10103_v43 = vadd.f32 %v10102_v5, %v10083_v32 }
 0xed6   : > { %v10123_v0 = vadd.f32 %v10122_v52, %v10103_v43 }
 0xed7   : > { %v10167_v51 = vpop.f32.mrf.mxu2  ;;  %v10187_v36 = vpop.f32.mrf.mxu3 }
 0xed8   : > { %v10188_v49 = vadd.f32 %v10187_v36, %v10167_v51  ;;  %v10704_v48 = vsel %vm10680_vm0, %v10123_v0, 0.0 }
 0xed9   : > { %v10705_v29 = vadd.f32 %v10704_v48, %v10703_v17 }
 0xeda   : > { %v10287_v25 = vpop.f32.mrf.mxu0  ;;  %v10208_v50 = vadd.f32 %v10207_v2, %v10188_v49 }
 0xedb   : > { %v10307_v18 = vpop.f32.mrf.mxu1 }
 0xedc   : > { %v10228_v38 = vadd.f32 %v10227_v58, %v10208_v50 }
 0xedf   : > { %v10247_v28 = vpop.f32.mrf.mxu2  ;;  %v10267_v47 = vpop.f32.mrf.mxu3 }
 0xee0   : > { %v10248_v21 = vadd.f32 %v10247_v28, %v10228_v38 }
 0xee2   : > { %v10392_v13 = vpop.f32.mrf.mxu0  ;;  %v10268_v33 = vadd.f32 %v10267_v47, %v10248_v21 }
 0xee3   : > { %v10412_v11 = vpop.f32.mrf.mxu1 }
 0xee4   : > { %v10288_v35 = vadd.f32 %v10287_v25, %v10268_v33 }
 0xee6   : > { %v10308_v24 = vadd.f32 %v10307_v18, %v10288_v35  ;;  %v10964_v18 = vld [vmem:[%s17189_s10] ss:$0 sm:$0xff] }
 0xee7   : > { %v10352_v45 = vpop.f32.mrf.mxu2  ;;  %v10372_v23 = vpop.f32.mrf.mxu3 }
 0xee8   : > { %v10373_v59 = vadd.f32 %v10372_v23, %v10352_v45  ;;  %v10706_v5 = vsel %vm10680_vm0, %v10308_v24, 0.0 }
 0xee9   : > { %v10707_v58 = vadd.f32 %v10706_v5, %v10705_v29 }
 0xeea   : > { %v10393_v53 = vadd.f32 %v10392_v13, %v10373_v59  ;;  %v10472_v40 = vpop.f32.mrf.mxu0 }
 0xeeb   : > { %v10492_v34 = vpop.f32.mrf.mxu1 }
 0xeec   : > { %v10413_v26 = vadd.f32 %v10412_v11, %v10393_v53 }
 0xeef   : > { %v10432_v8 = vpop.f32.mrf.mxu2  ;;  %v10452_v61 = vpop.f32.mrf.mxu3 }
 0xef0   : > { %v10433_v39 = vadd.f32 %v10432_v8, %v10413_v26 }
 0xef2   : > { %v10453_v22 = vadd.f32 %v10452_v61, %v10433_v39  ;;  %v10577_v12 = vpop.f32.mrf.mxu0 }
 0xef3   : > { %v10597_v9 = vpop.f32.mrf.mxu1 }
 0xef4   : > { %v10473_v42 = vadd.f32 %v10472_v40, %v10453_v22 }
 0xef6   : > { %v10493_v44 = vadd.f32 %v10492_v34, %v10473_v42 }
 0xef7   : > { %v10537_v27 = vpop.f32.mrf.mxu2  ;;  %v10557_v7 = vpop.f32.mrf.mxu3 }
 0xef8   : > { %v10558_v37 = vadd.f32 %v10557_v7, %v10537_v27  ;;  %v10708_v52 = vsel %vm10680_vm0, %v10493_v44, 0.0 }
 0xef9   : > { %v10709_v25 = vadd.f32 %v10708_v52, %v10707_v58 }
 0xefa   : > { %v10578_v46 = vadd.f32 %v10577_v12, %v10558_v37  ;;  %v10657_v30 = vpop.f32.mrf.mxu0 }
 0xefb   : > { %v10677_v51 = vpop.f32.mrf.mxu1 }
 0xefc   : > { %v10598_v3 = vadd.f32 %v10597_v9, %v10578_v46 }
 0xeff   : > { %v10617_v57 = vpop.f32.mrf.mxu2  ;;  %v10637_v55 = vpop.f32.mrf.mxu3 }
 0xf00   : > { %v10618_v15 = vadd.f32 %v10617_v57, %v10598_v3 }
 0xf02   : > { %v10638_v10 = vadd.f32 %v10637_v55, %v10618_v15 }
 0xf04   : > { %v10658_v2 = vadd.f32 %v10657_v30, %v10638_v10 }
 0xf06   : > { %v10678_v36 = vadd.f32 %v10677_v51, %v10658_v2 }
 0xf08   : > { %v10710_v28 = vsel %vm10680_vm0, %v10678_v36, 0.0 }
 0xf09   : > { %v10711_v41 = vadd.f32 %v10710_v28, %v10709_v25 }
 0xf0b   : > { %v10716_v47 = vadd.f32 %v10964_v18, %v10711_v41 }
 0xf0d   : > { %10897 = vmatmul.msk.f32.vlgmr.msra.gmra.mxu2 %vm17721_vm7, %v10716_v47 }
 0xf90   : > { %v10742_v13 = vpop.f32.mrf.mxu2 }
 0xf91   : > { %v10743_v19 = vadd.f32 %v10965_v63, %v10742_v13 }
 0xf93   : > { %v10746_v11 = vsel %vm10745_vm4, %v10743_v19, -inf }
 0xf94   : > { %10747 = vmax.xlane.f32.xlu1 %v10746_v11 }
0x1007   : > { %v10748_v45 = vpop.xlane.xlu1 %10747 }
0x1008   : > { %v10749_v23 = vsub.f32 %v10743_v19, %v10748_v45 }
0x100a   : > { %v10750_v20 = vmul.f32 1.442695, %v10749_v23 }
0x100c   : > { %10966 = vpow2.f32 %v10750_v20 }
0x1012   : > { %v10967_v49 = vpop.eup %10966 }
0x1013   : > { %v10752_v54 = vsel %vm10745_vm4, %v10967_v49, 0.0 }
0x1014   : > { %10753 = vadd.xlane.f32.xlu2 %v10752_v54 }
0x1087   : > { %v10754_v59 = vpop.xlane.xlu2 %10753 }
0x1088   : > { %10968 = vrcp.f32 %v10754_v59  ;;  %v10766_v16 = vand.u32 2147483648, %v10754_v59  ;;  %v10764_v53 = vand.u32 2147483647, %v10754_v59  ;;  %vm10760_vm11 = vweird.f32 %v10754_v59 }
0x108a   : > { %v10767_v8 = vor.u32 1.1754944e-38, %v10766_v16  ;;  %vm10765_vm8 = vcmp.eq.f32.partialorder %v10764_v53, 8.507059e+37 }
0x108e   : > { %v10969_v62 = vpop.eup %10968 }
0x108f   : > { %v10756_v4 = vmul.f32 %v10969_v62, %v10754_v59  ;;  %vm10761_vm14 = vweird.f32 %v10969_v62 }
0x1090   : > { %vm10762_vm12 = vmor %vm10760_vm11, %vm10761_vm14 }
0x1091   : > { %v10757_v50 = vsub.f32 1.0, %v10756_v4 }
0x1093   : > { %v10758_v31 = vmul.f32 %v10969_v62, %v10757_v50 }
0x1095   : > { %v10759_v40 = vadd.f32 %v10969_v62, %v10758_v31 }
0x1097   : > { %v10763_v61 = vsel %vm10762_vm12, %v10969_v62, %v10759_v40 }
0x1098   : > { %v10768_v56 = vsel %vm10765_vm8, %v10767_v8, %v10763_v61 }
0x1099   : > { %v10769_v38 = vmul.f32 %v10967_v49, %v10768_v56 }
0x109b   : > { %10770 = vst.msk [vmem:[%s431_s1] sm:$0x3] %vm10745_vm4, %v10769_v38 }
0x109c   : > { %11069 = shalt.err (!%p11066_p3)
}
0x109d   : > { %10903 = dma.vmem_to_hbm [thread:$0]  (%p11233_p5), %s10785_s2, 32, %s10787_s30, %s10772_s29  }
0x109e PF: > { %p10909_p4 = scmp.ge.s32.totalorder %s11104_s28, 2  ;;  %s10798_s21 = sand.u32 1, %s11092_s25  }
0x109f   : > { %s10799_s16 = scalar_lea.sflag [#allocation5], %s10798_s21 }
0x10a0   : > { %p10906_p7 = pnand %p10909_p4, %p11237_p6 }
0x10a2   : > { %p10907_p8 = pneg %p10906_p7 }
0x10a4   : > { %11087 = dma.done.wait (%p10907_p8), %s10799_s16, 32  }
0x10a5   : > { %11089 = vsyncadd (%p10907_p8), %s10799_s16, 4294967264  ;;  %s17722_s17 = sld [smem:[#allocation7_spill]]  ;;  %p23_p9 = scmp.ge.s32.totalorder %s11220_s14, 4  }
0x10a6   : > { %s17723_s25 = smov %s11096_s26  ;;  %s17724_s26 = smov %s11100_s27 }
0x10a7   : > { %s17726_s28 = smov %s11220_s14  ;;  %25 = sbr.rel (!%p23_p9) target bundleno = 9 (0x9), region = 185 }
0x10ab   : > { %s17725_s27 = smov %s17722_s17 }
0x10ac   :  { %10805 = vsyncpa [#allocation5], 1 }
0x10ad   :  { %10807 = vsyncpa [#allocation5 + $0x1], 1 }

</bundles_post_ra>
